<compile_context>
chip_gen: v7x
topology: tpu7x:2x2x1
jax: 0.10.0
libtpu: 0.0.40
codegen_flags: <defaults>
</compile_context>

<pallas_src>
import functools

import jax
import jax.numpy as jnp
import numpy as np
from jax.experimental import pallas as pl
from jax.experimental.pallas import tpu as pltpu

# Synthetic CnfSettings values (module __init__ reads these).
SHARP_EMB_DIM = 16           # self.vemb_dim
SHARP_DECODED_EMB_DIM = 16   # self.decoded_dim
SIZE = 16                    # grid spatial size (small, VMEM-resident)

C_IN = 5
C_MID = 16
C_OUT = SHARP_DECODED_EMB_DIM + SHARP_EMB_DIM            # 32
_LAYER_DEFS = (                                           # (Cin, Cout, K, pad)
    (C_IN, C_MID, 3, 1),
    (C_MID, C_MID, 5, 2),
    (C_MID, C_OUT, 3, 1),
)


def _fused_kernel(x_ref, w1_ref, b1_ref, w2_ref, b2_ref, w3_ref, b3_ref,
                  o_ref, p1_ref, p2_ref, p3_ref, *, H, W, SB):
    """Fused 3x (conv2d stride-1 + ReLU) for SB samples stacked along M.

    Layout: act[r, w*C + c] == act[row r, col w, channel c] (lane-dense 2D).
    Horizontal (W) zero padding is folded into the weights; only vertical
    halo rows exist, interleaved per sample in the padded scratch buffers.
    w_ref[kh] is a block-Toeplitz matrix (W*Cin, W*Cout), so a whole conv
    layer is KH row-shifted MXU dots accumulated in f32.
    """
    s1 = H + 2   # per-sample row stride for pad=1 layers (1 halo row each side)
    s2 = H + 4   # per-sample row stride for pad=2 layer  (2 halo rows each side)

    def zero_halos(p_ref, pad, stride):
        z = jnp.zeros((pad, p_ref.shape[1]), jnp.float32)   # hoisted, reused
        for s in range(SB):
            base = s * stride
            p_ref[base:base + pad, :] = z                    # top halo rows
            p_ref[base + pad + H:base + stride, :] = z       # bottom halo rows

    # Halo-only memset, every step (cheap; interiors are always overwritten).
    # Per-step (not step-0-gated) so it stays correct under "parallel"
    # core sharding where program_id(0)==0 never runs on the second core.
    zero_halos(p1_ref, 1, s1)
    zero_halos(p2_ref, 2, s2)
    zero_halos(p3_ref, 1, s1)

    def conv_relu(p_ref, w_ref, b_ref, pad):
        KH = w_ref.shape[0]
        M = p_ref.shape[0] - 2 * pad                 # SB*(H+2p) - 2p output rows
        acc = jnp.zeros((M, w_ref.shape[-1]), jnp.float32)
        for kh in range(KH):                         # static unroll: 3/5/3 dots
            acc = acc + jnp.dot(p_ref[kh:kh + M, :], w_ref[kh],
                                preferred_element_type=jnp.float32)
        return jnp.maximum(acc + b_ref[...], 0.0)    # bias + ReLU on the VPU

    # --- layer 1: Conv2d(5 -> 16, k3, pad 1) + ReLU -------------------------
    for s in range(SB):
        p1_ref[s * s1 + 1:s * s1 + 1 + H, :] = x_ref[s]
    a1 = conv_relu(p1_ref, w1_ref, b1_ref, 1)        # (SB*s1 - 2, W*16)

    # --- layer 2: Conv2d(16 -> 16, k5, pad 2) + ReLU ------------------------
    # Valid rows of sample s in a1 are a1[s*s1 : s*s1 + H]; re-stack with the
    # pad-2 halo spacing (inter-sample garbage rows of a1 are never read).
    for s in range(SB):
        p2_ref[s * s2 + 2:s * s2 + 2 + H, :] = a1[s * s1:s * s1 + H, :]
    a2 = conv_relu(p2_ref, w2_ref, b2_ref, 2)        # (SB*s2 - 4, W*16)

    # --- layer 3: Conv2d(16 -> 32, k3, pad 1) + ReLU ------------------------
    for s in range(SB):
        p3_ref[s * s1 + 1:s * s1 + 1 + H, :] = a2[s * s2:s * s2 + H, :]
    a3 = conv_relu(p3_ref, w3_ref, b3_ref, 1)        # (SB*s1 - 2, W*32)

    # Lane-dense (H, W*C_OUT) per-sample output slabs: unmasked full-lane stores.
    for s in range(SB):
        o_ref[s] = a3[s * s1:s * s1 + H, :]


@functools.partial(jax.jit, static_argnames=("sub_batch",))
def grid_model3_forward_batched(x_bchw, packed, *, sub_batch=8):
    """Batched GridModel3.forward: (B, 5, H, W) -> (B, H, W, C_OUT)."""
    (w1, b1), (w2, b2), (w3, b3) = packed
    B, _, H, W = x_bchw.shape
    SB = max(1, min(sub_batch, B))
    Bp = -(-B // SB) * SB                             # round batch up to SB
    x = x_bchw.astype(jnp.float32)
    if Bp != B:
        x = jnp.pad(x, ((0, Bp - B), (0, 0), (0, 0), (0, 0)))
    # BCHW -> BHWC -> lane-dense (B, H, W*Cin): one layout op for the whole batch.
    x2d = jnp.transpose(x, (0, 2, 3, 1)).reshape(Bp, H, W * C_IN)

    kernel = functools.partial(_fused_kernel, H=H, W=W, SB=SB)
    out = pl.pallas_call(
        kernel,
        out_shape=jax.ShapeDtypeStruct((Bp, H, W * C_OUT), jnp.float32),
        grid=(Bp // SB,),
        in_specs=[
            # per-step input block (pipelined / double-buffered)
            pl.BlockSpec((SB, H, W * C_IN), lambda b: (b, 0, 0)),
            # weights & biases: constant block index -> DMA'd once, VMEM-resident
            pl.BlockSpec(w1.shape, lambda b: (0, 0, 0)),
            pl.BlockSpec(b1.shape, lambda b: (0, 0)),
            pl.BlockSpec(w2.shape, lambda b: (0, 0, 0)),
            pl.BlockSpec(b2.shape, lambda b: (0, 0)),
            pl.BlockSpec(w3.shape, lambda b: (0, 0, 0)),
            pl.BlockSpec(b3.shape, lambda b: (0, 0)),
        ],
        out_specs=pl.BlockSpec((SB, H, W * C_OUT), lambda b: (b, 0, 0)),
        scratch_shapes=[
            pltpu.VMEM((SB * (H + 2), W * C_IN), jnp.float32),   # padded input
            pltpu.VMEM((SB * (H + 4), W * C_MID), jnp.float32),  # padded act1
            pltpu.VMEM((SB * (H + 2), W * C_MID), jnp.float32),  # padded act2
        ],
        compiler_params=pltpu.CompilerParams(
            dimension_semantics=("parallel",)),       # shard batch across v7x TCs
    )(x2d, w1, b1, w2, b2, w3, b3)
    return out[:B].reshape(B, H, W, C_OUT)


def grid_model3_forward(x_chw, packed):
    """Module-faithful GridModel3.forward: (5, H, W) -> (H, W, C_OUT)."""
    return grid_model3_forward_batched(x_chw[None], packed, sub_batch=1)[0]


def init_params(key):
    """Deterministic synthetic weights (PyTorch OIHW init) for the 3 convs."""
    shapes = [((co, ci, k, k), (co,)) for (ci, co, k, _) in _LAYER_DEFS]
    params = []
    for (wshape, bshape) in shapes:
        key, kw, kb = jax.random.split(key, 3)
        fan_in = wshape[1] * wshape[2] * wshape[3]
        bound = 1.0 / np.sqrt(fan_in)
        w = jax.random.uniform(kw, wshape, jnp.float32, -bound, bound)
        b = jax.random.uniform(kb, bshape, jnp.float32, -bound, bound)
        params.append((w, b))
    return params


def pack_params(params, W_dim):
    """Hoist ALL layout work to init: OIHW -> per-kh block-Toeplitz matrices.

    W-direction zero padding is folded in by clipping out-of-range kw taps,
    so the matrices only cover in-range input columns:
      wmats: (KH, W*Cin, W*Cout) with
             wmats[kh, wi*Cin + ci, wo*Cout + co] = w[co, ci, kh, kw]
             where wi = wo + kw - pad, kept only if 0 <= wi < W.
      brow:  (1, W*Cout)  bias tiled lane-dense.
    """
    packed = []
    for (w_oihw, b), (Cin, Cout, K, pad) in zip(params, _LAYER_DEFS):
        w = np.transpose(np.asarray(w_oihw, np.float32), (2, 3, 1, 0))  # KH,KW,Ci,Co
        wmats = np.zeros((K, W_dim * Cin, W_dim * Cout), np.float32)
        for kh in range(K):
            for kw in range(K):
                blk = w[kh, kw]                                  # (Cin, Cout)
                for wo in range(W_dim):
                    wi = wo + kw - pad
                    if 0 <= wi < W_dim:
                        wmats[kh,
                              wi * Cin:(wi + 1) * Cin,
                              wo * Cout:(wo + 1) * Cout] = blk
        brow = np.tile(np.asarray(b, np.float32), W_dim).reshape(1, W_dim * Cout)
        packed.append((jnp.asarray(wmats), jnp.asarray(brow)))
    return tuple(packed)


def _reference_forward(x_chw, params):
    """Pure-JAX reference (lax.conv) replicating the PyTorch forward."""
    y = x_chw[None].astype(jnp.float32)                          # (1, 5, H, W)
    pads = (1, 2, 1)
    for (w, b), pad in zip(params, pads):
        y = jax.lax.conv_general_dilated(
            y, w, (1, 1), [(pad, pad), (pad, pad)],
            dimension_numbers=("NCHW", "OIHW", "NCHW"))
        y = jnp.maximum(y + b.reshape(1, -1, 1, 1), 0.0)
    return jnp.transpose(y[0], (1, 2, 0))                        # (H, W, C)


def _make_input(key, size):
    """Mimic world_to_features: 4 one-hot world planes + a start-pos plane."""
    world = jax.random.randint(key, (size, size), 1, 5)          # values 1..4
    world = world.at[0, 0].set(4)                                # num_feats == 4
    start_feat = jnp.zeros((size, size), jnp.float32).at[0, 0].set(1.0)
    planes = [(world == i).astype(jnp.float32) for i in range(4)]
    return jnp.stack(planes + [start_feat], axis=0)              # (5, size, size)


# TODO(synk): GridModel3.decode / GridModelBase.update_from_file do pickle file
# I/O and reference undefined symbols (decoded_blob); only forward() is here.

if __name__ == "__main__":
    B = 16
    key = jax.random.PRNGKey(0)
    keys = jax.random.split(key, B)
    x_batch = jnp.stack([_make_input(k, SIZE) for k in keys], axis=0)  # (B,5,16,16)

    params = init_params(jax.random.PRNGKey(42))
    packed = pack_params(params, SIZE)                           # init-time only

    # Batched path: grid of 2 steps, 8 samples stacked along M per step,
    # weights resident in VMEM across the whole call.
    out = jax.block_until_ready(
        grid_model3_forward_batched(x_batch, packed, sub_batch=8))
    ref = jax.block_until_ready(
        jax.vmap(lambda xi: _reference_forward(xi, params))(x_batch))
    assert out.shape == (B, SIZE, SIZE, C_OUT)
    np.testing.assert_allclose(np.asarray(out), np.asarray(ref),
                               rtol=1e-4, atol=1e-4)

    # Module-faithful single-sample forward (same kernel, SB=1).
    out1 = jax.block_until_ready(grid_model3_forward(x_batch[0], packed))
    np.testing.assert_allclose(np.asarray(out1), np.asarray(ref[0]),
                               rtol=1e-4, atol=1e-4)
    print("KERNEL_OK")
</pallas_src>

<mosaic_0001>
module attributes {stable_mosaic.version = 11 : i64} {
  func.func @_fused_kernel(%arg0: i32, %arg1: memref<8x16x80xf32, #tpu.memory_space<vmem>>, %arg2: memref<3x80x256xf32, #tpu.memory_space<vmem>>, %arg3: memref<1x256xf32, #tpu.memory_space<vmem>>, %arg4: memref<5x256x256xf32, #tpu.memory_space<vmem>>, %arg5: memref<1x256xf32, #tpu.memory_space<vmem>>, %arg6: memref<3x256x512xf32, #tpu.memory_space<vmem>>, %arg7: memref<1x512xf32, #tpu.memory_space<vmem>>, %arg8: memref<8x16x512xf32, #tpu.memory_space<vmem>>, %arg9: memref<144x80xf32, #tpu.memory_space<vmem>>, %arg10: memref<160x256xf32, #tpu.memory_space<vmem>>, %arg11: memref<144x256xf32, #tpu.memory_space<vmem>>) attributes {dimension_semantics = [#tpu.dimension_semantics<parallel>], iteration_bounds = array<i64: 2>, scalar_prefetch = 0 : i64, scratch_operands = 3 : i64, tpu.core_type = #tpu.core_type<tc>, window_params = [{transform_indices = @transform_0, window_bounds = array<i64: 8, 16, 80>}, {pipeline_mode = #tpu.pipeline_mode<synchronous>, transform_indices = @transform_1, window_bounds = array<i64: 3, 80, 256>}, {pipeline_mode = #tpu.pipeline_mode<synchronous>, transform_indices = @transform_2, window_bounds = array<i64: 1, 256>}, {pipeline_mode = #tpu.pipeline_mode<synchronous>, transform_indices = @transform_3, window_bounds = array<i64: 5, 256, 256>}, {pipeline_mode = #tpu.pipeline_mode<synchronous>, transform_indices = @transform_4, window_bounds = array<i64: 1, 256>}, {pipeline_mode = #tpu.pipeline_mode<synchronous>, transform_indices = @transform_5, window_bounds = array<i64: 3, 256, 512>}, {pipeline_mode = #tpu.pipeline_mode<synchronous>, transform_indices = @transform_6, window_bounds = array<i64: 1, 512>}, {transform_indices = @transform_7, window_bounds = array<i64: 8, 16, 512>}]} {
    %cst = arith.constant 0.000000e+00 : f32
    %0 = vector.broadcast %cst : f32 to vector<1x80xf32>
    %c0 = arith.constant 0 : index
    %c0_0 = arith.constant 0 : index
    %1 = vector.load %arg9[%c0, %c0_0] : memref<144x80xf32, #tpu.memory_space<vmem>>, vector<1x80xf32>
    tpu.vector_store %arg9[%c0, %c0_0], %0 {strides = array<i32>} : memref<144x80xf32, #tpu.memory_space<vmem>>, vector<1x80xf32>,
    %c17 = arith.constant 17 : index
    %c0_1 = arith.constant 0 : index
    %2 = vector.load %arg9[%c17, %c0_1] : memref<144x80xf32, #tpu.memory_space<vmem>>, vector<1x80xf32>
    tpu.vector_store %arg9[%c17, %c0_1], %0 {strides = array<i32>} : memref<144x80xf32, #tpu.memory_space<vmem>>, vector<1x80xf32>,
    %c18 = arith.constant 18 : index
    %c0_2 = arith.constant 0 : index
    %3 = vector.load %arg9[%c18, %c0_2] : memref<144x80xf32, #tpu.memory_space<vmem>>, vector<1x80xf32>
    tpu.vector_store %arg9[%c18, %c0_2], %0 {strides = array<i32>} : memref<144x80xf32, #tpu.memory_space<vmem>>, vector<1x80xf32>,
    %c35 = arith.constant 35 : index
    %c0_3 = arith.constant 0 : index
    %4 = vector.load %arg9[%c35, %c0_3] : memref<144x80xf32, #tpu.memory_space<vmem>>, vector<1x80xf32>
    tpu.vector_store %arg9[%c35, %c0_3], %0 {strides = array<i32>} : memref<144x80xf32, #tpu.memory_space<vmem>>, vector<1x80xf32>,
    %c36 = arith.constant 36 : index
    %c0_4 = arith.constant 0 : index
    %5 = vector.load %arg9[%c36, %c0_4] : memref<144x80xf32, #tpu.memory_space<vmem>>, vector<1x80xf32>
    tpu.vector_store %arg9[%c36, %c0_4], %0 {strides = array<i32>} : memref<144x80xf32, #tpu.memory_space<vmem>>, vector<1x80xf32>,
    %c53 = arith.constant 53 : index
    %c0_5 = arith.constant 0 : index
    %6 = vector.load %arg9[%c53, %c0_5] : memref<144x80xf32, #tpu.memory_space<vmem>>, vector<1x80xf32>
    tpu.vector_store %arg9[%c53, %c0_5], %0 {strides = array<i32>} : memref<144x80xf32, #tpu.memory_space<vmem>>, vector<1x80xf32>,
    %c54 = arith.constant 54 : index
    %c0_6 = arith.constant 0 : index
    %7 = vector.load %arg9[%c54, %c0_6] : memref<144x80xf32, #tpu.memory_space<vmem>>, vector<1x80xf32>
    tpu.vector_store %arg9[%c54, %c0_6], %0 {strides = array<i32>} : memref<144x80xf32, #tpu.memory_space<vmem>>, vector<1x80xf32>,
    %c71 = arith.constant 71 : index
    %c0_7 = arith.constant 0 : index
    %8 = vector.load %arg9[%c71, %c0_7] : memref<144x80xf32, #tpu.memory_space<vmem>>, vector<1x80xf32>
    tpu.vector_store %arg9[%c71, %c0_7], %0 {strides = array<i32>} : memref<144x80xf32, #tpu.memory_space<vmem>>, vector<1x80xf32>,
    %c72 = arith.constant 72 : index
    %c0_8 = arith.constant 0 : index
    %9 = vector.load %arg9[%c72, %c0_8] : memref<144x80xf32, #tpu.memory_space<vmem>>, vector<1x80xf32>
    tpu.vector_store %arg9[%c72, %c0_8], %0 {strides = array<i32>} : memref<144x80xf32, #tpu.memory_space<vmem>>, vector<1x80xf32>,
    %c89 = arith.constant 89 : index
    %c0_9 = arith.constant 0 : index
    %10 = vector.load %arg9[%c89, %c0_9] : memref<144x80xf32, #tpu.memory_space<vmem>>, vector<1x80xf32>
    tpu.vector_store %arg9[%c89, %c0_9], %0 {strides = array<i32>} : memref<144x80xf32, #tpu.memory_space<vmem>>, vector<1x80xf32>,
    %c90 = arith.constant 90 : index
    %c0_10 = arith.constant 0 : index
    %11 = vector.load %arg9[%c90, %c0_10] : memref<144x80xf32, #tpu.memory_space<vmem>>, vector<1x80xf32>
    tpu.vector_store %arg9[%c90, %c0_10], %0 {strides = array<i32>} : memref<144x80xf32, #tpu.memory_space<vmem>>, vector<1x80xf32>,
    %c107 = arith.constant 107 : index
    %c0_11 = arith.constant 0 : index
    %12 = vector.load %arg9[%c107, %c0_11] : memref<144x80xf32, #tpu.memory_space<vmem>>, vector<1x80xf32>
    tpu.vector_store %arg9[%c107, %c0_11], %0 {strides = array<i32>} : memref<144x80xf32, #tpu.memory_space<vmem>>, vector<1x80xf32>,
    %c108 = arith.constant 108 : index
    %c0_12 = arith.constant 0 : index
    %13 = vector.load %arg9[%c108, %c0_12] : memref<144x80xf32, #tpu.memory_space<vmem>>, vector<1x80xf32>
    tpu.vector_store %arg9[%c108, %c0_12], %0 {strides = array<i32>} : memref<144x80xf32, #tpu.memory_space<vmem>>, vector<1x80xf32>,
    %c125 = arith.constant 125 : index
    %c0_13 = arith.constant 0 : index
    %14 = vector.load %arg9[%c125, %c0_13] : memref<144x80xf32, #tpu.memory_space<vmem>>, vector<1x80xf32>
    tpu.vector_store %arg9[%c125, %c0_13], %0 {strides = array<i32>} : memref<144x80xf32, #tpu.memory_space<vmem>>, vector<1x80xf32>,
    %c126 = arith.constant 126 : index
    %c0_14 = arith.constant 0 : index
    %15 = vector.load %arg9[%c126, %c0_14] : memref<144x80xf32, #tpu.memory_space<vmem>>, vector<1x80xf32>
    tpu.vector_store %arg9[%c126, %c0_14], %0 {strides = array<i32>} : memref<144x80xf32, #tpu.memory_space<vmem>>, vector<1x80xf32>,
    %c143 = arith.constant 143 : index
    %c0_15 = arith.constant 0 : index
    %16 = vector.load %arg9[%c143, %c0_15] : memref<144x80xf32, #tpu.memory_space<vmem>>, vector<1x80xf32>
    tpu.vector_store %arg9[%c143, %c0_15], %0 {strides = array<i32>} : memref<144x80xf32, #tpu.memory_space<vmem>>, vector<1x80xf32>,
    %cst_16 = arith.constant 0.000000e+00 : f32
    %17 = vector.broadcast %cst_16 : f32 to vector<2x256xf32>
    %c0_17 = arith.constant 0 : index
    %c0_18 = arith.constant 0 : index
    %18 = vector.load %arg10[%c0_17, %c0_18] : memref<160x256xf32, #tpu.memory_space<vmem>>, vector<2x256xf32>
    tpu.vector_store %arg10[%c0_17, %c0_18], %17 {strides = array<i32>} : memref<160x256xf32, #tpu.memory_space<vmem>>, vector<2x256xf32>,
    %c18_19 = arith.constant 18 : index
    %c0_20 = arith.constant 0 : index
    %19 = vector.load %arg10[%c18_19, %c0_20] : memref<160x256xf32, #tpu.memory_space<vmem>>, vector<2x256xf32>
    tpu.vector_store %arg10[%c18_19, %c0_20], %17 {strides = array<i32>} : memref<160x256xf32, #tpu.memory_space<vmem>>, vector<2x256xf32>,
    %c20 = arith.constant 20 : index
    %c0_21 = arith.constant 0 : index
    %20 = vector.load %arg10[%c20, %c0_21] : memref<160x256xf32, #tpu.memory_space<vmem>>, vector<2x256xf32>
    tpu.vector_store %arg10[%c20, %c0_21], %17 {strides = array<i32>} : memref<160x256xf32, #tpu.memory_space<vmem>>, vector<2x256xf32>,
    %c38 = arith.constant 38 : index
    %c0_22 = arith.constant 0 : index
    %21 = vector.load %arg10[%c38, %c0_22] : memref<160x256xf32, #tpu.memory_space<vmem>>, vector<2x256xf32>
    tpu.vector_store %arg10[%c38, %c0_22], %17 {strides = array<i32>} : memref<160x256xf32, #tpu.memory_space<vmem>>, vector<2x256xf32>,
    %c40 = arith.constant 40 : index
    %c0_23 = arith.constant 0 : index
    %22 = vector.load %arg10[%c40, %c0_23] : memref<160x256xf32, #tpu.memory_space<vmem>>, vector<2x256xf32>
    tpu.vector_store %arg10[%c40, %c0_23], %17 {strides = array<i32>} : memref<160x256xf32, #tpu.memory_space<vmem>>, vector<2x256xf32>,
    %c58 = arith.constant 58 : index
    %c0_24 = arith.constant 0 : index
    %23 = vector.load %arg10[%c58, %c0_24] : memref<160x256xf32, #tpu.memory_space<vmem>>, vector<2x256xf32>
    tpu.vector_store %arg10[%c58, %c0_24], %17 {strides = array<i32>} : memref<160x256xf32, #tpu.memory_space<vmem>>, vector<2x256xf32>,
    %c60 = arith.constant 60 : index
    %c0_25 = arith.constant 0 : index
    %24 = vector.load %arg10[%c60, %c0_25] : memref<160x256xf32, #tpu.memory_space<vmem>>, vector<2x256xf32>
    tpu.vector_store %arg10[%c60, %c0_25], %17 {strides = array<i32>} : memref<160x256xf32, #tpu.memory_space<vmem>>, vector<2x256xf32>,
    %c78 = arith.constant 78 : index
    %c0_26 = arith.constant 0 : index
    %25 = vector.load %arg10[%c78, %c0_26] : memref<160x256xf32, #tpu.memory_space<vmem>>, vector<2x256xf32>
    tpu.vector_store %arg10[%c78, %c0_26], %17 {strides = array<i32>} : memref<160x256xf32, #tpu.memory_space<vmem>>, vector<2x256xf32>,
    %c80 = arith.constant 80 : index
    %c0_27 = arith.constant 0 : index
    %26 = vector.load %arg10[%c80, %c0_27] : memref<160x256xf32, #tpu.memory_space<vmem>>, vector<2x256xf32>
    tpu.vector_store %arg10[%c80, %c0_27], %17 {strides = array<i32>} : memref<160x256xf32, #tpu.memory_space<vmem>>, vector<2x256xf32>,
    %c98 = arith.constant 98 : index
    %c0_28 = arith.constant 0 : index
    %27 = vector.load %arg10[%c98, %c0_28] : memref<160x256xf32, #tpu.memory_space<vmem>>, vector<2x256xf32>
    tpu.vector_store %arg10[%c98, %c0_28], %17 {strides = array<i32>} : memref<160x256xf32, #tpu.memory_space<vmem>>, vector<2x256xf32>,
    %c100 = arith.constant 100 : index
    %c0_29 = arith.constant 0 : index
    %28 = vector.load %arg10[%c100, %c0_29] : memref<160x256xf32, #tpu.memory_space<vmem>>, vector<2x256xf32>
    tpu.vector_store %arg10[%c100, %c0_29], %17 {strides = array<i32>} : memref<160x256xf32, #tpu.memory_space<vmem>>, vector<2x256xf32>,
    %c118 = arith.constant 118 : index
    %c0_30 = arith.constant 0 : index
    %29 = vector.load %arg10[%c118, %c0_30] : memref<160x256xf32, #tpu.memory_space<vmem>>, vector<2x256xf32>
    tpu.vector_store %arg10[%c118, %c0_30], %17 {strides = array<i32>} : memref<160x256xf32, #tpu.memory_space<vmem>>, vector<2x256xf32>,
    %c120 = arith.constant 120 : index
    %c0_31 = arith.constant 0 : index
    %30 = vector.load %arg10[%c120, %c0_31] : memref<160x256xf32, #tpu.memory_space<vmem>>, vector<2x256xf32>
    tpu.vector_store %arg10[%c120, %c0_31], %17 {strides = array<i32>} : memref<160x256xf32, #tpu.memory_space<vmem>>, vector<2x256xf32>,
    %c138 = arith.constant 138 : index
    %c0_32 = arith.constant 0 : index
    %31 = vector.load %arg10[%c138, %c0_32] : memref<160x256xf32, #tpu.memory_space<vmem>>, vector<2x256xf32>
    tpu.vector_store %arg10[%c138, %c0_32], %17 {strides = array<i32>} : memref<160x256xf32, #tpu.memory_space<vmem>>, vector<2x256xf32>,
    %c140 = arith.constant 140 : index
    %c0_33 = arith.constant 0 : index
    %32 = vector.load %arg10[%c140, %c0_33] : memref<160x256xf32, #tpu.memory_space<vmem>>, vector<2x256xf32>
    tpu.vector_store %arg10[%c140, %c0_33], %17 {strides = array<i32>} : memref<160x256xf32, #tpu.memory_space<vmem>>, vector<2x256xf32>,
    %c158 = arith.constant 158 : index
    %c0_34 = arith.constant 0 : index
    %33 = vector.load %arg10[%c158, %c0_34] : memref<160x256xf32, #tpu.memory_space<vmem>>, vector<2x256xf32>
    tpu.vector_store %arg10[%c158, %c0_34], %17 {strides = array<i32>} : memref<160x256xf32, #tpu.memory_space<vmem>>, vector<2x256xf32>,
    %cst_35 = arith.constant 0.000000e+00 : f32
    %34 = vector.broadcast %cst_35 : f32 to vector<1x256xf32>
    %c0_36 = arith.constant 0 : index
    %c0_37 = arith.constant 0 : index
    %35 = vector.load %arg11[%c0_36, %c0_37] : memref<144x256xf32, #tpu.memory_space<vmem>>, vector<1x256xf32>
    tpu.vector_store %arg11[%c0_36, %c0_37], %34 {strides = array<i32>} : memref<144x256xf32, #tpu.memory_space<vmem>>, vector<1x256xf32>,
    %c17_38 = arith.constant 17 : index
    %c0_39 = arith.constant 0 : index
    %36 = vector.load %arg11[%c17_38, %c0_39] : memref<144x256xf32, #tpu.memory_space<vmem>>, vector<1x256xf32>
    tpu.vector_store %arg11[%c17_38, %c0_39], %34 {strides = array<i32>} : memref<144x256xf32, #tpu.memory_space<vmem>>, vector<1x256xf32>,
    %c18_40 = arith.constant 18 : index
    %c0_41 = arith.constant 0 : index
    %37 = vector.load %arg11[%c18_40, %c0_41] : memref<144x256xf32, #tpu.memory_space<vmem>>, vector<1x256xf32>
    tpu.vector_store %arg11[%c18_40, %c0_41], %34 {strides = array<i32>} : memref<144x256xf32, #tpu.memory_space<vmem>>, vector<1x256xf32>,
    %c35_42 = arith.constant 35 : index
    %c0_43 = arith.constant 0 : index
    %38 = vector.load %arg11[%c35_42, %c0_43] : memref<144x256xf32, #tpu.memory_space<vmem>>, vector<1x256xf32>
    tpu.vector_store %arg11[%c35_42, %c0_43], %34 {strides = array<i32>} : memref<144x256xf32, #tpu.memory_space<vmem>>, vector<1x256xf32>,
    %c36_44 = arith.constant 36 : index
    %c0_45 = arith.constant 0 : index
    %39 = vector.load %arg11[%c36_44, %c0_45] : memref<144x256xf32, #tpu.memory_space<vmem>>, vector<1x256xf32>
    tpu.vector_store %arg11[%c36_44, %c0_45], %34 {strides = array<i32>} : memref<144x256xf32, #tpu.memory_space<vmem>>, vector<1x256xf32>,
    %c53_46 = arith.constant 53 : index
    %c0_47 = arith.constant 0 : index
    %40 = vector.load %arg11[%c53_46, %c0_47] : memref<144x256xf32, #tpu.memory_space<vmem>>, vector<1x256xf32>
    tpu.vector_store %arg11[%c53_46, %c0_47], %34 {strides = array<i32>} : memref<144x256xf32, #tpu.memory_space<vmem>>, vector<1x256xf32>,
    %c54_48 = arith.constant 54 : index
    %c0_49 = arith.constant 0 : index
    %41 = vector.load %arg11[%c54_48, %c0_49] : memref<144x256xf32, #tpu.memory_space<vmem>>, vector<1x256xf32>
    tpu.vector_store %arg11[%c54_48, %c0_49], %34 {strides = array<i32>} : memref<144x256xf32, #tpu.memory_space<vmem>>, vector<1x256xf32>,
    %c71_50 = arith.constant 71 : index
    %c0_51 = arith.constant 0 : index
    %42 = vector.load %arg11[%c71_50, %c0_51] : memref<144x256xf32, #tpu.memory_space<vmem>>, vector<1x256xf32>
    tpu.vector_store %arg11[%c71_50, %c0_51], %34 {strides = array<i32>} : memref<144x256xf32, #tpu.memory_space<vmem>>, vector<1x256xf32>,
    %c72_52 = arith.constant 72 : index
    %c0_53 = arith.constant 0 : index
    %43 = vector.load %arg11[%c72_52, %c0_53] : memref<144x256xf32, #tpu.memory_space<vmem>>, vector<1x256xf32>
    tpu.vector_store %arg11[%c72_52, %c0_53], %34 {strides = array<i32>} : memref<144x256xf32, #tpu.memory_space<vmem>>, vector<1x256xf32>,
    %c89_54 = arith.constant 89 : index
    %c0_55 = arith.constant 0 : index
    %44 = vector.load %arg11[%c89_54, %c0_55] : memref<144x256xf32, #tpu.memory_space<vmem>>, vector<1x256xf32>
    tpu.vector_store %arg11[%c89_54, %c0_55], %34 {strides = array<i32>} : memref<144x256xf32, #tpu.memory_space<vmem>>, vector<1x256xf32>,
    %c90_56 = arith.constant 90 : index
    %c0_57 = arith.constant 0 : index
    %45 = vector.load %arg11[%c90_56, %c0_57] : memref<144x256xf32, #tpu.memory_space<vmem>>, vector<1x256xf32>
    tpu.vector_store %arg11[%c90_56, %c0_57], %34 {strides = array<i32>} : memref<144x256xf32, #tpu.memory_space<vmem>>, vector<1x256xf32>,
    %c107_58 = arith.constant 107 : index
    %c0_59 = arith.constant 0 : index
    %46 = vector.load %arg11[%c107_58, %c0_59] : memref<144x256xf32, #tpu.memory_space<vmem>>, vector<1x256xf32>
    tpu.vector_store %arg11[%c107_58, %c0_59], %34 {strides = array<i32>} : memref<144x256xf32, #tpu.memory_space<vmem>>, vector<1x256xf32>,
    %c108_60 = arith.constant 108 : index
    %c0_61 = arith.constant 0 : index
    %47 = vector.load %arg11[%c108_60, %c0_61] : memref<144x256xf32, #tpu.memory_space<vmem>>, vector<1x256xf32>
    tpu.vector_store %arg11[%c108_60, %c0_61], %34 {strides = array<i32>} : memref<144x256xf32, #tpu.memory_space<vmem>>, vector<1x256xf32>,
    %c125_62 = arith.constant 125 : index
    %c0_63 = arith.constant 0 : index
    %48 = vector.load %arg11[%c125_62, %c0_63] : memref<144x256xf32, #tpu.memory_space<vmem>>, vector<1x256xf32>
    tpu.vector_store %arg11[%c125_62, %c0_63], %34 {strides = array<i32>} : memref<144x256xf32, #tpu.memory_space<vmem>>, vector<1x256xf32>,
    %c126_64 = arith.constant 126 : index
    %c0_65 = arith.constant 0 : index
    %49 = vector.load %arg11[%c126_64, %c0_65] : memref<144x256xf32, #tpu.memory_space<vmem>>, vector<1x256xf32>
    tpu.vector_store %arg11[%c126_64, %c0_65], %34 {strides = array<i32>} : memref<144x256xf32, #tpu.memory_space<vmem>>, vector<1x256xf32>,
    %c143_66 = arith.constant 143 : index
    %c0_67 = arith.constant 0 : index
    %50 = vector.load %arg11[%c143_66, %c0_67] : memref<144x256xf32, #tpu.memory_space<vmem>>, vector<1x256xf32>
    tpu.vector_store %arg11[%c143_66, %c0_67], %34 {strides = array<i32>} : memref<144x256xf32, #tpu.memory_space<vmem>>, vector<1x256xf32>,
    %c0_68 = arith.constant 0 : index
    %c0_69 = arith.constant 0 : index
    %c0_70 = arith.constant 0 : index
    %51 = vector.load %arg1[%c0_68, %c0_69, %c0_70] : memref<8x16x80xf32, #tpu.memory_space<vmem>>, vector<1x16x80xf32>
    %52 = vector.shape_cast %51 : vector<1x16x80xf32> to vector<16x80xf32>
    %c1 = arith.constant 1 : index
    %c0_71 = arith.constant 0 : index
    %53 = vector.load %arg9[%c1, %c0_71] : memref<144x80xf32, #tpu.memory_space<vmem>>, vector<16x80xf32>
    tpu.vector_store %arg9[%c1, %c0_71], %52 {strides = array<i32>} : memref<144x80xf32, #tpu.memory_space<vmem>>, vector<16x80xf32>,
    %c1_72 = arith.constant 1 : index
    %c0_73 = arith.constant 0 : index
    %c0_74 = arith.constant 0 : index
    %54 = vector.load %arg1[%c1_72, %c0_73, %c0_74] : memref<8x16x80xf32, #tpu.memory_space<vmem>>, vector<1x16x80xf32>
    %55 = vector.shape_cast %54 : vector<1x16x80xf32> to vector<16x80xf32>
    %c19 = arith.constant 19 : index
    %c0_75 = arith.constant 0 : index
    %56 = vector.load %arg9[%c19, %c0_75] : memref<144x80xf32, #tpu.memory_space<vmem>>, vector<16x80xf32>
    tpu.vector_store %arg9[%c19, %c0_75], %55 {strides = array<i32>} : memref<144x80xf32, #tpu.memory_space<vmem>>, vector<16x80xf32>,
    %c2 = arith.constant 2 : index
    %c0_76 = arith.constant 0 : index
    %c0_77 = arith.constant 0 : index
    %57 = vector.load %arg1[%c2, %c0_76, %c0_77] : memref<8x16x80xf32, #tpu.memory_space<vmem>>, vector<1x16x80xf32>
    %58 = vector.shape_cast %57 : vector<1x16x80xf32> to vector<16x80xf32>
    %c37 = arith.constant 37 : index
    %c0_78 = arith.constant 0 : index
    %59 = vector.load %arg9[%c37, %c0_78] : memref<144x80xf32, #tpu.memory_space<vmem>>, vector<16x80xf32>
    tpu.vector_store %arg9[%c37, %c0_78], %58 {strides = array<i32>} : memref<144x80xf32, #tpu.memory_space<vmem>>, vector<16x80xf32>,
    %c3 = arith.constant 3 : index
    %c0_79 = arith.constant 0 : index
    %c0_80 = arith.constant 0 : index
    %60 = vector.load %arg1[%c3, %c0_79, %c0_80] : memref<8x16x80xf32, #tpu.memory_space<vmem>>, vector<1x16x80xf32>
    %61 = vector.shape_cast %60 : vector<1x16x80xf32> to vector<16x80xf32>
    %c55 = arith.constant 55 : index
    %c0_81 = arith.constant 0 : index
    %62 = vector.load %arg9[%c55, %c0_81] : memref<144x80xf32, #tpu.memory_space<vmem>>, vector<16x80xf32>
    tpu.vector_store %arg9[%c55, %c0_81], %61 {strides = array<i32>} : memref<144x80xf32, #tpu.memory_space<vmem>>, vector<16x80xf32>,
    %c4 = arith.constant 4 : index
    %c0_82 = arith.constant 0 : index
    %c0_83 = arith.constant 0 : index
    %63 = vector.load %arg1[%c4, %c0_82, %c0_83] : memref<8x16x80xf32, #tpu.memory_space<vmem>>, vector<1x16x80xf32>
    %64 = vector.shape_cast %63 : vector<1x16x80xf32> to vector<16x80xf32>
    %c73 = arith.constant 73 : index
    %c0_84 = arith.constant 0 : index
    %65 = vector.load %arg9[%c73, %c0_84] : memref<144x80xf32, #tpu.memory_space<vmem>>, vector<16x80xf32>
    tpu.vector_store %arg9[%c73, %c0_84], %64 {strides = array<i32>} : memref<144x80xf32, #tpu.memory_space<vmem>>, vector<16x80xf32>,
    %c5 = arith.constant 5 : index
    %c0_85 = arith.constant 0 : index
    %c0_86 = arith.constant 0 : index
    %66 = vector.load %arg1[%c5, %c0_85, %c0_86] : memref<8x16x80xf32, #tpu.memory_space<vmem>>, vector<1x16x80xf32>
    %67 = vector.shape_cast %66 : vector<1x16x80xf32> to vector<16x80xf32>
    %c91 = arith.constant 91 : index
    %c0_87 = arith.constant 0 : index
    %68 = vector.load %arg9[%c91, %c0_87] : memref<144x80xf32, #tpu.memory_space<vmem>>, vector<16x80xf32>
    tpu.vector_store %arg9[%c91, %c0_87], %67 {strides = array<i32>} : memref<144x80xf32, #tpu.memory_space<vmem>>, vector<16x80xf32>,
    %c6 = arith.constant 6 : index
    %c0_88 = arith.constant 0 : index
    %c0_89 = arith.constant 0 : index
    %69 = vector.load %arg1[%c6, %c0_88, %c0_89] : memref<8x16x80xf32, #tpu.memory_space<vmem>>, vector<1x16x80xf32>
    %70 = vector.shape_cast %69 : vector<1x16x80xf32> to vector<16x80xf32>
    %c109 = arith.constant 109 : index
    %c0_90 = arith.constant 0 : index
    %71 = vector.load %arg9[%c109, %c0_90] : memref<144x80xf32, #tpu.memory_space<vmem>>, vector<16x80xf32>
    tpu.vector_store %arg9[%c109, %c0_90], %70 {strides = array<i32>} : memref<144x80xf32, #tpu.memory_space<vmem>>, vector<16x80xf32>,
    %c7 = arith.constant 7 : index
    %c0_91 = arith.constant 0 : index
    %c0_92 = arith.constant 0 : index
    %72 = vector.load %arg1[%c7, %c0_91, %c0_92] : memref<8x16x80xf32, #tpu.memory_space<vmem>>, vector<1x16x80xf32>
    %73 = vector.shape_cast %72 : vector<1x16x80xf32> to vector<16x80xf32>
    %c127 = arith.constant 127 : index
    %c0_93 = arith.constant 0 : index
    %74 = vector.load %arg9[%c127, %c0_93] : memref<144x80xf32, #tpu.memory_space<vmem>>, vector<16x80xf32>
    tpu.vector_store %arg9[%c127, %c0_93], %73 {strides = array<i32>} : memref<144x80xf32, #tpu.memory_space<vmem>>, vector<16x80xf32>,
    %cst_94 = arith.constant 0.000000e+00 : f32
    %75 = vector.broadcast %cst_94 : f32 to vector<142x256xf32>
    %c0_95 = arith.constant 0 : index
    %c0_96 = arith.constant 0 : index
    %76 = vector.load %arg9[%c0_95, %c0_96] : memref<144x80xf32, #tpu.memory_space<vmem>>, vector<142x80xf32>
    %c0_97 = arith.constant 0 : index
    %c0_98 = arith.constant 0 : index
    %c0_99 = arith.constant 0 : index
    %77 = vector.load %arg2[%c0_97, %c0_98, %c0_99] : memref<3x80x256xf32, #tpu.memory_space<vmem>>, vector<1x80x256xf32>
    %78 = vector.shape_cast %77 : vector<1x80x256xf32> to vector<80x256xf32>
    %cst_100 = arith.constant dense<0.000000e+00> : vector<142x256xf32>
    %79 = tpu.matmul %76, %78, %cst_100 {dimension_numbers = #tpu.dot_dimension_numbers<[1], [0], [0], [1], [0, 0, 1, 1], [], []>} : vector<142x80xf32>, vector<80x256xf32>, vector<142x256xf32> -> vector<142x256xf32>
    %80 = arith.addf %75, %79 : vector<142x256xf32>
    %c1_101 = arith.constant 1 : index
    %c0_102 = arith.constant 0 : index
    %81 = vector.load %arg9[%c1_101, %c0_102] : memref<144x80xf32, #tpu.memory_space<vmem>>, vector<142x80xf32>
    %c1_103 = arith.constant 1 : index
    %c0_104 = arith.constant 0 : index
    %c0_105 = arith.constant 0 : index
    %82 = vector.load %arg2[%c1_103, %c0_104, %c0_105] : memref<3x80x256xf32, #tpu.memory_space<vmem>>, vector<1x80x256xf32>
    %83 = vector.shape_cast %82 : vector<1x80x256xf32> to vector<80x256xf32>
    %cst_106 = arith.constant dense<0.000000e+00> : vector<142x256xf32>
    %84 = tpu.matmul %81, %83, %cst_106 {dimension_numbers = #tpu.dot_dimension_numbers<[1], [0], [0], [1], [0, 0, 1, 1], [], []>} : vector<142x80xf32>, vector<80x256xf32>, vector<142x256xf32> -> vector<142x256xf32>
    %85 = arith.addf %80, %84 : vector<142x256xf32>
    %c2_107 = arith.constant 2 : index
    %c0_108 = arith.constant 0 : index
    %86 = vector.load %arg9[%c2_107, %c0_108] : memref<144x80xf32, #tpu.memory_space<vmem>>, vector<142x80xf32>
    %c2_109 = arith.constant 2 : index
    %c0_110 = arith.constant 0 : index
    %c0_111 = arith.constant 0 : index
    %87 = vector.load %arg2[%c2_109, %c0_110, %c0_111] : memref<3x80x256xf32, #tpu.memory_space<vmem>>, vector<1x80x256xf32>
    %88 = vector.shape_cast %87 : vector<1x80x256xf32> to vector<80x256xf32>
    %cst_112 = arith.constant dense<0.000000e+00> : vector<142x256xf32>
    %89 = tpu.matmul %86, %88, %cst_112 {dimension_numbers = #tpu.dot_dimension_numbers<[1], [0], [0], [1], [0, 0, 1, 1], [], []>} : vector<142x80xf32>, vector<80x256xf32>, vector<142x256xf32> -> vector<142x256xf32>
    %90 = arith.addf %85, %89 : vector<142x256xf32>
    %c0_113 = arith.constant 0 : index
    %c0_114 = arith.constant 0 : index
    %91 = vector.load %arg3[%c0_113, %c0_114] : memref<1x256xf32, #tpu.memory_space<vmem>>, vector<1x256xf32>
    %92 = vector.broadcast %91 : vector<1x256xf32> to vector<142x256xf32>
    %93 = arith.addf %90, %92 : vector<142x256xf32>
    %cst_115 = arith.constant 0.000000e+00 : f32
    %94 = vector.broadcast %cst_115 : f32 to vector<142x256xf32>
    %95 = arith.maximumf %93, %94 : vector<142x256xf32>
    %96 = vector.extract_strided_slice %95 {offsets = [0, 0], sizes = [16, 256], strides = [1, 1]} : vector<142x256xf32> to vector<16x256xf32>
    %c2_116 = arith.constant 2 : index
    %c0_117 = arith.constant 0 : index
    %97 = vector.load %arg10[%c2_116, %c0_117] : memref<160x256xf32, #tpu.memory_space<vmem>>, vector<16x256xf32>
    tpu.vector_store %arg10[%c2_116, %c0_117], %96 {strides = array<i32>} : memref<160x256xf32, #tpu.memory_space<vmem>>, vector<16x256xf32>,
    %98 = vector.extract_strided_slice %95 {offsets = [18, 0], sizes = [16, 256], strides = [1, 1]} : vector<142x256xf32> to vector<16x256xf32>
    %c22 = arith.constant 22 : index
    %c0_118 = arith.constant 0 : index
    %99 = vector.load %arg10[%c22, %c0_118] : memref<160x256xf32, #tpu.memory_space<vmem>>, vector<16x256xf32>
    tpu.vector_store %arg10[%c22, %c0_118], %98 {strides = array<i32>} : memref<160x256xf32, #tpu.memory_space<vmem>>, vector<16x256xf32>,
    %100 = vector.extract_strided_slice %95 {offsets = [36, 0], sizes = [16, 256], strides = [1, 1]} : vector<142x256xf32> to vector<16x256xf32>
    %c42 = arith.constant 42 : index
    %c0_119 = arith.constant 0 : index
    %101 = vector.load %arg10[%c42, %c0_119] : memref<160x256xf32, #tpu.memory_space<vmem>>, vector<16x256xf32>
    tpu.vector_store %arg10[%c42, %c0_119], %100 {strides = array<i32>} : memref<160x256xf32, #tpu.memory_space<vmem>>, vector<16x256xf32>,
    %102 = vector.extract_strided_slice %95 {offsets = [54, 0], sizes = [16, 256], strides = [1, 1]} : vector<142x256xf32> to vector<16x256xf32>
    %c62 = arith.constant 62 : index
    %c0_120 = arith.constant 0 : index
    %103 = vector.load %arg10[%c62, %c0_120] : memref<160x256xf32, #tpu.memory_space<vmem>>, vector<16x256xf32>
    tpu.vector_store %arg10[%c62, %c0_120], %102 {strides = array<i32>} : memref<160x256xf32, #tpu.memory_space<vmem>>, vector<16x256xf32>,
    %104 = vector.extract_strided_slice %95 {offsets = [72, 0], sizes = [16, 256], strides = [1, 1]} : vector<142x256xf32> to vector<16x256xf32>
    %c82 = arith.constant 82 : index
    %c0_121 = arith.constant 0 : index
    %105 = vector.load %arg10[%c82, %c0_121] : memref<160x256xf32, #tpu.memory_space<vmem>>, vector<16x256xf32>
    tpu.vector_store %arg10[%c82, %c0_121], %104 {strides = array<i32>} : memref<160x256xf32, #tpu.memory_space<vmem>>, vector<16x256xf32>,
    %106 = vector.extract_strided_slice %95 {offsets = [90, 0], sizes = [16, 256], strides = [1, 1]} : vector<142x256xf32> to vector<16x256xf32>
    %c102 = arith.constant 102 : index
    %c0_122 = arith.constant 0 : index
    %107 = vector.load %arg10[%c102, %c0_122] : memref<160x256xf32, #tpu.memory_space<vmem>>, vector<16x256xf32>
    tpu.vector_store %arg10[%c102, %c0_122], %106 {strides = array<i32>} : memref<160x256xf32, #tpu.memory_space<vmem>>, vector<16x256xf32>,
    %108 = vector.extract_strided_slice %95 {offsets = [108, 0], sizes = [16, 256], strides = [1, 1]} : vector<142x256xf32> to vector<16x256xf32>
    %c122 = arith.constant 122 : index
    %c0_123 = arith.constant 0 : index
    %109 = vector.load %arg10[%c122, %c0_123] : memref<160x256xf32, #tpu.memory_space<vmem>>, vector<16x256xf32>
    tpu.vector_store %arg10[%c122, %c0_123], %108 {strides = array<i32>} : memref<160x256xf32, #tpu.memory_space<vmem>>, vector<16x256xf32>,
    %110 = vector.extract_strided_slice %95 {offsets = [126, 0], sizes = [16, 256], strides = [1, 1]} : vector<142x256xf32> to vector<16x256xf32>
    %c142 = arith.constant 142 : index
    %c0_124 = arith.constant 0 : index
    %111 = vector.load %arg10[%c142, %c0_124] : memref<160x256xf32, #tpu.memory_space<vmem>>, vector<16x256xf32>
    tpu.vector_store %arg10[%c142, %c0_124], %110 {strides = array<i32>} : memref<160x256xf32, #tpu.memory_space<vmem>>, vector<16x256xf32>,
    %cst_125 = arith.constant 0.000000e+00 : f32
    %112 = vector.broadcast %cst_125 : f32 to vector<156x256xf32>
    %c0_126 = arith.constant 0 : index
    %c0_127 = arith.constant 0 : index
    %113 = vector.load %arg10[%c0_126, %c0_127] : memref<160x256xf32, #tpu.memory_space<vmem>>, vector<156x256xf32>
    %c0_128 = arith.constant 0 : index
    %c0_129 = arith.constant 0 : index
    %c0_130 = arith.constant 0 : index
    %114 = vector.load %arg4[%c0_128, %c0_129, %c0_130] : memref<5x256x256xf32, #tpu.memory_space<vmem>>, vector<1x256x256xf32>
    %115 = vector.shape_cast %114 : vector<1x256x256xf32> to vector<256x256xf32>
    %cst_131 = arith.constant dense<0.000000e+00> : vector<156x256xf32>
    %116 = tpu.matmul %113, %115, %cst_131 {dimension_numbers = #tpu.dot_dimension_numbers<[1], [0], [0], [1], [0, 0, 1, 1], [], []>} : vector<156x256xf32>, vector<256x256xf32>, vector<156x256xf32> -> vector<156x256xf32>
    %117 = arith.addf %112, %116 : vector<156x256xf32>
    %c1_132 = arith.constant 1 : index
    %c0_133 = arith.constant 0 : index
    %118 = vector.load %arg10[%c1_132, %c0_133] : memref<160x256xf32, #tpu.memory_space<vmem>>, vector<156x256xf32>
    %c1_134 = arith.constant 1 : index
    %c0_135 = arith.constant 0 : index
    %c0_136 = arith.constant 0 : index
    %119 = vector.load %arg4[%c1_134, %c0_135, %c0_136] : memref<5x256x256xf32, #tpu.memory_space<vmem>>, vector<1x256x256xf32>
    %120 = vector.shape_cast %119 : vector<1x256x256xf32> to vector<256x256xf32>
    %cst_137 = arith.constant dense<0.000000e+00> : vector<156x256xf32>
    %121 = tpu.matmul %118, %120, %cst_137 {dimension_numbers = #tpu.dot_dimension_numbers<[1], [0], [0], [1], [0, 0, 1, 1], [], []>} : vector<156x256xf32>, vector<256x256xf32>, vector<156x256xf32> -> vector<156x256xf32>
    %122 = arith.addf %117, %121 : vector<156x256xf32>
    %c2_138 = arith.constant 2 : index
    %c0_139 = arith.constant 0 : index
    %123 = vector.load %arg10[%c2_138, %c0_139] : memref<160x256xf32, #tpu.memory_space<vmem>>, vector<156x256xf32>
    %c2_140 = arith.constant 2 : index
    %c0_141 = arith.constant 0 : index
    %c0_142 = arith.constant 0 : index
    %124 = vector.load %arg4[%c2_140, %c0_141, %c0_142] : memref<5x256x256xf32, #tpu.memory_space<vmem>>, vector<1x256x256xf32>
    %125 = vector.shape_cast %124 : vector<1x256x256xf32> to vector<256x256xf32>
    %cst_143 = arith.constant dense<0.000000e+00> : vector<156x256xf32>
    %126 = tpu.matmul %123, %125, %cst_143 {dimension_numbers = #tpu.dot_dimension_numbers<[1], [0], [0], [1], [0, 0, 1, 1], [], []>} : vector<156x256xf32>, vector<256x256xf32>, vector<156x256xf32> -> vector<156x256xf32>
    %127 = arith.addf %122, %126 : vector<156x256xf32>
    %c3_144 = arith.constant 3 : index
    %c0_145 = arith.constant 0 : index
    %128 = vector.load %arg10[%c3_144, %c0_145] : memref<160x256xf32, #tpu.memory_space<vmem>>, vector<156x256xf32>
    %c3_146 = arith.constant 3 : index
    %c0_147 = arith.constant 0 : index
    %c0_148 = arith.constant 0 : index
    %129 = vector.load %arg4[%c3_146, %c0_147, %c0_148] : memref<5x256x256xf32, #tpu.memory_space<vmem>>, vector<1x256x256xf32>
    %130 = vector.shape_cast %129 : vector<1x256x256xf32> to vector<256x256xf32>
    %cst_149 = arith.constant dense<0.000000e+00> : vector<156x256xf32>
    %131 = tpu.matmul %128, %130, %cst_149 {dimension_numbers = #tpu.dot_dimension_numbers<[1], [0], [0], [1], [0, 0, 1, 1], [], []>} : vector<156x256xf32>, vector<256x256xf32>, vector<156x256xf32> -> vector<156x256xf32>
    %132 = arith.addf %127, %131 : vector<156x256xf32>
    %c4_150 = arith.constant 4 : index
    %c0_151 = arith.constant 0 : index
    %133 = vector.load %arg10[%c4_150, %c0_151] : memref<160x256xf32, #tpu.memory_space<vmem>>, vector<156x256xf32>
    %c4_152 = arith.constant 4 : index
    %c0_153 = arith.constant 0 : index
    %c0_154 = arith.constant 0 : index
    %134 = vector.load %arg4[%c4_152, %c0_153, %c0_154] : memref<5x256x256xf32, #tpu.memory_space<vmem>>, vector<1x256x256xf32>
    %135 = vector.shape_cast %134 : vector<1x256x256xf32> to vector<256x256xf32>
    %cst_155 = arith.constant dense<0.000000e+00> : vector<156x256xf32>
    %136 = tpu.matmul %133, %135, %cst_155 {dimension_numbers = #tpu.dot_dimension_numbers<[1], [0], [0], [1], [0, 0, 1, 1], [], []>} : vector<156x256xf32>, vector<256x256xf32>, vector<156x256xf32> -> vector<156x256xf32>
    %137 = arith.addf %132, %136 : vector<156x256xf32>
    %c0_156 = arith.constant 0 : index
    %c0_157 = arith.constant 0 : index
    %138 = vector.load %arg5[%c0_156, %c0_157] : memref<1x256xf32, #tpu.memory_space<vmem>>, vector<1x256xf32>
    %139 = vector.broadcast %138 : vector<1x256xf32> to vector<156x256xf32>
    %140 = arith.addf %137, %139 : vector<156x256xf32>
    %cst_158 = arith.constant 0.000000e+00 : f32
    %141 = vector.broadcast %cst_158 : f32 to vector<156x256xf32>
    %142 = arith.maximumf %140, %141 : vector<156x256xf32>
    %143 = vector.extract_strided_slice %142 {offsets = [0, 0], sizes = [16, 256], strides = [1, 1]} : vector<156x256xf32> to vector<16x256xf32>
    %c1_159 = arith.constant 1 : index
    %c0_160 = arith.constant 0 : index
    %144 = vector.load %arg11[%c1_159, %c0_160] : memref<144x256xf32, #tpu.memory_space<vmem>>, vector<16x256xf32>
    tpu.vector_store %arg11[%c1_159, %c0_160], %143 {strides = array<i32>} : memref<144x256xf32, #tpu.memory_space<vmem>>, vector<16x256xf32>,
    %145 = vector.extract_strided_slice %142 {offsets = [20, 0], sizes = [16, 256], strides = [1, 1]} : vector<156x256xf32> to vector<16x256xf32>
    %c19_161 = arith.constant 19 : index
    %c0_162 = arith.constant 0 : index
    %146 = vector.load %arg11[%c19_161, %c0_162] : memref<144x256xf32, #tpu.memory_space<vmem>>, vector<16x256xf32>
    tpu.vector_store %arg11[%c19_161, %c0_162], %145 {strides = array<i32>} : memref<144x256xf32, #tpu.memory_space<vmem>>, vector<16x256xf32>,
    %147 = vector.extract_strided_slice %142 {offsets = [40, 0], sizes = [16, 256], strides = [1, 1]} : vector<156x256xf32> to vector<16x256xf32>
    %c37_163 = arith.constant 37 : index
    %c0_164 = arith.constant 0 : index
    %148 = vector.load %arg11[%c37_163, %c0_164] : memref<144x256xf32, #tpu.memory_space<vmem>>, vector<16x256xf32>
    tpu.vector_store %arg11[%c37_163, %c0_164], %147 {strides = array<i32>} : memref<144x256xf32, #tpu.memory_space<vmem>>, vector<16x256xf32>,
    %149 = vector.extract_strided_slice %142 {offsets = [60, 0], sizes = [16, 256], strides = [1, 1]} : vector<156x256xf32> to vector<16x256xf32>
    %c55_165 = arith.constant 55 : index
    %c0_166 = arith.constant 0 : index
    %150 = vector.load %arg11[%c55_165, %c0_166] : memref<144x256xf32, #tpu.memory_space<vmem>>, vector<16x256xf32>
    tpu.vector_store %arg11[%c55_165, %c0_166], %149 {strides = array<i32>} : memref<144x256xf32, #tpu.memory_space<vmem>>, vector<16x256xf32>,
    %151 = vector.extract_strided_slice %142 {offsets = [80, 0], sizes = [16, 256], strides = [1, 1]} : vector<156x256xf32> to vector<16x256xf32>
    %c73_167 = arith.constant 73 : index
    %c0_168 = arith.constant 0 : index
    %152 = vector.load %arg11[%c73_167, %c0_168] : memref<144x256xf32, #tpu.memory_space<vmem>>, vector<16x256xf32>
    tpu.vector_store %arg11[%c73_167, %c0_168], %151 {strides = array<i32>} : memref<144x256xf32, #tpu.memory_space<vmem>>, vector<16x256xf32>,
    %153 = vector.extract_strided_slice %142 {offsets = [100, 0], sizes = [16, 256], strides = [1, 1]} : vector<156x256xf32> to vector<16x256xf32>
    %c91_169 = arith.constant 91 : index
    %c0_170 = arith.constant 0 : index
    %154 = vector.load %arg11[%c91_169, %c0_170] : memref<144x256xf32, #tpu.memory_space<vmem>>, vector<16x256xf32>
    tpu.vector_store %arg11[%c91_169, %c0_170], %153 {strides = array<i32>} : memref<144x256xf32, #tpu.memory_space<vmem>>, vector<16x256xf32>,
    %155 = vector.extract_strided_slice %142 {offsets = [120, 0], sizes = [16, 256], strides = [1, 1]} : vector<156x256xf32> to vector<16x256xf32>
    %c109_171 = arith.constant 109 : index
    %c0_172 = arith.constant 0 : index
    %156 = vector.load %arg11[%c109_171, %c0_172] : memref<144x256xf32, #tpu.memory_space<vmem>>, vector<16x256xf32>
    tpu.vector_store %arg11[%c109_171, %c0_172], %155 {strides = array<i32>} : memref<144x256xf32, #tpu.memory_space<vmem>>, vector<16x256xf32>,
    %157 = vector.extract_strided_slice %142 {offsets = [140, 0], sizes = [16, 256], strides = [1, 1]} : vector<156x256xf32> to vector<16x256xf32>
    %c127_173 = arith.constant 127 : index
    %c0_174 = arith.constant 0 : index
    %158 = vector.load %arg11[%c127_173, %c0_174] : memref<144x256xf32, #tpu.memory_space<vmem>>, vector<16x256xf32>
    tpu.vector_store %arg11[%c127_173, %c0_174], %157 {strides = array<i32>} : memref<144x256xf32, #tpu.memory_space<vmem>>, vector<16x256xf32>,
    %cst_175 = arith.constant 0.000000e+00 : f32
    %159 = vector.broadcast %cst_175 : f32 to vector<142x512xf32>
    %c0_176 = arith.constant 0 : index
    %c0_177 = arith.constant 0 : index
    %160 = vector.load %arg11[%c0_176, %c0_177] : memref<144x256xf32, #tpu.memory_space<vmem>>, vector<142x256xf32>
    %c0_178 = arith.constant 0 : index
    %c0_179 = arith.constant 0 : index
    %c0_180 = arith.constant 0 : index
    %161 = vector.load %arg6[%c0_178, %c0_179, %c0_180] : memref<3x256x512xf32, #tpu.memory_space<vmem>>, vector<1x256x512xf32>
    %162 = vector.shape_cast %161 : vector<1x256x512xf32> to vector<256x512xf32>
    %cst_181 = arith.constant dense<0.000000e+00> : vector<142x512xf32>
    %163 = tpu.matmul %160, %162, %cst_181 {dimension_numbers = #tpu.dot_dimension_numbers<[1], [0], [0], [1], [0, 0, 1, 1], [], []>} : vector<142x256xf32>, vector<256x512xf32>, vector<142x512xf32> -> vector<142x512xf32>
    %164 = arith.addf %159, %163 : vector<142x512xf32>
    %c1_182 = arith.constant 1 : index
    %c0_183 = arith.constant 0 : index
    %165 = vector.load %arg11[%c1_182, %c0_183] : memref<144x256xf32, #tpu.memory_space<vmem>>, vector<142x256xf32>
    %c1_184 = arith.constant 1 : index
    %c0_185 = arith.constant 0 : index
    %c0_186 = arith.constant 0 : index
    %166 = vector.load %arg6[%c1_184, %c0_185, %c0_186] : memref<3x256x512xf32, #tpu.memory_space<vmem>>, vector<1x256x512xf32>
    %167 = vector.shape_cast %166 : vector<1x256x512xf32> to vector<256x512xf32>
    %cst_187 = arith.constant dense<0.000000e+00> : vector<142x512xf32>
    %168 = tpu.matmul %165, %167, %cst_187 {dimension_numbers = #tpu.dot_dimension_numbers<[1], [0], [0], [1], [0, 0, 1, 1], [], []>} : vector<142x256xf32>, vector<256x512xf32>, vector<142x512xf32> -> vector<142x512xf32>
    %169 = arith.addf %164, %168 : vector<142x512xf32>
    %c2_188 = arith.constant 2 : index
    %c0_189 = arith.constant 0 : index
    %170 = vector.load %arg11[%c2_188, %c0_189] : memref<144x256xf32, #tpu.memory_space<vmem>>, vector<142x256xf32>
    %c2_190 = arith.constant 2 : index
    %c0_191 = arith.constant 0 : index
    %c0_192 = arith.constant 0 : index
    %171 = vector.load %arg6[%c2_190, %c0_191, %c0_192] : memref<3x256x512xf32, #tpu.memory_space<vmem>>, vector<1x256x512xf32>
    %172 = vector.shape_cast %171 : vector<1x256x512xf32> to vector<256x512xf32>
    %cst_193 = arith.constant dense<0.000000e+00> : vector<142x512xf32>
    %173 = tpu.matmul %170, %172, %cst_193 {dimension_numbers = #tpu.dot_dimension_numbers<[1], [0], [0], [1], [0, 0, 1, 1], [], []>} : vector<142x256xf32>, vector<256x512xf32>, vector<142x512xf32> -> vector<142x512xf32>
    %174 = arith.addf %169, %173 : vector<142x512xf32>
    %c0_194 = arith.constant 0 : index
    %c0_195 = arith.constant 0 : index
    %175 = vector.load %arg7[%c0_194, %c0_195] : memref<1x512xf32, #tpu.memory_space<vmem>>, vector<1x512xf32>
    %176 = vector.broadcast %175 : vector<1x512xf32> to vector<142x512xf32>
    %177 = arith.addf %174, %176 : vector<142x512xf32>
    %cst_196 = arith.constant 0.000000e+00 : f32
    %178 = vector.broadcast %cst_196 : f32 to vector<142x512xf32>
    %179 = arith.maximumf %177, %178 : vector<142x512xf32>
    %180 = vector.extract_strided_slice %179 {offsets = [0, 0], sizes = [16, 512], strides = [1, 1]} : vector<142x512xf32> to vector<16x512xf32>
    %c0_197 = arith.constant 0 : index
    %c0_198 = arith.constant 0 : index
    %c0_199 = arith.constant 0 : index
    %181 = vector.load %arg8[%c0_197, %c0_198, %c0_199] : memref<8x16x512xf32, #tpu.memory_space<vmem>>, vector<1x16x512xf32>
    %182 = vector.shape_cast %181 : vector<1x16x512xf32> to vector<16x512xf32>
    %183 = vector.shape_cast %180 : vector<16x512xf32> to vector<1x16x512xf32>
    tpu.vector_store %arg8[%c0_197, %c0_198, %c0_199], %183 {strides = array<i32>} : memref<8x16x512xf32, #tpu.memory_space<vmem>>, vector<1x16x512xf32>,
    %184 = vector.extract_strided_slice %179 {offsets = [18, 0], sizes = [16, 512], strides = [1, 1]} : vector<142x512xf32> to vector<16x512xf32>
    %c1_200 = arith.constant 1 : index
    %c0_201 = arith.constant 0 : index
    %c0_202 = arith.constant 0 : index
    %185 = vector.load %arg8[%c1_200, %c0_201, %c0_202] : memref<8x16x512xf32, #tpu.memory_space<vmem>>, vector<1x16x512xf32>
    %186 = vector.shape_cast %185 : vector<1x16x512xf32> to vector<16x512xf32>
    %187 = vector.shape_cast %184 : vector<16x512xf32> to vector<1x16x512xf32>
    tpu.vector_store %arg8[%c1_200, %c0_201, %c0_202], %187 {strides = array<i32>} : memref<8x16x512xf32, #tpu.memory_space<vmem>>, vector<1x16x512xf32>,
    %188 = vector.extract_strided_slice %179 {offsets = [36, 0], sizes = [16, 512], strides = [1, 1]} : vector<142x512xf32> to vector<16x512xf32>
    %c2_203 = arith.constant 2 : index
    %c0_204 = arith.constant 0 : index
    %c0_205 = arith.constant 0 : index
    %189 = vector.load %arg8[%c2_203, %c0_204, %c0_205] : memref<8x16x512xf32, #tpu.memory_space<vmem>>, vector<1x16x512xf32>
    %190 = vector.shape_cast %189 : vector<1x16x512xf32> to vector<16x512xf32>
    %191 = vector.shape_cast %188 : vector<16x512xf32> to vector<1x16x512xf32>
    tpu.vector_store %arg8[%c2_203, %c0_204, %c0_205], %191 {strides = array<i32>} : memref<8x16x512xf32, #tpu.memory_space<vmem>>, vector<1x16x512xf32>,
    %192 = vector.extract_strided_slice %179 {offsets = [54, 0], sizes = [16, 512], strides = [1, 1]} : vector<142x512xf32> to vector<16x512xf32>
    %c3_206 = arith.constant 3 : index
    %c0_207 = arith.constant 0 : index
    %c0_208 = arith.constant 0 : index
    %193 = vector.load %arg8[%c3_206, %c0_207, %c0_208] : memref<8x16x512xf32, #tpu.memory_space<vmem>>, vector<1x16x512xf32>
    %194 = vector.shape_cast %193 : vector<1x16x512xf32> to vector<16x512xf32>
    %195 = vector.shape_cast %192 : vector<16x512xf32> to vector<1x16x512xf32>
    tpu.vector_store %arg8[%c3_206, %c0_207, %c0_208], %195 {strides = array<i32>} : memref<8x16x512xf32, #tpu.memory_space<vmem>>, vector<1x16x512xf32>,
    %196 = vector.extract_strided_slice %179 {offsets = [72, 0], sizes = [16, 512], strides = [1, 1]} : vector<142x512xf32> to vector<16x512xf32>
    %c4_209 = arith.constant 4 : index
    %c0_210 = arith.constant 0 : index
    %c0_211 = arith.constant 0 : index
    %197 = vector.load %arg8[%c4_209, %c0_210, %c0_211] : memref<8x16x512xf32, #tpu.memory_space<vmem>>, vector<1x16x512xf32>
    %198 = vector.shape_cast %197 : vector<1x16x512xf32> to vector<16x512xf32>
    %199 = vector.shape_cast %196 : vector<16x512xf32> to vector<1x16x512xf32>
    tpu.vector_store %arg8[%c4_209, %c0_210, %c0_211], %199 {strides = array<i32>} : memref<8x16x512xf32, #tpu.memory_space<vmem>>, vector<1x16x512xf32>,
    %200 = vector.extract_strided_slice %179 {offsets = [90, 0], sizes = [16, 512], strides = [1, 1]} : vector<142x512xf32> to vector<16x512xf32>
    %c5_212 = arith.constant 5 : index
    %c0_213 = arith.constant 0 : index
    %c0_214 = arith.constant 0 : index
    %201 = vector.load %arg8[%c5_212, %c0_213, %c0_214] : memref<8x16x512xf32, #tpu.memory_space<vmem>>, vector<1x16x512xf32>
    %202 = vector.shape_cast %201 : vector<1x16x512xf32> to vector<16x512xf32>
    %203 = vector.shape_cast %200 : vector<16x512xf32> to vector<1x16x512xf32>
    tpu.vector_store %arg8[%c5_212, %c0_213, %c0_214], %203 {strides = array<i32>} : memref<8x16x512xf32, #tpu.memory_space<vmem>>, vector<1x16x512xf32>,
    %204 = vector.extract_strided_slice %179 {offsets = [108, 0], sizes = [16, 512], strides = [1, 1]} : vector<142x512xf32> to vector<16x512xf32>
    %c6_215 = arith.constant 6 : index
    %c0_216 = arith.constant 0 : index
    %c0_217 = arith.constant 0 : index
    %205 = vector.load %arg8[%c6_215, %c0_216, %c0_217] : memref<8x16x512xf32, #tpu.memory_space<vmem>>, vector<1x16x512xf32>
    %206 = vector.shape_cast %205 : vector<1x16x512xf32> to vector<16x512xf32>
    %207 = vector.shape_cast %204 : vector<16x512xf32> to vector<1x16x512xf32>
    tpu.vector_store %arg8[%c6_215, %c0_216, %c0_217], %207 {strides = array<i32>} : memref<8x16x512xf32, #tpu.memory_space<vmem>>, vector<1x16x512xf32>,
    %208 = vector.extract_strided_slice %179 {offsets = [126, 0], sizes = [16, 512], strides = [1, 1]} : vector<142x512xf32> to vector<16x512xf32>
    %c7_218 = arith.constant 7 : index
    %c0_219 = arith.constant 0 : index
    %c0_220 = arith.constant 0 : index
    %209 = vector.load %arg8[%c7_218, %c0_219, %c0_220] : memref<8x16x512xf32, #tpu.memory_space<vmem>>, vector<1x16x512xf32>
    %210 = vector.shape_cast %209 : vector<1x16x512xf32> to vector<16x512xf32>
    %211 = vector.shape_cast %208 : vector<16x512xf32> to vector<1x16x512xf32>
    tpu.vector_store %arg8[%c7_218, %c0_219, %c0_220], %211 {strides = array<i32>} : memref<8x16x512xf32, #tpu.memory_space<vmem>>, vector<1x16x512xf32>,
    return
  }
  func.func @transform_0(%arg0: i32) -> (i32, i32, i32) {
    %c0_i32 = arith.constant 0 : i32
    %c0_i32_0 = arith.constant 0 : i32
    %c0_i32_1 = arith.constant 0 : i32
    return %arg0, %c0_i32, %c0_i32_0 : i32, i32, i32
  }
  func.func @transform_1(%arg0: i32) -> (i32, i32, i32) {
    %c0_i32 = arith.constant 0 : i32
    %c0_i32_0 = arith.constant 0 : i32
    %c0_i32_1 = arith.constant 0 : i32
    %c0_i32_2 = arith.constant 0 : i32
    return %c0_i32, %c0_i32_0, %c0_i32_1 : i32, i32, i32
  }
  func.func @transform_2(%arg0: i32) -> (i32, i32) {
    %c0_i32 = arith.constant 0 : i32
    %c0_i32_0 = arith.constant 0 : i32
    %c0_i32_1 = arith.constant 0 : i32
    return %c0_i32, %c0_i32_0 : i32, i32
  }
  func.func @transform_3(%arg0: i32) -> (i32, i32, i32) {
    %c0_i32 = arith.constant 0 : i32
    %c0_i32_0 = arith.constant 0 : i32
    %c0_i32_1 = arith.constant 0 : i32
    %c0_i32_2 = arith.constant 0 : i32
    return %c0_i32, %c0_i32_0, %c0_i32_1 : i32, i32, i32
  }
  func.func @transform_4(%arg0: i32) -> (i32, i32) {
    %c0_i32 = arith.constant 0 : i32
    %c0_i32_0 = arith.constant 0 : i32
    %c0_i32_1 = arith.constant 0 : i32
    return %c0_i32, %c0_i32_0 : i32, i32
  }
  func.func @transform_5(%arg0: i32) -> (i32, i32, i32) {
    %c0_i32 = arith.constant 0 : i32
    %c0_i32_0 = arith.constant 0 : i32
    %c0_i32_1 = arith.constant 0 : i32
    %c0_i32_2 = arith.constant 0 : i32
    return %c0_i32, %c0_i32_0, %c0_i32_1 : i32, i32, i32
  }
  func.func @transform_6(%arg0: i32) -> (i32, i32) {
    %c0_i32 = arith.constant 0 : i32
    %c0_i32_0 = arith.constant 0 : i32
    %c0_i32_1 = arith.constant 0 : i32
    return %c0_i32, %c0_i32_0 : i32, i32
  }
  func.func @transform_7(%arg0: i32) -> (i32, i32, i32) {
    %c0_i32 = arith.constant 0 : i32
    %c0_i32_0 = arith.constant 0 : i32
    %c0_i32_1 = arith.constant 0 : i32
    return %arg0, %c0_i32, %c0_i32_0 : i32, i32, i32
  }
}

</mosaic_0001>

<bundles_post_ra>
// kernel: grid_model3_forward_batched.1
= control target key start
LH: loop header
LB: loop body
LE: loop exit
PB: predicated region body
PF: predicated region fallthrough
CT: control target
= control target key end

     0   :  { %12 = vsyncpa [#allocation6], 0  ;;  %s7896_s24 = smov 0   ;;  %s11565_s0 = inlined_call_operand.vmem [shape: f32[16,16,80], index: 0, kind: input, shape index: {}]   ;;  %s11566_s1 = inlined_call_operand.vmem [shape: f32[3,80,256], index: 1, kind: input, shape index: {}]   ;;  %s11567_s2 = inlined_call_operand.vmem [shape: f32[1,256], index: 2, kind: input, shape index: {}]   ;;  %s11568_s3 = inlined_call_operand.hbm [shape: f32[5,256,256], index: 3, kind: input, shape index: {}]   ;;  %s11569_s4 = inlined_call_operand.vmem [shape: f32[1,256], index: 4, kind: input, shape index: {}]   ;;  %s11570_s5 = inlined_call_operand.vmem [shape: f32[3,256,512], index: 5, kind: input, shape index: {}]   ;;  %s11571_s6 = inlined_call_operand.vmem [shape: f32[1,512], index: 6, kind: input, shape index: {}]   ;;  %s11572_s7 = inlined_call_operand.vmem [shape: f32[16,16,512], index: 7, kind: output, shape index: {}]  }
   0x1 LB: > { %s6094_s25 = sadd.s32 4294967295, %s7850_s24   ;;  %p6096_p0 = scmp.ge.s32.totalorder %s7850_s24, 1  ;;  %s7850_s24 = sphi %s7896_s24, %s18_s24  }
   0x2   : > { %p201_p1 = scmp.lt.s32.totalorder %s7850_s24, 3  ;;  %s7852_s26 = smov [#allocation5]  }
   0x3   : > { %s219_s27 = sshll.u32 %s7852_s26, 4  ;;  %p7910_p3 = scmp.eq.s32.totalorder %s6094_s25, 0  ;;  %s220_s27 = int_to_ptr.vmem [resolvable:$true] %s219_s27 }
   0x4   : > { %p7904_p2 = pnand %p6096_p0, %p201_p1  ;;  %s7812_s10 = scalar_lea.hbm %s11568_s3, 40960 }
   0x5   : > { %s11649_s29 = scalar_select %p7910_p3, 1, 0 }
   0x6   : > { %s11648_s28 = scalar_select %p7904_p2, 1, 0 }
   0x7   : > { %p7707_p4 = pneg %p7904_p2  ;;  %p7813_p6 = scmp.ne.s32.totalorder %s11568_s3, %s7812_s10 }
   0x8   : > { %p7819_p10 = scmp.lt.u32.totalorder %s7812_s10, %s11568_s3 }
   0x9   : > { %p7918_p5 = pnand %p7910_p3, %p7707_p4 }
   0xb   : > { %p7814_p7 = pneg %p7918_p5 }
   0xd   : > { %p7815_p8 = pnand %p7814_p7, %p7813_p6 }
   0xf   : > { %p7816_p9 = pneg %p7815_p8 }
  0x11   : > { %p7821_p11 = pnand %p7819_p10, %p7816_p9 }
  0x13   : > { %7824 = shalt.err (!%p7821_p11)
}
  0x14   : > { %s7825_s15 = scalar_lea.vmem %s220_s27, 40960  ;;  %p7833_p1 = scmp.lt.s32.totalorder %s220_s27, %s220_s27 }
  0x15   : > { %p7826_p12 = scmp.ne.s32.totalorder %s220_s27, %s7825_s15  ;;  %p7834_p4 = scmp.lt.s32.totalorder %s7825_s15, %s7825_s15 }
  0x17   : > { %p7828_p13 = pnand %p7826_p12, %p7814_p7  ;;  %p7835_p3 = por %p7834_p4, %p7833_p1 }
  0x19   : > { %p7829_p0 = pneg %p7828_p13 }
  0x1b   : > { %p7836_p2 = pnand %p7835_p3, %p7829_p0 }
  0x1d   : > { %7839 = shalt.err (!%p7836_p2)
}
  0x1e   : > { %s7853_s16 = smov 256   ;;  %s7854_s17 = smov 16  }
  0x1f   : > { %7710 = dma.hbm_to_vmem [thread:$0]  (!%p7918_p5), %s11568_s3, 40960, %s220_s27, [#allocation6], %s7853_s16, %s7853_s16, %s7854_s17  }
  0x20   : > { %p11651_p6 = scmp.ne.s32.totalorder %s11648_s28, 0 }
  0x22   : > { %254 = sbr.rel (%p11651_p6) target bundleno = 1554 (0x612), region = 48 }
  0x29   : > { %p11652_p8 = scmp.ne.s32.totalorder %s11649_s29, 0 }
  0x2b   : > { %7845 = dma.done.wait (%p11652_p8), [#allocation6], 40960  }
  0x2c   : > { %7847 = vsyncadd (%p11652_p8), [#allocation6], 4294926336  ;;  %s7946_s20 = sshll.u32 %s6094_s25, 3  ;;  %vm302_vm0 = vcmask 647168   ;;  %v11576_v0 = vmov 0.0   ;;  %v461_v1 = vld [vmem:[%s11566_s1 + $0x8] sm:$0xff] }
  0x2d   : > { %864 = vmatprep.mubr.f32.mxu0 %v11576_v0  ;;  %319 = vst [vmem:[#allocation3] sm:$0x3] %v11576_v0  ;;  %320 = vst [vmem:[#allocation3 + $0x8] sm:$0x3] %v11576_v0  ;;  %p289_p2 = scmp.lt.s32.totalorder %s7946_s20, 15  ;;  %637 = vmatprep.mubr.f32.mxu1 %v11576_v0  ;;  %v463_v2 = vld [vmem:[%s11566_s1 + $0x18] sm:$0xff] }
  0x2e   : > { %321 = vst [vmem:[#allocation3 + $0x20] sm:$0xc] %v11576_v0  ;;  %322 = vst [vmem:[#allocation3 + $0x28] sm:$0xc] %v11576_v0  ;;  %v460_v3 = vld [vmem:[%s11566_s1] sm:$0xff]  ;;  %v6551_v4 = vpack.c.bf16 %v463_v2, %v461_v1  ;;  %v462_v5 = vld [vmem:[%s11566_s1 + $0x10] sm:$0xff] }
  0x2f   : > { %323 = vst [vmem:[#allocation3 + $0x20] sm:$0x30] %v11576_v0  ;;  %324 = vst [vmem:[#allocation3 + $0x28] sm:$0x30] %v11576_v0  ;;  %s11808_s20 = smov (!%p289_p2, %s7946_s20), 15  ;;  %v465_v6 = vld [vmem:[%s11566_s1 + $0x28] sm:$0xff]  ;;  %v6553_v8 = vpack.c.bf16 %v462_v5, %v460_v3 }
  0x30   : > { %325 = vst [vmem:[#allocation3 + $0x40] sm:$0xc0] %v11576_v0  ;;  %326 = vst [vmem:[#allocation3 + $0x48] sm:$0xc0] %v11576_v0  ;;  %s6529_s28 = sshll.u32 %s11808_s20, 4  ;;  %v467_v7 = vld [vmem:[%s11566_s1 + $0x38] sm:$0xff]  ;;  %6552 = vmatprep.subr.bf16.mxu0 %v6551_v4 }
  0x31   : > { %327 = vst [vmem:[#allocation3 + $0x50] sm:$0x3] %v11576_v0  ;;  %328 = vst [vmem:[#allocation3 + $0x58] sm:$0x3] %v11576_v0  ;;  %v6555_v9 = vpack.c.bf16 %v467_v7, %v465_v6  ;;  %v464_v10 = vld [vmem:[%s11566_s1 + $0x20] sm:$0xff]  ;;  %v466_v11 = vld [vmem:[%s11566_s1 + $0x30] sm:$0xff]  ;;  %s8054_s23 = scalar_lea.vmem %s11565_s0, %s6529_s28  ;;  %6554 = vmatpush1.bf16.msra.mxu0 %v6553_v8 }
  0x32   : > { %329 = vst [vmem:[#allocation3 + $0x70] sm:$0xc] %v11576_v0  ;;  %330 = vst [vmem:[#allocation3 + $0x78] sm:$0xc] %v11576_v0  ;;  %v469_v12 = vld [vmem:[%s11566_s1 + $0x48] sm:$0xff]  ;;  %v471_v13 = vld [vmem:[%s11566_s1 + $0x58] sm:$0xff]  ;;  %v6557_v14 = vpack.c.bf16 %v466_v11, %v464_v10 }
  0x33   : > { %331 = vst [vmem:[#allocation3 + $0x70] sm:$0x30] %v11576_v0  ;;  %332 = vst [vmem:[#allocation3 + $0x78] sm:$0x30] %v11576_v0  ;;  %vm404_vm1 = vcmask 654336   ;;  %6556 = vmatprep.subr.bf16.mxu0 %v6555_v9  ;;  %v6559_v15 = vpack.c.bf16 %v471_v13, %v469_v12  ;;  %v468_v16 = vld [vmem:[%s11566_s1 + $0x40] sm:$0xff] }
  0x34   : > { %333 = vst [vmem:[#allocation3 + $0x90] sm:$0xc0] %v11576_v0  ;;  %334 = vst [vmem:[#allocation3 + $0x98] sm:$0xc0] %v11576_v0  ;;  %v470_v17 = vld [vmem:[%s11566_s1 + $0x50] sm:$0xff]  ;;  %v473_v18 = vld [vmem:[%s11566_s1 + $0x68] sm:$0xff] }
  0x35   : > { %335 = vst [vmem:[#allocation3 + $0xa0] sm:$0x3] %v11576_v0  ;;  %336 = vst [vmem:[#allocation3 + $0xa8] sm:$0x3] %v11576_v0  ;;  %v475_v19 = vld [vmem:[%s11566_s1 + $0x78] sm:$0xff]  ;;  %v402_v20 = vld [vmem:[%s8054_s23] sm:$0xff]  ;;  %6558 = vmatpush1.bf16.msra.mxu0 %v6557_v14  ;;  %v6561_v21 = vpack.c.bf16 %v470_v17, %v468_v16 }
  0x36   : > { %337 = vst [vmem:[#allocation3 + $0xc0] sm:$0xc] %v11576_v0  ;;  %338 = vst [vmem:[#allocation3 + $0xc8] sm:$0xc] %v11576_v0  ;;  %v403_v22 = vld [vmem:[%s8054_s23 + $0x8] sm:$0xff]  ;;  %v6107_v23 = vld [vmem:[%s8054_s23 + $0x10] sm:$0xff]  ;;  %6560 = vmatprep.subr.bf16.mxu0 %v6559_v15  ;;  %v6563_v24 = vpack.c.bf16 %v475_v19, %v473_v18 }
  0x37   : > { %339 = vst [vmem:[#allocation3 + $0xc0] sm:$0x30] %v11576_v0  ;;  %340 = vst [vmem:[#allocation3 + $0xc8] sm:$0x30] %v11576_v0  ;;  %v472_v25 = vld [vmem:[%s11566_s1 + $0x60] sm:$0xff]  ;;  %v474_v26 = vld [vmem:[%s11566_s1 + $0x70] sm:$0xff] }
  0x38   : > { %341 = vst [vmem:[#allocation3 + $0xe0] sm:$0xc0] %v11576_v0  ;;  %342 = vst [vmem:[#allocation3 + $0xe8] sm:$0xc0] %v11576_v0  ;;  %v6108_v27 = vld [vmem:[%s8054_s23 + $0x18] sm:$0xff]  ;;  %v477_v28 = vld [vmem:[%s11566_s1 + $0x88] sm:$0xff]  ;;  %v6565_v34 = vpack.c.bf16 %v474_v26, %v472_v25 }
  0x39   : > { %343 = vst [vmem:[#allocation3 + $0xf0] sm:$0x3] %v11576_v0  ;;  %344 = vst [vmem:[#allocation3 + $0xf8] sm:$0x3] %v11576_v0  ;;  %v479_v29 = vld [vmem:[%s11566_s1 + $0x98] sm:$0xff]  ;;  %v6109_v30 = vld [vmem:[%s8054_s23 + $0x20] sm:$0xff]  ;;  %6562 = vmatpush1.bf16.msra.mxu0 %v6561_v21 }
  0x3a   : > { %345 = vst [vmem:[#allocation3 + $0x110] sm:$0xc] %v11576_v0  ;;  %346 = vst [vmem:[#allocation3 + $0x118] sm:$0xc] %v11576_v0  ;;  %v6110_v31 = vld [vmem:[%s8054_s23 + $0x28] sm:$0xff]  ;;  %v6111_v32 = vld [vmem:[%s8054_s23 + $0x30] sm:$0xff]  ;;  %6564 = vmatprep.subr.bf16.mxu0 %v6563_v24  ;;  %v6567_v36 = vpack.c.bf16 %v479_v29, %v477_v28 }
  0x3b   : > { %347 = vst [vmem:[#allocation3 + $0x110] sm:$0x30] %v11576_v0  ;;  %348 = vst [vmem:[#allocation3 + $0x118] sm:$0x30] %v11576_v0  ;;  %v6112_v33 = vld [vmem:[%s8054_s23 + $0x38] sm:$0xff]  ;;  %v476_v35 = vld [vmem:[%s11566_s1 + $0x80] sm:$0xff] }
  0x3c   : > { %349 = vst [vmem:[#allocation3 + $0x130] sm:$0xc0] %v11576_v0  ;;  %350 = vst [vmem:[#allocation3 + $0x138] sm:$0xc0] %v11576_v0  ;;  %v478_v37 = vld [vmem:[%s11566_s1 + $0x90] sm:$0xff]  ;;  %v6113_v38 = vld [vmem:[%s8054_s23 + $0x40] sm:$0xff] }
  0x3d   : > { %303 = vst.msk [vmem:[#allocation2] sm:$0x1] %vm302_vm0, %v11576_v0  ;;  %304 = vst.msk [vmem:[#allocation2 + $0x11] sm:$0x1] %vm302_vm0, %v11576_v0  ;;  %v6114_v39 = vld [vmem:[%s8054_s23 + $0x48] sm:$0xff]  ;;  %v6180_v41 = vld [vmem:[%s11566_s1 + $0x158] sm:$0xff]  ;;  %6566 = vmatpush1.bf16.msra.mxu0 %v6565_v34  ;;  %v6569_v43 = vpack.c.bf16 %v478_v37, %v476_v35 }
  0x3e   : > { %305 = vst.msk [vmem:[#allocation2 + $0x12] sm:$0x1] %vm302_vm0, %v11576_v0  ;;  %306 = vst.msk [vmem:[#allocation2 + $0x23] sm:$0x1] %vm302_vm0, %v11576_v0  ;;  %v6178_v40 = vld [vmem:[%s11566_s1 + $0x148] sm:$0xff]  ;;  %v6115_v42 = vld [vmem:[%s8054_s23 + $0x50] sm:$0xff]  ;;  %6568 = vmatprep.subr.bf16.mxu0 %v6567_v36 }
  0x3f   : > { %307 = vst.msk [vmem:[#allocation2 + $0x24] sm:$0x1] %vm302_vm0, %v11576_v0  ;;  %308 = vst.msk [vmem:[#allocation2 + $0x35] sm:$0x1] %vm302_vm0, %v11576_v0  ;;  %v6177_v44 = vld [vmem:[%s11566_s1 + $0x140] sm:$0xff]  ;;  %v6179_v45 = vld [vmem:[%s11566_s1 + $0x150] sm:$0xff]  ;;  %v6571_v47 = vpack.c.bf16 %v6180_v41, %v6178_v40 }
  0x40   : > { %309 = vst.msk [vmem:[#allocation2 + $0x36] sm:$0x1] %vm302_vm0, %v11576_v0  ;;  %310 = vst.msk [vmem:[#allocation2 + $0x47] sm:$0x1] %vm302_vm0, %v11576_v0  ;;  %v6116_v46 = vld [vmem:[%s8054_s23 + $0x58] sm:$0xff]  ;;  %v6182_v48 = vld [vmem:[%s11566_s1 + $0x168] sm:$0xff]  ;;  %v6573_v57 = vpack.c.bf16 %v6179_v45, %v6177_v44 }
  0x41   : > { %311 = vst.msk [vmem:[#allocation2 + $0x48] sm:$0x1] %vm302_vm0, %v11576_v0  ;;  %312 = vst.msk [vmem:[#allocation2 + $0x59] sm:$0x1] %vm302_vm0, %v11576_v0  ;;  %v6122_v49 = vld [vmem:[%s11566_s1 + $0xa8] sm:$0xff]  ;;  %v6124_v50 = vld [vmem:[%s11566_s1 + $0xb8] sm:$0xff]  ;;  %6570 = vmatpush1.bf16.msra.mxu0 %v6569_v43 }
  0x42   : > { %313 = vst.msk [vmem:[#allocation2 + $0x5a] sm:$0x1] %vm302_vm0, %v11576_v0  ;;  %314 = vst.msk [vmem:[#allocation2 + $0x6b] sm:$0x1] %vm302_vm0, %v11576_v0  ;;  %v6184_v51 = vld [vmem:[%s11566_s1 + $0x178] sm:$0xff]  ;;  %v6531_v52 = vpack.c.bf16 %v6124_v50, %v6122_v49  ;;  %v6117_v53 = vld [vmem:[%s8054_s23 + $0x60] sm:$0xff]  ;;  %6572 = vmatprep.subr.bf16.mxu0 %v6571_v47 }
  0x43   : > { %315 = vst.msk [vmem:[#allocation2 + $0x6c] sm:$0x1] %vm302_vm0, %v11576_v0  ;;  %316 = vst.msk [vmem:[#allocation2 + $0x7d] sm:$0x1] %vm302_vm0, %v11576_v0  ;;  %v6121_v54 = vld [vmem:[%s11566_s1 + $0xa0] sm:$0xff]  ;;  %v6123_v58 = vld [vmem:[%s11566_s1 + $0xb0] sm:$0xff]  ;;  %v6575_v60 = vpack.c.bf16 %v6184_v51, %v6182_v48 }
  0x44   : > { %317 = vst.msk [vmem:[#allocation2 + $0x7e] sm:$0x1] %vm302_vm0, %v11576_v0  ;;  %318 = vst.msk [vmem:[#allocation2 + $0x8f] sm:$0x1] %vm302_vm0, %v11576_v0  ;;  %v6181_v55 = vld [vmem:[%s11566_s1 + $0x160] sm:$0xff]  ;;  %6532 = vmatprep.subr.bf16.mxu1 %v6531_v52  ;;  %v6126_v59 = vld [vmem:[%s11566_s1 + $0xc8] sm:$0xff]  ;;  %v6533_v63 = vpack.c.bf16 %v6123_v58, %v6121_v54 }
  0x45   : > { %405 = vst.msk [vmem:[#allocation2 + $0x1] sm:$0xff] %vm404_vm1, %v402_v20  ;;  %406 = vst.msk [vmem:[#allocation2 + $0x9] sm:$0xff] %vm404_vm1, %v403_v22  ;;  %v6183_v61 = vld [vmem:[%s11566_s1 + $0x170] sm:$0xff]  ;;  %v6186_v62 = vld [vmem:[%s11566_s1 + $0x188] sm:$0xff]  ;;  %vm1363_vm2 = vcmask 1041408   ;;  %vm1388_vm3 = vcmask 1043456  }
  0x46   : > { %410 = vst.msk [vmem:[#allocation2 + $0x13] sm:$0xff] %vm404_vm1, %v6107_v23  ;;  %411 = vst.msk [vmem:[#allocation2 + $0x1b] sm:$0xff] %vm404_vm1, %v6108_v27  ;;  %v6128_v1 = vld [vmem:[%s11566_s1 + $0xd8] sm:$0xff]  ;;  %v6118_v4 = vld [vmem:[%s8054_s23 + $0x68] sm:$0xff]  ;;  %6534 = vmatpush1.bf16.msra.mxu1 %v6533_v63  ;;  %v6577_v9 = vpack.c.bf16 %v6183_v61, %v6181_v55  ;;  %vm1739_vm4 = vcmask 1046528   ;;  %vm1415_vm5 = vcmask 1045504  }
  0x47   : > { %415 = vst.msk [vmem:[#allocation2 + $0x25] sm:$0xff] %vm404_vm1, %v6109_v30  ;;  %416 = vst.msk [vmem:[#allocation2 + $0x2d] sm:$0xff] %vm404_vm1, %v6110_v31  ;;  %v6188_v2 = vld [vmem:[%s11566_s1 + $0x198] sm:$0xff]  ;;  %v6535_v3 = vpack.c.bf16 %v6128_v1, %v6126_v59  ;;  %v6125_v5 = vld [vmem:[%s11566_s1 + $0xc0] sm:$0xff]  ;;  %vm2717_vm6 = vcmask 1044480   ;;  %vm3573_vm8 = vcmask 1040384  }
  0x48   : > { %420 = vst.msk [vmem:[#allocation2 + $0x37] sm:$0xff] %vm404_vm1, %v6111_v32  ;;  %421 = vst.msk [vmem:[#allocation2 + $0x3f] sm:$0xff] %vm404_vm1, %v6112_v33  ;;  %v6185_v6 = vld [vmem:[%s11566_s1 + $0x180] sm:$0xff]  ;;  %v6127_v7 = vld [vmem:[%s11566_s1 + $0xd0] sm:$0xff]  ;;  %v6579_v13 = vpack.c.bf16 %v6188_v2, %v6186_v62  ;;  %vm3648_vm9 = vcmask 1042432   ;;  %s6530_s18 = sshll.u32 %s11808_s20, 6 }
  0x49   : > { %425 = vst.msk [vmem:[#allocation2 + $0x49] sm:$0xff] %vm404_vm1, %v6113_v38  ;;  %426 = vst.msk [vmem:[#allocation2 + $0x51] sm:$0xff] %vm404_vm1, %v6114_v39  ;;  %v6187_v10 = vld [vmem:[%s11566_s1 + $0x190] sm:$0xff]  ;;  %v6190_v11 = vld [vmem:[%s11566_s1 + $0x1a8] sm:$0xff]  ;;  %v6537_v12 = vpack.c.bf16 %v6127_v7, %v6125_v5  ;;  %6536 = vmatprep.subr.bf16.mxu1 %v6535_v3  ;;  %s11344_s22 = scalar_lea.vmem %s11572_s7, %s6530_s18 }
  0x4a   : > { %430 = vst.msk [vmem:[#allocation2 + $0x5b] sm:$0xff] %vm404_vm1, %v6115_v42  ;;  %431 = vst.msk [vmem:[#allocation2 + $0x63] sm:$0xff] %vm404_vm1, %v6116_v46  ;;  %v6130_v14 = vld [vmem:[%s11566_s1 + $0xe8] sm:$0xff]  ;;  %v6132_v15 = vld [vmem:[%s11566_s1 + $0xf8] sm:$0xff]  ;;  %v6581_v26 = vpack.c.bf16 %v6187_v10, %v6185_v6 }
  0x4b   : > { %435 = vst.msk [vmem:[#allocation2 + $0x6d] sm:$0xff] %vm404_vm1, %v6117_v53  ;;  %436 = vst.msk [vmem:[#allocation2 + $0x75] sm:$0xff] %vm404_vm1, %v6118_v4  ;;  %v6119_v16 = vld [vmem:[%s8054_s23 + $0x70] sm:$0xff]  ;;  %v6192_v17 = vld [vmem:[%s11566_s1 + $0x1b8] sm:$0xff]  ;;  %v6539_v18 = vpack.c.bf16 %v6132_v15, %v6130_v14  ;;  %6538 = vmatpush1.bf16.msra.mxu1 %v6537_v12 }
  0x4c   : > { %v442_v56 = vld [vmem:[#allocation2] sm:$0xff]  ;;  %v443_v8 = vld [vmem:[#allocation2 + $0x8] sm:$0xff]  ;;  %440 = vst.msk [vmem:[#allocation2 + $0x7f] sm:$0xff] %vm404_vm1, %v6119_v16  ;;  %v6131_v20 = vld [vmem:[%s11566_s1 + $0xf0] sm:$0xff]  ;;  %v6583_v29 = vpack.c.bf16 %v6192_v17, %v6190_v11 }
  0x4d   : > { %6159 = vmatmul.mubr.msk.f32.vlgmr.msra.gmra.mrb[0].mxu0 %vm404_vm1, %v442_v56  ;;  %v6129_v19 = vld [vmem:[%s11566_s1 + $0xe0] sm:$0xff]  ;;  %v6134_v22 = vld [vmem:[%s11566_s1 + $0x108] sm:$0xff]  ;;  %v6136_v23 = vld [vmem:[%s11566_s1 + $0x118] sm:$0xff]  ;;  %6540 = vmatprep.subr.bf16.mxu1 %v6539_v18 }
  0x4e   : > { %6574 = vmatpush1.bf16.msra.mxu0 %v6573_v57  ;;  %870 = vmatprep.mubr.f32.mxu0 %v11576_v0  ;;  %v6541_v21 = vpack.c.bf16 %v6131_v20, %v6129_v19  ;;  %v6120_v24 = vld [vmem:[%s8054_s23 + $0x78] sm:$0xff]  ;;  %v444_v25 = vld [vmem:[#allocation2 + $0x10] sm:$0xff]  ;;  %v6133_v27 = vld [vmem:[%s11566_s1 + $0x100] sm:$0xff]  ;;  %v6543_v33 = vpack.c.bf16 %v6136_v23, %v6134_v22 }
  0x4f   : > { %6576 = vmatprep.subr.bf16.mxu0 %v6575_v60  ;;  %441 = vst.msk [vmem:[#allocation2 + $0x87] sm:$0xff] %vm404_vm1, %v6120_v24  ;;  %v6135_v28 = vld [vmem:[%s11566_s1 + $0x110] sm:$0xff]  ;;  %v6189_v30 = vld [vmem:[%s11566_s1 + $0x1a0] sm:$0xff]  ;;  %v6194_v32 = vld [vmem:[%s11566_s1 + $0x1c8] sm:$0xff] }
  0x50   : > { %v6191_v31 = vld [vmem:[%s11566_s1 + $0x1b0] sm:$0xff]  ;;  %v6196_v34 = vld [vmem:[%s11566_s1 + $0x1d8] sm:$0xff]  ;;  %v6138_v35 = vld [vmem:[%s11566_s1 + $0x128] sm:$0xff]  ;;  %6542 = vmatpush1.bf16.msra.mxu1 %v6541_v21  ;;  %v6545_v37 = vpack.c.bf16 %v6135_v28, %v6133_v27 }
  0x51   : > { %6160 = vmatmul.mubr.msk.f32.gmra.mrb[2].mxu0 %vm404_vm1, %v443_v8  ;;  %v6140_v36 = vld [vmem:[%s11566_s1 + $0x138] sm:$0xff]  ;;  %v6585_v39 = vpack.c.bf16 %v6191_v31, %v6189_v30  ;;  %v6137_v40 = vld [vmem:[%s11566_s1 + $0x120] sm:$0xff]  ;;  %v6139_v41 = vld [vmem:[%s11566_s1 + $0x130] sm:$0xff]  ;;  %v6587_v42 = vpack.c.bf16 %v6196_v34, %v6194_v32  ;;  %6544 = vmatprep.subr.bf16.mxu1 %v6543_v33 }
  0x52   : > { %876 = vmatprep.mubr.f32.mxu0 %v11576_v0  ;;  %6578 = vmatpush1.bf16.msra.mxu0 %v6577_v9  ;;  %v445_v38 = vld [vmem:[#allocation2 + $0x18] sm:$0xff]  ;;  %v6193_v43 = vld [vmem:[%s11566_s1 + $0x1c0] sm:$0xff]  ;;  %v6195_v44 = vld [vmem:[%s11566_s1 + $0x1d0] sm:$0xff]  ;;  %v6547_v45 = vpack.c.bf16 %v6140_v36, %v6138_v35  ;;  %v6549_v46 = vpack.c.bf16 %v6139_v41, %v6137_v40 }
  0x53   : > { %6580 = vmatprep.subr.bf16.mxu0 %v6579_v13  ;;  %v446_v47 = vld [vmem:[#allocation2 + $0x20] sm:$0xff]  ;;  %v6589_v48 = vpack.c.bf16 %v6195_v44, %v6193_v43  ;;  %v447_v50 = vld [vmem:[#allocation2 + $0x28] sm:$0xff]  ;;  %v448_v51 = vld [vmem:[#allocation2 + $0x30] sm:$0xff] }
  0x54   : > { %6546 = vmatpush1.bf16.msra.mxu1 %v6545_v37  ;;  %v480_v49 = vld [vmem:[#allocation2 + $0x1] sm:$0xff]  ;;  %v481_v52 = vld [vmem:[#allocation2 + $0x9] sm:$0xff]  ;;  %v1636_v53 = vld [vmem:[#allocation5 + $0x208] sm:$0xff] }
  0x55   : > { %6161 = vmatmul.mubr.msk.f32.gmra.mrb[4].mxu0 %vm404_vm1, %v444_v25  ;;  %6548 = vmatprep.subr.bf16.mxu1 %v6547_v45  ;;  %v1638_v54 = vld [vmem:[#allocation5 + $0x218] sm:$0xff]  ;;  %v1635_v56 = vld [vmem:[#allocation5 + $0x200] sm:$0xff]  ;;  %v1637_v57 = vld [vmem:[#allocation5 + $0x210] sm:$0xff] }
  0x56   : > { %882 = vmatprep.mubr.f32.mxu0 %v11576_v0  ;;  %6582 = vmatpush1.bf16.msra.mxu0 %v6581_v26  ;;  %v6591_v55 = vpack.c.bf16 %v1638_v54, %v1636_v53  ;;  %v1640_v58 = vld [vmem:[#allocation5 + $0x228] sm:$0xff]  ;;  %v6593_v59 = vpack.c.bf16 %v1637_v57, %v1635_v56  ;;  %v1642_v60 = vld [vmem:[#allocation5 + $0x238] sm:$0xff]  ;;  %v1639_v61 = vld [vmem:[#allocation5 + $0x220] sm:$0xff] }
  0x57   : > { %6584 = vmatprep.subr.bf16.mxu0 %v6583_v29  ;;  %v1641_v62 = vld [vmem:[#allocation5 + $0x230] sm:$0xff]  ;;  %v6595_v63 = vpack.c.bf16 %v1642_v60, %v1640_v58  ;;  %v1644_v1 = vld [vmem:[#allocation5 + $0x248] sm:$0xff]  ;;  %v1646_v2 = vld [vmem:[#allocation5 + $0x258] sm:$0xff] }
  0x58   : > { %6550 = vmatpush1.bf16.msra.mxu1 %v6549_v46  ;;  %v482_v3 = vld [vmem:[#allocation2 + $0x11] sm:$0xff]  ;;  %v6597_v5 = vpack.c.bf16 %v1641_v62, %v1639_v61  ;;  %v6599_v6 = vpack.c.bf16 %v1646_v2, %v1644_v1  ;;  %v1645_v8 = vld [vmem:[#allocation5 + $0x250] sm:$0xff]  ;;  %v1650_v10 = vld [vmem:[#allocation5 + $0x278] sm:$0xff] }
  0x59   : > { %6162 = vmatmul.mubr.msk.f32.gmra.mrb[6].mxu0 %vm404_vm1, %v445_v38  ;;  %6592 = vmatprep.subr.bf16.mxu1 %v6591_v55  ;;  %v449_v4 = vld [vmem:[#allocation2 + $0x38] sm:$0xff]  ;;  %v1643_v7 = vld [vmem:[#allocation5 + $0x240] sm:$0xff]  ;;  %v450_v12 = vld [vmem:[#allocation2 + $0x40] sm:$0xff] }
  0x5a   : > { %888 = vmatprep.mubr.f32.mxu0 %v11576_v0  ;;  %6586 = vmatpush1.bf16.msra.mxu0 %v6585_v39  ;;  %v1648_v9 = vld [vmem:[#allocation5 + $0x268] sm:$0xff]  ;;  %v6601_v13 = vpack.c.bf16 %v1645_v8, %v1643_v7  ;;  %v1647_v15 = vld [vmem:[#allocation5 + $0x260] sm:$0xff]  ;;  %v1649_v16 = vld [vmem:[#allocation5 + $0x270] sm:$0xff] }
  0x5b   : > { %6588 = vmatprep.subr.bf16.mxu0 %v6587_v42  ;;  %6141 = vmatmul.mubr.msk.f32.vlgmr.msra.gmra.mrb[0].mxu1 %vm404_vm1, %v480_v49  ;;  %v483_v11 = vld [vmem:[#allocation2 + $0x19] sm:$0xff]  ;;  %v6603_v14 = vpack.c.bf16 %v1650_v10, %v1648_v9  ;;  %v1654_v18 = vld [vmem:[#allocation5 + $0x298] sm:$0xff]  ;;  %v6605_v21 = vpack.c.bf16 %v1649_v16, %v1647_v15  ;;  %v1651_v23 = vld [vmem:[#allocation5 + $0x280] sm:$0xff] }
  0x5c   : > { %643 = vmatprep.mubr.f32.mxu1 %v11576_v0  ;;  %6594 = vmatpush1.bf16.msra.mxu1 %v6593_v59  ;;  %v1652_v17 = vld [vmem:[#allocation5 + $0x288] sm:$0xff]  ;;  %v484_v19 = vld [vmem:[#allocation2 + $0x21] sm:$0xff]  ;;  %v485_v27 = vld [vmem:[#allocation2 + $0x29] sm:$0xff] }
  0x5d   : > { %6163 = vmatmul.mubr.msk.f32.gmra.mrb[8].mxu0 %vm404_vm1, %v446_v47  ;;  %6596 = vmatprep.subr.bf16.mxu1 %v6595_v63  ;;  %v451_v20 = vld [vmem:[#allocation2 + $0x48] sm:$0xff]  ;;  %v6607_v22 = vpack.c.bf16 %v1654_v18, %v1652_v17  ;;  %v1653_v24 = vld [vmem:[#allocation5 + $0x290] sm:$0xff]  ;;  %v1656_v25 = vld [vmem:[#allocation5 + $0x2a8] sm:$0xff] }
  0x5e   : > { %894 = vmatprep.mubr.f32.mxu0 %v11576_v0  ;;  %6590 = vmatpush1.bf16.msra.mxu0 %v6589_v48  ;;  %v1658_v26 = vld [vmem:[#allocation5 + $0x2b8] sm:$0xff]  ;;  %v452_v28 = vld [vmem:[#allocation2 + $0x50] sm:$0xff]  ;;  %v6609_v29 = vpack.c.bf16 %v1653_v24, %v1651_v23  ;;  %v1657_v32 = vld [vmem:[#allocation5 + $0x2b0] sm:$0xff] }
  0x5f   : > { %6142 = vmatmul.mubr.msk.f32.gmra.mrb[2].mxu1 %vm404_vm1, %v481_v52  ;;  %v6611_v30 = vpack.c.bf16 %v1658_v26, %v1656_v25  ;;  %v1655_v31 = vld [vmem:[#allocation5 + $0x2a0] sm:$0xff]  ;;  %v1660_v33 = vld [vmem:[#allocation5 + $0x2c8] sm:$0xff]  ;;  %v1662_v34 = vld [vmem:[#allocation5 + $0x2d8] sm:$0xff] }
  0x60   : > { %649 = vmatprep.mubr.f32.mxu1 %v11576_v0  ;;  %6598 = vmatpush1.bf16.msra.mxu1 %v6597_v5  ;;  %v486_v35 = vld [vmem:[#allocation2 + $0x31] sm:$0xff]  ;;  %v6613_v37 = vpack.c.bf16 %v1657_v32, %v1655_v31  ;;  %v6615_v38 = vpack.c.bf16 %v1662_v34, %v1660_v33  ;;  %v1661_v40 = vld [vmem:[#allocation5 + $0x2d0] sm:$0xff]  ;;  %v1666_v42 = vld [vmem:[#allocation5 + $0x2f8] sm:$0xff] }
  0x61   : > { %6164 = vmatmul.mubr.msk.f32.gmra.mrb[10].mxu0 %vm404_vm1, %v447_v50  ;;  %6600 = vmatprep.subr.bf16.mxu1 %v6599_v6  ;;  %v453_v36 = vld [vmem:[#allocation2 + $0x58] sm:$0xff]  ;;  %v1659_v39 = vld [vmem:[#allocation5 + $0x2c0] sm:$0xff]  ;;  %v454_v44 = vld [vmem:[#allocation2 + $0x60] sm:$0xff] }
  0x62   : > { %900 = vmatprep.mubr.f32.mxu0 %v11576_v0  ;;  %v1664_v41 = vld [vmem:[#allocation5 + $0x2e8] sm:$0xff]  ;;  %v6617_v45 = vpack.c.bf16 %v1661_v40, %v1659_v39  ;;  %v1663_v47 = vld [vmem:[#allocation5 + $0x2e0] sm:$0xff]  ;;  %v1665_v48 = vld [vmem:[#allocation5 + $0x2f0] sm:$0xff] }
  0x63   : > { %6143 = vmatmul.mubr.msk.f32.gmra.mrb[4].mxu1 %vm404_vm1, %v482_v3  ;;  %v487_v43 = vld [vmem:[#allocation2 + $0x39] sm:$0xff]  ;;  %v6619_v46 = vpack.c.bf16 %v1666_v42, %v1664_v41  ;;  %v1670_v50 = vld [vmem:[#allocation5 + $0x318] sm:$0xff]  ;;  %v6621_v53 = vpack.c.bf16 %v1665_v48, %v1663_v47  ;;  %v1667_v55 = vld [vmem:[#allocation5 + $0x300] sm:$0xff] }
  0x64   : > { %655 = vmatprep.mubr.f32.mxu1 %v11576_v0  ;;  %6602 = vmatpush1.bf16.msra.mxu1 %v6601_v13  ;;  %v1668_v49 = vld [vmem:[#allocation5 + $0x308] sm:$0xff]  ;;  %v455_v52 = vld [vmem:[#allocation2 + $0x68] sm:$0xff]  ;;  %v1669_v56 = vld [vmem:[#allocation5 + $0x310] sm:$0xff] }
  0x65   : > { %6165 = vmatmul.mubr.msk.f32.gmra.mrb[12].mxu0 %vm404_vm1, %v448_v51  ;;  %6604 = vmatprep.subr.bf16.mxu1 %v6603_v14  ;;  %v488_v51 = vld [vmem:[#allocation2 + $0x41] sm:$0xff]  ;;  %v6623_v54 = vpack.c.bf16 %v1670_v50, %v1668_v49  ;;  %v1672_v57 = vld [vmem:[#allocation5 + $0x328] sm:$0xff]  ;;  %v489_v59 = vld [vmem:[#allocation2 + $0x49] sm:$0xff]  ;;  %v6625_v61 = vpack.c.bf16 %v1669_v56, %v1667_v55 }
  0x66   : > { %906 = vmatprep.mubr.f32.mxu0 %v11576_v0  ;;  %v1674_v58 = vld [vmem:[#allocation5 + $0x338] sm:$0xff]  ;;  %v456_v60 = vld [vmem:[#allocation2 + $0x70] sm:$0xff]  ;;  %v1673_v1 = vld [vmem:[#allocation5 + $0x330] sm:$0xff] }
  0x67   : > { %6144 = vmatmul.mubr.msk.f32.gmra.mrb[6].mxu1 %vm404_vm1, %v483_v11  ;;  %v6627_v62 = vpack.c.bf16 %v1674_v58, %v1672_v57  ;;  %v1671_v63 = vld [vmem:[#allocation5 + $0x320] sm:$0xff]  ;;  %v457_v3 = vld [vmem:[#allocation2 + $0x78] sm:$0xff]  ;;  %v458_v6 = vld [vmem:[#allocation2 + $0x80] sm:$0xff] }
  0x68   : > { %661 = vmatprep.mubr.f32.mxu1 %v11576_v0  ;;  %6606 = vmatpush1.bf16.msra.mxu1 %v6605_v21  ;;  %v490_v2 = vld [vmem:[#allocation2 + $0x51] sm:$0xff]  ;;  %v491_v5 = vld [vmem:[#allocation2 + $0x59] sm:$0xff]  ;;  %v492_v7 = vld [vmem:[#allocation2 + $0x61] sm:$0xff] }
  0x69   : > { %6166 = vmatmul.mubr.msk.f32.gmra.mrb[14].mxu0 %vm404_vm1, %v449_v4  ;;  %6608 = vmatprep.subr.bf16.mxu1 %v6607_v22  ;;  %v6629_v4 = vpack.c.bf16 %v1673_v1, %v1671_v63  ;;  %v459_v8 = vld [vmem:[#allocation2 + $0x88] sm:$0x3f]  ;;  %v494_v11 = vld [vmem:[#allocation2 + $0x71] sm:$0xff]  ;;  %v495_v13 = vld [vmem:[#allocation2 + $0x79] sm:$0xff] }
  0x6a   : > { %912 = vmatprep.mubr.f32.mxu0 %v11576_v0  ;;  %v493_v9 = vld [vmem:[#allocation2 + $0x69] sm:$0xff]  ;;  %v975_v14 = vld [vmem:[#allocation2 + $0x12] sm:$0xff]  ;;  %v496_v15 = vld [vmem:[#allocation2 + $0x81] sm:$0xff] }
  0x6b   : > { %6145 = vmatmul.mubr.msk.f32.gmra.mrb[8].mxu1 %vm404_vm1, %v484_v19  ;;  %v973_v10 = vld [vmem:[#allocation2 + $0x2] sm:$0xff]  ;;  %v976_v16 = vld [vmem:[#allocation2 + $0x1a] sm:$0xff]  ;;  %v978_v19 = vld [vmem:[#allocation2 + $0x2a] sm:$0xff] }
  0x6c   : > { %667 = vmatprep.mubr.f32.mxu1 %v11576_v0  ;;  %6610 = vmatpush1.bf16.msra.mxu1 %v6609_v29  ;;  %v497_v17 = vld [vmem:[#allocation2 + $0x89] sm:$0x3f]  ;;  %v980_v21 = vld [vmem:[#allocation2 + $0x3a] sm:$0xff]  ;;  %v983_v24 = vld [vmem:[#allocation2 + $0x52] sm:$0xff] }
  0x6d   : > { %6167 = vmatmul.mubr.msk.f32.gmra.mrb[16].mxu0 %vm404_vm1, %v450_v12  ;;  %6612 = vmatprep.subr.bf16.mxu1 %v6611_v30  ;;  %v974_v12 = vld [vmem:[#allocation2 + $0xa] sm:$0xff]  ;;  %v977_v18 = vld [vmem:[#allocation2 + $0x22] sm:$0xff]  ;;  %v984_v25 = vld [vmem:[#allocation2 + $0x5a] sm:$0xff] }
  0x6e   : > { %918 = vmatprep.mubr.f32.mxu0 %v11576_v0  ;;  %v981_v22 = vld [vmem:[#allocation2 + $0x42] sm:$0xff]  ;;  %v982_v23 = vld [vmem:[#allocation2 + $0x4a] sm:$0xff]  ;;  %v988_v29 = vld [vmem:[#allocation2 + $0x7a] sm:$0xff] }
  0x6f   : > { %6146 = vmatmul.mubr.msk.f32.gmra.mrb[10].mxu1 %vm404_vm1, %v485_v27  ;;  %v985_v26 = vld [vmem:[#allocation2 + $0x62] sm:$0xff]  ;;  %v986_v27 = vld [vmem:[#allocation2 + $0x6a] sm:$0xff]  ;;  %v1676_v32 = vld [vmem:[#allocation5 + $0x348] sm:$0xff] }
  0x70   : > { %673 = vmatprep.mubr.f32.mxu1 %v11576_v0  ;;  %6614 = vmatpush1.bf16.msra.mxu1 %v6613_v37  ;;  %v989_v30 = vld [vmem:[#allocation2 + $0x82] sm:$0xff]  ;;  %v990_v31 = vld [vmem:[#allocation2 + $0x8a] sm:$0x3f]  ;;  %v1679_v41 = vld [vmem:[#allocation5 + $0x360] sm:$0xff] }
  0x71   : > { %6168 = vmatmul.mubr.msk.f32.gmra.mrb[18].mxu0 %vm404_vm1, %v451_v20  ;;  %6616 = vmatprep.subr.bf16.mxu1 %v6615_v38  ;;  %v979_v20 = vld [vmem:[#allocation2 + $0x32] sm:$0xff]  ;;  %v1678_v33 = vld [vmem:[#allocation5 + $0x358] sm:$0xff]  ;;  %v1681_v42 = vld [vmem:[#allocation5 + $0x370] sm:$0xff] }
  0x72   : > { %924 = vmatprep.mubr.f32.mxu0 %v11576_v0  ;;  %v6631_v34 = vpack.c.bf16 %v1678_v33, %v1676_v32  ;;  %v1680_v38 = vld [vmem:[#allocation5 + $0x368] sm:$0xff]  ;;  %v1682_v39 = vld [vmem:[#allocation5 + $0x378] sm:$0xff]  ;;  %v1683_v47 = vld [vmem:[#allocation5 + $0x380] sm:$0xff] }
  0x73   : > { %6147 = vmatmul.mubr.msk.f32.gmra.mrb[12].mxu1 %vm404_vm1, %v486_v35  ;;  %v1675_v35 = vld [vmem:[#allocation5 + $0x340] sm:$0xff]  ;;  %v6635_v40 = vpack.c.bf16 %v1682_v39, %v1680_v38  ;;  %v1685_v48 = vld [vmem:[#allocation5 + $0x390] sm:$0xff]  ;;  %v1688_v50 = vld [vmem:[#allocation5 + $0x3a8] sm:$0xff] }
  0x74   : > { %679 = vmatprep.mubr.f32.mxu1 %v11576_v0  ;;  %6618 = vmatpush1.bf16.msra.mxu1 %v6617_v45  ;;  %v1686_v45 = vld [vmem:[#allocation5 + $0x398] sm:$0xff]  ;;  %v6641_v49 = vpack.c.bf16 %v1685_v48, %v1683_v47  ;;  %v1692_v56 = vld [vmem:[#allocation5 + $0x3c8] sm:$0xff] }
  0x75   : > { %6169 = vmatmul.mubr.msk.f32.gmra.mrb[20].mxu0 %vm404_vm1, %v452_v28  ;;  %6620 = vmatprep.subr.bf16.mxu1 %v6619_v46  ;;  %v987_v28 = vld [vmem:[#allocation2 + $0x72] sm:$0xff]  ;;  %v1694_v57 = vld [vmem:[#allocation5 + $0x3d8] sm:$0xff] }
  0x76   : > { %930 = vmatprep.mubr.f32.mxu0 %v11576_v0  ;;  %v6647_v58 = vpack.c.bf16 %v1694_v57, %v1692_v56  ;;  %v1698_v63 = vld [vmem:[#allocation5 + $0x3f8] sm:$0xff] }
  0x77   : > { %6148 = vmatmul.mubr.msk.f32.gmra.mrb[14].mxu1 %vm404_vm1, %v487_v43  ;;  %v6637_v43 = vpack.c.bf16 %v1681_v42, %v1679_v41 }
  0x78   : > { %685 = vmatprep.mubr.f32.mxu1 %v11576_v0  ;;  %6622 = vmatpush1.bf16.msra.mxu1 %v6621_v53  ;;  %v1687_v53 = vld [vmem:[#allocation5 + $0x3a0] sm:$0xff] }
  0x79   : > { %6170 = vmatmul.mubr.msk.f32.gmra.mrb[22].mxu0 %vm404_vm1, %v453_v36  ;;  %6624 = vmatprep.subr.bf16.mxu1 %v6623_v54  ;;  %v1677_v36 = vld [vmem:[#allocation5 + $0x350] sm:$0xff] }
  0x7a   : > { %936 = vmatprep.mubr.f32.mxu0 %v11576_v0  ;;  %v6633_v37 = vpack.c.bf16 %v1677_v36, %v1675_v35  ;;  %v1689_v54 = vld [vmem:[#allocation5 + $0x3b0] sm:$0xff] }
  0x7b   : > { %6149 = vmatmul.mubr.msk.f32.gmra.mrb[16].mxu1 %vm404_vm1, %v488_v51  ;;  %v1690_v51 = vld [vmem:[#allocation5 + $0x3b8] sm:$0xff]  ;;  %v6645_v55 = vpack.c.bf16 %v1689_v54, %v1687_v53  ;;  %v1275_v36 = vld [vmem:[%s11567_s2] sm:$0x3] }
  0x7c   : > { %691 = vmatprep.mubr.f32.mxu1 %v11576_v0  ;;  %6626 = vmatpush1.bf16.msra.mxu1 %v6625_v61 }
  0x7d   : > { %6171 = vmatmul.mubr.msk.f32.gmra.mrb[24].mxu0 %vm404_vm1, %v454_v44  ;;  %6628 = vmatprep.subr.bf16.mxu1 %v6627_v62  ;;  %v1684_v44 = vld [vmem:[#allocation5 + $0x388] sm:$0xff] }
  0x7e   : > { %942 = vmatprep.mubr.f32.mxu0 %v11576_v0  ;;  %v6639_v46 = vpack.c.bf16 %v1686_v45, %v1684_v44  ;;  %v1696_v62 = vld [vmem:[#allocation5 + $0x3e8] sm:$0xff] }
  0x7f   : > { %6150 = vmatmul.mubr.msk.f32.gmra.mrb[18].mxu1 %vm404_vm1, %v489_v59  ;;  %v1691_v59 = vld [vmem:[#allocation5 + $0x3c0] sm:$0xff]  ;;  %v6651_v1 = vpack.c.bf16 %v1698_v63, %v1696_v62 }
  0x80   : > { %697 = vmatprep.mubr.f32.mxu1 %v11576_v0  ;;  %6630 = vmatpush1.bf16.msra.mxu1 %v6629_v4 }
  0x81   : > { %6172 = vmatmul.mubr.msk.f32.gmra.mrb[26].mxu0 %vm404_vm1, %v455_v52  ;;  %6632 = vmatprep.subr.bf16.mxu1 %v6631_v34  ;;  %v6643_v52 = vpack.c.bf16 %v1690_v51, %v1688_v50 }
  0x82   : > { %948 = vmatprep.mubr.f32.mxu0 %v11576_v0 }
  0x83   : > { %6151 = vmatmul.mubr.msk.f32.gmra.mrb[20].mxu1 %vm404_vm1, %v490_v2  ;;  %v1695_v2 = vld [vmem:[#allocation5 + $0x3e0] sm:$0xff] }
  0x84   : > { %703 = vmatprep.mubr.f32.mxu1 %v11576_v0  ;;  %6634 = vmatpush1.bf16.msra.mxu1 %v6633_v37 }
  0x85   : > { %6173 = vmatmul.mubr.msk.f32.gmra.mrb[28].mxu0 %vm404_vm1, %v456_v60  ;;  %6636 = vmatprep.subr.bf16.mxu1 %v6635_v40  ;;  %v1693_v60 = vld [vmem:[#allocation5 + $0x3d0] sm:$0xff] }
  0x86   : > { %954 = vmatprep.mubr.f32.mxu0 %v11576_v0  ;;  %v6649_v61 = vpack.c.bf16 %v1693_v60, %v1691_v59 }
  0x87   : > { %6152 = vmatmul.mubr.msk.f32.gmra.mrb[22].mxu1 %vm404_vm1, %v491_v5  ;;  %v1567_v5 = vld [vmem:[#allocation5 + $0x8] sm:$0xff] }
  0x88   : > { %709 = vmatprep.mubr.f32.mxu1 %v11576_v0  ;;  %6638 = vmatpush1.bf16.msra.mxu1 %v6637_v43 }
  0x89   : > { %6174 = vmatmul.mubr.msk.f32.gmra.mrb[30].mxu0 %vm404_vm1, %v457_v3  ;;  %6640 = vmatprep.subr.bf16.mxu1 %v6639_v46  ;;  %v1697_v3 = vld [vmem:[#allocation5 + $0x3f0] sm:$0xff] }
  0x8a   : > { %960 = vmatprep.mubr.f32.mxu0 %v11576_v0  ;;  %v6653_v4 = vpack.c.bf16 %v1697_v3, %v1695_v2 }
  0x8b   : > { %6153 = vmatmul.mubr.msk.f32.gmra.mrb[24].mxu1 %vm404_vm1, %v492_v7 }
  0x8c   : > { %715 = vmatprep.mubr.f32.mxu1 %v11576_v0  ;;  %6642 = vmatpush1.bf16.msra.mxu1 %v6641_v49 }
  0x8d   : > { %6175 = vmatmul.mubr.msk.f32.gmra.mrb[32].mxu0 %vm404_vm1, %v458_v6  ;;  %6644 = vmatprep.subr.bf16.mxu1 %v6643_v52  ;;  %v1569_v6 = vld [vmem:[#allocation5 + $0x18] sm:$0xff] }
  0x8e   : > { %966 = vmatprep.mubr.f32.mxu0 %v11576_v0  ;;  %v6655_v7 = vpack.c.bf16 %v1569_v6, %v1567_v5 }
  0x8f   : > { %6154 = vmatmul.mubr.msk.f32.gmra.mrb[26].mxu1 %vm404_vm1, %v493_v9 }
  0x90   : > { %721 = vmatprep.mubr.f32.mxu1 %v11576_v0  ;;  %6646 = vmatpush1.bf16.msra.mxu1 %v6645_v55 }
  0x91   : > { %6176 = vmatmul.mubr.msk.f32.gmra.mrb[34].mxu0 %vm404_vm1, %v459_v8  ;;  %6648 = vmatprep.subr.bf16.mxu1 %v6647_v58 }
  0x92   : > { %1130 = vmatprep.mubr.f32.mxu0 %v11576_v0 }
  0x93   : > { %6155 = vmatmul.mubr.msk.f32.gmra.mrb[28].mxu1 %vm404_vm1, %v494_v11 }
  0x94   : > { %727 = vmatprep.mubr.f32.mxu1 %v11576_v0  ;;  %6650 = vmatpush1.bf16.msra.mxu1 %v6649_v61 }
  0x95   : > { %6197 = vmatmul.mubr.msk.f32.vlgmr.msra.gmra.mrb[0].mxu0 %vm404_vm1, %v973_v10  ;;  %6652 = vmatprep.subr.bf16.mxu1 %v6651_v1 }
  0x96   : > { %1136 = vmatprep.mubr.f32.mxu0 %v11576_v0 }
  0x97   : > { %6156 = vmatmul.mubr.msk.f32.gmra.mrb[30].mxu1 %vm404_vm1, %v495_v13 }
  0x98   : > { %733 = vmatprep.mubr.f32.mxu1 %v11576_v0  ;;  %6654 = vmatpush1.bf16.msra.mxu1 %v6653_v4 }
  0x99   : > { %6198 = vmatmul.mubr.msk.f32.gmra.mrb[2].mxu0 %vm404_vm1, %v974_v12  ;;  %6656 = vmatprep.subr.bf16.mxu1 %v6655_v7 }
  0x9a   : > { %1142 = vmatprep.mubr.f32.mxu0 %v11576_v0 }
  0x9b   : > { %6157 = vmatmul.mubr.msk.f32.gmra.mrb[32].mxu1 %vm404_vm1, %v496_v15 }
  0x9c   : > { %739 = vmatprep.mubr.f32.mxu1 %v11576_v0 }
  0x9d   : > { %6199 = vmatmul.mubr.msk.f32.gmra.mrb[4].mxu0 %vm404_vm1, %v975_v14 }
  0x9e   : > { %1148 = vmatprep.mubr.f32.mxu0 %v11576_v0 }
  0x9f   : > { %6158 = vmatmul.mubr.msk.f32.gmra.mrb[34].mxu1 %vm404_vm1, %v497_v17 }
  0xa1   : > { %6200 = vmatmul.mubr.msk.f32.gmra.mrb[6].mxu0 %vm404_vm1, %v976_v16 }
  0xa2   : > { %1154 = vmatprep.mubr.f32.mxu0 %v11576_v0 }
  0xa5   : > { %6201 = vmatmul.mubr.msk.f32.gmra.mrb[8].mxu0 %vm404_vm1, %v977_v18 }
  0xa6   : > { %1160 = vmatprep.mubr.f32.mxu0 %v11576_v0 }
  0xa9   : > { %6202 = vmatmul.mubr.msk.f32.gmra.mrb[10].mxu0 %vm404_vm1, %v978_v19 }
  0xaa   : > { %1166 = vmatprep.mubr.f32.mxu0 %v11576_v0 }
  0xad   : > { %6203 = vmatmul.mubr.msk.f32.gmra.mrb[12].mxu0 %vm404_vm1, %v979_v20 }
  0xae   : > { %1172 = vmatprep.mubr.f32.mxu0 %v11576_v0 }
  0xb1   : > { %6204 = vmatmul.mubr.msk.f32.gmra.mrb[14].mxu0 %vm404_vm1, %v980_v21 }
  0xb2   : > { %1178 = vmatprep.mubr.f32.mxu0 %v11576_v0 }
  0xb5   : > { %6205 = vmatmul.mubr.msk.f32.gmra.mrb[16].mxu0 %vm404_vm1, %v981_v22 }
  0xb6   : > { %1184 = vmatprep.mubr.f32.mxu0 %v11576_v0 }
  0xb9   : > { %6206 = vmatmul.mubr.msk.f32.gmra.mrb[18].mxu0 %vm404_vm1, %v982_v23 }
  0xba   : > { %1190 = vmatprep.mubr.f32.mxu0 %v11576_v0 }
  0xbd   : > { %6207 = vmatmul.mubr.msk.f32.gmra.mrb[20].mxu0 %vm404_vm1, %v983_v24 }
  0xbe   : > { %1196 = vmatprep.mubr.f32.mxu0 %v11576_v0 }
  0xc1   : > { %6208 = vmatmul.mubr.msk.f32.gmra.mrb[22].mxu0 %vm404_vm1, %v984_v25 }
  0xc2   : > { %1202 = vmatprep.mubr.f32.mxu0 %v11576_v0 }
  0xc5   : > { %6209 = vmatmul.mubr.msk.f32.gmra.mrb[24].mxu0 %vm404_vm1, %v985_v26 }
  0xc6   : > { %1208 = vmatprep.mubr.f32.mxu0 %v11576_v0 }
  0xc9   : > { %6210 = vmatmul.mubr.msk.f32.gmra.mrb[26].mxu0 %vm404_vm1, %v986_v27 }
  0xca   : > { %1214 = vmatprep.mubr.f32.mxu0 %v11576_v0 }
  0xcd   : > { %6211 = vmatmul.mubr.msk.f32.gmra.mrb[28].mxu0 %vm404_vm1, %v987_v28  ;;  %v11578_v28 = vlaneseq }
  0xce   : > { %1220 = vmatprep.mubr.f32.mxu0 %v11576_v0 }
  0xd1   : > { %6212 = vmatmul.mubr.msk.f32.gmra.mrb[30].mxu0 %vm404_vm1, %v988_v29 }
  0xd2   : > { %1226 = vmatprep.mubr.f32.mxu0 %v11576_v0 }
  0xd5   : > { %6213 = vmatmul.mubr.msk.f32.gmra.mrb[32].mxu0 %vm404_vm1, %v989_v30 }
  0xd6   : > { %1232 = vmatprep.mubr.f32.mxu0 %v11576_v0 }
  0xd9   : > { %6214 = vmatmul.mubr.msk.f32.gmra.mrb[34].mxu0 %vm404_vm1, %v990_v31  ;;  %v8377_v31 = vshrl.u32 %v11578_v28, 7 }
  0xdb   : > { %11653 = vst [vmem:[#allocation8_spill] sm:$0xff] %v8377_v31  ;;  %v8384_v34 = vsub.s32 0, %v8377_v31  ;;  %v8392_v37 = vsub.s32 1, %v8377_v31 }
  0xdd   : > { %11654 = vst [vmem:[#allocation9_spill] sm:$0xff] %v8384_v34  ;;  %11655 = vst [vmem:[#allocation10_spill] sm:$0xff] %v8392_v37  ;;  %v8397_v39 = vrot.slane %v1275_v36, %v8384_v34  ;;  %v8402_v42 = vrot.slane %v1275_v36, %v8392_v37 }
 0x12e   : > { %v639_v8 = vpop.f32.mrb[0].mxu1 }
 0x12f   : > { %v641_v9 = vpop.f32.mrb[1].mxu1 }
 0x132   : > { %v645_v10 = vpop.f32.mrb[2].mxu1 }
 0x133   : > { %v647_v11 = vpop.f32.mrb[3].mxu1 }
 0x136   : > { %v651_v12 = vpop.f32.mrb[4].mxu1 }
 0x137   : > { %v653_v13 = vpop.f32.mrb[5].mxu1 }
 0x13a   : > { %v8344_v14 = vpop.f32.mrb[6].mxu1 }
 0x13b   : > { %v8346_v15 = vpop.f32.mrb[7].mxu1 }
 0x13e   : > { %v8348_v16 = vpop.f32.mrb[8].mxu1 }
 0x13f   : > { %v8350_v17 = vpop.f32.mrb[9].mxu1 }
 0x142   : > { %v8352_v18 = vpop.f32.mrb[10].mxu1 }
 0x143   : > { %v8354_v19 = vpop.f32.mrb[11].mxu1 }
 0x146   : > { %v8356_v20 = vpop.f32.mrb[12].mxu1 }
 0x147   : > { %v8358_v21 = vpop.f32.mrb[13].mxu1 }
 0x14a   : > { %v8360_v22 = vpop.f32.mrb[14].mxu1 }
 0x14b   : > { %v8362_v23 = vpop.f32.mrb[15].mxu1 }
 0x14e   : > { %v8364_v24 = vpop.f32.mrb[16].mxu1 }
 0x14f   : > { %v8366_v25 = vpop.f32.mrb[17].mxu1 }
 0x152   : > { %v8368_v26 = vpop.f32.mrb[18].mxu1 }
 0x153   : > { %v8370_v27 = vpop.f32.mrb[19].mxu1 }
 0x156   : > { %v8372_v29 = vpop.f32.mrb[20].mxu1 }
 0x157   : > { %v8374_v30 = vpop.f32.mrb[21].mxu1 }
 0x15a   : > { %v8379_v32 = vpop.f32.mrb[22].mxu1 }
 0x15b   : > { %v8381_v33 = vpop.f32.mrb[23].mxu1 }
 0x15e   : > { %v8386_v35 = vpop.f32.mrb[24].mxu1 }
 0x15f   : > { %v8394_v38 = vpop.f32.mrb[25].mxu1 }
 0x162   : > { %v8399_v40 = vpop.f32.mrb[26].mxu1 }
 0x163   : > { %v8404_v43 = vpop.f32.mrb[27].mxu1 }
 0x166   : > { %v8407_v48 = vpop.f32.mrb[28].mxu1 }
 0x167   : > { %v8410_v51 = vpop.f32.mrb[29].mxu1 }
 0x168   : > { %v1132_v41 = vpop.f32.mrb[0].mxu0 }
 0x169   : > { %v7327_v44 = vadd.f32 %v1132_v41, %v639_v8  ;;  %v1134_v45 = vpop.f32.mrb[1].mxu0 }
 0x16a   : > { %v7328_v46 = vadd.f32 %v1134_v45, %v641_v9  ;;  %v8413_v59 = vpop.f32.mrb[30].mxu1 }
 0x16b   : > { %v1287_v47 = vadd.f32 %v7327_v44, %v8397_v39  ;;  %v8416_v63 = vpop.f32.mrb[31].mxu1 }
 0x16c   : > { %v1288_v49 = vadd.f32 %v7328_v46, %v8402_v42  ;;  %v1138_v50 = vpop.f32.mrb[2].mxu0 }
 0x16d   : > { %v1323_v52 = vmax.f32 %v1287_v47, 0.0  ;;  %v7329_v53 = vadd.f32 %v1138_v50, %v645_v10  ;;  %v1140_v54 = vpop.f32.mrb[3].mxu0 }
 0x16e   : > { %v1324_v55 = vmax.f32 %v1288_v49, 0.0  ;;  %v7330_v56 = vadd.f32 %v1140_v54, %v647_v11  ;;  %v8419_v8 = vpop.f32.mrb[32].mxu1 }
 0x16f   : > { %v1364_v57 = vrot.slane %v1323_v52, 6  ;;  %v1289_v58 = vadd.f32 %v7329_v53, %v8397_v39  ;;  %v8422_v36 = vpop.f32.mrb[33].mxu1  ;;  %v1566_v52 = vld [vmem:[#allocation5] sm:$0xff]  ;;  %v1568_v53 = vld [vmem:[#allocation5 + $0x10] sm:$0xff] }
 0x170   : > { %v1365_v60 = vrot.slane %v1324_v55, 6  ;;  %v1290_v61 = vadd.f32 %v7330_v56, %v8402_v42  ;;  %v1144_v62 = vpop.f32.mrb[4].mxu0 }
 0x171   : > { %1376 = vst [vmem:[#allocation3] sm:$0xfc] %v1364_v57  ;;  %v1325_v1 = vmax.f32 %v1289_v58, 0.0  ;;  %v7331_v2 = vadd.f32 %v1144_v62, %v651_v12  ;;  %v1146_v3 = vpop.f32.mrb[5].mxu0  ;;  %v1571_v58 = vld [vmem:[#allocation5 + $0x28] sm:$0xff] }
 0x172   : > { %1377 = vst [vmem:[#allocation3 + $0x8] sm:$0xfc] %v1365_v60  ;;  %v1326_v4 = vmax.f32 %v1290_v61, 0.0  ;;  %v7332_v5 = vadd.f32 %v1146_v3, %v653_v13  ;;  %v1573_v3 = vld [vmem:[#allocation5 + $0x38] sm:$0xff] }
 0x173   : > { %v1366_v6 = vrot.slane %v1325_v1, 6  ;;  %v1291_v7 = vadd.f32 %v7331_v2, %v8397_v39 }
 0x174   : > { %v1368_v9 = vrot.slane %v1326_v4, 6  ;;  %v1292_v10 = vadd.f32 %v7332_v5, %v8402_v42  ;;  %v1150_v11 = vpop.f32.mrb[6].mxu0 }
 0x175   : > { %v8425_v41 = vsel %vm1363_vm2, %v1364_v57, %v1366_v6  ;;  %1380 = vst [vmem:[#allocation3 + $0x20] sm:$0x3] %v1366_v6  ;;  %v1327_v12 = vmax.f32 %v1291_v7, 0.0  ;;  %v7333_v44 = vadd.f32 %v1150_v11, %v8344_v14  ;;  %v1152_v45 = vpop.f32.mrb[7].mxu0  ;;  %v8435_v14 = vpop.f32.mrb[34].mxu1 }
 0x176   : > { %1378 = vst [vmem:[#allocation3 + $0x10] sm:$0xff] %v8425_v41  ;;  %v8430_v13 = vsel %vm1363_vm2, %v1365_v60, %v1368_v9  ;;  %1381 = vst [vmem:[#allocation3 + $0x28] sm:$0x3] %v1368_v9  ;;  %v1328_v46 = vmax.f32 %v1292_v10, 0.0  ;;  %v7334_v47 = vadd.f32 %v1152_v45, %v8346_v15  ;;  %v8438_v60 = vpop.f32.mrb[35].mxu1  ;;  %v1741_v11 = vrot.slane %v8425_v41, 1 }
 0x177   : > { %1379 = vst [vmem:[#allocation3 + $0x18] sm:$0xff] %v8430_v13  ;;  %v1389_v49 = vrot.slane %v1327_v12, 4  ;;  %v1293_v50 = vadd.f32 %v7333_v44, %v8397_v39  ;;  %v1744_v7 = vrot.slane %v8430_v13, 1  ;;  %v6657_v12 = vpack.c.bf16 %v1568_v53, %v1566_v52  ;;  %v1570_v44 = vld [vmem:[#allocation5 + $0x20] sm:$0xff]  ;;  %v1572_v45 = vld [vmem:[#allocation5 + $0x30] sm:$0xff] }
 0x178   : > { %v1390_v54 = vrot.slane %v1328_v46, 4  ;;  %v1294_v55 = vadd.f32 %v7334_v47, %v8402_v42  ;;  %v1156_v56 = vpop.f32.mrb[8].mxu0  ;;  %v1630_v57 = vld [vmem:[#allocation3] sm:$0xfe] }
 0x179   : > { %1405 = vst [vmem:[#allocation3 + $0x20] sm:$0xc0] %v1389_v49  ;;  %v1329_v15 = vmax.f32 %v1293_v50, 0.0  ;;  %v7335_v61 = vadd.f32 %v1156_v56, %v8348_v16  ;;  %v1158_v62 = vpop.f32.mrb[9].mxu0  ;;  %v1631_v1 = vld [vmem:[#allocation3 + $0x8] sm:$0xfe] }
 0x17a   : > { %v1740_v2 = vrot.slane %v1630_v57, 1  ;;  %1406 = vst [vmem:[#allocation3 + $0x28] sm:$0xc0] %v1390_v54  ;;  %v1330_v4 = vmax.f32 %v1294_v55, 0.0  ;;  %v7336_v5 = vadd.f32 %v1158_v62, %v8350_v17  ;;  %v1743_v6 = vrot.slane %v1631_v1, 1  ;;  %v1575_v55 = vld [vmem:[#allocation5 + $0x48] sm:$0xff] }
 0x17b   : > { %v1391_v9 = vrot.slane %v1329_v15, 4  ;;  %v1295_v10 = vadd.f32 %v7335_v61, %v8397_v39  ;;  %v6659_v17 = vpack.c.bf16 %v1573_v3, %v1571_v58  ;;  %v1577_v56 = vld [vmem:[#allocation5 + $0x58] sm:$0xff]  ;;  %v8449_v57 = vld [vmem:[#allocation5 + $0x40] sm:$0xff]  ;;  %v8458_v1 = vld [vmem:[#allocation5 + $0x50] sm:$0xff] }
 0x17c   : > { %v1393_v16 = vrot.slane %v1330_v4, 4  ;;  %v1296_v46 = vadd.f32 %v7336_v5, %v8402_v42  ;;  %v1162_v47 = vpop.f32.mrb[10].mxu0  ;;  %v1745_v50 = vsel %vm1739_vm4, %v1743_v6, %v1744_v7  ;;  %v1742_v62 = vsel %vm1739_vm4, %v1740_v2, %v1741_v11  ;;  %v8460_v4 = vld [vmem:[#allocation5 + $0x68] sm:$0xff]  ;;  %v8462_v58 = vld [vmem:[#allocation5 + $0x78] sm:$0xff] }
 0x17d   : > { %v8452_v15 = vsel %vm1388_vm3, %v1389_v49, %v1391_v9  ;;  %v1331_v61 = vmax.f32 %v1295_v10, 0.0  ;;  %v7337_v52 = vadd.f32 %v1162_v47, %v8352_v18  ;;  %v1164_v53 = vpop.f32.mrb[11].mxu0  ;;  %1922 = vmatprep.mubr.f32.mxu1 %v1745_v50  ;;  %v6661_v6 = vpack.c.bf16 %v1572_v45, %v1570_v44 }
 0x17e   : > { %1407 = vst [vmem:[#allocation3 + $0x30] sm:$0xff] %v8452_v15  ;;  %v8466_v49 = vsel %vm1388_vm3, %v1390_v54, %v1393_v16  ;;  %v1332_v3 = vmax.f32 %v1296_v46, 0.0  ;;  %v7338_v18 = vadd.f32 %v1164_v53, %v8354_v19  ;;  %1923 = vmatmul.mubr.f32.vlgmr.msra.gmra.mrb[36].mxu1 %v1742_v62  ;;  %v6663_v10 = vpack.c.bf16 %v1577_v56, %v1575_v55 }
 0x17f   : > { %1408 = vst [vmem:[#allocation3 + $0x38] sm:$0xff] %v8466_v49  ;;  %v1395_v5 = vrot.slane %v1331_v61, 4  ;;  %v1297_v2 = vadd.f32 %v7337_v52, %v8397_v39  ;;  %6658 = vmatpush1.bf16.msra.mxu1 %v6657_v12  ;;  %v6665_v54 = vpack.c.bf16 %v8458_v1, %v8449_v57  ;;  %v6667_v19 = vpack.c.bf16 %v8462_v58, %v8460_v4 }
 0x180   : > { %v1397_v47 = vrot.slane %v1332_v3, 4  ;;  %v1298_v50 = vadd.f32 %v7338_v18, %v8402_v42  ;;  %v1168_v0 = vpop.f32.mrb[12].mxu0  ;;  %v8472_v28 = vld [vmem:[#allocation3 + $0x20] sm:$0xff]  ;;  %6660 = vmatprep.subr.bf16.mxu1 %v6659_v17  ;;  %v1416_v62 = vrot.slane %v1331_v61, 2 }
 0x181   : > { %v1396_v46 = vsel %vm1388_vm3, %v1391_v9, %v1395_v5  ;;  %v1333_v53 = vmax.f32 %v1297_v2, 0.0  ;;  %v7339_v12 = vadd.f32 %v1168_v0, %v8356_v20  ;;  %v1170_v44 = vpop.f32.mrb[13].mxu0  ;;  %v8480_v45 = vld [vmem:[#allocation3 + $0x28] sm:$0xff]  ;;  %v1746_v55 = vrot.slane %v8472_v28, 1  ;;  %v1580_v5 = vld [vmem:[#allocation5 + $0x70] sm:$0xff] }
 0x182   : > { %1409 = vst [vmem:[#allocation3 + $0x40] sm:$0x3f] %v1396_v46  ;;  %v1398_v56 = vsel %vm1388_vm3, %v1393_v16, %v1397_v47  ;;  %v1334_v17 = vmax.f32 %v1298_v50, 0.0  ;;  %v7340_v52 = vadd.f32 %v1170_v44, %v8358_v21  ;;  %v1748_v57 = vrot.slane %v8480_v45, 1  ;;  %v1578_v21 = vld [vmem:[#allocation5 + $0x60] sm:$0xff]  ;;  %v1583_v50 = vld [vmem:[#allocation5 + $0x88] sm:$0xff] }
 0x183   : > { %1410 = vst [vmem:[#allocation3 + $0x48] sm:$0x3f] %v1398_v56  ;;  %v1417_v1 = vrot.slane %v1333_v53, 2  ;;  %v1299_v9 = vadd.f32 %v7339_v12, %v8397_v39  ;;  %6662 = vmatpush1.bf16.msra.mxu1 %v6661_v6  ;;  %v1752_v0 = vrot.slane %v8466_v49, 1  ;;  %v1419_v20 = vrot.slane %v1332_v3, 2  ;;  %v1585_v46 = vld [vmem:[#allocation5 + $0x98] sm:$0xff] }
 0x184   : > { %v1420_v4 = vrot.slane %v1334_v17, 2  ;;  %v1300_v58 = vadd.f32 %v7340_v52, %v8402_v42  ;;  %v1174_v18 = vpop.f32.mrb[14].mxu0  ;;  %v1749_v16 = vsel %vm1739_vm4, %v1744_v7, %v1748_v57  ;;  %6664 = vmatprep.subr.bf16.mxu1 %v6663_v10  ;;  %v1747_v3 = vsel %vm1739_vm4, %v1741_v11, %v1746_v55 }
 0x185   : > { %v1418_v61 = vsel %vm1415_vm5, %v1416_v62, %v1417_v1  ;;  %v1335_v2 = vmax.f32 %v1299_v9, 0.0  ;;  %v7341_v47 = vadd.f32 %v1174_v18, %v8360_v22  ;;  %v1176_v6 = vpop.f32.mrb[15].mxu0  ;;  %1928 = vmatprep.mubr.f32.mxu1 %v1749_v16  ;;  %v1753_v12 = vsel %vm1739_vm4, %v1748_v57, %v1752_v0  ;;  %v1582_v16 = vld [vmem:[#allocation5 + $0x80] sm:$0xff] }
 0x186   : > { %1432 = vst [vmem:[#allocation3 + $0x50] sm:$0xfc] %v1418_v61  ;;  %v1421_v53 = vsel %vm1415_vm5, %v1419_v20, %v1420_v4  ;;  %v1336_v7 = vmax.f32 %v1300_v58, 0.0  ;;  %v7342_v10 = vadd.f32 %v1176_v6, %v8362_v23  ;;  %1929 = vmatmul.mubr.f32.gmra.mrb[38].mxu1 %v1747_v3  ;;  %v1750_v11 = vrot.slane %v8452_v15, 1 }
 0x187   : > { %1433 = vst [vmem:[#allocation3 + $0x58] sm:$0xfc] %v1421_v53  ;;  %v1422_v22 = vrot.slane %v1335_v2, 2  ;;  %1438 = vst [vmem:[#allocation3 + $0x70] sm:$0xc0] %v1335_v2  ;;  %v1301_v44 = vadd.f32 %v7341_v47, %v8397_v39  ;;  %1934 = vmatprep.mubr.f32.mxu1 %v1753_v12  ;;  %6666 = vmatpush1.bf16.msra.mxu1 %v6665_v54  ;;  %v6669_v56 = vpack.c.bf16 %v1580_v5, %v1578_v21  ;;  %v1584_v21 = vld [vmem:[#allocation5 + $0x90] sm:$0xff] }
 0x188   : > { %v1424_v17 = vrot.slane %v1336_v7, 2  ;;  %1439 = vst [vmem:[#allocation3 + $0x78] sm:$0xc0] %v1336_v7  ;;  %v1302_v52 = vadd.f32 %v7342_v10, %v8402_v42  ;;  %v1180_v23 = vpop.f32.mrb[16].mxu0  ;;  %6668 = vmatprep.subr.bf16.mxu1 %v6667_v19  ;;  %v6671_v62 = vpack.c.bf16 %v1585_v46, %v1583_v50  ;;  %v1751_v18 = vsel %vm1739_vm4, %v1746_v55, %v1750_v11  ;;  %v1587_v55 = vld [vmem:[#allocation5 + $0xa8] sm:$0xff]  ;;  %v1589_v2 = vld [vmem:[#allocation5 + $0xb8] sm:$0xff] }
 0x189   : > { %v8506_v9 = vsel %vm1415_vm5, %v1417_v1, %v1422_v22  ;;  %1436 = vst [vmem:[#allocation3 + $0x70] sm:$0x3] %v1422_v22  ;;  %v8508_v57 = vmax.f32 %v1301_v44, 0.0  ;;  %v7343_v20 = vadd.f32 %v1180_v23, %v8364_v24  ;;  %v1182_v58 = vpop.f32.mrb[17].mxu0  ;;  %v8512_v54 = vld [vmem:[#allocation3 + $0x40] sm:$0xff]  ;;  %v6673_v3 = vpack.c.bf16 %v1584_v21, %v1582_v16  ;;  %v1588_v46 = vld [vmem:[#allocation5 + $0xb0] sm:$0xff] }
 0x18a   : > { %1434 = vst [vmem:[#allocation3 + $0x60] sm:$0xff] %v8506_v9  ;;  %v8516_v19 = vsel %vm1415_vm5, %v1420_v4, %v1424_v17  ;;  %1437 = vst [vmem:[#allocation3 + $0x78] sm:$0x3] %v1424_v17  ;;  %v8518_v1 = vmax.f32 %v1302_v52, 0.0  ;;  %v7344_v5 = vadd.f32 %v1182_v58, %v8366_v25  ;;  %1935 = vmatmul.mubr.f32.gmra.mrb[40].mxu1 %v1751_v18  ;;  %v8521_v61 = vld [vmem:[#allocation3 + $0x48] sm:$0xff]  ;;  %v1754_v24 = vrot.slane %v8512_v54, 1 }
 0x18b   : > { %1435 = vst [vmem:[#allocation3 + $0x68] sm:$0xff] %v8516_v19  ;;  %1440 = vst [vmem:[#allocation3 + $0x80] sm:$0xff] %v8508_v57  ;;  %v1303_v47 = vadd.f32 %v7343_v20, %v8397_v39  ;;  %v1756_v4 = vrot.slane %v8521_v61, 1  ;;  %6670 = vmatpush1.bf16.msra.mxu1 %v6669_v56  ;;  %v1586_v50 = vld [vmem:[#allocation5 + $0xa0] sm:$0xff]  ;;  %v6675_v44 = vpack.c.bf16 %v1589_v2, %v1587_v55  ;;  %v1591_v56 = vld [vmem:[#allocation5 + $0xc8] sm:$0xff] }
 0x18c   : > { %1441 = vst [vmem:[#allocation3 + $0x88] sm:$0xff] %v8518_v1  ;;  %v1304_v25 = vadd.f32 %v7344_v5, %v8402_v42  ;;  %v1186_v6 = vpop.f32.mrb[18].mxu0  ;;  %6672 = vmatprep.subr.bf16.mxu1 %v6671_v62  ;;  %v1593_v17 = vld [vmem:[#allocation5 + $0xd8] sm:$0xff]  ;;  %v1755_v62 = vsel %vm1739_vm4, %v1750_v11, %v1754_v24  ;;  %v6677_v21 = vpack.c.bf16 %v1588_v46, %v1586_v50  ;;  %v1595_v50 = vld [vmem:[#allocation5 + $0xe8] sm:$0xff] }
 0x18d   : > { %v1339_v53 = vmax.f32 %v1303_v47, 0.0  ;;  %v7345_v7 = vadd.f32 %v1186_v6, %v8368_v26  ;;  %v1188_v10 = vpop.f32.mrb[19].mxu0  ;;  %v1757_v12 = vsel %vm1739_vm4, %v1752_v0, %v1756_v4  ;;  %v8534_v22 = vld [vmem:[#allocation3 + $0x50] sm:$0xff]  ;;  %v1764_v47 = vrot.slane %v8516_v19, 1  ;;  %v1590_v6 = vld [vmem:[#allocation5 + $0xc0] sm:$0xff]  ;;  %v1597_v46 = vld [vmem:[#allocation5 + $0xf8] sm:$0xff] }
 0x18e   : > { %v1340_v52 = vmax.f32 %v1304_v25, 0.0  ;;  %v7346_v23 = vadd.f32 %v1188_v10, %v8370_v27  ;;  %1940 = vmatprep.mubr.f32.mxu1 %v1757_v12  ;;  %v8538_v20 = vld [vmem:[#allocation3 + $0x58] sm:$0xff]  ;;  %v1758_v26 = vrot.slane %v8534_v22, 1  ;;  %v6679_v27 = vpack.c.bf16 %v1593_v17, %v1591_v56 }
 0x18f   : > { %1442 = vst [vmem:[#allocation3 + $0x90] sm:$0x3f] %v1339_v53  ;;  %v1305_v58 = vadd.f32 %v7345_v7, %v8397_v39  ;;  %1941 = vmatmul.mubr.f32.gmra.mrb[42].mxu1 %v1755_v62  ;;  %v1760_v0 = vrot.slane %v8538_v20, 1  ;;  %v1592_v53 = vld [vmem:[#allocation5 + $0xd0] sm:$0xff]  ;;  %v1594_v62 = vld [vmem:[#allocation5 + $0xe0] sm:$0xff] }
 0x190   : > { %1443 = vst [vmem:[#allocation3 + $0x98] sm:$0x3f] %v1340_v52  ;;  %v1306_v18 = vadd.f32 %v7346_v23, %v8402_v42  ;;  %v1192_v16 = vpop.f32.mrb[20].mxu0  ;;  %6674 = vmatpush1.bf16.msra.mxu1 %v6673_v3  ;;  %v1759_v3 = vsel %vm1739_vm4, %v1754_v24, %v1758_v26  ;;  %v8554_v17 = vld [vmem:[#allocation3 + $0x70] sm:$0xff]  ;;  %v6681_v24 = vpack.c.bf16 %v1592_v53, %v1590_v6 }
 0x191   : > { %v1341_v5 = vmax.f32 %v1305_v58, 0.0  ;;  %v7347_v11 = vadd.f32 %v1192_v16, %v8372_v29  ;;  %v1194_v55 = vpop.f32.mrb[21].mxu0  ;;  %v1761_v2 = vsel %vm1739_vm4, %v1756_v4, %v1760_v0  ;;  %v8547_v25 = vld [vmem:[#allocation3 + $0x78] sm:$0xff]  ;;  %6676 = vmatprep.subr.bf16.mxu1 %v6675_v44  ;;  %v1765_v4 = vsel %vm1739_vm4, %v1760_v0, %v1764_v47  ;;  %v1596_v58 = vld [vmem:[#allocation5 + $0xf0] sm:$0xff] }
 0x192   : > { %v1342_v7 = vmax.f32 %v1306_v18, 0.0  ;;  %v7348_v10 = vadd.f32 %v1194_v55, %v8374_v30  ;;  %1946 = vmatprep.mubr.f32.mxu1 %v1761_v2  ;;  %v1768_v56 = vrot.slane %v8547_v25, 1  ;;  %v1762_v30 = vrot.slane %v8506_v9, 1  ;;  %v8558_v18 = vld [vmem:[#allocation5 + $0x108] sm:$0xff]  ;;  %v1601_v55 = vld [vmem:[#allocation5 + $0x118] sm:$0xff]  ;;  %v8561_v2 = vld [vmem:[#allocation5 + $0x100] sm:$0xff] }
 0x193   : > { %v1448_v12 = vrot.slane %v1341_v5, 6  ;;  %v1307_v29 = vadd.f32 %v7347_v11, %v8397_v39  ;;  %1947 = vmatmul.mubr.f32.gmra.mrb[44].mxu1 %v1759_v3  ;;  %v6683_v11 = vpack.c.bf16 %v1597_v46, %v1595_v50  ;;  %v1766_v53 = vrot.slane %v8554_v17, 1 }
 0x194   : > { %v1449_v44 = vrot.slane %v1342_v7, 6  ;;  %v1308_v52 = vadd.f32 %v7348_v10, %v8402_v42  ;;  %v1198_v23 = vpop.f32.mrb[22].mxu0  ;;  %1952 = vmatprep.mubr.f32.mxu1 %v1765_v4  ;;  %6678 = vmatpush1.bf16.msra.mxu1 %v6677_v21  ;;  %v8563_v7 = vld [vmem:[#allocation5 + $0x110] sm:$0xff]  ;;  %v1763_v6 = vsel %vm1739_vm4, %v1758_v26, %v1762_v30 }
 0x195   : > { %1460 = vst [vmem:[#allocation3 + $0xa0] sm:$0xfc] %v1448_v12  ;;  %v1343_v16 = vmax.f32 %v1307_v29, 0.0  ;;  %v7349_v0 = vadd.f32 %v1198_v23, %v8379_v32  ;;  %v1200_v5 = vpop.f32.mrb[23].mxu0  ;;  %6680 = vmatprep.subr.bf16.mxu1 %v6679_v27  ;;  %v1769_v32 = vsel %vm1739_vm4, %v1764_v47, %v1768_v56  ;;  %v6685_v27 = vpack.c.bf16 %v1596_v58, %v1594_v62 }
 0x196   : > { %1461 = vst [vmem:[#allocation3 + $0xa8] sm:$0xfc] %v1449_v44  ;;  %v1344_v10 = vmax.f32 %v1308_v52, 0.0  ;;  %v7350_v21 = vadd.f32 %v1200_v5, %v8381_v33  ;;  %v6687_v33 = vpack.c.bf16 %v1601_v55, %v8558_v18  ;;  %v6689_v26 = vpack.c.bf16 %v8563_v7, %v8561_v2  ;;  %v1605_v5 = vld [vmem:[#allocation5 + $0x138] sm:$0xff]  ;;  %v8595_v2 = vld [vmem:[#allocation5 + $0x130] sm:$0xff] }
 0x197   : > { %v1450_v3 = vrot.slane %v1343_v16, 6  ;;  %v1309_v29 = vadd.f32 %v7349_v0, %v8397_v39  ;;  %1953 = vmatmul.mubr.f32.gmra.mrb[46].mxu1 %v1763_v6  ;;  %v8573_v52 = vld [vmem:[#allocation3 + $0x98] sm:$0xff]  ;;  %v1772_v58 = vrot.slane %v8518_v1, 1  ;;  %v8583_v0 = vld [vmem:[#allocation5 + $0x128] sm:$0xff]  ;;  %v8607_v6 = vld [vmem:[#allocation3 + $0x90] sm:$0xff] }
 0x198   : > { %v1452_v50 = vrot.slane %v1344_v10, 6  ;;  %v1310_v46 = vadd.f32 %v7350_v21, %v8402_v42  ;;  %v1204_v4 = vpop.f32.mrb[24].mxu0  ;;  %1958 = vmatprep.mubr.f32.mxu1 %v1769_v32  ;;  %6682 = vmatpush1.bf16.msra.mxu1 %v6681_v24  ;;  %v8585_v24 = vld [vmem:[#allocation5 + $0x120] sm:$0xff]  ;;  %v8599_v7 = vld [vmem:[#allocation5 + $0x158] sm:$0xff]  ;;  %v1776_v21 = vrot.slane %v8573_v52, 1  ;;  %v1770_v32 = vrot.slane %v8508_v57, 1 }
 0x199   : > { %v8579_v23 = vsel %vm1363_vm2, %v1448_v12, %v1450_v3  ;;  %1464 = vst [vmem:[#allocation3 + $0xc0] sm:$0x3] %v1450_v3  ;;  %v1345_v16 = vmax.f32 %v1309_v29, 0.0  ;;  %v7351_v47 = vadd.f32 %v1204_v4, %v8386_v35  ;;  %v1206_v62 = vpop.f32.mrb[25].mxu0  ;;  %6684 = vmatprep.subr.bf16.mxu1 %v6683_v11  ;;  %v1767_v35 = vsel %vm1739_vm4, %v1762_v30, %v1766_v53  ;;  %v8597_v11 = vld [vmem:[#allocation5 + $0x148] sm:$0xff]  ;;  %v8614_v4 = vld [vmem:[#allocation5 + $0x150] sm:$0xff] }
 0x19a   : > { %1462 = vst [vmem:[#allocation3 + $0xb0] sm:$0xff] %v8579_v23  ;;  %v8589_v18 = vsel %vm1363_vm2, %v1449_v44, %v1452_v50  ;;  %1465 = vst [vmem:[#allocation3 + $0xc8] sm:$0x3] %v1452_v50  ;;  %v1346_v12 = vmax.f32 %v1310_v46, 0.0  ;;  %v7352_v55 = vadd.f32 %v1206_v62, %v8394_v38  ;;  %v1773_v38 = vsel %vm1739_vm4, %v1768_v56, %v1772_v58  ;;  %v8612_v46 = vld [vmem:[#allocation5 + $0x140] sm:$0xff] }
 0x19b   : > { %1463 = vst [vmem:[#allocation3 + $0xb8] sm:$0xff] %v8589_v18  ;;  %v1472_v10 = vrot.slane %v1345_v16, 4  ;;  %v1311_v44 = vadd.f32 %v7351_v47, %v8397_v39  ;;  %1959 = vmatmul.mubr.f32.gmra.mrb[48].mxu1 %v1767_v35  ;;  %v6691_v50 = vpack.c.bf16 %v1605_v5, %v8583_v0  ;;  %v8625_v0 = vld [vmem:[#allocation5 + $0x178] sm:$0xff] }
 0x19c   : > { %v1473_v30 = vrot.slane %v1346_v12, 4  ;;  %v1312_v3 = vadd.f32 %v7352_v55, %v8402_v42  ;;  %v1210_v29 = vpop.f32.mrb[26].mxu0  ;;  %1964 = vmatprep.mubr.f32.mxu1 %v1773_v38  ;;  %6686 = vmatpush1.bf16.msra.mxu1 %v6685_v27  ;;  %v6693_v12 = vpack.c.bf16 %v8595_v2, %v8585_v24  ;;  %v6695_v27 = vpack.c.bf16 %v8599_v7, %v8597_v11  ;;  %v8623_v55 = vld [vmem:[#allocation5 + $0x168] sm:$0xff] }
 0x19d   : > { %1488 = vst [vmem:[#allocation3 + $0xc0] sm:$0xc0] %v1472_v10  ;;  %v1347_v56 = vmax.f32 %v1311_v44, 0.0  ;;  %v7353_v16 = vadd.f32 %v1210_v29, %v8399_v40  ;;  %v1212_v47 = vpop.f32.mrb[27].mxu0  ;;  %v8617_v62 = vld [vmem:[#allocation3 + $0xa8] sm:$0xff]  ;;  %6688 = vmatprep.subr.bf16.mxu1 %v6687_v33  ;;  %v1771_v40 = vsel %vm1739_vm4, %v1766_v53, %v1770_v32  ;;  %v1774_v33 = vrot.slane %v8607_v6, 1 }
 0x19e   : > { %1489 = vst [vmem:[#allocation3 + $0xc8] sm:$0xc0] %v1473_v30  ;;  %v1348_v5 = vmax.f32 %v1312_v3, 0.0  ;;  %v7354_v35 = vadd.f32 %v1212_v47, %v8404_v43  ;;  %v8632_v44 = vld [vmem:[#allocation3 + $0xa0] sm:$0xff]  ;;  %v1777_v11 = vsel %vm1739_vm4, %v1772_v58, %v1776_v21  ;;  %v1780_v7 = vrot.slane %v8617_v62, 1 }
 0x19f   : > { %v1474_v24 = vrot.slane %v1347_v56, 4  ;;  %v1313_v2 = vadd.f32 %v7353_v16, %v8397_v39  ;;  %1965 = vmatmul.mubr.f32.gmra.mrb[50].mxu1 %v1771_v40  ;;  %v6697_v53 = vpack.c.bf16 %v8614_v4, %v8612_v46  ;;  %v6699_v29 = vpack.c.bf16 %v8625_v0, %v8623_v55  ;;  %v8642_v56 = vld [vmem:[#allocation5 + $0x160] sm:$0xff]  ;;  %v8644_v16 = vld [vmem:[#allocation5 + $0x170] sm:$0xff] }
 0x1a0   : > { %v1476_v38 = vrot.slane %v1348_v5, 4  ;;  %v1314_v3 = vadd.f32 %v7354_v35, %v8402_v42  ;;  %v1216_v43 = vpop.f32.mrb[28].mxu0  ;;  %1970 = vmatprep.mubr.f32.mxu1 %v1777_v11  ;;  %6690 = vmatpush1.bf16.msra.mxu1 %v6689_v26  ;;  %v1778_v40 = vrot.slane %v8632_v44, 1  ;;  %v1775_v55 = vsel %vm1739_vm4, %v1770_v32, %v1774_v33 }
 0x1a1   : > { %v8647_v58 = vsel %vm1388_vm3, %v1472_v10, %v1474_v24  ;;  %v1349_v47 = vmax.f32 %v1313_v2, 0.0  ;;  %v7355_v5 = vadd.f32 %v1216_v43, %v8407_v48  ;;  %v1218_v35 = vpop.f32.mrb[29].mxu0  ;;  %6692 = vmatprep.subr.bf16.mxu1 %v6691_v50  ;;  %v1781_v48 = vsel %vm1739_vm4, %v1776_v21, %v1780_v7 }
 0x1a2   : > { %1490 = vst [vmem:[#allocation3 + $0xd0] sm:$0xff] %v8647_v58  ;;  %v8653_v26 = vsel %vm1388_vm3, %v1473_v30, %v1476_v38  ;;  %v1350_v46 = vmax.f32 %v1314_v3, 0.0  ;;  %v7356_v4 = vadd.f32 %v1218_v35, %v8410_v51  ;;  %v6701_v50 = vpack.c.bf16 %v8644_v16, %v8642_v56  ;;  %v1615_v56 = vld [vmem:[#allocation5 + $0x188] sm:$0xff]  ;;  %v1617_v16 = vld [vmem:[#allocation5 + $0x198] sm:$0xff] }
 0x1a3   : > { %1491 = vst [vmem:[#allocation3 + $0xd8] sm:$0xff] %v8653_v26  ;;  %v1478_v10 = vrot.slane %v1349_v47, 4  ;;  %v1315_v0 = vadd.f32 %v7355_v5, %v8397_v39  ;;  %1971 = vmatmul.mubr.f32.gmra.mrb[52].mxu1 %v1775_v55  ;;  %v1784_v51 = vrot.slane %v8589_v18, 1  ;;  %v1779_v21 = vsel %vm1739_vm4, %v1774_v33, %v1778_v40 }
 0x1a4   : > { %v1480_v2 = vrot.slane %v1350_v46, 4  ;;  %v1316_v30 = vadd.f32 %v7356_v4, %v8402_v42  ;;  %v1222_v11 = vpop.f32.mrb[30].mxu0  ;;  %1976 = vmatprep.mubr.f32.mxu1 %v1781_v48  ;;  %6694 = vmatpush1.bf16.msra.mxu1 %v6693_v12 }
 0x1a5   : > { %v1479_v3 = vsel %vm1388_vm3, %v1474_v24, %v1478_v10  ;;  %v1351_v43 = vmax.f32 %v1315_v0, 0.0  ;;  %v7357_v5 = vadd.f32 %v1222_v11, %v8413_v59  ;;  %v1224_v35 = vpop.f32.mrb[31].mxu0  ;;  %v8668_v55 = vld [vmem:[#allocation3 + $0xc8] sm:$0xff]  ;;  %6696 = vmatprep.subr.bf16.mxu1 %v6695_v27  ;;  %v1785_v12 = vsel %vm1739_vm4, %v1780_v7, %v1784_v51  ;;  %v8675_v0 = vld [vmem:[#allocation3 + $0xc0] sm:$0xff] }
 0x1a6   : > { %1492 = vst [vmem:[#allocation3 + $0xe0] sm:$0x3f] %v1479_v3  ;;  %v1481_v4 = vsel %vm1388_vm3, %v1476_v38, %v1480_v2  ;;  %v1352_v48 = vmax.f32 %v1316_v30, 0.0  ;;  %v7358_v32 = vadd.f32 %v1224_v35, %v8416_v63  ;;  %v1498_v24 = vrot.slane %v1349_v47, 2  ;;  %v1614_v2 = vld [vmem:[#allocation5 + $0x180] sm:$0xff] }
 0x1a7   : > { %1493 = vst [vmem:[#allocation3 + $0xe8] sm:$0x3f] %v1481_v4  ;;  %v1499_v10 = vrot.slane %v1351_v43, 2  ;;  %v1317_v59 = vadd.f32 %v7357_v5, %v8397_v39  ;;  %1977 = vmatmul.mubr.f32.gmra.mrb[54].mxu1 %v1779_v21  ;;  %v1788_v33 = vrot.slane %v8668_v55, 1  ;;  %v1501_v27 = vrot.slane %v1350_v46, 2  ;;  %v1616_v46 = vld [vmem:[#allocation5 + $0x190] sm:$0xff] }
 0x1a8   : > { %v1502_v11 = vrot.slane %v1352_v48, 2  ;;  %v1318_v3 = vadd.f32 %v7358_v32, %v8402_v42  ;;  %v1228_v38 = vpop.f32.mrb[32].mxu0  ;;  %1982 = vmatprep.mubr.f32.mxu1 %v1785_v12  ;;  %6698 = vmatpush1.bf16.msra.mxu1 %v6697_v53  ;;  %v6703_v63 = vpack.c.bf16 %v1617_v16, %v1615_v56  ;;  %v11656_v5 = vrot.slane %v8579_v23, 1  ;;  %v1619_v21 = vld [vmem:[#allocation5 + $0x1a8] sm:$0xff]  ;;  %v1621_v4 = vld [vmem:[#allocation5 + $0x1b8] sm:$0xff] }
 0x1a9   : > { %v1500_v7 = vsel %vm1415_vm5, %v1498_v24, %v1499_v10  ;;  %v1353_v47 = vmax.f32 %v1317_v59, 0.0  ;;  %v7359_v30 = vadd.f32 %v1228_v38, %v8419_v8  ;;  %v1230_v43 = vpop.f32.mrb[33].mxu0  ;;  %6700 = vmatprep.subr.bf16.mxu1 %v6699_v29  ;;  %v1786_v16 = vrot.slane %v8675_v0, 1 }
 0x1aa   : > { %v1783_v35 = vsel %vm1739_vm4, %v1778_v40, %v11656_v5  ;;  %1514 = vst [vmem:[#allocation3 + $0xf0] sm:$0xfc] %v1500_v7  ;;  %v1503_v32 = vsel %vm1415_vm5, %v1501_v27, %v1502_v11  ;;  %v1354_v53 = vmax.f32 %v1318_v3, 0.0  ;;  %v7360_v56 = vadd.f32 %v1230_v43, %v8422_v36 }
 0x1ab   : > { %1515 = vst [vmem:[#allocation3 + $0xf8] sm:$0xfc] %v1503_v32  ;;  %v1504_v48 = vrot.slane %v1353_v47, 2  ;;  %1520 = vst [vmem:[#allocation3 + $0x110] sm:$0xc0] %v1353_v47  ;;  %v1319_v8 = vadd.f32 %v7359_v30, %v8397_v39  ;;  %1983 = vmatmul.mubr.f32.gmra.mrb[56].mxu1 %v1783_v35  ;;  %v1789_v40 = vsel %vm1739_vm4, %v1784_v51, %v1788_v33  ;;  %v1792_v51 = vrot.slane %v8653_v26, 1 }
 0x1ac   : > { %v1506_v29 = vrot.slane %v1354_v53, 2  ;;  %1521 = vst [vmem:[#allocation3 + $0x118] sm:$0xc0] %v1354_v53  ;;  %v1320_v12 = vadd.f32 %v7360_v56, %v8402_v42  ;;  %v1234_v24 = vpop.f32.mrb[34].mxu0  ;;  %1988 = vmatprep.mubr.f32.mxu1 %v1789_v40  ;;  %6702 = vmatpush1.bf16.msra.mxu1 %v6701_v50  ;;  %v6705_v59 = vpack.c.bf16 %v1616_v46, %v1614_v2  ;;  %v1618_v47 = vld [vmem:[#allocation5 + $0x1a0] sm:$0xff]  ;;  %v1620_v30 = vld [vmem:[#allocation5 + $0x1b0] sm:$0xff]  ;;  %v11657_v43 = vmov %v11656_v5 }
 0x1ad   : > { %v6707_v27 = vpack.c.bf16 %v1621_v4, %v1619_v21  ;;  %v8690_v36 = vsel %vm1415_vm5, %v1499_v10, %v1504_v48  ;;  %1518 = vst [vmem:[#allocation3 + $0x110] sm:$0x3] %v1504_v48  ;;  %v8692_v3 = vmax.f32 %v1319_v8, 0.0  ;;  %v7361_v38 = vadd.f32 %v1234_v24, %v8435_v14  ;;  %v1236_v7 = vpop.f32.mrb[35].mxu0  ;;  %6704 = vmatprep.subr.bf16.mxu1 %v6703_v63  ;;  %v1623_v35 = vld [vmem:[#allocation5 + $0x1c8] sm:$0xff]  ;;  %v1625_v63 = vld [vmem:[#allocation5 + $0x1d8] sm:$0xff] }
 0x1ae   : > { %1516 = vst [vmem:[#allocation3 + $0x100] sm:$0xff] %v8690_v36  ;;  %v8698_v50 = vsel %vm1415_vm5, %v1502_v11, %v1506_v29  ;;  %1519 = vst [vmem:[#allocation3 + $0x118] sm:$0x3] %v1506_v29  ;;  %v8700_v2 = vmax.f32 %v1320_v12, 0.0  ;;  %v7362_v10 = vadd.f32 %v1236_v7, %v8438_v60  ;;  %v1787_v14 = vsel %vm1739_vm4, %v11657_v43, %v1786_v16  ;;  %v8706_v5 = vld [vmem:[#allocation3 + $0xe8] sm:$0xff]  ;;  %v8713_v60 = vld [vmem:[#allocation3 + $0xe0] sm:$0xff] }
 0x1af   : > { %1517 = vst [vmem:[#allocation3 + $0x108] sm:$0xff] %v8698_v50  ;;  %1522 = vst [vmem:[#allocation3 + $0x120] sm:$0xff] %v8692_v3  ;;  %v1321_v11 = vadd.f32 %v7361_v38, %v8397_v39  ;;  %1989 = vmatmul.mubr.f32.gmra.mrb[58].mxu1 %v1787_v14  ;;  %v1793_v46 = vsel %vm1739_vm4, %v1788_v33, %v1792_v51  ;;  %v1796_v21 = vrot.slane %v8706_v5, 1  ;;  %v1790_v32 = vrot.slane %v8647_v58, 1  ;;  %v1622_v39 = vld [vmem:[#allocation5 + $0x1c0] sm:$0xff]  ;;  %v1624_v8 = vld [vmem:[#allocation5 + $0x1d0] sm:$0xff] }
 0x1b0   : > { %1523 = vst [vmem:[#allocation3 + $0x128] sm:$0xff] %v8700_v2  ;;  %v1322_v4 = vadd.f32 %v7362_v10, %v8402_v42  ;;  %1994 = vmatprep.mubr.f32.mxu1 %v1793_v46  ;;  %6706 = vmatpush1.bf16.msra.mxu1 %v6705_v59  ;;  %v6709_v53 = vpack.c.bf16 %v1620_v30, %v1618_v47  ;;  %v1794_v29 = vrot.slane %v8713_v60, 1  ;;  %v1627_v24 = vld [vmem:[#allocation5 + $0x1e8] sm:$0xff]  ;;  %v1629_v38 = vld [vmem:[#allocation5 + $0x1f8] sm:$0xff]  ;;  %v1626_v47 = vld [vmem:[#allocation5 + $0x1e0] sm:$0xff]  ;;  %v1804_v46 = vrot.slane %v8698_v50, 1 }
 0x1b1   : > { %v1357_v56 = vmax.f32 %v1321_v11, 0.0  ;;  %6708 = vmatprep.subr.bf16.mxu1 %v6707_v27  ;;  %v6711_v48 = vpack.c.bf16 %v1625_v63, %v1623_v35  ;;  %v1791_v33 = vsel %vm1739_vm4, %v1786_v16, %v1790_v32  ;;  %v1797_v42 = vsel %vm1739_vm4, %v1792_v51, %v1796_v21  ;;  %v8724_v7 = vld [vmem:[#allocation3 + $0xf0] sm:$0xff]  ;;  %v2234_v14 = vld [vmem:[#allocation5 + $0x408] sm:$0xff]  ;;  %v2236_v35 = vld [vmem:[#allocation5 + $0x418] sm:$0xff] }
 0x1b2   : > { %v1358_v40 = vmax.f32 %v1322_v4, 0.0  ;;  %v8720_v12 = vld [vmem:[#allocation3 + $0xf8] sm:$0xff]  ;;  %v6713_v27 = vpack.c.bf16 %v1624_v8, %v1622_v39  ;;  %v6715_v16 = vpack.c.bf16 %v1629_v38, %v1627_v24  ;;  %v1628_v30 = vld [vmem:[#allocation5 + $0x1f0] sm:$0xff]  ;;  %v1795_v10 = vsel %vm1739_vm4, %v1790_v32, %v1794_v29 }
 0x1b3   : > { %1524 = vst [vmem:[#allocation3 + $0x130] sm:$0x3f] %v1357_v56  ;;  %1995 = vmatmul.mubr.f32.gmra.mrb[60].mxu1 %v1791_v33  ;;  %v1800_v59 = vrot.slane %v8720_v12, 1  ;;  %v1798_v43 = vrot.slane %v8724_v7, 1  ;;  %v6717_v11 = vpack.c.bf16 %v1628_v30, %v1626_v47  ;;  %v6719_v4 = vpack.c.bf16 %v2236_v35, %v2234_v14  ;;  %v2235_v14 = vld [vmem:[#allocation5 + $0x410] sm:$0xff]  ;;  %v2238_v35 = vld [vmem:[#allocation5 + $0x428] sm:$0xff] }
 0x1b4   : > { %1525 = vst [vmem:[#allocation3 + $0x138] sm:$0x3f] %v1358_v40  ;;  %2000 = vmatprep.mubr.f32.mxu1 %v1797_v42  ;;  %6710 = vmatpush1.bf16.msra.mxu1 %v6709_v53 }
 0x1b5   : > { %6712 = vmatprep.subr.bf16.mxu1 %v6711_v48  ;;  %v1801_v51 = vsel %vm1739_vm4, %v1796_v21, %v1800_v59  ;;  %v8729_v63 = vld [vmem:[#allocation3 + $0x118] sm:$0xff]  ;;  %v1799_v53 = vsel %vm1739_vm4, %v1794_v29, %v1798_v43  ;;  %v1805_v32 = vsel %vm1739_vm4, %v1800_v59, %v1804_v46  ;;  %v8735_v48 = vld [vmem:[#allocation3 + $0x110] sm:$0xff]  ;;  %v1802_v21 = vrot.slane %v8690_v36, 1 }
 0x1b6   : > { %v1808_v56 = vrot.slane %v8729_v63, 1  ;;  %v1806_v8 = vrot.slane %v8735_v48, 1  ;;  %v1812_v29 = vrot.slane %v8700_v2, 1 }
 0x1b7   : > { %2001 = vmatmul.mubr.f32.gmra.mrb[62].mxu1 %v1795_v10  ;;  %v1803_v39 = vsel %vm1739_vm4, %v1798_v43, %v1802_v21  ;;  %v2233_v43 = vld [vmem:[#allocation5 + $0x400] sm:$0xff] }
 0x1b8   : > { %2006 = vmatprep.mubr.f32.mxu1 %v1801_v51  ;;  %6714 = vmatpush1.bf16.msra.mxu1 %v6713_v27  ;;  %v1809_v40 = vsel %vm1739_vm4, %v1804_v46, %v1808_v56  ;;  %v1807_v24 = vsel %vm1739_vm4, %v1802_v21, %v1806_v8  ;;  %v1813_v38 = vsel %vm1739_vm4, %v1808_v56, %v1812_v29  ;;  %v1810_v27 = vrot.slane %v8692_v3, 1  ;;  %v2240_v51 = vld [vmem:[#allocation5 + $0x438] sm:$0xff]  ;;  %v1526_v56 = vld [vmem:[#allocation3] sm:$0xff]  ;;  %v2242_v21 = vld [vmem:[#allocation5 + $0x448] sm:$0xff] }
 0x1b9   : > { %6716 = vmatprep.subr.bf16.mxu1 %v6715_v16  ;;  %v6721_v46 = vpack.c.bf16 %v2235_v14, %v2233_v43  ;;  %v2249_v43 = vld [vmem:[#allocation5 + $0x480] sm:$0xff]  ;;  %v2254_v14 = vld [vmem:[#allocation5 + $0x4a8] sm:$0xff] }
 0x1ba   : > { %v1632_v59 = vld [vmem:[#allocation3 + $0x130] sm:$0x1f]  ;;  %v1811_v16 = vsel %vm1739_vm4, %v1806_v8, %v1810_v27 }
 0x1bb   : > { %2007 = vmatmul.mubr.f32.gmra.mrb[64].mxu1 %v1799_v53  ;;  %v1633_v33 = vld [vmem:[#allocation3 + $0x138] sm:$0x1f]  ;;  %v1814_v47 = vrot.slane %v1632_v59, 1  ;;  %v2237_v53 = vld [vmem:[#allocation5 + $0x420] sm:$0xff] }
 0x1bc   : > { %2012 = vmatprep.mubr.f32.mxu1 %v1805_v32  ;;  %6718 = vmatpush1.bf16.msra.mxu1 %v6717_v11  ;;  %v1816_v42 = vrot.slane %v1633_v33, 1  ;;  %v1527_v11 = vld [vmem:[#allocation3 + $0x8] sm:$0xff]  ;;  %v2239_v32 = vld [vmem:[#allocation5 + $0x430] sm:$0xff]  ;;  %v2241_v33 = vld [vmem:[#allocation5 + $0x440] sm:$0xff] }
 0x1bd   : > { %6720 = vmatprep.subr.bf16.mxu1 %v6719_v4  ;;  %v1815_v10 = vsel %vm1739_vm4, %v1810_v27, %v1814_v47  ;;  %v6723_v4 = vpack.c.bf16 %v2240_v51, %v2238_v35  ;;  %v6725_v8 = vpack.c.bf16 %v2239_v32, %v2237_v53  ;;  %v2245_v27 = vld [vmem:[#allocation5 + $0x460] sm:$0xff] }
 0x1be   : > { %v1817_v30 = vsel %vm1739_vm4, %v1812_v29, %v1816_v42  ;;  %v2243_v29 = vld [vmem:[#allocation5 + $0x450] sm:$0xff]  ;;  %v2257_v32 = vld [vmem:[#allocation5 + $0x4c0] sm:$0xff] }
 0x1bf   : > { %2013 = vmatmul.mubr.f32.gmra.mrb[66].mxu1 %v1803_v39  ;;  %v2244_v39 = vld [vmem:[#allocation5 + $0x458] sm:$0xff] }
 0x1c0   : > { %2018 = vmatprep.mubr.f32.mxu1 %v1809_v40  ;;  %v6727_v40 = vpack.c.bf16 %v2244_v39, %v2242_v21 }
 0x1c3   : > { %2019 = vmatmul.mubr.f32.gmra.mrb[68].mxu1 %v1807_v24  ;;  %v2246_v24 = vld [vmem:[#allocation5 + $0x468] sm:$0xff] }
 0x1c4   : > { %2024 = vmatprep.mubr.f32.mxu1 %v1813_v38  ;;  %v2248_v38 = vld [vmem:[#allocation5 + $0x478] sm:$0xff] }
 0x1c5   : > { %v6731_v59 = vpack.c.bf16 %v2248_v38, %v2246_v24  ;;  %v2265_v24 = vld [vmem:[#allocation5 + $0x500] sm:$0xff]  ;;  %v2270_v38 = vld [vmem:[#allocation5 + $0x528] sm:$0xff] }
 0x1c7   : > { %2025 = vmatmul.mubr.f32.gmra.mrb[70].mxu1 %v1811_v16  ;;  %v2247_v16 = vld [vmem:[#allocation5 + $0x470] sm:$0xff] }
 0x1c8   : > { %2030 = vmatprep.mubr.f32.mxu1 %v1817_v30  ;;  %v6733_v30 = vpack.c.bf16 %v2247_v16, %v2245_v27  ;;  %v2269_v27 = vld [vmem:[#allocation5 + $0x520] sm:$0xff]  ;;  %v2274_v16 = vld [vmem:[#allocation5 + $0x548] sm:$0xff] }
 0x1cb   : > { %2031 = vmatmul.mubr.f32.gmra.mrb[72].mxu1 %v1815_v10 }
 0x1cc   : > { %2036 = vmatprep.mubr.f32.mxu1 %v1816_v42  ;;  %v6729_v42 = vpack.c.bf16 %v2243_v29, %v2241_v33 }
 0x1cf   : > { %2037 = vmatmul.mubr.f32.gmra.mrb[74].mxu1 %v1814_v47  ;;  %v2250_v47 = vld [vmem:[#allocation5 + $0x488] sm:$0xff] }
 0x1d0   : > { %2107 = vmatprep.mubr.f32.mxu1 %v1527_v11  ;;  %v2253_v11 = vld [vmem:[#allocation5 + $0x4a0] sm:$0xff] }
 0x1d3   : > { %2108 = vmatmul.mubr.f32.vlgmr.msra.gmra.mrb[36].mxu1 %v1526_v56  ;;  %v2262_v56 = vld [vmem:[#allocation5 + $0x4e8] sm:$0xff] }
 0x1d4   : > { %2113 = vmatprep.mubr.f32.mxu1 %v8430_v13  ;;  %6722 = vmatpush1.bf16.msra.mxu1 %v6721_v46  ;;  %v2252_v13 = vld [vmem:[#allocation5 + $0x498] sm:$0xff]  ;;  %v2258_v46 = vld [vmem:[#allocation5 + $0x4c8] sm:$0xff] }
 0x1d5   : > { %6724 = vmatprep.subr.bf16.mxu1 %v6723_v4  ;;  %v6735_v10 = vpack.c.bf16 %v2252_v13, %v2250_v47 }
 0x1d7   : > { %2114 = vmatmul.mubr.f32.gmra.mrb[38].mxu1 %v8425_v41  ;;  %v2251_v41 = vld [vmem:[#allocation5 + $0x490] sm:$0xff] }
 0x1d8   : > { %2119 = vmatprep.mubr.f32.mxu1 %v8480_v45  ;;  %6726 = vmatpush1.bf16.msra.mxu1 %v6725_v8  ;;  %v2256_v45 = vld [vmem:[#allocation5 + $0x4b8] sm:$0xff]  ;;  %v6737_v35 = vpack.c.bf16 %v2251_v41, %v2249_v43  ;;  %v2261_v8 = vld [vmem:[#allocation5 + $0x4e0] sm:$0xff] }
 0x1d9   : > { %6728 = vmatprep.subr.bf16.mxu1 %v6727_v40  ;;  %v6739_v51 = vpack.c.bf16 %v2256_v45, %v2254_v14  ;;  %v2266_v40 = vld [vmem:[#allocation5 + $0x508] sm:$0xff]  ;;  %v2277_v14 = vld [vmem:[#allocation5 + $0x560] sm:$0xff] }
 0x1da   : > { %v2282_v45 = vld [vmem:[#allocation5 + $0x588] sm:$0xff] }
 0x1db   : > { %2120 = vmatmul.mubr.f32.gmra.mrb[40].mxu1 %v8472_v28  ;;  %v2255_v28 = vld [vmem:[#allocation5 + $0x4b0] sm:$0xff] }
 0x1dc   : > { %2125 = vmatprep.mubr.f32.mxu1 %v8466_v49  ;;  %6730 = vmatpush1.bf16.msra.mxu1 %v6729_v42  ;;  %v2260_v49 = vld [vmem:[#allocation5 + $0x4d8] sm:$0xff]  ;;  %v6741_v4 = vpack.c.bf16 %v2255_v28, %v2253_v11  ;;  %v2281_v11 = vld [vmem:[#allocation5 + $0x580] sm:$0xff]  ;;  %v2283_v28 = vld [vmem:[#allocation5 + $0x590] sm:$0xff] }
 0x1dd   : > { %6732 = vmatprep.subr.bf16.mxu1 %v6731_v59  ;;  %v6743_v53 = vpack.c.bf16 %v2260_v49, %v2258_v46  ;;  %v2286_v46 = vld [vmem:[#allocation5 + $0x5a8] sm:$0xff]  ;;  %v2288_v49 = vld [vmem:[#allocation5 + $0x5b8] sm:$0xff] }
 0x1df   : > { %2126 = vmatmul.mubr.f32.gmra.mrb[42].mxu1 %v8452_v15  ;;  %v2259_v15 = vld [vmem:[#allocation5 + $0x4d0] sm:$0xff] }
 0x1e0   : > { %2131 = vmatprep.mubr.f32.mxu1 %v8521_v61  ;;  %6734 = vmatpush1.bf16.msra.mxu1 %v6733_v30  ;;  %v2264_v61 = vld [vmem:[#allocation5 + $0x4f8] sm:$0xff]  ;;  %v6745_v21 = vpack.c.bf16 %v2259_v15, %v2257_v32  ;;  %v2273_v30 = vld [vmem:[#allocation5 + $0x540] sm:$0xff]  ;;  %v2287_v15 = vld [vmem:[#allocation5 + $0x5b0] sm:$0xff] }
 0x1e1   : > { %6736 = vmatprep.subr.bf16.mxu1 %v6735_v10  ;;  %v6747_v39 = vpack.c.bf16 %v2264_v61, %v2262_v56  ;;  %v2278_v10 = vld [vmem:[#allocation5 + $0x568] sm:$0xff]  ;;  %v2285_v32 = vld [vmem:[#allocation5 + $0x5a0] sm:$0xff] }
 0x1e2   : > { %v2290_v56 = vld [vmem:[#allocation5 + $0x5c8] sm:$0xff]  ;;  %v6773_v61 = vpack.c.bf16 %v2287_v15, %v2285_v32  ;;  %v8799_v15 = vld [vmem:[#allocation3 + $0x38] sm:$0xff] }
 0x1e3   : > { %2132 = vmatmul.mubr.f32.gmra.mrb[44].mxu1 %v8512_v54  ;;  %v2263_v54 = vld [vmem:[#allocation5 + $0x4f0] sm:$0xff] }
 0x1e4   : > { %2137 = vmatprep.mubr.f32.mxu1 %v8538_v20  ;;  %6738 = vmatpush1.bf16.msra.mxu1 %v6737_v35  ;;  %v2268_v20 = vld [vmem:[#allocation5 + $0x518] sm:$0xff]  ;;  %v6749_v33 = vpack.c.bf16 %v2263_v54, %v2261_v8  ;;  %v2294_v8 = vld [vmem:[#allocation5 + $0x5e8] sm:$0xff] }
 0x1e5   : > { %6740 = vmatprep.subr.bf16.mxu1 %v6739_v51  ;;  %v6751_v29 = vpack.c.bf16 %v2268_v20, %v2266_v40  ;;  %v2296_v54 = vld [vmem:[#allocation5 + $0x5f8] sm:$0xff] }
 0x1e6   : > { %v6779_v20 = vpack.c.bf16 %v2296_v54, %v2294_v8  ;;  %v2664_v8 = vld [vmem:[#allocation5 + $0x678] sm:$0xff] }
 0x1e7   : > { %2138 = vmatmul.mubr.f32.gmra.mrb[46].mxu1 %v8534_v22  ;;  %v2267_v22 = vld [vmem:[#allocation5 + $0x510] sm:$0xff] }
 0x1e8   : > { %2143 = vmatprep.mubr.f32.mxu1 %v8516_v19  ;;  %6742 = vmatpush1.bf16.msra.mxu1 %v6741_v4  ;;  %v2272_v19 = vld [vmem:[#allocation5 + $0x538] sm:$0xff]  ;;  %v6753_v42 = vpack.c.bf16 %v2267_v22, %v2265_v24  ;;  %v6769_v4 = vpack.c.bf16 %v2283_v28, %v2281_v11  ;;  %v2650_v24 = vld [vmem:[#allocation5 + $0x608] sm:$0xff]  ;;  %v8795_v28 = vld [vmem:[#allocation3 + $0x20] sm:$0xff] }
 0x1e9   : > { %6744 = vmatprep.subr.bf16.mxu1 %v6743_v53  ;;  %v6755_v59 = vpack.c.bf16 %v2272_v19, %v2270_v38  ;;  %v6771_v53 = vpack.c.bf16 %v2288_v49, %v2286_v46  ;;  %v2652_v22 = vld [vmem:[#allocation5 + $0x618] sm:$0xff]  ;;  %v2307_v46 = vrot.slane %v8795_v28, 2  ;;  %v2658_v49 = vld [vmem:[#allocation5 + $0x648] sm:$0xff] }
 0x1ea   : > { %v6783_v19 = vpack.c.bf16 %v2652_v22, %v2650_v24 }
 0x1eb   : > { %2144 = vmatmul.mubr.f32.gmra.mrb[48].mxu1 %v8506_v9  ;;  %v2271_v9 = vld [vmem:[#allocation5 + $0x530] sm:$0xff] }
 0x1ec   : > { %2149 = vmatprep.mubr.f32.mxu1 %v8547_v25  ;;  %6746 = vmatpush1.bf16.msra.mxu1 %v6745_v21  ;;  %v2276_v25 = vld [vmem:[#allocation5 + $0x558] sm:$0xff]  ;;  %v6757_v47 = vpack.c.bf16 %v2271_v9, %v2269_v27  ;;  %v2228_v27 = vld [vmem:[#allocation3] sm:$0xfc] }
 0x1ed   : > { %6748 = vmatprep.subr.bf16.mxu1 %v6747_v39  ;;  %v6759_v13 = vpack.c.bf16 %v2276_v25, %v2274_v16  ;;  %v2289_v39 = vld [vmem:[#allocation5 + $0x5c0] sm:$0xff]  ;;  %v8784_v9 = vld [vmem:[#allocation3 + $0x18] sm:$0xff] }
 0x1ee   : > { %v2305_v16 = vrot.slane %v8784_v9, 2  ;;  %v2649_v25 = vld [vmem:[#allocation5 + $0x600] sm:$0xff] }
 0x1ef   : > { %2150 = vmatmul.mubr.f32.gmra.mrb[50].mxu1 %v8554_v17  ;;  %v2275_v17 = vld [vmem:[#allocation5 + $0x550] sm:$0xff] }
 0x1f0   : > { %2155 = vmatprep.mubr.f32.mxu1 %v8518_v1  ;;  %6750 = vmatpush1.bf16.msra.mxu1 %v6749_v33  ;;  %v2280_v1 = vld [vmem:[#allocation5 + $0x578] sm:$0xff]  ;;  %v6761_v43 = vpack.c.bf16 %v2275_v17, %v2273_v30  ;;  %v2293_v33 = vld [vmem:[#allocation5 + $0x5e0] sm:$0xff]  ;;  %v2301_v30 = vrot.slane %v2228_v27, 2  ;;  %v2654_v17 = vld [vmem:[#allocation5 + $0x628] sm:$0xff] }
 0x1f1   : > { %6752 = vmatprep.subr.bf16.mxu1 %v6751_v29  ;;  %v6763_v41 = vpack.c.bf16 %v2280_v1, %v2278_v10  ;;  %v2295_v29 = vld [vmem:[#allocation5 + $0x5f0] sm:$0xff]  ;;  %v2656_v10 = vld [vmem:[#allocation5 + $0x638] sm:$0xff]  ;;  %v2666_v27 = vld [vmem:[#allocation5 + $0x688] sm:$0xff] }
 0x1f2   : > { %v6781_v38 = vpack.c.bf16 %v2295_v29, %v2293_v33  ;;  %v8807_v33 = vld [vmem:[#allocation3 + $0x30] sm:$0xff] }
 0x1f3   : > { %2156 = vmatmul.mubr.f32.gmra.mrb[52].mxu1 %v8508_v57  ;;  %v2279_v57 = vld [vmem:[#allocation5 + $0x570] sm:$0xff]  ;;  %v2311_v29 = vrot.slane %v8807_v33, 2 }
 0x1f4   : > { %2161 = vmatprep.mubr.f32.mxu1 %v8573_v52  ;;  %6754 = vmatpush1.bf16.msra.mxu1 %v6753_v42  ;;  %v2284_v52 = vld [vmem:[#allocation5 + $0x598] sm:$0xff]  ;;  %v6765_v35 = vpack.c.bf16 %v2279_v57, %v2277_v14  ;;  %v8791_v14 = vld [vmem:[#allocation3 + $0x10] sm:$0xff] }
 0x1f5   : > { %6756 = vmatprep.subr.bf16.mxu1 %v6755_v59  ;;  %v6767_v51 = vpack.c.bf16 %v2284_v52, %v2282_v45  ;;  %v1565_v42 = vld [vmem:[#allocation3 + $0x138] sm:$0xf]  ;;  %v2302_v57 = vrot.slane %v8791_v14, 2  ;;  %v6787_v52 = vpack.c.bf16 %v2656_v10, %v2654_v17  ;;  %v2665_v10 = vld [vmem:[#allocation5 + $0x680] sm:$0xff] }
 0x1f7   : > { %2162 = vmatmul.mubr.f32.gmra.mrb[54].mxu1 %v8607_v6  ;;  %v2303_v11 = vsel %vm1415_vm5, %v2301_v30, %v2302_v57 }
 0x1f8   : > { %2167 = vmatprep.mubr.f32.mxu1 %v8617_v62  ;;  %6758 = vmatpush1.bf16.msra.mxu1 %v6757_v47  ;;  %v2651_v47 = vld [vmem:[#allocation5 + $0x610] sm:$0xff] }
 0x1f9   : > { %6760 = vmatprep.subr.bf16.mxu1 %v6759_v13  ;;  %v1564_v13 = vld [vmem:[#allocation3 + $0x130] sm:$0xf]  ;;  %v6785_v45 = vpack.c.bf16 %v2651_v47, %v2649_v25  ;;  %v8815_v47 = vld [vmem:[#allocation3 + $0x58] sm:$0xff] }
 0x1fb   : > { %2168 = vmatmul.mubr.f32.gmra.mrb[56].mxu1 %v8632_v44 }
 0x1fc   : > { %2173 = vmatprep.mubr.f32.mxu1 %v8589_v18  ;;  %6762 = vmatpush1.bf16.msra.mxu1 %v6761_v43  ;;  %v2292_v18 = vld [vmem:[#allocation5 + $0x5d8] sm:$0xff]  ;;  %v8788_v43 = vld [vmem:[#allocation3 + $0x28] sm:$0xff] }
 0x1fd   : > { %6764 = vmatprep.subr.bf16.mxu1 %v6763_v41  ;;  %v6775_v21 = vpack.c.bf16 %v2292_v18, %v2290_v56  ;;  %v2309_v41 = vrot.slane %v8788_v43, 2  ;;  %v2313_v56 = vrot.slane %v8799_v15, 2 }
 0x1ff   : > { %2174 = vmatmul.mubr.f32.gmra.mrb[58].mxu1 %v8579_v23  ;;  %v2291_v23 = vld [vmem:[#allocation5 + $0x5d0] sm:$0xff]  ;;  %v2314_v54 = vsel %vm1415_vm5, %v2309_v41, %v2313_v56 }
 0x200   : > { %2179 = vmatprep.mubr.f32.mxu1 %v8668_v55  ;;  %6766 = vmatpush1.bf16.msra.mxu1 %v6765_v35  ;;  %v6777_v40 = vpack.c.bf16 %v2291_v23, %v2289_v39  ;;  %v2653_v35 = vld [vmem:[#allocation5 + $0x620] sm:$0xff]  ;;  %v2308_v39 = vsel %vm1415_vm5, %v2302_v57, %v2307_v46  ;;  %v2662_v23 = vld [vmem:[#allocation5 + $0x668] sm:$0xff]  ;;  %v8819_v57 = vld [vmem:[#allocation3 + $0x50] sm:$0xff] }
 0x201   : > { %6768 = vmatprep.subr.bf16.mxu1 %v6767_v51  ;;  %v2655_v51 = vld [vmem:[#allocation5 + $0x630] sm:$0xff]  ;;  %v6795_v22 = vpack.c.bf16 %v2664_v8, %v2662_v23  ;;  %v8831_v8 = vld [vmem:[#allocation3 + $0x60] sm:$0xff] }
 0x202   : > { %v6789_v32 = vpack.c.bf16 %v2655_v51, %v2653_v35  ;;  %v2672_v35 = vld [vmem:[#allocation5 + $0x6b8] sm:$0xff] }
 0x203   : > { %2180 = vmatmul.mubr.f32.gmra.mrb[60].mxu1 %v8675_v0 }
 0x204   : > { %2185 = vmatprep.mubr.f32.mxu1 %v8653_v26  ;;  %6770 = vmatpush1.bf16.msra.mxu1 %v6769_v4  ;;  %v2660_v4 = vld [vmem:[#allocation5 + $0x658] sm:$0xff] }
 0x205   : > { %6772 = vmatprep.subr.bf16.mxu1 %v6771_v53  ;;  %v2310_v53 = vsel %vm1415_vm5, %v2305_v16, %v2309_v41  ;;  %v6791_v18 = vpack.c.bf16 %v2660_v4, %v2658_v49 }
 0x207   : > { %2186 = vmatmul.mubr.f32.gmra.mrb[62].mxu1 %v8647_v58  ;;  %v2229_v58 = vld [vmem:[#allocation3 + $0x8] sm:$0xfc] }
 0x208   : > { %2191 = vmatprep.mubr.f32.mxu1 %v8706_v5  ;;  %6774 = vmatpush1.bf16.msra.mxu1 %v6773_v61  ;;  %v2304_v59 = vrot.slane %v2229_v58, 2  ;;  %v2657_v61 = vld [vmem:[#allocation5 + $0x640] sm:$0xff]  ;;  %v2312_v58 = vsel %vm1415_vm5, %v2307_v46, %v2311_v29  ;;  %v8823_v46 = vld [vmem:[#allocation3 + $0x68] sm:$0xff] }
 0x209   : > { %6776 = vmatprep.subr.bf16.mxu1 %v6775_v21  ;;  %v2659_v21 = vld [vmem:[#allocation5 + $0x650] sm:$0xff]  ;;  %v2325_v49 = vrot.slane %v8823_v46, 2 }
 0x20a   : > { %v2306_v1 = vsel %vm1415_vm5, %v2304_v59, %v2305_v16  ;;  %v6793_v24 = vpack.c.bf16 %v2659_v21, %v2657_v61  ;;  %v2668_v16 = vld [vmem:[#allocation5 + $0x698] sm:$0xff] }
 0x20b   : > { %2192 = vmatmul.mubr.f32.gmra.mrb[64].mxu1 %v8713_v60  ;;  %v6799_v17 = vpack.c.bf16 %v2668_v16, %v2666_v27  ;;  %v2676_v61 = vld [vmem:[#allocation5 + $0x6d8] sm:$0xff] }
 0x20c   : > { %2197 = vmatprep.mubr.f32.mxu1 %v8720_v12  ;;  %6778 = vmatpush1.bf16.msra.mxu1 %v6777_v40  ;;  %v8804_v40 = vld [vmem:[#allocation3 + $0x48] sm:$0xff]  ;;  %v2680_v27 = vld [vmem:[#allocation5 + $0x6f8] sm:$0xff] }
 0x20d   : > { %6780 = vmatprep.subr.bf16.mxu1 %v6779_v20  ;;  %v2317_v20 = vrot.slane %v8804_v40, 2 }
 0x20f   : > { %2198 = vmatmul.mubr.f32.gmra.mrb[66].mxu1 %v8724_v7  ;;  %v2318_v25 = vsel %vm1415_vm5, %v2313_v56, %v2317_v20 }
 0x210   : > { %2203 = vmatprep.mubr.f32.mxu1 %v8698_v50  ;;  %6782 = vmatpush1.bf16.msra.mxu1 %v6781_v38  ;;  %v2661_v38 = vld [vmem:[#allocation5 + $0x660] sm:$0xff] }
 0x211   : > { %6784 = vmatprep.subr.bf16.mxu1 %v6783_v19  ;;  %v2663_v19 = vld [vmem:[#allocation5 + $0x670] sm:$0xff] }
 0x212   : > { %v6797_v30 = vpack.c.bf16 %v2663_v19, %v2661_v38  ;;  %v8835_v19 = vld [vmem:[#allocation3 + $0x70] sm:$0xff] }
 0x213   : > { %2204 = vmatmul.mubr.f32.gmra.mrb[68].mxu1 %v8690_v36 }
 0x214   : > { %2209 = vmatprep.mubr.f32.mxu1 %v8729_v63 }
 0x217   : > { %2210 = vmatmul.mubr.f32.gmra.mrb[70].mxu1 %v8735_v48 }
 0x218   : > { %2215 = vmatprep.mubr.f32.mxu1 %v8700_v2 }
 0x21b   : > { %2216 = vmatmul.mubr.f32.gmra.mrb[72].mxu1 %v8692_v3 }
 0x21c   : > { %2221 = vmatprep.mubr.f32.mxu1 %v1565_v42  ;;  %v8811_v42 = vld [vmem:[#allocation3 + $0x40] sm:$0xff] }
 0x21d   : > { %v2315_v59 = vrot.slane %v8811_v42, 2 }
 0x21f   : > { %2222 = vmatmul.mubr.f32.gmra.mrb[74].mxu1 %v1564_v13  ;;  %v2321_v13 = vrot.slane %v8815_v47, 2  ;;  %v2316_v41 = vsel %vm1415_vm5, %v2311_v29, %v2315_v59 }
 0x220   : > { %2483 = vmatprep.mubr.f32.mxu1 %v2306_v1  ;;  %v2667_v1 = vld [vmem:[#allocation5 + $0x690] sm:$0xff] }
 0x221   : > { %v2322_v51 = vsel %vm1415_vm5, %v2317_v20, %v2321_v13  ;;  %v2326_v21 = vsel %vm1415_vm5, %v2321_v13, %v2325_v49  ;;  %v8839_v13 = vld [vmem:[#allocation3 + $0x88] sm:$0xff] }
 0x223   : > { %2484 = vmatmul.mubr.f32.vlgmr.msra.gmra.mrb[36].mxu1 %v2303_v11  ;;  %v6801_v11 = vpack.c.bf16 %v2667_v1, %v2665_v10  ;;  %v2677_v10 = vld [vmem:[#allocation5 + $0x6e0] sm:$0xff]  ;;  %v2679_v1 = vld [vmem:[#allocation5 + $0x6f0] sm:$0xff] }
 0x224   : > { %2489 = vmatprep.mubr.f32.mxu1 %v2310_v53  ;;  %6786 = vmatpush1.bf16.msra.mxu1 %v6785_v45  ;;  %v2319_v45 = vrot.slane %v8819_v57, 2  ;;  %v2669_v53 = vld [vmem:[#allocation5 + $0x6a0] sm:$0xff] }
 0x225   : > { %6788 = vmatprep.subr.bf16.mxu1 %v6787_v52  ;;  %v2670_v52 = vld [vmem:[#allocation5 + $0x6a8] sm:$0xff] }
 0x226   : > { %v6803_v4 = vpack.c.bf16 %v2672_v35, %v2670_v52  ;;  %v2320_v56 = vsel %vm1415_vm5, %v2315_v59, %v2319_v45  ;;  %v2678_v59 = vld [vmem:[#allocation5 + $0x6e8] sm:$0xff]  ;;  %v2684_v52 = vld [vmem:[#allocation5 + $0x718] sm:$0xff] }
 0x227   : > { %2490 = vmatmul.mubr.f32.gmra.mrb[38].mxu1 %v2308_v39  ;;  %v8828_v39 = vld [vmem:[#allocation3 + $0x78] sm:$0xff] }
 0x228   : > { %2495 = vmatprep.mubr.f32.mxu1 %v2314_v54  ;;  %6790 = vmatpush1.bf16.msra.mxu1 %v6789_v32  ;;  %v2671_v32 = vld [vmem:[#allocation5 + $0x6b0] sm:$0xff]  ;;  %v2329_v23 = vrot.slane %v8828_v39, 2  ;;  %v2323_v54 = vrot.slane %v8831_v8, 2 }
 0x229   : > { %6792 = vmatprep.subr.bf16.mxu1 %v6791_v18  ;;  %v2674_v18 = vld [vmem:[#allocation5 + $0x6c8] sm:$0xff]  ;;  %v6805_v20 = vpack.c.bf16 %v2671_v32, %v2669_v53  ;;  %v6813_v53 = vpack.c.bf16 %v2679_v1, %v2677_v10  ;;  %v2689_v1 = vld [vmem:[#allocation5 + $0x740] sm:$0xff] }
 0x22a   : > { %v6807_v29 = vpack.c.bf16 %v2676_v61, %v2674_v18  ;;  %v2324_v38 = vsel %vm1415_vm5, %v2319_v45, %v2323_v54  ;;  %v2330_v16 = vsel %vm1415_vm5, %v2325_v49, %v2329_v23  ;;  %v2682_v45 = vld [vmem:[#allocation5 + $0x708] sm:$0xff]  ;;  %v8847_v49 = vld [vmem:[#allocation3 + $0x80] sm:$0xff]  ;;  %v2683_v18 = vld [vmem:[#allocation5 + $0x710] sm:$0xff] }
 0x22b   : > { %2496 = vmatmul.mubr.f32.gmra.mrb[40].mxu1 %v2312_v58  ;;  %v2327_v58 = vrot.slane %v8835_v19, 2  ;;  %v6815_v32 = vpack.c.bf16 %v2684_v52, %v2682_v45  ;;  %v2694_v52 = vld [vmem:[#allocation5 + $0x768] sm:$0xff] }
 0x22c   : > { %2501 = vmatprep.mubr.f32.mxu1 %v2318_v25  ;;  %6794 = vmatpush1.bf16.msra.mxu1 %v6793_v24  ;;  %v2673_v24 = vld [vmem:[#allocation5 + $0x6c0] sm:$0xff] }
 0x22d   : > { %6796 = vmatprep.subr.bf16.mxu1 %v6795_v22  ;;  %v2675_v22 = vld [vmem:[#allocation5 + $0x6d0] sm:$0xff] }
 0x22e   : > { %v6809_v25 = vpack.c.bf16 %v2675_v22, %v2673_v24 }
 0x22f   : > { %2502 = vmatmul.mubr.f32.gmra.mrb[42].mxu1 %v2316_v41  ;;  %v2328_v41 = vsel %vm1415_vm5, %v2323_v54, %v2327_v58  ;;  %v2688_v54 = vld [vmem:[#allocation5 + $0x738] sm:$0xff] }
 0x230   : > { %2507 = vmatprep.mubr.f32.mxu1 %v2322_v51  ;;  %6798 = vmatpush1.bf16.msra.mxu1 %v6797_v30  ;;  %v2333_v30 = vrot.slane %v8839_v13, 2  ;;  %v8844_v51 = vld [vmem:[#allocation3 + $0x98] sm:$0xff] }
 0x231   : > { %6800 = vmatprep.subr.bf16.mxu1 %v6799_v17  ;;  %v6811_v17 = vpack.c.bf16 %v2680_v27, %v2678_v59  ;;  %v2687_v59 = vld [vmem:[#allocation5 + $0x730] sm:$0xff] }
 0x232   : > { %v2334_v35 = vsel %vm1415_vm5, %v2329_v23, %v2333_v30  ;;  %v2686_v23 = vld [vmem:[#allocation5 + $0x728] sm:$0xff] }
 0x233   : > { %2508 = vmatmul.mubr.f32.gmra.mrb[44].mxu1 %v2320_v56  ;;  %v2681_v56 = vld [vmem:[#allocation5 + $0x700] sm:$0xff]  ;;  %v6819_v22 = vpack.c.bf16 %v2688_v54, %v2686_v23  ;;  %v2347_v23 = vrot.slane %v8675_v0, 2  ;;  %v2698_v54 = vld [vmem:[#allocation5 + $0x788] sm:$0xff] }
 0x234   : > { %2513 = vmatprep.mubr.f32.mxu1 %v2326_v21  ;;  %6802 = vmatpush1.bf16.msra.mxu1 %v6801_v11  ;;  %v2337_v11 = vrot.slane %v8844_v51, 2  ;;  %v2335_v21 = vrot.slane %v8607_v6, 2  ;;  %v6817_v24 = vpack.c.bf16 %v2683_v18, %v2681_v56  ;;  %v2692_v6 = vld [vmem:[#allocation5 + $0x758] sm:$0xff]  ;;  %v2693_v18 = vld [vmem:[#allocation5 + $0x760] sm:$0xff] }
 0x235   : > { %6804 = vmatprep.subr.bf16.mxu1 %v6803_v4  ;;  %v2331_v4 = vrot.slane %v8847_v49, 2 }
 0x237   : > { %2514 = vmatmul.mubr.f32.gmra.mrb[46].mxu1 %v2324_v38  ;;  %v2332_v61 = vsel %vm1415_vm5, %v2327_v58, %v2331_v4  ;;  %v2685_v38 = vld [vmem:[#allocation5 + $0x720] sm:$0xff]  ;;  %v2336_v27 = vsel %vm1415_vm5, %v2331_v4, %v2335_v21  ;;  %v2339_v58 = vrot.slane %v8632_v44, 2  ;;  %v2696_v44 = vld [vmem:[#allocation5 + $0x778] sm:$0xff]  ;;  %v8863_v4 = vld [vmem:[#allocation3 + $0xb0] sm:$0xff] }
 0x238   : > { %2519 = vmatprep.mubr.f32.mxu1 %v2330_v16  ;;  %6806 = vmatpush1.bf16.msra.mxu1 %v6805_v20  ;;  %v2338_v20 = vsel %vm1415_vm5, %v2333_v30, %v2337_v11  ;;  %v2690_v16 = vld [vmem:[#allocation5 + $0x748] sm:$0xff]  ;;  %v6821_v30 = vpack.c.bf16 %v2687_v59, %v2685_v38  ;;  %v6827_v56 = vpack.c.bf16 %v2696_v44, %v2694_v52  ;;  %v2697_v38 = vld [vmem:[#allocation5 + $0x780] sm:$0xff]  ;;  %v2699_v59 = vld [vmem:[#allocation5 + $0x790] sm:$0xff] }
 0x239   : > { %6808 = vmatprep.subr.bf16.mxu1 %v6807_v29  ;;  %v2341_v29 = vrot.slane %v8617_v62, 2  ;;  %v8857_v62 = vld [vmem:[#allocation3 + $0xb8] sm:$0xff]  ;;  %v6823_v10 = vpack.c.bf16 %v2692_v6, %v2690_v16  ;;  %v2340_v45 = vsel %vm1415_vm5, %v2335_v21, %v2339_v58  ;;  %v2702_v16 = vld [vmem:[#allocation5 + $0x7a8] sm:$0xff]  ;;  %v2357_v6 = vrot.slane %v8706_v5, 2 }
 0x23a   : > { %v2706_v52 = vld [vmem:[#allocation5 + $0x7c8] sm:$0xff]  ;;  %v2708_v44 = vld [vmem:[#allocation5 + $0x7d8] sm:$0xff] }
 0x23b   : > { %2520 = vmatmul.mubr.f32.gmra.mrb[48].mxu1 %v2328_v41  ;;  %v2691_v41 = vld [vmem:[#allocation5 + $0x750] sm:$0xff] }
 0x23c   : > { %2525 = vmatprep.mubr.f32.mxu1 %v2334_v35  ;;  %6810 = vmatpush1.bf16.msra.mxu1 %v6809_v25  ;;  %v2342_v25 = vsel %vm1415_vm5, %v2337_v11, %v2341_v29  ;;  %v2349_v11 = vrot.slane %v8668_v55, 2 }
 0x23d   : > { %6812 = vmatprep.subr.bf16.mxu1 %v6811_v17  ;;  %v2345_v17 = vrot.slane %v8857_v62, 2 }
 0x23f   : > { %2526 = vmatmul.mubr.f32.gmra.mrb[50].mxu1 %v2332_v61  ;;  %v2346_v35 = vsel %vm1415_vm5, %v2341_v29, %v2345_v17  ;;  %v2695_v61 = vld [vmem:[#allocation5 + $0x770] sm:$0xff]  ;;  %v2350_v55 = vsel %vm1415_vm5, %v2345_v17, %v2349_v11 }
 0x240   : > { %2531 = vmatprep.mubr.f32.mxu1 %v2338_v20  ;;  %6814 = vmatpush1.bf16.msra.mxu1 %v6813_v53  ;;  %v2343_v53 = vrot.slane %v8863_v4, 2  ;;  %v2700_v20 = vld [vmem:[#allocation5 + $0x798] sm:$0xff]  ;;  %v6829_v29 = vpack.c.bf16 %v2695_v61, %v2693_v18  ;;  %v2359_v61 = vrot.slane %v8724_v7, 2 }
 0x241   : > { %6816 = vmatprep.subr.bf16.mxu1 %v6815_v32  ;;  %v6825_v32 = vpack.c.bf16 %v2691_v41, %v2689_v1  ;;  %v2703_v1 = vld [vmem:[#allocation5 + $0x7b0] sm:$0xff] }
 0x242   : > { %v2344_v21 = vsel %vm1415_vm5, %v2339_v58, %v2343_v53  ;;  %v2704_v58 = vld [vmem:[#allocation5 + $0x7b8] sm:$0xff] }
 0x243   : > { %2532 = vmatmul.mubr.f32.gmra.mrb[52].mxu1 %v2336_v27  ;;  %v2348_v27 = vsel %vm1415_vm5, %v2343_v53, %v2347_v23  ;;  %v6835_v17 = vpack.c.bf16 %v2704_v58, %v2702_v16  ;;  %v6839_v53 = vpack.c.bf16 %v2708_v44, %v2706_v52  ;;  %v2645_v52 = vld [vmem:[#allocation3 + $0x8] sm:$0xf8] }
 0x244   : > { %2537 = vmatprep.mubr.f32.mxu1 %v2342_v25  ;;  %6818 = vmatpush1.bf16.msra.mxu1 %v6817_v24  ;;  %v2353_v24 = vrot.slane %v8653_v26, 2  ;;  %v8873_v25 = vld [vmem:[#allocation3 + $0xd0] sm:$0xff]  ;;  %v6833_v26 = vpack.c.bf16 %v2699_v59, %v2697_v38  ;;  %v3069_v38 = vld [vmem:[#allocation5 + $0x818] sm:$0xff]  ;;  %v2369_v59 = vrot.slane %v8729_v63, 2  ;;  %v2721_v44 = vrot.slane %v2645_v52, 3 }
 0x245   : > { %6820 = vmatprep.subr.bf16.mxu1 %v6819_v22  ;;  %v6831_v22 = vpack.c.bf16 %v2700_v20, %v2698_v54  ;;  %v2736_v52 = vrot.slane %v8819_v57, 3 }
 0x246   : > { %v2354_v0 = vsel %vm1415_vm5, %v2349_v11, %v2353_v24  ;;  %v2358_v5 = vsel %vm1415_vm5, %v2353_v24, %v2357_v6 }
 0x247   : > { %2538 = vmatmul.mubr.f32.gmra.mrb[54].mxu1 %v2340_v45  ;;  %v2355_v45 = vrot.slane %v8713_v60, 2  ;;  %v2712_v60 = vld [vmem:[#allocation5 + $0x7f8] sm:$0xff] }
 0x248   : > { %2543 = vmatprep.mubr.f32.mxu1 %v2346_v35  ;;  %6822 = vmatpush1.bf16.msra.mxu1 %v6821_v30  ;;  %v2351_v30 = vrot.slane %v8873_v25, 2  ;;  %v2361_v35 = vrot.slane %v8720_v12, 2  ;;  %v2365_v12 = vrot.slane %v8698_v50, 2 }
 0x249   : > { %6824 = vmatprep.subr.bf16.mxu1 %v6823_v10  ;;  %v2701_v10 = vld [vmem:[#allocation5 + $0x7a0] sm:$0xff]  ;;  %v2360_v24 = vsel %vm1415_vm5, %v2355_v45, %v2359_v61 }
 0x24a   : > { %v2352_v41 = vsel %vm1415_vm5, %v2347_v23, %v2351_v30  ;;  %v6837_v11 = vpack.c.bf16 %v2703_v1, %v2701_v10  ;;  %v2356_v18 = vsel %vm1415_vm5, %v2351_v30, %v2355_v45  ;;  %v2362_v23 = vsel %vm1415_vm5, %v2357_v6, %v2361_v35  ;;  %v2231_v30 = vld [vmem:[#allocation3 + $0x138] sm:$0x3f]  ;;  %v2230_v10 = vld [vmem:[#allocation3 + $0x130] sm:$0x3f] }
 0x24b   : > { %2544 = vmatmul.mubr.f32.gmra.mrb[56].mxu1 %v2344_v21  ;;  %v2710_v21 = vld [vmem:[#allocation5 + $0x7e8] sm:$0xff]  ;;  %v2366_v7 = vsel %vm1415_vm5, %v2361_v35, %v2365_v12  ;;  %v2370_v6 = vsel %vm1415_vm5, %v2365_v12, %v2369_v59  ;;  %v2371_v1 = vrot.slane %v8692_v3, 2  ;;  %v2722_v35 = vrot.slane %v8784_v9, 3  ;;  %v3072_v12 = vld [vmem:[#allocation5 + $0x830] sm:$0xff] }
 0x24c   : > { %2549 = vmatprep.mubr.f32.mxu1 %v2350_v55  ;;  %6826 = vmatpush1.bf16.msra.mxu1 %v6825_v32  ;;  %v2705_v32 = vld [vmem:[#allocation5 + $0x7c0] sm:$0xff]  ;;  %v6843_v20 = vpack.c.bf16 %v2712_v60, %v2710_v21  ;;  %v2719_v21 = vrot.slane %v8791_v14, 3  ;;  %v2724_v9 = vrot.slane %v8795_v28, 3 }
 0x24d   : > { %6828 = vmatprep.subr.bf16.mxu1 %v6827_v56  ;;  %v2707_v56 = vld [vmem:[#allocation5 + $0x7d0] sm:$0xff]  ;;  %v2709_v55 = vld [vmem:[#allocation5 + $0x7e0] sm:$0xff] }
 0x24e   : > { %v6841_v54 = vpack.c.bf16 %v2707_v56, %v2705_v32  ;;  %v3071_v32 = vld [vmem:[#allocation5 + $0x828] sm:$0xff]  ;;  %v3073_v56 = vld [vmem:[#allocation5 + $0x838] sm:$0xff] }
 0x24f   : > { %2550 = vmatmul.mubr.f32.gmra.mrb[58].mxu1 %v2348_v27  ;;  %v2363_v27 = vrot.slane %v8690_v36, 2 }
 0x250   : > { %2555 = vmatprep.mubr.f32.mxu1 %v2354_v0  ;;  %6830 = vmatpush1.bf16.msra.mxu1 %v6829_v29  ;;  %v2711_v29 = vld [vmem:[#allocation5 + $0x7f0] sm:$0xff]  ;;  %v2367_v0 = vrot.slane %v8735_v48, 2 }
 0x251   : > { %6832 = vmatprep.subr.bf16.mxu1 %v6831_v22  ;;  %v3067_v22 = vld [vmem:[#allocation5 + $0x808] sm:$0xff]  ;;  %v6845_v16 = vpack.c.bf16 %v2711_v29, %v2709_v55  ;;  %v2364_v58 = vsel %vm1415_vm5, %v2359_v61, %v2363_v27  ;;  %v2726_v61 = vrot.slane %v8788_v43, 3  ;;  %v3077_v29 = vld [vmem:[#allocation5 + $0x858] sm:$0xff]  ;;  %v2730_v43 = vrot.slane %v8799_v15, 3 }
 0x252   : > { %v6847_v50 = vpack.c.bf16 %v3069_v38, %v3067_v22  ;;  %v2368_v63 = vsel %vm1415_vm5, %v2363_v27, %v2367_v0  ;;  %v2372_v48 = vsel %vm1415_vm5, %v2367_v0, %v2371_v1  ;;  %v3075_v55 = vld [vmem:[#allocation5 + $0x848] sm:$0xff]  ;;  %v3074_v38 = vld [vmem:[#allocation5 + $0x840] sm:$0xff] }
 0x253   : > { %2556 = vmatmul.mubr.f32.gmra.mrb[60].mxu1 %v2352_v41  ;;  %v2375_v41 = vrot.slane %v2230_v10, 2  ;;  %v6855_v14 = vpack.c.bf16 %v3077_v29, %v3075_v55  ;;  %v3079_v27 = vld [vmem:[#allocation5 + $0x868] sm:$0xff]  ;;  %v2731_v28 = vsel %vm2717_vm6, %v2726_v61, %v2730_v43 }
 0x254   : > { %2561 = vmatprep.mubr.f32.mxu1 %v2358_v5  ;;  %6834 = vmatpush1.bf16.msra.mxu1 %v6833_v26  ;;  %v2373_v26 = vrot.slane %v8700_v2, 2  ;;  %v2644_v5 = vld [vmem:[#allocation3] sm:$0xf8] }
 0x255   : > { %6836 = vmatprep.subr.bf16.mxu1 %v6835_v17  ;;  %v2377_v17 = vrot.slane %v2231_v30, 2  ;;  %v2376_v2 = vsel %vm1415_vm5, %v2371_v1, %v2375_v41  ;;  %v2718_v3 = vrot.slane %v2644_v5, 3  ;;  %v3080_v30 = vld [vmem:[#allocation5 + $0x870] sm:$0xff] }
 0x256   : > { %v2374_v36 = vsel %vm1415_vm5, %v2369_v59, %v2373_v26  ;;  %v2725_v59 = vsel %vm2717_vm6, %v2719_v21, %v2724_v9 }
 0x257   : > { %2562 = vmatmul.mubr.f32.gmra.mrb[62].mxu1 %v2356_v18  ;;  %v2378_v45 = vsel %vm1415_vm5, %v2373_v26, %v2377_v17  ;;  %v2723_v18 = vsel %vm2717_vm6, %v2721_v44, %v2722_v35 }
 0x258   : > { %2567 = vmatprep.mubr.f32.mxu1 %v2362_v23  ;;  %6838 = vmatpush1.bf16.msra.mxu1 %v6837_v11  ;;  %v3066_v11 = vld [vmem:[#allocation5 + $0x800] sm:$0xff]  ;;  %v6851_v23 = vpack.c.bf16 %v3073_v56, %v3071_v32  ;;  %v3091_v32 = vld [vmem:[#allocation5 + $0x8c8] sm:$0xff]  ;;  %v3093_v56 = vld [vmem:[#allocation5 + $0x8d8] sm:$0xff] }
 0x259   : > { %6840 = vmatprep.subr.bf16.mxu1 %v6839_v53  ;;  %v3068_v53 = vld [vmem:[#allocation5 + $0x810] sm:$0xff] }
 0x25a   : > { %v6849_v60 = vpack.c.bf16 %v3068_v53, %v3066_v11  ;;  %v3086_v11 = vld [vmem:[#allocation5 + $0x8a0] sm:$0xff]  ;;  %v3088_v53 = vld [vmem:[#allocation5 + $0x8b0] sm:$0xff] }
 0x25b   : > { %2568 = vmatmul.mubr.f32.gmra.mrb[64].mxu1 %v2360_v24  ;;  %v2727_v24 = vsel %vm2717_vm6, %v2722_v35, %v2726_v61  ;;  %v2740_v61 = vrot.slane %v8831_v8, 3  ;;  %v2750_v8 = vrot.slane %v8839_v13, 3 }
 0x25c   : > { %2573 = vmatprep.mubr.f32.mxu1 %v2366_v7  ;;  %6842 = vmatpush1.bf16.msra.mxu1 %v6841_v54  ;;  %v3070_v54 = vld [vmem:[#allocation5 + $0x820] sm:$0xff]  ;;  %v3076_v7 = vld [vmem:[#allocation5 + $0x850] sm:$0xff] }
 0x25d   : > { %6844 = vmatprep.subr.bf16.mxu1 %v6843_v20  ;;  %v2720_v20 = vsel %vm2717_vm6, %v2718_v3, %v2719_v21  ;;  %v6853_v22 = vpack.c.bf16 %v3072_v12, %v3070_v54  ;;  %v6857_v0 = vpack.c.bf16 %v3076_v7, %v3074_v38  ;;  %v6869_v21 = vpack.c.bf16 %v3088_v53, %v3086_v11  ;;  %v3101_v38 = vld [vmem:[#allocation5 + $0x918] sm:$0xff] }
 0x25e   : > { %v2741_v54 = vsel %vm2717_vm6, %v2736_v52, %v2740_v61  ;;  %v2744_v12 = vrot.slane %v8835_v19, 3  ;;  %v2754_v7 = vrot.slane %v8844_v51, 3  ;;  %v3109_v53 = vld [vmem:[#allocation5 + $0x958] sm:$0xff] }
 0x25f   : > { %2574 = vmatmul.mubr.f32.gmra.mrb[66].mxu1 %v2364_v58  ;;  %v2728_v58 = vrot.slane %v8807_v33, 3 }
 0x260   : > { %2579 = vmatprep.mubr.f32.mxu1 %v2370_v6  ;;  %6846 = vmatpush1.bf16.msra.mxu1 %v6845_v16  ;;  %v3081_v16 = vld [vmem:[#allocation5 + $0x878] sm:$0xff]  ;;  %v3078_v6 = vld [vmem:[#allocation5 + $0x860] sm:$0xff]  ;;  %v2755_v51 = vsel %vm2717_vm6, %v2750_v8, %v2754_v7 }
 0x261   : > { %6848 = vmatprep.subr.bf16.mxu1 %v6847_v50  ;;  %v2734_v50 = vrot.slane %v8804_v40, 3  ;;  %v6859_v15 = vpack.c.bf16 %v3081_v16, %v3079_v27  ;;  %v2729_v26 = vsel %vm2717_vm6, %v2724_v9, %v2728_v58  ;;  %v2738_v40 = vrot.slane %v8815_v47, 3  ;;  %v3097_v9 = vld [vmem:[#allocation5 + $0x8f8] sm:$0xff]  ;;  %v3098_v16 = vld [vmem:[#allocation5 + $0x900] sm:$0xff] }
 0x262   : > { %v6861_v1 = vpack.c.bf16 %v3080_v30, %v3078_v6  ;;  %v2742_v47 = vrot.slane %v8823_v46, 3  ;;  %v6871_v46 = vpack.c.bf16 %v3093_v56, %v3091_v32  ;;  %v3105_v6 = vld [vmem:[#allocation5 + $0x938] sm:$0xff]  ;;  %v8935_v30 = vld [vmem:[#allocation3 + $0xa8] sm:$0xff] }
 0x263   : > { %2580 = vmatmul.mubr.f32.gmra.mrb[68].mxu1 %v2368_v63  ;;  %v2732_v63 = vrot.slane %v8811_v42, 3  ;;  %v2735_v10 = vsel %vm2717_vm6, %v2730_v43, %v2734_v50  ;;  %v3089_v42 = vld [vmem:[#allocation5 + $0x8b8] sm:$0xff]  ;;  %v2739_v44 = vsel %vm2717_vm6, %v2734_v50, %v2738_v40  ;;  %v2745_v43 = vsel %vm2717_vm6, %v2740_v61, %v2744_v12  ;;  %v6231_v61 = vld [vmem:[%s11570_s5 + $0x480] sm:$0xff] }
 0x264   : > { %2585 = vmatprep.mubr.f32.mxu1 %v2374_v36  ;;  %v3083_v36 = vld [vmem:[#allocation5 + $0x888] sm:$0xff]  ;;  %v2743_v57 = vsel %vm2717_vm6, %v2738_v40, %v2742_v47  ;;  %v6236_v32 = vld [vmem:[%s11570_s5 + $0x4a8] sm:$0xff] }
 0x265   : > { %v2737_v3 = vsel %vm2717_vm6, %v2732_v63, %v2736_v52  ;;  %v3107_v52 = vld [vmem:[#allocation5 + $0x948] sm:$0xff] }
 0x267   : > { %2586 = vmatmul.mubr.f32.gmra.mrb[70].mxu1 %v2372_v48  ;;  %v3082_v48 = vld [vmem:[#allocation5 + $0x880] sm:$0xff] }
 0x268   : > { %2591 = vmatprep.mubr.f32.mxu1 %v2378_v45  ;;  %v2733_v45 = vsel %vm2717_vm6, %v2728_v58, %v2732_v63  ;;  %v8931_v58 = vld [vmem:[#allocation3 + $0x90] sm:$0xff] }
 0x269   : > { %v3104_v63 = vld [vmem:[#allocation5 + $0x930] sm:$0xff] }
 0x26b   : > { %2592 = vmatmul.mubr.f32.gmra.mrb[72].mxu1 %v2376_v2  ;;  %v3087_v2 = vld [vmem:[#allocation5 + $0x8a8] sm:$0xff] }
 0x26c   : > { %2597 = vmatprep.mubr.f32.mxu1 %v2377_v17  ;;  %v3085_v17 = vld [vmem:[#allocation5 + $0x898] sm:$0xff]  ;;  %v6867_v35 = vpack.c.bf16 %v3089_v42, %v3087_v2 }
 0x26d   : > { %v6863_v33 = vpack.c.bf16 %v3085_v17, %v3083_v36  ;;  %v6216_v36 = vld [vmem:[%s11570_s5 + $0x408] sm:$0xff] }
 0x26e   : > { %v6220_v17 = vld [vmem:[%s11570_s5 + $0x428] sm:$0xff] }
 0x26f   : > { %2598 = vmatmul.mubr.f32.gmra.mrb[74].mxu1 %v2375_v41  ;;  %v3084_v41 = vld [vmem:[#allocation5 + $0x890] sm:$0xff] }
 0x270   : > { %2900 = vmatprep.mubr.f32.mxu1 %v2723_v18  ;;  %v6865_v5 = vpack.c.bf16 %v3084_v41, %v3082_v48  ;;  %v2746_v18 = vrot.slane %v8828_v39, 3  ;;  %v6224_v48 = vld [vmem:[%s11570_s5 + $0x448] sm:$0xff] }
 0x271   : > { %v6228_v41 = vld [vmem:[%s11570_s5 + $0x468] sm:$0xff] }
 0x272   : > { %v2747_v55 = vsel %vm2717_vm6, %v2742_v47, %v2746_v18  ;;  %v2751_v19 = vsel %vm2717_vm6, %v2746_v18, %v2750_v8  ;;  %v6915_v42 = vpack.c.bf16 %v6228_v41, %v6224_v48  ;;  %v6244_v8 = vld [vmem:[%s11570_s5 + $0x4e8] sm:$0xff]  ;;  %v3119_v48 = vld [vmem:[#allocation5 + $0x9a8] sm:$0xff] }
 0x273   : > { %2901 = vmatmul.mubr.f32.vlgmr.msra.gmra.mrb[36].mxu1 %v2720_v20  ;;  %v3095_v20 = vld [vmem:[#allocation5 + $0x8e8] sm:$0xff] }
 0x274   : > { %2906 = vmatprep.mubr.f32.mxu1 %v2727_v24  ;;  %6850 = vmatpush1.bf16.msra.mxu1 %v6849_v60  ;;  %v3090_v60 = vld [vmem:[#allocation5 + $0x8c0] sm:$0xff]  ;;  %v6875_v29 = vpack.c.bf16 %v3097_v9, %v3095_v20 }
 0x275   : > { %6852 = vmatprep.subr.bf16.mxu1 %v6851_v23  ;;  %v3092_v23 = vld [vmem:[#allocation5 + $0x8d0] sm:$0xff]  ;;  %v3094_v24 = vld [vmem:[#allocation5 + $0x8e0] sm:$0xff] }
 0x276   : > { %v6873_v39 = vpack.c.bf16 %v3092_v23, %v3090_v60  ;;  %v6887_v60 = vpack.c.bf16 %v3109_v53, %v3107_v52  ;;  %v3106_v23 = vld [vmem:[#allocation5 + $0x940] sm:$0xff]  ;;  %v3121_v52 = vld [vmem:[#allocation5 + $0x9b8] sm:$0xff]  ;;  %v2768_v53 = vrot.slane %v8873_v25, 3 }
 0x277   : > { %2907 = vmatmul.mubr.f32.gmra.mrb[38].mxu1 %v2725_v59  ;;  %v2748_v59 = vrot.slane %v8847_v49, 3  ;;  %v2758_v49 = vrot.slane %v8935_v30, 3 }
 0x278   : > { %2912 = vmatprep.mubr.f32.mxu1 %v2731_v28  ;;  %6854 = vmatpush1.bf16.msra.mxu1 %v6853_v22  ;;  %v3096_v22 = vld [vmem:[#allocation5 + $0x8f0] sm:$0xff] }
 0x279   : > { %6856 = vmatprep.subr.bf16.mxu1 %v6855_v14  ;;  %v3099_v14 = vld [vmem:[#allocation5 + $0x908] sm:$0xff]  ;;  %v6877_v27 = vpack.c.bf16 %v3096_v22, %v3094_v24  ;;  %v3100_v28 = vld [vmem:[#allocation5 + $0x910] sm:$0xff]  ;;  %v2749_v50 = vsel %vm2717_vm6, %v2744_v12, %v2748_v59  ;;  %v2759_v56 = vsel %vm2717_vm6, %v2754_v7, %v2758_v49 }
 0x27a   : > { %v6879_v13 = vpack.c.bf16 %v3101_v38, %v3099_v14  ;;  %v6881_v40 = vpack.c.bf16 %v3100_v28, %v3098_v16  ;;  %v3111_v12 = vld [vmem:[#allocation5 + $0x968] sm:$0xff]  ;;  %v6239_v38 = vld [vmem:[%s11570_s5 + $0x4c0] sm:$0xff] }
 0x27b   : > { %2913 = vmatmul.mubr.f32.gmra.mrb[40].mxu1 %v2729_v26  ;;  %v3102_v26 = vld [vmem:[#allocation5 + $0x920] sm:$0xff] }
 0x27c   : > { %2918 = vmatprep.mubr.f32.mxu1 %v2735_v10  ;;  %6858 = vmatpush1.bf16.msra.mxu1 %v6857_v0  ;;  %v2752_v0 = vrot.slane %v8931_v58, 3  ;;  %v6215_v10 = vld [vmem:[%s11570_s5 + $0x400] sm:$0xff]  ;;  %v6885_v18 = vpack.c.bf16 %v3104_v63, %v3102_v26 }
 0x27d   : > { %6860 = vmatprep.subr.bf16.mxu1 %v6859_v15  ;;  %v3103_v15 = vld [vmem:[#allocation5 + $0x928] sm:$0xff]  ;;  %v6247_v63 = vld [vmem:[%s11570_s5 + $0x500] sm:$0xff] }
 0x27e   : > { %v2753_v47 = vsel %vm2717_vm6, %v2748_v59, %v2752_v0  ;;  %v3110_v59 = vld [vmem:[#allocation5 + $0x960] sm:$0xff] }
 0x27f   : > { %2919 = vmatmul.mubr.f32.gmra.mrb[42].mxu1 %v2733_v45  ;;  %v6883_v45 = vpack.c.bf16 %v3105_v6, %v3103_v15  ;;  %v6248_v15 = vld [vmem:[%s11570_s5 + $0x508] sm:$0xff] }
 0x280   : > { %2924 = vmatprep.mubr.f32.mxu1 %v2739_v44  ;;  %6862 = vmatpush1.bf16.msra.mxu1 %v6861_v1  ;;  %v6911_v1 = vpack.c.bf16 %v6220_v17, %v6216_v36  ;;  %v6223_v44 = vld [vmem:[%s11570_s5 + $0x440] sm:$0xff]  ;;  %v6252_v6 = vld [vmem:[%s11570_s5 + $0x528] sm:$0xff] }
 0x281   : > { %6864 = vmatprep.subr.bf16.mxu1 %v6863_v33  ;;  %v6219_v33 = vld [vmem:[%s11570_s5 + $0x420] sm:$0xff]  ;;  %v9015_v17 = vld [vmem:[#allocation3 + $0xd8] sm:$0xff]  ;;  %v6927_v41 = vpack.c.bf16 %v6252_v6, %v6248_v15 }
 0x282   : > { %v6913_v2 = vpack.c.bf16 %v6219_v33, %v6215_v10  ;;  %6912 = vmatprep.subr.bf16.mxu0 %v6911_v1  ;;  %v6251_v36 = vld [vmem:[%s11570_s5 + $0x520] sm:$0xff]  ;;  %v2770_v10 = vrot.slane %v9015_v17, 3  ;;  %v3114_v1 = vld [vmem:[#allocation5 + $0x980] sm:$0xff] }
 0x283   : > { %2925 = vmatmul.mubr.f32.gmra.mrb[44].mxu1 %v2737_v3  ;;  %v6232_v3 = vld [vmem:[%s11570_s5 + $0x488] sm:$0xff]  ;;  %v3116_v33 = vld [vmem:[#allocation5 + $0x990] sm:$0xff] }
 0x284   : > { %2930 = vmatprep.mubr.f32.mxu1 %v2743_v57  ;;  %6866 = vmatpush1.bf16.msra.mxu1 %v6865_v5  ;;  %v6227_v5 = vld [vmem:[%s11570_s5 + $0x460] sm:$0xff]  ;;  %v6919_v20 = vpack.c.bf16 %v6236_v32, %v6232_v3  ;;  %v6897_v3 = vpack.c.bf16 %v3116_v33, %v3114_v1  ;;  %v6346_v33 = vld [vmem:[%s11570_s5 + $0x818] sm:$0xff] }
 0x285   : > { %6868 = vmatprep.subr.bf16.mxu1 %v6867_v35  ;;  %v8963_v35 = vld [vmem:[#allocation3 + $0xa0] sm:$0xff]  ;;  %6914 = vmatpush1.bf16.msra.mxu0 %v6913_v2  ;;  %v6917_v57 = vpack.c.bf16 %v6227_v5, %v6223_v44  ;;  %v6256_v2 = vld [vmem:[%s11570_s5 + $0x548] sm:$0xff]  ;;  %v9026_v5 = vld [vmem:[#allocation3 + $0xe8] sm:$0xff] }
 0x286   : > { %v2756_v11 = vrot.slane %v8963_v35, 3  ;;  %6916 = vmatprep.subr.bf16.mxu0 %v6915_v42  ;;  %v6260_v42 = vld [vmem:[%s11570_s5 + $0x568] sm:$0xff]  ;;  %v6255_v32 = vld [vmem:[%s11570_s5 + $0x540] sm:$0xff] }
 0x287   : > { %2931 = vmatmul.mubr.f32.gmra.mrb[46].mxu1 %v2741_v54  ;;  %v3108_v54 = vld [vmem:[#allocation5 + $0x950] sm:$0xff] }
 0x288   : > { %2936 = vmatprep.mubr.f32.mxu1 %v2747_v55  ;;  %6870 = vmatpush1.bf16.msra.mxu1 %v6869_v21  ;;  %v6235_v21 = vld [vmem:[%s11570_s5 + $0x4a0] sm:$0xff]  ;;  %v2757_v9 = vsel %vm2717_vm6, %v2752_v0, %v2756_v11  ;;  %v3113_v55 = vld [vmem:[#allocation5 + $0x978] sm:$0xff]  ;;  %v6889_v14 = vpack.c.bf16 %v3108_v54, %v3106_v23  ;;  %v9037_v23 = vld [vmem:[#allocation3 + $0xe0] sm:$0xff] }
 0x289   : > { %6872 = vmatprep.subr.bf16.mxu1 %v6871_v46  ;;  %v2762_v46 = vrot.slane %v8857_v62, 3  ;;  %6918 = vmatpush1.bf16.msra.mxu0 %v6917_v57  ;;  %v6921_v22 = vpack.c.bf16 %v6235_v21, %v6231_v61  ;;  %v6891_v7 = vpack.c.bf16 %v3113_v55, %v3111_v12  ;;  %v3117_v0 = vld [vmem:[#allocation5 + $0x998] sm:$0xff]  ;;  %v6899_v57 = vpack.c.bf16 %v3121_v52, %v3119_v48  ;;  %v3120_v61 = vld [vmem:[#allocation5 + $0x9b0] sm:$0xff]  ;;  %v3123_v21 = vld [vmem:[#allocation5 + $0x9c8] sm:$0xff] }
 0x28a   : > { %6920 = vmatprep.subr.bf16.mxu0 %v6919_v20  ;;  %v2772_v54 = vrot.slane %v9037_v23, 3  ;;  %v3125_v12 = vld [vmem:[#allocation5 + $0x9d8] sm:$0xff]  ;;  %v3128_v1 = vld [vmem:[#allocation5 + $0x9f0] sm:$0xff] }
 0x28b   : > { %2937 = vmatmul.mubr.f32.gmra.mrb[48].mxu1 %v2745_v43  ;;  %v2763_v62 = vsel %vm2717_vm6, %v2758_v49, %v2762_v46  ;;  %v2760_v43 = vrot.slane %v8863_v4, 3  ;;  %v8999_v4 = vld [vmem:[#allocation3 + $0xc0] sm:$0xff]  ;;  %v6264_v20 = vld [vmem:[%s11570_s5 + $0x588] sm:$0xff] }
 0x28c   : > { %2942 = vmatprep.mubr.f32.mxu1 %v2751_v19  ;;  %6874 = vmatpush1.bf16.msra.mxu1 %v6873_v39  ;;  %v6240_v39 = vld [vmem:[%s11570_s5 + $0x4c8] sm:$0xff]  ;;  %v6243_v19 = vld [vmem:[%s11570_s5 + $0x4e0] sm:$0xff] }
 0x28d   : > { %6876 = vmatprep.subr.bf16.mxu1 %v6875_v29  ;;  %v8988_v29 = vld [vmem:[#allocation3 + $0xc8] sm:$0xff]  ;;  %v6923_v16 = vpack.c.bf16 %v6244_v8, %v6240_v39  ;;  %v2761_v28 = vsel %vm2717_vm6, %v2756_v11, %v2760_v43  ;;  %6922 = vmatpush1.bf16.msra.mxu0 %v6921_v22  ;;  %v6925_v49 = vpack.c.bf16 %v6243_v19, %v6239_v38  ;;  %v9047_v39 = vld [vmem:[#allocation3 + $0xf8] sm:$0xff]  ;;  %v6263_v22 = vld [vmem:[%s11570_s5 + $0x580] sm:$0xff] }
 0x28e   : > { %v2766_v24 = vrot.slane %v8988_v29, 3  ;;  %v6929_v11 = vpack.c.bf16 %v6251_v36, %v6247_v63  ;;  %v2778_v8 = vrot.slane %v9047_v39, 3  ;;  %v3122_v38 = vld [vmem:[#allocation5 + $0x9c0] sm:$0xff]  ;;  %v3124_v19 = vld [vmem:[#allocation5 + $0x9d0] sm:$0xff]  ;;  %v9073_v63 = vld [vmem:[#allocation3 + $0x108] sm:$0xff] }
 0x28f   : > { %2943 = vmatmul.mubr.f32.gmra.mrb[50].mxu1 %v2749_v50  ;;  %v2764_v50 = vrot.slane %v8999_v4, 3  ;;  %6924 = vmatprep.subr.bf16.mxu0 %v6923_v16  ;;  %v2782_v36 = vrot.slane %v9073_v63, 3  ;;  %v6280_v52 = vld [vmem:[%s11570_s5 + $0x608] sm:$0xff] }
 0x290   : > { %2948 = vmatprep.mubr.f32.mxu1 %v2755_v51  ;;  %6878 = vmatpush1.bf16.msra.mxu1 %v6877_v27  ;;  %v3112_v27 = vld [vmem:[#allocation5 + $0x970] sm:$0xff]  ;;  %v2767_v51 = vsel %vm2717_vm6, %v2762_v46, %v2766_v24  ;;  %v2771_v44 = vsel %vm2717_vm6, %v2766_v24, %v2770_v10  ;;  %v6931_v46 = vpack.c.bf16 %v6260_v42, %v6256_v2  ;;  %v6284_v2 = vld [vmem:[%s11570_s5 + $0x628] sm:$0xff] }
 0x291   : > { %6880 = vmatprep.subr.bf16.mxu1 %v6879_v13  ;;  %v3115_v13 = vld [vmem:[#allocation5 + $0x988] sm:$0xff]  ;;  %v6893_v26 = vpack.c.bf16 %v3112_v27, %v3110_v59  ;;  %6926 = vmatpush1.bf16.msra.mxu0 %v6925_v49  ;;  %v2773_v27 = vsel %vm2717_vm6, %v2768_v53, %v2772_v54  ;;  %v6271_v49 = vld [vmem:[%s11570_s5 + $0x5c0] sm:$0xff]  ;;  %v2783_v42 = vsel %vm2717_vm6, %v2778_v8, %v2782_v36 }
 0x292   : > { %6928 = vmatprep.subr.bf16.mxu0 %v6927_v41 }
 0x293   : > { %2949 = vmatmul.mubr.f32.gmra.mrb[52].mxu1 %v2753_v47  ;;  %v2774_v47 = vrot.slane %v9026_v5, 3 }
 0x294   : > { %2954 = vmatprep.mubr.f32.mxu1 %v2759_v56  ;;  %6882 = vmatpush1.bf16.msra.mxu1 %v6881_v40  ;;  %v6895_v40 = vpack.c.bf16 %v3117_v0, %v3115_v13  ;;  %v6259_v56 = vld [vmem:[%s11570_s5 + $0x560] sm:$0xff]  ;;  %v6276_v0 = vld [vmem:[%s11570_s5 + $0x5e8] sm:$0xff] }
 0x295   : > { %6884 = vmatprep.subr.bf16.mxu1 %v6883_v45  ;;  %v2765_v45 = vsel %vm2717_vm6, %v2760_v43, %v2764_v50  ;;  %v2775_v55 = vsel %vm2717_vm6, %v2770_v10, %v2774_v47  ;;  %6930 = vmatpush1.bf16.msra.mxu0 %v6929_v11  ;;  %v6267_v43 = vld [vmem:[%s11570_s5 + $0x5a0] sm:$0xff]  ;;  %v2779_v15 = vsel %vm2717_vm6, %v2774_v47, %v2778_v8 }
 0x296   : > { %6932 = vmatprep.subr.bf16.mxu0 %v6931_v46  ;;  %v9057_v13 = vld [vmem:[#allocation3 + $0xf0] sm:$0xff]  ;;  %v6937_v6 = vpack.c.bf16 %v6267_v43, %v6263_v22  ;;  %v6292_v46 = vld [vmem:[%s11570_s5 + $0x668] sm:$0xff]  ;;  %v9121_v22 = vld [vmem:[#allocation3 + $0x128] sm:$0xff] }
 0x297   : > { %2955 = vmatmul.mubr.f32.gmra.mrb[54].mxu1 %v2757_v9  ;;  %v6268_v9 = vld [vmem:[%s11570_s5 + $0x5a8] sm:$0xff]  ;;  %v2776_v16 = vrot.slane %v9057_v13, 3  ;;  %v2790_v43 = vrot.slane %v9121_v22, 3 }
 0x298   : > { %2960 = vmatprep.mubr.f32.mxu1 %v2763_v62  ;;  %6886 = vmatpush1.bf16.msra.mxu1 %v6885_v18  ;;  %v3118_v18 = vld [vmem:[#allocation5 + $0x9a0] sm:$0xff]  ;;  %v6933_v62 = vpack.c.bf16 %v6259_v56, %v6255_v32  ;;  %v6935_v59 = vpack.c.bf16 %v6268_v9, %v6264_v20  ;;  %v6279_v56 = vld [vmem:[%s11570_s5 + $0x600] sm:$0xff] }
 0x299   : > { %6888 = vmatprep.subr.bf16.mxu1 %v6887_v60  ;;  %v2769_v60 = vsel %vm2717_vm6, %v2764_v50, %v2768_v53  ;;  %v6901_v24 = vpack.c.bf16 %v3120_v61, %v3118_v18  ;;  %v6272_v50 = vld [vmem:[%s11570_s5 + $0x5c8] sm:$0xff]  ;;  %v2777_v41 = vsel %vm2717_vm6, %v2772_v54, %v2776_v16  ;;  %v9093_v53 = vld [vmem:[#allocation3 + $0x100] sm:$0xff]  ;;  %v6943_v61 = vpack.c.bf16 %v6284_v2, %v6280_v52  ;;  %v9111_v54 = vld [vmem:[#allocation3 + $0x110] sm:$0xff] }
 0x29a   : > { %6934 = vmatpush1.bf16.msra.mxu0 %v6933_v62  ;;  %v6939_v48 = vpack.c.bf16 %v6276_v0, %v6272_v50  ;;  %v6287_v62 = vld [vmem:[%s11570_s5 + $0x640] sm:$0xff] }
 0x29b   : > { %2961 = vmatmul.mubr.f32.gmra.mrb[56].mxu1 %v2761_v28  ;;  %v3129_v28 = vld [vmem:[#allocation5 + $0x9f8] sm:$0xff]  ;;  %6936 = vmatprep.subr.bf16.mxu0 %v6935_v59  ;;  %v7763_v2 = vld [vmem:[#allocation3 + $0x10] sm:$0xff] }
 0x29c   : > { %2966 = vmatprep.mubr.f32.mxu1 %v2767_v51  ;;  %6890 = vmatpush1.bf16.msra.mxu1 %v6889_v14  ;;  %v6903_v14 = vpack.c.bf16 %v3125_v12, %v3123_v21  ;;  %v6905_v51 = vpack.c.bf16 %v3124_v19, %v3122_v38  ;;  %v6288_v21 = vld [vmem:[%s11570_s5 + $0x648] sm:$0xff]  ;;  %v2784_v12 = vrot.slane %v9111_v54, 3 }
 0x29d   : > { %6892 = vmatprep.subr.bf16.mxu1 %v6891_v7  ;;  %v3127_v7 = vld [vmem:[#allocation5 + $0x9e8] sm:$0xff]  ;;  %v6947_v8 = vpack.c.bf16 %v6292_v46, %v6288_v21 }
 0x29e   : > { %v6907_v10 = vpack.c.bf16 %v3129_v28, %v3127_v7  ;;  %6938 = vmatpush1.bf16.msra.mxu0 %v6937_v6  ;;  %v2646_v7 = vld [vmem:[#allocation3 + $0x130] sm:$0x7f]  ;;  %v6362_v21 = vld [vmem:[%s11570_s5 + $0x898] sm:$0xff] }
 0x29f   : > { %2967 = vmatmul.mubr.f32.gmra.mrb[58].mxu1 %v2765_v45  ;;  %v6350_v45 = vld [vmem:[%s11570_s5 + $0x838] sm:$0xff]  ;;  %6940 = vmatprep.subr.bf16.mxu0 %v6939_v48  ;;  %v2792_v50 = vrot.slane %v2646_v7, 3 }
 0x2a0   : > { %2972 = vmatprep.mubr.f32.mxu1 %v2771_v44  ;;  %6894 = vmatpush1.bf16.msra.mxu1 %v6893_v26  ;;  %v6275_v26 = vld [vmem:[%s11570_s5 + $0x5e0] sm:$0xff]  ;;  %v9090_v44 = vld [vmem:[#allocation3 + $0x118] sm:$0xff]  ;;  %v9102_v18 = vpack.c.bf16 %v6350_v45, %v6346_v33  ;;  %v6354_v33 = vld [vmem:[%s11570_s5 + $0x858] sm:$0xff] }
 0x2a1   : > { %6896 = vmatprep.subr.bf16.mxu1 %v6895_v40  ;;  %v3126_v40 = vld [vmem:[#allocation5 + $0x9e0] sm:$0xff]  ;;  %v2786_v47 = vrot.slane %v9090_v44, 3  ;;  %v6941_v11 = vpack.c.bf16 %v6275_v26, %v6271_v49  ;;  %v7761_v26 = vld [vmem:[#allocation3 + $0x18] sm:$0xff]  ;;  %v6358_v48 = vld [vmem:[%s11570_s5 + $0x878] sm:$0xff] }
 0x2a2   : > { %v6909_v32 = vpack.c.bf16 %v3128_v1, %v3126_v40  ;;  %v3061_v49 = vld [vmem:[#allocation3] sm:$0xf0]  ;;  %v7762_v45 = vld [vmem:[#allocation3 + $0x28] sm:$0xff] }
 0x2a3   : > { %2973 = vmatmul.mubr.f32.gmra.mrb[60].mxu1 %v2769_v60  ;;  %v2787_v20 = vsel %vm2717_vm6, %v2782_v36, %v2786_v47  ;;  %6942 = vmatpush1.bf16.msra.mxu0 %v6941_v11  ;;  %v2791_v38 = vsel %vm2717_vm6, %v2786_v47, %v2790_v43  ;;  %v3138_v36 = vrot.slane %v7761_v26, 4  ;;  %v6349_v40 = vld [vmem:[%s11570_s5 + $0x830] sm:$0xff]  ;;  %v3134_v1 = vrot.slane %v3061_v49, 4  ;;  %v6366_v46 = vld [vmem:[%s11570_s5 + $0x8b8] sm:$0xff] }
 0x2a4   : > { %2978 = vmatprep.mubr.f32.mxu1 %v2775_v55  ;;  %6898 = vmatpush1.bf16.msra.mxu1 %v6897_v3  ;;  %v2780_v3 = vrot.slane %v9093_v53, 3  ;;  %v2647_v55 = vld [vmem:[#allocation3 + $0x138] sm:$0x7f]  ;;  %v3142_v52 = vrot.slane %v7762_v45, 4  ;;  %v9148_v11 = vpack.c.bf16 %v6358_v48, %v6354_v33  ;;  %v7770_v33 = vld [vmem:[#allocation3 + $0x50] sm:$0xff]  ;;  %v7771_v45 = vld [vmem:[#allocation3 + $0x68] sm:$0xff] }
 0x2a5   : > { %6900 = vmatprep.subr.bf16.mxu1 %v6899_v57  ;;  %v6283_v57 = vld [vmem:[%s11570_s5 + $0x620] sm:$0xff]  ;;  %6944 = vmatprep.subr.bf16.mxu0 %v6943_v61  ;;  %v2794_v19 = vrot.slane %v2647_v55, 3  ;;  %v9168_v55 = vpack.c.bf16 %v6366_v46, %v6362_v21  ;;  %v3152_v48 = vrot.slane %v7770_v33, 4 }
 0x2a6   : > { %v2781_v60 = vsel %vm2717_vm6, %v2776_v16, %v2780_v3  ;;  %v6945_v9 = vpack.c.bf16 %v6283_v57, %v6279_v56  ;;  %v7764_v57 = vld [vmem:[#allocation3 + $0x20] sm:$0xff]  ;;  %v7774_v21 = vld [vmem:[#allocation3 + $0x70] sm:$0xff] }
 0x2a7   : > { %2979 = vmatmul.mubr.f32.gmra.mrb[62].mxu1 %v2773_v27  ;;  %v9127_v27 = vld [vmem:[#allocation3 + $0x120] sm:$0xff]  ;;  %v2795_v0 = vsel %vm2717_vm6, %v2790_v43, %v2794_v19  ;;  %v3140_v61 = vrot.slane %v7764_v57, 4  ;;  %11659 = vst [vmem:[#allocation12_spill] sm:$0xff] %v9168_v55  ;;  %v6370_v43 = vld [vmem:[%s11570_s5 + $0x8d8] sm:$0xff]  ;;  %v3160_v46 = vrot.slane %v7774_v21, 4 }
 0x2a8   : > { %2984 = vmatprep.mubr.f32.mxu1 %v2779_v15  ;;  %6902 = vmatpush1.bf16.msra.mxu1 %v6901_v24  ;;  %v6291_v24 = vld [vmem:[%s11570_s5 + $0x660] sm:$0xff]  ;;  %v2788_v16 = vrot.slane %v9127_v27, 3  ;;  %v3062_v15 = vld [vmem:[#allocation3 + $0x8] sm:$0xf0] }
 0x2a9   : > { %6904 = vmatprep.subr.bf16.mxu1 %v6903_v14  ;;  %v2785_v14 = vsel %vm2717_vm6, %v2780_v3, %v2784_v12  ;;  %6946 = vmatpush1.bf16.msra.mxu0 %v6945_v9  ;;  %v6949_v59 = vpack.c.bf16 %v6291_v24, %v6287_v62  ;;  %v6353_v3 = vld [vmem:[%s11570_s5 + $0x850] sm:$0xff] }
 0x2aa   : > { %6948 = vmatprep.subr.bf16.mxu0 %v6947_v8  ;;  %v2789_v28 = vsel %vm2717_vm6, %v2784_v12, %v2788_v16  ;;  %v2793_v6 = vsel %vm2717_vm6, %v2788_v16, %v2792_v50  ;;  %v6361_v8 = vld [vmem:[%s11570_s5 + $0x890] sm:$0xff] }
 0x2ab   : > { %2985 = vmatmul.mubr.f32.gmra.mrb[64].mxu1 %v2777_v41  ;;  %v6365_v62 = vld [vmem:[%s11570_s5 + $0x8b0] sm:$0xff] }
 0x2ac   : > { %2990 = vmatprep.mubr.f32.mxu1 %v2783_v42  ;;  %6906 = vmatpush1.bf16.msra.mxu1 %v6905_v51  ;;  %v3137_v51 = vrot.slane %v3062_v15, 4  ;;  %v3135_v42 = vrot.slane %v7763_v2, 4  ;;  %v6373_v15 = vld [vmem:[%s11570_s5 + $0x8f0] sm:$0xff] }
 0x2ad   : > { %6908 = vmatprep.subr.bf16.mxu1 %v6907_v10  ;;  %6950 = vmatpush1.bf16.msra.mxu0 %v6949_v59  ;;  %v6345_v10 = vld [vmem:[%s11570_s5 + $0x810] sm:$0xff]  ;;  %v7767_v59 = vld [vmem:[#allocation3 + $0x30] sm:$0xff] }
 0x2ae   : > { %v3139_v41 = vsel %vm1388_vm3, %v3137_v51, %v3138_v36  ;;  %v9146_v47 = vpack.c.bf16 %v6349_v40, %v6345_v10  ;;  %v3136_v56 = vsel %vm1388_vm3, %v3134_v1, %v3135_v42  ;;  %v3141_v24 = vsel %vm1388_vm3, %v3135_v42, %v3140_v61  ;;  %v7768_v51 = vld [vmem:[#allocation3 + $0x40] sm:$0xff] }
 0x2af   : > { %2991 = vmatmul.mubr.f32.gmra.mrb[66].mxu1 %v2781_v60  ;;  %v3143_v60 = vsel %vm1388_vm3, %v3138_v36, %v3142_v52  ;;  %v3144_v16 = vrot.slane %v7767_v59, 4  ;;  %v3148_v49 = vrot.slane %v7768_v51, 4  ;;  %v7769_v36 = vld [vmem:[#allocation3 + $0x58] sm:$0xff] }
 0x2b0   : > { %2996 = vmatprep.mubr.f32.mxu1 %v2787_v20  ;;  %6910 = vmatpush1.bf16.msra.mxu1 %v6909_v32  ;;  %v6357_v32 = vld [vmem:[%s11570_s5 + $0x870] sm:$0xff]  ;;  %v7765_v20 = vld [vmem:[#allocation3 + $0x38] sm:$0xff]  ;;  %v3154_v10 = vrot.slane %v7769_v36, 4  ;;  %v3182_v36 = vrot.slane %v8988_v29, 4  ;;  %v3190_v29 = vrot.slane %v9026_v5, 4 }
 0x2b1   : > { %7295 = vmatprep.subr.bf16.mxu1 %v9102_v18  ;;  %v9165_v12 = vpack.c.bf16 %v6357_v32, %v6353_v3  ;;  %v3146_v9 = vrot.slane %v7765_v20, 4  ;;  %v3149_v1 = vsel %vm1388_vm3, %v3144_v16, %v3148_v49  ;;  %v3153_v2 = vsel %vm1388_vm3, %v3148_v49, %v3152_v48  ;;  %v7772_v3 = vld [vmem:[#allocation3 + $0x78] sm:$0xff]  ;;  %v7775_v20 = vld [vmem:[#allocation3 + $0x88] sm:$0xff] }
 0x2b2   : > { %v3162_v32 = vrot.slane %v7772_v3, 4  ;;  %v7778_v51 = vld [vmem:[#allocation3 + $0xb8] sm:$0xff]  ;;  %v3194_v3 = vrot.slane %v9047_v39, 4  ;;  %v3196_v39 = vrot.slane %v9093_v53, 4  ;;  %v3204_v53 = vrot.slane %v9127_v27, 4  ;;  %v6382_v27 = vld [vmem:[%s11570_s5 + $0x938] sm:$0xff] }
 0x2b3   : > { %2997 = vmatmul.mubr.f32.gmra.mrb[68].mxu1 %v2785_v14  ;;  %11658 = vst [vmem:[#allocation11_spill] sm:$0xff] %v9165_v12  ;;  %v6374_v14 = vld [vmem:[%s11570_s5 + $0x8f8] sm:$0xff]  ;;  %v3178_v49 = vrot.slane %v7778_v51, 4 }
 0x2b4   : > { %3002 = vmatprep.mubr.f32.mxu1 %v2791_v38  ;;  %v3147_v38 = vsel %vm1388_vm3, %v3142_v52, %v3146_v9  ;;  %v3158_v52 = vrot.slane %v7771_v45, 4  ;;  %v3195_v5 = vsel %vm1388_vm3, %v3190_v29, %v3194_v3  ;;  %v6386_v51 = vld [vmem:[%s11570_s5 + $0x958] sm:$0xff] }
 0x2b5   : > { %v3183_v33 = vsel %vm1388_vm3, %v3178_v49, %v3182_v36 }
 0x2b6   : > { %v3159_v42 = vsel %vm1388_vm3, %v3154_v10, %v3158_v52 }
 0x2b7   : > { %3003 = vmatmul.mubr.f32.gmra.mrb[70].mxu1 %v2789_v28  ;;  %v9185_v28 = vpack.c.bf16 %v6365_v62, %v6361_v8 }
 0x2b8   : > { %3008 = vmatprep.mubr.f32.mxu1 %v2795_v0  ;;  %v6369_v0 = vld [vmem:[%s11570_s5 + $0x8d0] sm:$0xff] }
 0x2b9   : > { %11660 = vst [vmem:[#allocation13_spill] sm:$0xff] %v9185_v28  ;;  %v9199_v40 = vpack.c.bf16 %v6373_v15, %v6369_v0  ;;  %v3172_v15 = vrot.slane %v8963_v35, 4  ;;  %v3180_v35 = vrot.slane %v8999_v4, 4  ;;  %v3188_v4 = vrot.slane %v9037_v23, 4 }
 0x2bb   : > { %3009 = vmatmul.mubr.f32.gmra.mrb[72].mxu1 %v2793_v6  ;;  %v3145_v6 = vsel %vm1388_vm3, %v3140_v61, %v3144_v16  ;;  %11662 = vst [vmem:[#allocation15_spill] sm:$0xff] %v9199_v40  ;;  %v3174_v16 = vrot.slane %v8935_v30, 4  ;;  %v7779_v30 = vld [vmem:[#allocation3 + $0xb0] sm:$0xff] }
 0x2bc   : > { %3014 = vmatprep.mubr.f32.mxu1 %v2794_v19  ;;  %v7766_v19 = vld [vmem:[#allocation3 + $0x48] sm:$0xff] }
 0x2bd   : > { %v3150_v7 = vrot.slane %v7766_v19, 4 }
 0x2bf   : > { %3015 = vmatmul.mubr.f32.gmra.mrb[74].mxu1 %v2792_v50  ;;  %v9188_v50 = vpack.c.bf16 %v6374_v14, %v6370_v43  ;;  %v3151_v26 = vsel %vm1388_vm3, %v3146_v9, %v3150_v7  ;;  %v3166_v9 = vrot.slane %v7775_v20, 4  ;;  %v7777_v14 = vld [vmem:[#allocation3 + $0x80] sm:$0xff] }
 0x2c0   : > { %3316 = vmatprep.mubr.f32.mxu1 %v3139_v41  ;;  %v3155_v41 = vsel %vm1388_vm3, %v3150_v7, %v3154_v10  ;;  %v3168_v7 = vrot.slane %v8931_v58, 4  ;;  %v3179_v58 = vsel %vm1388_vm3, %v3174_v16, %v3178_v49  ;;  %v3176_v10 = vrot.slane %v7779_v30, 4  ;;  %v6390_v49 = vld [vmem:[%s11570_s5 + $0x978] sm:$0xff]  ;;  %v6385_v30 = vld [vmem:[%s11570_s5 + $0x950] sm:$0xff] }
 0x2c1   : > { %11661 = vst [vmem:[#allocation14_spill] sm:$0xff] %v9188_v50  ;;  %v3167_v62 = vsel %vm1388_vm3, %v3162_v32, %v3166_v9 }
 0x2c3   : > { %3317 = vmatmul.mubr.f32.vlgmr.msra.gmra.mrb[36].mxu1 %v3136_v56  ;;  %v7773_v56 = vld [vmem:[#allocation3 + $0x60] sm:$0xff] }
 0x2c4   : > { %3322 = vmatprep.mubr.f32.mxu1 %v3143_v60  ;;  %7311 = vmatpush1.bf16.msra.mxu1 %v9146_v47  ;;  %v3156_v57 = vrot.slane %v7773_v56, 4  ;;  %v3163_v60 = vsel %vm1388_vm3, %v3158_v52, %v3162_v32  ;;  %v3184_v52 = vrot.slane %v8873_v25, 4  ;;  %v3192_v32 = vrot.slane %v9057_v13, 4 }
 0x2c5   : > { %7296 = vmatprep.subr.bf16.mxu1 %v9148_v11  ;;  %v3198_v25 = vrot.slane %v9073_v63, 4  ;;  %v3200_v13 = vrot.slane %v9111_v54, 4  ;;  %v3206_v63 = vrot.slane %v9121_v22, 4  ;;  %v6378_v22 = vld [vmem:[%s11570_s5 + $0x918] sm:$0xff] }
 0x2c6   : > { %v3157_v61 = vsel %vm1388_vm3, %v3152_v48, %v3156_v57  ;;  %v3161_v8 = vsel %vm1388_vm3, %v3156_v57, %v3160_v46  ;;  %v3186_v48 = vrot.slane %v9015_v17, 4  ;;  %v3189_v17 = vsel %vm1388_vm3, %v3184_v52, %v3188_v4 }
 0x2c7   : > { %3323 = vmatmul.mubr.f32.gmra.mrb[38].mxu1 %v3141_v24  ;;  %v7776_v24 = vld [vmem:[#allocation3 + $0x98] sm:$0xff]  ;;  %v3193_v56 = vsel %vm1388_vm3, %v3188_v4, %v3192_v32  ;;  %v3199_v23 = vsel %vm1388_vm3, %v3194_v3, %v3198_v25  ;;  %v3202_v57 = vrot.slane %v9090_v44, 4  ;;  %v6397_v3 = vld [vmem:[%s11570_s5 + $0x9b0] sm:$0xff] }
 0x2c8   : > { %3328 = vmatprep.mubr.f32.mxu1 %v3147_v38  ;;  %7312 = vmatpush1.bf16.msra.mxu1 %v9165_v12  ;;  %v3170_v43 = vrot.slane %v7776_v24, 4  ;;  %v3164_v38 = vrot.slane %v7777_v14, 4  ;;  %v3187_v45 = vsel %vm1388_vm3, %v3182_v36, %v3186_v48  ;;  %v6296_v14 = vld [vmem:[%s11570_s5 + $0x688] sm:$0xff] }
 0x2c9   : > { %7297 = vmatprep.subr.bf16.mxu1 %v9168_v55  ;;  %v3203_v21 = vsel %vm1388_vm3, %v3198_v25, %v3202_v57  ;;  %v3207_v20 = vsel %vm1388_vm3, %v3202_v57, %v3206_v63  ;;  %v6308_v36 = vld [vmem:[%s11570_s5 + $0x6e8] sm:$0xff]  ;;  %v6315_v25 = vld [vmem:[%s11570_s5 + $0x720] sm:$0xff]  ;;  %v6406_v57 = vld [vmem:[%s11570_s5 + $0x9f8] sm:$0xff] }
 0x2ca   : > { %v3165_v19 = vsel %vm1388_vm3, %v3160_v46, %v3164_v38  ;;  %v3171_v59 = vsel %vm1388_vm3, %v3166_v9, %v3170_v43  ;;  %v3169_v0 = vsel %vm1388_vm3, %v3164_v38, %v3168_v7  ;;  %v3064_v46 = vld [vmem:[#allocation3 + $0x138] sm:$0xff]  ;;  %v3063_v9 = vld [vmem:[#allocation3 + $0x130] sm:$0xff] }
 0x2cb   : > { %3329 = vmatmul.mubr.f32.gmra.mrb[40].mxu1 %v3145_v6  ;;  %v3175_v6 = vsel %vm1388_vm3, %v3170_v43, %v3174_v16  ;;  %v3210_v44 = vrot.slane %v3064_v46, 4  ;;  %v3208_v54 = vrot.slane %v3063_v9, 4  ;;  %v9257_v43 = vpack.c.bf16 %v6382_v27, %v6378_v22  ;;  %v6300_v38 = vld [vmem:[%s11570_s5 + $0x6a8] sm:$0xff]  ;;  %v6295_v16 = vld [vmem:[%s11570_s5 + $0x680] sm:$0xff]  ;;  %v6409_v22 = vld [vmem:[%s11570_s5 + $0xa10] sm:$0xff] }
 0x2cc   : > { %3334 = vmatprep.mubr.f32.mxu1 %v3151_v26  ;;  %7313 = vmatpush1.bf16.msra.mxu1 %v9185_v28  ;;  %v3173_v26 = vsel %vm1388_vm3, %v3168_v7, %v3172_v15  ;;  %v6951_v7 = vpack.c.bf16 %v6300_v38, %v6296_v14  ;;  %v6316_v4 = vld [vmem:[%s11570_s5 + $0x728] sm:$0xff]  ;;  %v6413_v14 = vld [vmem:[%s11570_s5 + $0xa30] sm:$0xff]  ;;  %v6327_v38 = vld [vmem:[%s11570_s5 + $0x780] sm:$0xff] }
 0x2cd   : > { %7298 = vmatprep.subr.bf16.mxu1 %v9188_v50  ;;  %v3209_v24 = vsel %vm1388_vm3, %v3204_v53, %v3208_v54  ;;  %11663 = vst [vmem:[#allocation16_spill] sm:$0xff] %v9257_v43 }
 0x2ce   : > { %6952 = vmatprep.subr.bf16.mxu0 %v6951_v7  ;;  %v9398_v7 = vpack.c.bf16 %v6413_v14, %v6409_v22  ;;  %v6454_v22 = vld [vmem:[%s11570_s5 + $0xb78] sm:$0xff]  ;;  %v6449_v14 = vld [vmem:[%s11570_s5 + $0xb50] sm:$0xff] }
 0x2cf   : > { %3335 = vmatmul.mubr.f32.gmra.mrb[42].mxu1 %v3149_v1  ;;  %v3177_v1 = vsel %vm1388_vm3, %v3172_v15, %v3176_v10 }
 0x2d0   : > { %3340 = vmatprep.mubr.f32.mxu1 %v3155_v41  ;;  %7314 = vmatpush1.bf16.msra.mxu1 %v9199_v40  ;;  %v3181_v41 = vsel %vm1388_vm3, %v3176_v10, %v3180_v35  ;;  %11672 = vst [vmem:[#allocation25_spill] sm:$0xff] %v9398_v7 }
 0x2d1   : > { %7299 = vmatprep.subr.bf16.mxu1 %v9257_v43 }
 0x2d3   : > { %3341 = vmatmul.mubr.f32.gmra.mrb[44].mxu1 %v3153_v2  ;;  %v3185_v2 = vsel %vm1388_vm3, %v3180_v35, %v3184_v52  ;;  %v6303_v35 = vld [vmem:[%s11570_s5 + $0x6c0] sm:$0xff]  ;;  %v6312_v52 = vld [vmem:[%s11570_s5 + $0x708] sm:$0xff] }
 0x2d4   : > { %3346 = vmatprep.mubr.f32.mxu1 %v3159_v42  ;;  %v3191_v42 = vsel %vm1388_vm3, %v3186_v48, %v3190_v29  ;;  %v6398_v29 = vld [vmem:[%s11570_s5 + $0x9b8] sm:$0xff] }
 0x2d7   : > { %3347 = vmatmul.mubr.f32.gmra.mrb[46].mxu1 %v3157_v61  ;;  %v3197_v61 = vsel %vm1388_vm3, %v3192_v32, %v3196_v39 }
 0x2d8   : > { %3352 = vmatprep.mubr.f32.mxu1 %v3163_v60  ;;  %v3201_v60 = vsel %vm1388_vm3, %v3196_v39, %v3200_v13 }
 0x2db   : > { %3353 = vmatmul.mubr.f32.gmra.mrb[48].mxu1 %v3161_v8  ;;  %v3205_v8 = vsel %vm1388_vm3, %v3200_v13, %v3204_v53  ;;  %v6324_v13 = vld [vmem:[%s11570_s5 + $0x768] sm:$0xff]  ;;  %v6410_v53 = vld [vmem:[%s11570_s5 + $0xa18] sm:$0xff] }
 0x2dc   : > { %3358 = vmatprep.mubr.f32.mxu1 %v3167_v62  ;;  %v3211_v62 = vsel %vm1388_vm3, %v3206_v63, %v3210_v44  ;;  %v6405_v63 = vld [vmem:[%s11570_s5 + $0x9f0] sm:$0xff] }
 0x2df   : > { %3359 = vmatmul.mubr.f32.gmra.mrb[50].mxu1 %v3165_v19  ;;  %v6377_v19 = vld [vmem:[%s11570_s5 + $0x910] sm:$0xff] }
 0x2e0   : > { %3364 = vmatprep.mubr.f32.mxu1 %v3171_v59  ;;  %v6381_v59 = vld [vmem:[%s11570_s5 + $0x930] sm:$0xff] }
 0x2e1   : > { %v9278_v15 = vpack.c.bf16 %v6381_v59, %v6377_v19  ;;  %v6331_v19 = vld [vmem:[%s11570_s5 + $0x7a0] sm:$0xff] }
 0x2e2   : > { %v6969_v59 = vpack.c.bf16 %v6331_v19, %v6327_v38  ;;  %v6453_v38 = vld [vmem:[%s11570_s5 + $0xb70] sm:$0xff] }
 0x2e3   : > { %3365 = vmatmul.mubr.f32.gmra.mrb[52].mxu1 %v3169_v0  ;;  %v6299_v0 = vld [vmem:[%s11570_s5 + $0x6a0] sm:$0xff]  ;;  %11664 = vst [vmem:[#allocation17_spill] sm:$0xff] %v9278_v15  ;;  %v9558_v19 = vpack.c.bf16 %v6453_v38, %v6449_v14 }
 0x2e4   : > { %3370 = vmatprep.mubr.f32.mxu1 %v3175_v6  ;;  %v6953_v6 = vpack.c.bf16 %v6299_v0, %v6295_v16  ;;  %7315 = vmatpush1.bf16.msra.mxu1 %v9278_v15  ;;  %v6418_v16 = vld [vmem:[%s11570_s5 + $0xa58] sm:$0xff] }
 0x2e5   : > { %v6422_v0 = vld [vmem:[%s11570_s5 + $0xa78] sm:$0xff]  ;;  %11686 = vst [vmem:[#allocation35_spill] sm:$0xff] %v9558_v19 }
 0x2e6   : > { %6954 = vmatpush1.bf16.msra.mxu0 %v6953_v6  ;;  %v9406_v6 = vpack.c.bf16 %v6422_v0, %v6418_v16  ;;  %v6462_v16 = vld [vmem:[%s11570_s5 + $0xbb8] sm:$0xff] }
 0x2e7   : > { %3371 = vmatmul.mubr.f32.gmra.mrb[54].mxu1 %v3173_v26  ;;  %v9287_v26 = vpack.c.bf16 %v6390_v49, %v6386_v51  ;;  %v6336_v51 = vld [vmem:[%s11570_s5 + $0x7c8] sm:$0xff] }
 0x2e8   : > { %3376 = vmatprep.mubr.f32.mxu1 %v3179_v58  ;;  %v6304_v58 = vld [vmem:[%s11570_s5 + $0x6c8] sm:$0xff]  ;;  %11673 = vst [vmem:[#allocation26_spill] sm:$0xff] %v9406_v6 }
 0x2e9   : > { %11665 = vst [vmem:[#allocation18_spill] sm:$0xff] %v9287_v26  ;;  %v6955_v10 = vpack.c.bf16 %v6308_v36, %v6304_v58  ;;  %7300 = vmatprep.subr.bf16.mxu1 %v9287_v26  ;;  %v6340_v49 = vld [vmem:[%s11570_s5 + $0x7e8] sm:$0xff]  ;;  %v6417_v58 = vld [vmem:[%s11570_s5 + $0xa50] sm:$0xff] }
 0x2ea   : > { %v6971_v36 = vpack.c.bf16 %v6340_v49, %v6336_v51  ;;  %v6457_v51 = vld [vmem:[%s11570_s5 + $0xb90] sm:$0xff] }
 0x2eb   : > { %3377 = vmatmul.mubr.f32.gmra.mrb[56].mxu1 %v3177_v1  ;;  %v6389_v1 = vld [vmem:[%s11570_s5 + $0x970] sm:$0xff]  ;;  %6956 = vmatprep.subr.bf16.mxu0 %v6955_v10  ;;  %v6335_v10 = vld [vmem:[%s11570_s5 + $0x7c0] sm:$0xff] }
 0x2ec   : > { %3382 = vmatprep.mubr.f32.mxu1 %v3183_v33  ;;  %v6307_v33 = vld [vmem:[%s11570_s5 + $0x6e0] sm:$0xff]  ;;  %v9308_v48 = vpack.c.bf16 %v6389_v1, %v6385_v30  ;;  %v6421_v30 = vld [vmem:[%s11570_s5 + $0xa70] sm:$0xff] }
 0x2ed   : > { %v6339_v1 = vld [vmem:[%s11570_s5 + $0x7e0] sm:$0xff]  ;;  %v6461_v49 = vld [vmem:[%s11570_s5 + $0xbb0] sm:$0xff] }
 0x2ee   : > { %11666 = vst [vmem:[#allocation19_spill] sm:$0xff] %v9308_v48  ;;  %7316 = vmatpush1.bf16.msra.mxu1 %v9308_v48 }
 0x2ef   : > { %3383 = vmatmul.mubr.f32.gmra.mrb[58].mxu1 %v3181_v41  ;;  %v6957_v41 = vpack.c.bf16 %v6307_v33, %v6303_v35  ;;  %v9428_v35 = vpack.c.bf16 %v6421_v30, %v6417_v58  ;;  %v6973_v33 = vpack.c.bf16 %v6339_v1, %v6335_v10  ;;  %v9576_v58 = vpack.c.bf16 %v6461_v49, %v6457_v51  ;;  %v6470_v30 = vld [vmem:[%s11570_s5 + $0xbf8] sm:$0xff]  ;;  %v6465_v1 = vld [vmem:[%s11570_s5 + $0xbd0] sm:$0xff] }
 0x2f0   : > { %3388 = vmatprep.mubr.f32.mxu1 %v3187_v45  ;;  %v6394_v45 = vld [vmem:[%s11570_s5 + $0x998] sm:$0xff] }
 0x2f1   : > { %6958 = vmatpush1.bf16.msra.mxu0 %v6957_v41  ;;  %11674 = vst [vmem:[#allocation27_spill] sm:$0xff] %v9428_v35  ;;  %v6426_v41 = vld [vmem:[%s11570_s5 + $0xa98] sm:$0xff]  ;;  %11688 = vst [vmem:[#allocation37_spill] sm:$0xff] %v9576_v58 }
 0x2f3   : > { %3389 = vmatmul.mubr.f32.gmra.mrb[60].mxu1 %v3185_v2  ;;  %v9319_v2 = vpack.c.bf16 %v6398_v29, %v6394_v45  ;;  %v6430_v45 = vld [vmem:[%s11570_s5 + $0xab8] sm:$0xff] }
 0x2f4   : > { %3394 = vmatprep.mubr.f32.mxu1 %v3191_v42  ;;  %v6393_v42 = vld [vmem:[%s11570_s5 + $0x990] sm:$0xff]  ;;  %v9437_v29 = vpack.c.bf16 %v6430_v45, %v6426_v41  ;;  %v3477_v45 = vld [vmem:[%s11569_s4] sm:$0x3] }
 0x2f5   : > { %11667 = vst [vmem:[#allocation20_spill] sm:$0xff] %v9319_v2  ;;  %v9331_v32 = vpack.c.bf16 %v6397_v3, %v6393_v42  ;;  %7301 = vmatprep.subr.bf16.mxu1 %v9319_v2  ;;  %v6434_v3 = vld [vmem:[%s11570_s5 + $0xad8] sm:$0xff] }
 0x2f6   : > { %11675 = vst [vmem:[#allocation28_spill] sm:$0xff] %v9437_v29 }
 0x2f7   : > { %3395 = vmatmul.mubr.f32.gmra.mrb[62].mxu1 %v3189_v17  ;;  %v6959_v17 = vpack.c.bf16 %v6316_v4, %v6312_v52  ;;  %11668 = vst [vmem:[#allocation21_spill] sm:$0xff] %v9331_v32  ;;  %v6425_v52 = vld [vmem:[%s11570_s5 + $0xa90] sm:$0xff] }
 0x2f8   : > { %3400 = vmatprep.mubr.f32.mxu1 %v3195_v5  ;;  %v6311_v5 = vld [vmem:[%s11570_s5 + $0x700] sm:$0xff]  ;;  %7317 = vmatpush1.bf16.msra.mxu1 %v9331_v32  ;;  %v6429_v4 = vld [vmem:[%s11570_s5 + $0xab0] sm:$0xff] }
 0x2f9   : > { %6960 = vmatprep.subr.bf16.mxu0 %v6959_v17  ;;  %v9445_v42 = vpack.c.bf16 %v6429_v4, %v6425_v52  ;;  %v6438_v17 = vld [vmem:[%s11570_s5 + $0xaf8] sm:$0xff]  ;;  %v9602_v52 = vrot.slane %v3477_v45, %v8384_v34  ;;  %v9605_v4 = vrot.slane %v3477_v45, %v8392_v37 }
 0x2fb   : > { %3401 = vmatmul.mubr.f32.gmra.mrb[64].mxu1 %v3193_v56  ;;  %v6961_v56 = vpack.c.bf16 %v6315_v25, %v6311_v5  ;;  %11676 = vst [vmem:[#allocation29_spill] sm:$0xff] %v9445_v42  ;;  %v9454_v5 = vpack.c.bf16 %v6438_v17, %v6434_v3  ;;  %v6433_v25 = vld [vmem:[%s11570_s5 + $0xad0] sm:$0xff] }
 0x2fc   : > { %3406 = vmatprep.mubr.f32.mxu1 %v3199_v23  ;;  %v6402_v23 = vld [vmem:[%s11570_s5 + $0x9d8] sm:$0xff] }
 0x2fd   : > { %6962 = vmatpush1.bf16.msra.mxu0 %v6961_v56  ;;  %v9347_v39 = vpack.c.bf16 %v6406_v57, %v6402_v23  ;;  %11677 = vst [vmem:[#allocation30_spill] sm:$0xff] %v9454_v5  ;;  %v6437_v56 = vld [vmem:[%s11570_s5 + $0xaf0] sm:$0xff]  ;;  %v11679_v57 = vlaneseq }
 0x2fe   : > { %v9463_v23 = vpack.c.bf16 %v6437_v56, %v6433_v25 }
 0x2ff   : > { %3407 = vmatmul.mubr.f32.gmra.mrb[66].mxu1 %v3197_v61  ;;  %11669 = vst [vmem:[#allocation22_spill] sm:$0xff] %v9347_v39  ;;  %v6320_v61 = vld [vmem:[%s11570_s5 + $0x748] sm:$0xff]  ;;  %7302 = vmatprep.subr.bf16.mxu1 %v9347_v39  ;;  %vm9467_vm7 = vcmp.lt.s32.totalorder %v11679_v57, 256 }
 0x300   : > { %3412 = vmatprep.mubr.f32.mxu1 %v3203_v21  ;;  %v6401_v21 = vld [vmem:[%s11570_s5 + $0x9d0] sm:$0xff]  ;;  %v6963_v46 = vpack.c.bf16 %v6324_v13, %v6320_v61  ;;  %11678 = vst [vmem:[#allocation31_spill] sm:$0xff] %v9463_v23  ;;  %v6442_v13 = vld [vmem:[%s11570_s5 + $0xb18] sm:$0xff] }
 0x302   : > { %6964 = vmatprep.subr.bf16.mxu0 %v6963_v46  ;;  %v11682_v46 = vmov 0.0  }
 0x303   : > { %3413 = vmatmul.mubr.f32.gmra.mrb[68].mxu1 %v3201_v60  ;;  %v6319_v60 = vld [vmem:[%s11570_s5 + $0x740] sm:$0xff]  ;;  %358 = vst.msk [vmem:[#allocation4 + $0x21] ss:$8 sm:$0x3] %vm9467_vm7, %v11682_v46 }
 0x304   : > { %3418 = vmatprep.mubr.f32.mxu1 %v3207_v20  ;;  %v6323_v20 = vld [vmem:[%s11570_s5 + $0x760] sm:$0xff]  ;;  %361 = vst.msk [vmem:[#allocation4 + $0x22] ss:$8 sm:$0x3] %vm9467_vm7, %v11682_v46 }
 0x305   : > { %v6965_v9 = vpack.c.bf16 %v6323_v20, %v6319_v60  ;;  %355 = vst.msk [vmem:[#allocation4] ss:$8 sm:$0x3] %vm9467_vm7, %v11682_v46  ;;  %364 = vst.msk [vmem:[#allocation4 + $0x43] ss:$8 sm:$0x3] %vm9467_vm7, %v11682_v46 }
 0x306   : > { %367 = vst.msk [vmem:[#allocation4 + $0x44] ss:$8 sm:$0x3] %vm9467_vm7, %v11682_v46  ;;  %370 = vst.msk [vmem:[#allocation4 + $0x65] ss:$8 sm:$0x3] %vm9467_vm7, %v11682_v46 }
 0x307   : > { %3419 = vmatmul.mubr.f32.gmra.mrb[70].mxu1 %v3205_v8  ;;  %v6414_v8 = vld [vmem:[%s11570_s5 + $0xa38] sm:$0xff]  ;;  %6966 = vmatpush1.bf16.msra.mxu0 %v6965_v9  ;;  %373 = vst.msk [vmem:[#allocation4 + $0x66] ss:$8 sm:$0x3] %vm9467_vm7, %v11682_v46  ;;  %v6441_v9 = vld [vmem:[%s11570_s5 + $0xb10] sm:$0xff] }
 0x308   : > { %3424 = vmatprep.mubr.f32.mxu1 %v3211_v62  ;;  %v6328_v62 = vld [vmem:[%s11570_s5 + $0x788] sm:$0xff]  ;;  %376 = vst.msk [vmem:[#allocation4 + $0x87] ss:$8 sm:$0x3] %vm9467_vm7, %v11682_v46  ;;  %v6218_v60 = vld [vmem:[%s11570_s5 + $0x418] sm:$0xff] }
 0x309   : > { %379 = vst.msk [vmem:[#allocation4 + $0x90] ss:$8 sm:$0x3] %vm9467_vm7, %v11682_v46  ;;  %382 = vst.msk [vmem:[#allocation4 + $0xb1] ss:$8 sm:$0x3] %vm9467_vm7, %v11682_v46 }
 0x30a   : > { %385 = vst.msk [vmem:[#allocation4 + $0xb2] ss:$8 sm:$0x3] %vm9467_vm7, %v11682_v46  ;;  %388 = vst.msk [vmem:[#allocation4 + $0xd3] ss:$8 sm:$0x3] %vm9467_vm7, %v11682_v46 }
 0x30b   : > { %3425 = vmatmul.mubr.f32.gmra.mrb[72].mxu1 %v3209_v24  ;;  %v6332_v24 = vld [vmem:[%s11570_s5 + $0x7a8] sm:$0xff]  ;;  %391 = vst.msk [vmem:[#allocation4 + $0xd4] ss:$8 sm:$0x3] %vm9467_vm7, %v11682_v46  ;;  %v6222_v20 = vld [vmem:[%s11570_s5 + $0x438] sm:$0xff] }
 0x30c   : > { %3430 = vmatprep.mubr.f32.mxu1 %v3210_v44  ;;  %v9368_v44 = vpack.c.bf16 %v6405_v63, %v6401_v21  ;;  %v6967_v27 = vpack.c.bf16 %v6332_v24, %v6328_v62  ;;  %v6446_v21 = vld [vmem:[%s11570_s5 + $0xb38] sm:$0xff]  ;;  %394 = vst.msk [vmem:[#allocation4 + $0xf5] ss:$8 sm:$0x3] %vm9467_vm7, %v11682_v46 }
 0x30d   : > { %397 = vst.msk [vmem:[#allocation4 + $0xf6] ss:$8 sm:$0x3] %vm9467_vm7, %v11682_v46  ;;  %400 = vst.msk [vmem:[#allocation4 + $0x117] ss:$8 sm:$0x3] %vm9467_vm7, %v11682_v46  ;;  %v9526_v63 = vpack.c.bf16 %v6446_v21, %v6442_v13 }
 0x30e   : > { %11670 = vst [vmem:[#allocation23_spill] sm:$0xff] %v9368_v44  ;;  %7318 = vmatpush1.bf16.msra.mxu1 %v9368_v44  ;;  %6968 = vmatprep.subr.bf16.mxu0 %v6967_v27  ;;  %v6450_v24 = vld [vmem:[%s11570_s5 + $0xb58] sm:$0xff] }
 0x30f   : > { %3431 = vmatmul.mubr.f32.gmra.mrb[74].mxu1 %v3208_v54  ;;  %v9377_v54 = vpack.c.bf16 %v6414_v8, %v6410_v53  ;;  %6970 = vmatpush1.bf16.msra.mxu0 %v6969_v59  ;;  %11683 = vst [vmem:[#allocation32_spill] sm:$0xff] %v9526_v63  ;;  %v6975_v53 = vpack.c.bf16 %v6222_v20, %v6218_v60  ;;  %v6445_v8 = vld [vmem:[%s11570_s5 + $0xb30] sm:$0xff]  ;;  %v6458_v59 = vld [vmem:[%s11570_s5 + $0xb98] sm:$0xff] }
 0x310   : > { %6972 = vmatprep.subr.bf16.mxu0 %v6971_v36  ;;  %v9541_v62 = vpack.c.bf16 %v6445_v8, %v6441_v9  ;;  %v9550_v27 = vpack.c.bf16 %v6454_v22, %v6450_v24  ;;  %v9567_v0 = vpack.c.bf16 %v6462_v16, %v6458_v59  ;;  %v6466_v36 = vld [vmem:[%s11570_s5 + $0xbd8] sm:$0xff] }
 0x311   : > { %11671 = vst [vmem:[#allocation24_spill] sm:$0xff] %v9377_v54  ;;  %7303 = vmatprep.subr.bf16.mxu1 %v9377_v54  ;;  %v9586_v10 = vpack.c.bf16 %v6470_v30, %v6466_v36  ;;  %v6217_v30 = vld [vmem:[%s11570_s5 + $0x410] sm:$0xff] }
 0x312   : > { %7319 = vmatpush1.bf16.msra.mxu1 %v9398_v7  ;;  %11684 = vst [vmem:[#allocation33_spill] sm:$0xff] %v9541_v62  ;;  %11685 = vst [vmem:[#allocation34_spill] sm:$0xff] %v9550_v27 }
 0x313   : > { %7304 = vmatprep.subr.bf16.mxu1 %v9406_v6  ;;  %6974 = vmatpush1.bf16.msra.mxu0 %v6973_v33  ;;  %11687 = vst [vmem:[#allocation36_spill] sm:$0xff] %v9567_v0  ;;  %11689 = vst [vmem:[#allocation38_spill] sm:$0xff] %v9586_v10  ;;  %v6469_v33 = vld [vmem:[%s11570_s5 + $0xbf0] sm:$0xff] }
 0x314   : > { %6976 = vmatprep.subr.bf16.mxu0 %v6975_v53  ;;  %v9594_v41 = vpack.c.bf16 %v6469_v33, %v6465_v1  ;;  %v6221_v1 = vld [vmem:[%s11570_s5 + $0x430] sm:$0xff] }
 0x316   : > { %7320 = vmatpush1.bf16.msra.mxu1 %v9428_v35  ;;  %11690 = vst [vmem:[#allocation39_spill] sm:$0xff] %v9594_v41 }
 0x317   : > { %7305 = vmatprep.subr.bf16.mxu1 %v9437_v29 }
 0x31a   : > { %7321 = vmatpush1.bf16.msra.mxu1 %v9445_v42 }
 0x31b   : > { %7306 = vmatprep.subr.bf16.mxu1 %v9454_v5 }
 0x31e   : > { %7322 = vmatpush1.bf16.msra.mxu1 %v9463_v23 }
 0x31f   : > { %7307 = vmatprep.subr.bf16.mxu1 %v9526_v63 }
 0x322   : > { %7323 = vmatpush1.bf16.msra.mxu1 %v9541_v62 }
 0x323   : > { %7308 = vmatprep.subr.bf16.mxu1 %v9550_v27  ;;  %v9839_v27 = vld [vmem:[%s11570_s5 + $0x630] sm:$0xff] }
 0x326   : > { %7324 = vmatpush1.bf16.msra.mxu1 %v9558_v19 }
 0x327   : > { %7309 = vmatprep.subr.bf16.mxu1 %v9567_v0 }
 0x32a   : > { %7325 = vmatpush1.bf16.msra.mxu1 %v9576_v58 }
 0x32b   : > { %7310 = vmatprep.subr.bf16.mxu1 %v9586_v10 }
 0x32e   : > { %7326 = vmatpush1.bf16.msra.mxu1 %v9594_v41  ;;  %v9788_v41 = vld [vmem:[%s11570_s5 + $0x5d8] sm:$0xff] }
 0x396   : > { %v3318_v3 = vpop.f32.mrb[36].mxu1 }
 0x397   : > { %v3489_v17 = vadd.f32 %v9602_v52, %v3318_v3  ;;  %v3320_v25 = vpop.f32.mrb[37].mxu1 }
 0x398   : > { %v3490_v56 = vadd.f32 %v9605_v4, %v3320_v25  ;;  %v6230_v25 = vld [vmem:[%s11570_s5 + $0x478] sm:$0xff] }
 0x399   : > { %v3529_v57 = vmax.f32 %v3489_v17, 0.0  ;;  %v6226_v17 = vld [vmem:[%s11570_s5 + $0x458] sm:$0xff] }
 0x39a   : > { %v3530_v61 = vmax.f32 %v3490_v56, 0.0  ;;  %v3324_v13 = vpop.f32.mrb[38].mxu1 }
 0x39b   : > { %v3574_v21 = vrot.slane %v3529_v57, 7  ;;  %v3491_v46 = vadd.f32 %v9602_v52, %v3324_v13  ;;  %v3326_v60 = vpop.f32.mrb[39].mxu1 }
 0x39c   : > { %v3575_v20 = vrot.slane %v3530_v61, 7  ;;  %v3492_v9 = vadd.f32 %v9605_v4, %v3326_v60  ;;  %v6977_v60 = vpack.c.bf16 %v6221_v1, %v6217_v30  ;;  %v6225_v1 = vld [vmem:[%s11570_s5 + $0x450] sm:$0xff] }
 0x39d   : > { %3586 = vst [vmem:[#allocation4] sm:$0xfe] %v3574_v21  ;;  %v3531_v53 = vmax.f32 %v3491_v46, 0.0 }
 0x39e   : > { %3587 = vst [vmem:[#allocation4 + $0x8] sm:$0xfe] %v3575_v20  ;;  %v3532_v8 = vmax.f32 %v3492_v9, 0.0  ;;  %v3330_v24 = vpop.f32.mrb[40].mxu1 }
 0x39f   : > { %v3576_v22 = vrot.slane %v3531_v53, 7  ;;  %v3493_v14 = vadd.f32 %v9602_v52, %v3330_v24  ;;  %v3332_v38 = vpop.f32.mrb[41].mxu1  ;;  %v6979_v24 = vpack.c.bf16 %v6230_v25, %v6226_v17 }
 0x3a0   : > { %v3578_v59 = vrot.slane %v3532_v8, 7  ;;  %v3494_v16 = vadd.f32 %v9605_v4, %v3332_v38 }
 0x3a1   : > { %v9614_v51 = vsel %vm3573_vm8, %v3574_v21, %v3576_v22  ;;  %3590 = vst [vmem:[#allocation4 + $0x20] sm:$0x1] %v3576_v22  ;;  %v3533_v33 = vmax.f32 %v3493_v14, 0.0 }
 0x3a2   : > { %3588 = vst [vmem:[#allocation4 + $0x10] sm:$0xff] %v9614_v51  ;;  %v9618_v49 = vsel %vm3573_vm8, %v3575_v20, %v3578_v59  ;;  %3591 = vst [vmem:[#allocation4 + $0x28] sm:$0x1] %v3578_v59  ;;  %v3336_v36 = vpop.f32.mrb[42].mxu1  ;;  %v3534_v56 = vmax.f32 %v3494_v16, 0.0  ;;  %v11579_v16 = vrot.slane %v9614_v51, 1 }
 0x3a3   : > { %3589 = vst [vmem:[#allocation4 + $0x18] sm:$0xff] %v9618_v49  ;;  %v3495_v45 = vadd.f32 %v9602_v52, %v3336_v36  ;;  %v3338_v3 = vpop.f32.mrb[43].mxu1  ;;  %v11580_v8 = vrot.slane %v9618_v49, 1  ;;  %v3598_v22 = vrot.slane %v3533_v33, 1  ;;  %v6229_v33 = vld [vmem:[%s11570_s5 + $0x470] sm:$0xff] }
 0x3a4   : > { %v3496_v57 = vadd.f32 %v9605_v4, %v3338_v3  ;;  %v3935_v61 = vld [vmem:[#allocation4] sm:$0xfe]  ;;  %v3601_v36 = vrot.slane %v3534_v56, 1 }
 0x3a5   : > { %v3535_v13 = vmax.f32 %v3495_v45, 0.0  ;;  %v3936_v21 = vld [vmem:[#allocation4 + $0x8] sm:$0xfe]  ;;  %v4104_v46 = vrot.slane %v3935_v61, 1 }
 0x3a6   : > { %v3536_v20 = vmax.f32 %v3496_v57, 0.0  ;;  %v3342_v9 = vpop.f32.mrb[44].mxu1  ;;  %v4107_v53 = vrot.slane %v3936_v21, 1  ;;  %v6234_v57 = vld [vmem:[%s11570_s5 + $0x498] sm:$0xff] }
 0x3a7   : > { %v3599_v14 = vrot.slane %v3535_v13, 1  ;;  %v3497_v38 = vadd.f32 %v9602_v52, %v3342_v9  ;;  %v3344_v59 = vpop.f32.mrb[45].mxu1  ;;  %v9655_v56 = vsel %vm1739_vm4, %v4104_v46, %v11579_v16  ;;  %v6238_v61 = vld [vmem:[%s11570_s5 + $0x4b8] sm:$0xff] }
 0x3a8   : > { %v3602_v3 = vrot.slane %v3536_v20, 1  ;;  %v3498_v45 = vadd.f32 %v9605_v4, %v3344_v59  ;;  %v9642_v30 = vsel %vm1739_vm4, %v4107_v53, %v11580_v8  ;;  %v6983_v16 = vpack.c.bf16 %v6238_v61, %v6234_v57 }
 0x3a9   : > { %v3600_v17 = vsel %vm1739_vm4, %v3598_v22, %v3599_v14  ;;  %v3537_v25 = vmax.f32 %v3497_v38, 0.0  ;;  %4274 = vmatprep.mubr.f32.mxu0 %v9642_v30  ;;  %v6981_v22 = vpack.c.bf16 %v6229_v33, %v6225_v1 }
 0x3aa   : > { %3614 = vst [vmem:[#allocation4 + $0x20] sm:$0xf8] %v3600_v17  ;;  %v3603_v13 = vsel %vm1739_vm4, %v3601_v36, %v3602_v3  ;;  %v3538_v21 = vmax.f32 %v3498_v45, 0.0  ;;  %v3348_v20 = vpop.f32.mrb[46].mxu1  ;;  %4275 = vmatmul.mubr.f32.vlgmr.msra.gmra.mrb[36].mxu0 %v9655_v56  ;;  %v6233_v36 = vld [vmem:[%s11570_s5 + $0x490] sm:$0xff] }
 0x3ab   : > { %3615 = vst [vmem:[#allocation4 + $0x28] sm:$0xf8] %v3603_v13  ;;  %v3604_v9 = vrot.slane %v3537_v25, 1  ;;  %v3499_v46 = vadd.f32 %v9602_v52, %v3348_v20  ;;  %v3350_v53 = vpop.f32.mrb[47].mxu1  ;;  %6978 = vmatpush1.bf16.msra.mxu0 %v6977_v60  ;;  %v6237_v45 = vld [vmem:[%s11570_s5 + $0x4b0] sm:$0xff]  ;;  %v6242_v60 = vld [vmem:[%s11570_s5 + $0x4d8] sm:$0xff] }
 0x3ac   : > { %v3606_v38 = vrot.slane %v3538_v21, 1  ;;  %v3500_v59 = vadd.f32 %v9605_v4, %v3350_v53  ;;  %6980 = vmatprep.subr.bf16.mxu0 %v6979_v24  ;;  %v6246_v24 = vld [vmem:[%s11570_s5 + $0x4f8] sm:$0xff]  ;;  %v6985_v21 = vpack.c.bf16 %v6237_v45, %v6233_v36  ;;  %v6245_v53 = vld [vmem:[%s11570_s5 + $0x4f0] sm:$0xff] }
 0x3ad   : > { %v9674_v17 = vsel %vm1739_vm4, %v3599_v14, %v3604_v9  ;;  %3618 = vst [vmem:[#allocation4 + $0x40] sm:$0x7] %v3604_v9  ;;  %v3539_v25 = vmax.f32 %v3499_v46, 0.0  ;;  %v6987_v46 = vpack.c.bf16 %v6246_v24, %v6242_v60 }
 0x3ae   : > { %3616 = vst [vmem:[#allocation4 + $0x30] sm:$0xff] %v9674_v17  ;;  %v9684_v1 = vsel %vm1739_vm4, %v3602_v3, %v3606_v38  ;;  %3619 = vst [vmem:[#allocation4 + $0x48] sm:$0x7] %v3606_v38  ;;  %v3540_v33 = vmax.f32 %v3500_v59, 0.0  ;;  %v3354_v57 = vpop.f32.mrb[48].mxu1  ;;  %v6241_v3 = vld [vmem:[%s11570_s5 + $0x4d0] sm:$0xff] }
 0x3af   : > { %3617 = vst [vmem:[#allocation4 + $0x38] sm:$0xff] %v9684_v1  ;;  %v3624_v14 = vrot.slane %v3539_v25, 3  ;;  %v3501_v61 = vadd.f32 %v9602_v52, %v3354_v57  ;;  %v3356_v13 = vpop.f32.mrb[49].mxu1  ;;  %6982 = vmatpush1.bf16.msra.mxu0 %v6981_v22  ;;  %v6250_v22 = vld [vmem:[%s11570_s5 + $0x518] sm:$0xff] }
 0x3b0   : > { %v3625_v20 = vrot.slane %v3540_v33, 3  ;;  %v3502_v9 = vadd.f32 %v9605_v4, %v3356_v13  ;;  %6984 = vmatprep.subr.bf16.mxu0 %v6983_v16  ;;  %v6254_v16 = vld [vmem:[%s11570_s5 + $0x538] sm:$0xff]  ;;  %v9708_v13 = vld [vmem:[%s11570_s5 + $0x510] sm:$0xff] }
 0x3b1   : > { %3636 = vst [vmem:[#allocation4 + $0x40] sm:$0xe0] %v3624_v14  ;;  %v3541_v38 = vmax.f32 %v3501_v61, 0.0  ;;  %v9695_v59 = vld [vmem:[#allocation4 + $0x20] sm:$0xff]  ;;  %v6991_v34 = vpack.c.bf16 %v6254_v16, %v6250_v22  ;;  %v4116_v22 = vrot.slane %v9684_v1, 1 }
 0x3b2   : > { %3637 = vst [vmem:[#allocation4 + $0x48] sm:$0xe0] %v3625_v20  ;;  %v3542_v36 = vmax.f32 %v3502_v9, 0.0  ;;  %v3360_v45 = vpop.f32.mrb[50].mxu1  ;;  %v3776_v25 = vld [vmem:[#allocation4 + $0x28] sm:$0xff]  ;;  %v11583_v60 = vrot.slane %v9695_v59, 1  ;;  %v6989_v9 = vpack.c.bf16 %v6245_v53, %v6241_v3 }
 0x3b3   : > { %v3626_v24 = vrot.slane %v3541_v38, 3  ;;  %v3503_v33 = vadd.f32 %v9602_v52, %v3360_v45  ;;  %v3362_v57 = vpop.f32.mrb[51].mxu1  ;;  %v4112_v61 = vrot.slane %v3776_v25, 1  ;;  %6986 = vmatpush1.bf16.msra.mxu0 %v6985_v21  ;;  %v9714_v38 = vld [vmem:[%s11570_s5 + $0x530] sm:$0xff]  ;;  %v9719_v21 = vld [vmem:[%s11570_s5 + $0x558] sm:$0xff]  ;;  %v11692_v3 = vrot.slane %v9618_v49, 1 }
 0x3b4   : > { %v3628_v8 = vrot.slane %v3542_v36, 3  ;;  %v3504_v37 = vadd.f32 %v9605_v4, %v3362_v57  ;;  %6988 = vmatprep.subr.bf16.mxu0 %v6987_v46  ;;  %v9724_v45 = vld [vmem:[%s11570_s5 + $0x578] sm:$0xff]  ;;  %v9738_v16 = vld [vmem:[%s11570_s5 + $0x550] sm:$0xff]  ;;  %v6993_v31 = vpack.c.bf16 %v9714_v38, %v9708_v13 }
 0x3b5   : > { %v9727_v36 = vsel %vm2717_vm6, %v3624_v14, %v3626_v24  ;;  %3640 = vst [vmem:[#allocation4 + $0x60] sm:$0x1f] %v3626_v24  ;;  %v3543_v46 = vmax.f32 %v3503_v33, 0.0  ;;  %v9732_v53 = vsel %vm1739_vm4, %v11692_v3, %v4112_v61  ;;  %v9743_v25 = vld [vmem:[%s11570_s5 + $0x570] sm:$0xff]  ;;  %v9748_v14 = vld [vmem:[%s11570_s5 + $0x598] sm:$0xff]  ;;  %v11694_v33 = vrot.slane %v9614_v51, 1 }
 0x3b6   : > { %11691 = vst [vmem:[#allocation40_spill] sm:$0xff] %v9727_v36  ;;  %3638 = vst [vmem:[#allocation4 + $0x50] sm:$0xff] %v9727_v36  ;;  %v9752_v49 = vsel %vm2717_vm6, %v3625_v20, %v3628_v8  ;;  %v3544_v1 = vmax.f32 %v3504_v37, 0.0  ;;  %v3366_v24 = vpop.f32.mrb[52].mxu1  ;;  %4280 = vmatprep.mubr.f32.mxu0 %v9732_v53  ;;  %v9765_v3 = vld [vmem:[%s11570_s5 + $0x5b8] sm:$0xff]  ;;  %v9770_v37 = vld [vmem:[%s11570_s5 + $0x590] sm:$0xff]  ;;  %v6995_v13 = vpack.c.bf16 %v9724_v45, %v9719_v21 }
 0x3b7   : > { %11693 = vst [vmem:[#allocation41_spill] sm:$0xff] %v9752_v49  ;;  %3641 = vst [vmem:[#allocation4 + $0x68] sm:$0x1f] %v3628_v8  ;;  %v9760_v57 = vsel %vm1739_vm4, %v11694_v33, %v11583_v60  ;;  %v9775_v8 = vld [vmem:[%s11570_s5 + $0x5b0] sm:$0xff]  ;;  %v3649_v51 = vrot.slane %v3543_v46, 5  ;;  %v3505_v20 = vadd.f32 %v9602_v52, %v3366_v24  ;;  %v3368_v33 = vpop.f32.mrb[53].mxu1  ;;  %v9781_v60 = vsel %vm1739_vm4, %v4112_v61, %v4116_v22 }
 0x3b8   : > { %3639 = vst [vmem:[#allocation4 + $0x58] sm:$0xff] %v9752_v49  ;;  %4281 = vmatmul.mubr.f32.gmra.mrb[38].mxu0 %v9760_v57  ;;  %v9793_v46 = vld [vmem:[%s11570_s5 + $0x5f8] sm:$0xff]  ;;  %v3650_v24 = vrot.slane %v3544_v1, 5  ;;  %v3506_v10 = vadd.f32 %v9605_v4, %v3368_v33  ;;  %v4114_v61 = vrot.slane %v9674_v17, 1  ;;  %v3779_v58 = vld [vmem:[#allocation4 + $0x40] sm:$0xff]  ;;  %v6997_v17 = vpack.c.bf16 %v9743_v25, %v9738_v16 }
 0x3b9   : > { %4286 = vmatprep.mubr.f32.mxu0 %v9781_v60  ;;  %6990 = vmatpush1.bf16.msra.mxu0 %v6989_v9  ;;  %v9803_v38 = vld [vmem:[%s11570_s5 + $0x5d0] sm:$0xff]  ;;  %3665 = vst [vmem:[#allocation4 + $0x60] sm:$0x80] %v3649_v51  ;;  %v3545_v33 = vmax.f32 %v3505_v20, 0.0  ;;  %v3780_v0 = vld [vmem:[#allocation4 + $0x48] sm:$0xff]  ;;  %v6999_v9 = vpack.c.bf16 %v9765_v3, %v9748_v14  ;;  %v11695_v16 = vrot.slane %v9695_v59, 1  ;;  %v11700_v2 = vpack.c.bf16 %v9793_v46, %v9788_v41 }
 0x3ba   : > { %v9808_v1 = vld [vmem:[%s11570_s5 + $0x5f0] sm:$0xff]  ;;  %6992 = vmatprep.subr.bf16.mxu0 %v6991_v34  ;;  %v9819_v45 = vld [vmem:[%s11570_s5 + $0x618] sm:$0xff]  ;;  %3666 = vst [vmem:[#allocation4 + $0x68] sm:$0x80] %v3650_v24  ;;  %v3546_v34 = vmax.f32 %v3506_v10, 0.0  ;;  %v3372_v19 = vpop.f32.mrb[54].mxu1 }
 0x3bb   : > { %v9824_v20 = vld [vmem:[%s11570_s5 + $0x638] sm:$0xff]  ;;  %v9829_v25 = vsel %vm1739_vm4, %v11695_v16, %v4114_v61  ;;  %v4120_v14 = vrot.slane %v3780_v0, 1  ;;  %v4118_v3 = vrot.slane %v3779_v58, 1  ;;  %v9834_v21 = vld [vmem:[%s11570_s5 + $0x610] sm:$0xff]  ;;  %v3651_v62 = vrot.slane %v3545_v33, 5  ;;  %v3374_v63 = vpop.f32.mrb[55].mxu1 }
 0x3bc   : > { %v3507_v10 = vadd.f32 %v9602_v52, %v3372_v19  ;;  %4287 = vmatmul.mubr.f32.gmra.mrb[40].mxu0 %v9829_v25  ;;  %v3653_v59 = vrot.slane %v3546_v34, 5  ;;  %v3508_v16 = vadd.f32 %v9605_v4, %v3374_v63  ;;  %v9856_v19 = vld [vmem:[%s11570_s5 + $0x658] sm:$0xff] }
 0x3bd   : > { %v9849_v23 = vsel %vm1739_vm4, %v4116_v22, %v4120_v14  ;;  %6994 = vmatpush1.bf16.msra.mxu0 %v6993_v31  ;;  %v9861_v0 = vld [vmem:[%s11570_s5 + $0x678] sm:$0xff]  ;;  %v9864_v34 = vsel %vm3648_vm9, %v3649_v51, %v3651_v62  ;;  %v4124_v31 = vrot.slane %v9752_v49, 1  ;;  %v9875_v42 = vsel %vm1739_vm4, %v4114_v61, %v4118_v3 }
 0x3be   : > { %v3547_v63 = vmax.f32 %v3507_v10, 0.0  ;;  %4292 = vmatprep.mubr.f32.mxu0 %v9849_v23  ;;  %6996 = vmatprep.subr.bf16.mxu0 %v6995_v13  ;;  %3667 = vst [vmem:[#allocation4 + $0x70] sm:$0xff] %v9864_v34  ;;  %v9872_v33 = vsel %vm3648_vm9, %v3650_v24, %v3653_v59  ;;  %v3548_v58 = vmax.f32 %v3508_v16, 0.0  ;;  %v3378_v5 = vpop.f32.mrb[56].mxu1  ;;  %v4122_v51 = vrot.slane %v9727_v36, 1 }
 0x3bf   : > { %3668 = vst [vmem:[#allocation4 + $0x78] sm:$0xff] %v9872_v33  ;;  %v3509_v13 = vadd.f32 %v9602_v52, %v3378_v5  ;;  %v3380_v29 = vpop.f32.mrb[57].mxu1  ;;  %v9882_v22 = vsel %vm1739_vm4, %v4120_v14, %v4124_v31  ;;  %v4130_v32 = vrot.slane %v9864_v34, 1 }
 0x3c0   : > { %v3655_v10 = vrot.slane %v3547_v63, 5  ;;  %4293 = vmatmul.mubr.f32.gmra.mrb[42].mxu0 %v9875_v42  ;;  %v3657_v16 = vrot.slane %v3548_v58, 5  ;;  %v3510_v61 = vadd.f32 %v9605_v4, %v3380_v29  ;;  %v9889_v35 = vsel %vm1739_vm4, %v4118_v3, %v4122_v51  ;;  %v9892_v5 = vld [vmem:[#allocation4 + $0x60] sm:$0xff] }
 0x3c1   : > { %4298 = vmatprep.mubr.f32.mxu0 %v9882_v22  ;;  %v11605_v63 = vrot.slane %v9752_v49, 2  ;;  %6998 = vmatpush1.bf16.msra.mxu0 %v6997_v17  ;;  %v3549_v14 = vmax.f32 %v3509_v13, 0.0  ;;  %v3784_v7 = vld [vmem:[#allocation4 + $0x68] sm:$0xff]  ;;  %v5061_v54 = vrot.slane %v9892_v5, 2  ;;  %v4126_v58 = vrot.slane %v9892_v5, 1  ;;  %v9901_v17 = vld [vmem:[%s11570_s5 + $0x650] sm:$0xff] }
 0x3c2   : > { %v3656_v6 = vsel %vm3648_vm9, %v3651_v62, %v3655_v10  ;;  %7000 = vmatprep.subr.bf16.mxu0 %v6999_v9  ;;  %v3658_v29 = vsel %vm3648_vm9, %v3653_v59, %v3657_v16  ;;  %v3550_v24 = vmax.f32 %v3510_v61, 0.0  ;;  %v3384_v3 = vpop.f32.mrb[58].mxu1  ;;  %v4128_v44 = vrot.slane %v3784_v7, 1  ;;  %v9906_v62 = vld [vmem:[%s11570_s5 + $0x670] sm:$0xff] }
 0x3c3   : > { %3669 = vst [vmem:[#allocation4 + $0x80] sm:$0x7f] %v3656_v6  ;;  %v5063_v39 = vrot.slane %v3784_v7, 2  ;;  %3670 = vst [vmem:[#allocation4 + $0x88] sm:$0x7f] %v3658_v29  ;;  %v3675_v10 = vrot.slane %v3549_v14, 7  ;;  %v3511_v6 = vadd.f32 %v9602_v52, %v3384_v3  ;;  %v11697_v14 = vpack.c.bf16 %v9775_v8, %v9770_v37 }
 0x3c4   : > { %v3386_v9 = vpop.f32.mrb[59].mxu1  ;;  %4299 = vmatmul.mubr.f32.gmra.mrb[44].mxu0 %v9889_v35  ;;  %v11604_v59 = vrot.slane %v9727_v36, 2  ;;  %v11609_v7 = vrot.slane %v9872_v33, 2  ;;  %v3676_v13 = vrot.slane %v3550_v24, 7  ;;  %v9914_v61 = vsel %vm1739_vm4, %v4124_v31, %v4128_v44  ;;  %v9927_v29 = vld [vmem:[%s11570_s5 + $0x698] sm:$0xff] }
 0x3c5   : > { %v3512_v16 = vadd.f32 %v9605_v4, %v3386_v9  ;;  %v9919_v5 = vsel %vm1415_vm5, %v11605_v63, %v5063_v39  ;;  %7002 = vmatpush1.bf16.msra.mxu0 %v11697_v14  ;;  %3687 = vst [vmem:[#allocation4 + $0x90] sm:$0xfe] %v3675_v10  ;;  %v3551_v24 = vmax.f32 %v3511_v6, 0.0  ;;  %4304 = vmatprep.mubr.f32.mxu0 %v9914_v61  ;;  %v4132_v3 = vrot.slane %v9872_v33, 1  ;;  %v9942_v8 = vld [vmem:[%s11570_s5 + $0x6b8] sm:$0xff]  ;;  %v9947_v6 = vld [vmem:[%s11570_s5 + $0x690] sm:$0xff] }
 0x3c6   : > { %11696 = vst [vmem:[#allocation42_spill] sm:$0xff] %v9919_v5  ;;  %5412 = vmatprep.mubr.f32.mxu1 %v9919_v5  ;;  %v9934_v31 = vsel %vm1415_vm5, %v11604_v59, %v5061_v54  ;;  %v9952_v9 = vld [vmem:[%s11570_s5 + $0x6b0] sm:$0xff]  ;;  %3688 = vst [vmem:[#allocation4 + $0x98] sm:$0xfe] %v3676_v13  ;;  %v3390_v59 = vpop.f32.mrb[60].mxu1  ;;  %v9956_v63 = vsel %vm1739_vm4, %v4122_v51, %v4126_v58  ;;  %v9961_v37 = vsel %vm1415_vm5, %v5063_v39, %v11609_v7  ;;  %v9975_v51 = vld [vmem:[%s11570_s5 + $0x6f8] sm:$0xff] }
 0x3c7   : > { %11698 = vst [vmem:[#allocation43_spill] sm:$0xff] %v9934_v31  ;;  %v3552_v14 = vmax.f32 %v3512_v16, 0.0  ;;  %5413 = vmatmul.mubr.f32.vlgmr.msra.gmra.mrb[76].mxu1 %v9934_v31  ;;  %11699 = vst [vmem:[#allocation44_spill] sm:$0xff] %v9961_v37  ;;  %7004 = vmatprep.subr.bf16.mxu0 %v11700_v2  ;;  %v9970_v16 = vld [vmem:[%s11570_s5 + $0x6d8] sm:$0xff]  ;;  %v3677_v48 = vrot.slane %v3551_v24, 7  ;;  %v3513_v39 = vadd.f32 %v9602_v52, %v3390_v59  ;;  %v3392_v7 = vpop.f32.mrb[61].mxu1 }
 0x3c8   : > { %4305 = vmatmul.mubr.f32.gmra.mrb[46].mxu0 %v9956_v63  ;;  %v9980_v31 = vsel %vm1739_vm4, %v4128_v44, %v4132_v3  ;;  %5418 = vmatprep.mubr.f32.mxu1 %v9961_v37  ;;  %v5065_v2 = vrot.slane %v9864_v34, 2  ;;  %v3514_v46 = vadd.f32 %v9605_v4, %v3392_v7  ;;  %v11701_v24 = vpack.c.bf16 %v9808_v1, %v9803_v38 }
 0x3c9   : > { %v3679_v41 = vrot.slane %v3552_v14, 7  ;;  %4310 = vmatprep.mubr.f32.mxu0 %v9980_v31  ;;  %v9994_v26 = vsel %vm3573_vm8, %v3675_v10, %v3677_v48  ;;  %3691 = vst [vmem:[#allocation4 + $0xb0] sm:$0x1] %v3677_v48  ;;  %v9997_v34 = vsel %vm1739_vm4, %v4126_v58, %v4130_v32  ;;  %v11703_v38 = vpack.c.bf16 %v9824_v20, %v9819_v45  ;;  %v10012_v10 = vld [vmem:[%s11570_s5 + $0x6d0] sm:$0xff] }
 0x3ca   : > { %7006 = vmatpush1.bf16.msra.mxu0 %v11701_v24  ;;  %v10000_v7 = vsel %vm1415_vm5, %v5061_v54, %v5065_v2  ;;  %v10002_v14 = vld [vmem:[#allocation4 + $0x80] sm:$0xff]  ;;  %3689 = vst [vmem:[#allocation4 + $0xa0] sm:$0xff] %v9994_v26  ;;  %v3553_v45 = vmax.f32 %v3513_v39, 0.0  ;;  %v3396_v20 = vpop.f32.mrb[62].mxu1  ;;  %v3788_v58 = vld [vmem:[#allocation4 + $0x88] sm:$0xff]  ;;  %v3554_v1 = vmax.f32 %v3514_v46, 0.0  ;;  %v11705_v46 = vpack.c.bf16 %v9839_v27, %v9834_v21 }
 0x3cb   : > { %11702 = vst [vmem:[#allocation45_spill] sm:$0xff] %v10000_v7  ;;  %7008 = vmatprep.subr.bf16.mxu0 %v11703_v38  ;;  %v10017_v48 = vld [vmem:[%s11570_s5 + $0x6f0] sm:$0xff]  ;;  %v10021_v54 = vsel %vm3573_vm8, %v3676_v13, %v3679_v41  ;;  %3692 = vst [vmem:[#allocation4 + $0xb8] sm:$0x1] %v3679_v41  ;;  %5419 = vmatmul.mubr.f32.gmra.mrb[78].mxu1 %v10000_v7  ;;  %v4134_v24 = vrot.slane %v10002_v14, 1  ;;  %v5069_v38 = vrot.slane %v10002_v14, 2 }
 0x3cc   : > { %3690 = vst [vmem:[#allocation4 + $0xa8] sm:$0xff] %v10021_v54  ;;  %v3515_v44 = vadd.f32 %v9602_v52, %v3396_v20  ;;  %v3398_v59 = vpop.f32.mrb[63].mxu1  ;;  %4311 = vmatmul.mubr.f32.gmra.mrb[48].mxu0 %v9997_v34  ;;  %v4136_v13 = vrot.slane %v3788_v58, 1  ;;  %v5071_v37 = vrot.slane %v3788_v58, 2  ;;  %v10036_v15 = vld [vmem:[#allocation4 + $0x90] sm:$0xff]  ;;  %v11708_v27 = vpack.c.bf16 %v9861_v0, %v9856_v19 }
 0x3cd   : > { %v3516_v39 = vadd.f32 %v9605_v4, %v3398_v59  ;;  %v10031_v41 = vsel %vm1739_vm4, %v4130_v32, %v4134_v24  ;;  %v10034_v7 = vsel %vm1415_vm5, %v5065_v2, %v5069_v38  ;;  %v11706_v59 = vrot.slane %v9872_v33, 2  ;;  %v10051_v2 = vld [vmem:[#allocation4 + $0x98] sm:$0xff] }
 0x3ce   : > { %11704 = vst [vmem:[#allocation46_spill] sm:$0xff] %v10034_v7  ;;  %7010 = vmatpush1.bf16.msra.mxu0 %v11705_v46  ;;  %v3555_v20 = vmax.f32 %v3515_v44, 0.0  ;;  %v10044_v58 = vsel %vm1739_vm4, %v4132_v3, %v4136_v13  ;;  %v3402_v46 = vpop.f32.mrb[64].mxu1  ;;  %v4140_v3 = vrot.slane %v10051_v2, 1  ;;  %v5075_v33 = vrot.slane %v10051_v2, 2 }
 0x3cf   : > { %v10049_v32 = vsel %vm1415_vm5, %v11706_v59, %v5071_v37  ;;  %7012 = vmatprep.subr.bf16.mxu0 %v11708_v27  ;;  %v3556_v21 = vmax.f32 %v3516_v39, 0.0  ;;  %4316 = vmatprep.mubr.f32.mxu0 %v10044_v58  ;;  %v5073_v44 = vrot.slane %v10036_v15, 2  ;;  %v3699_v59 = vrot.slane %v3553_v45, 1  ;;  %v3404_v43 = vpop.f32.mrb[65].mxu1 }
 0x3d0   : > { %11707 = vst [vmem:[#allocation47_spill] sm:$0xff] %v10049_v32  ;;  %5424 = vmatprep.mubr.f32.mxu1 %v10049_v32  ;;  %v3702_v14 = vrot.slane %v3554_v1, 1  ;;  %v3700_v36 = vrot.slane %v3555_v20, 1  ;;  %v3517_v5 = vadd.f32 %v9602_v52, %v3402_v46  ;;  %4317 = vmatmul.mubr.f32.gmra.mrb[50].mxu0 %v10031_v41  ;;  %v3518_v19 = vadd.f32 %v9605_v4, %v3404_v43 }
 0x3d1   : > { %5425 = vmatmul.mubr.f32.gmra.mrb[80].mxu1 %v10034_v7  ;;  %v3703_v0 = vrot.slane %v3556_v21, 1  ;;  %v10067_v39 = vsel %vm1739_vm4, %v4136_v13, %v4140_v3  ;;  %v10070_v27 = vsel %vm1415_vm5, %v5071_v37, %v5075_v33  ;;  %v11710_v1 = vpack.c.bf16 %v9906_v62, %v9901_v17 }
 0x3d2   : > { %11709 = vst [vmem:[#allocation48_spill] sm:$0xff] %v10070_v27  ;;  %v3701_v45 = vsel %vm1739_vm4, %v3699_v59, %v3700_v36  ;;  %v3557_v20 = vmax.f32 %v3517_v5, 0.0  ;;  %4322 = vmatprep.mubr.f32.mxu0 %v10067_v39  ;;  %5430 = vmatprep.mubr.f32.mxu1 %v10070_v27  ;;  %v11711_v21 = vrot.slane %v10036_v15, 1  ;;  %v11621_v13 = vrot.slane %v10021_v54, 1  ;;  %v3408_v17 = vpop.f32.mrb[66].mxu1 }
 0x3d3   : > { %7014 = vmatpush1.bf16.msra.mxu0 %v11710_v1  ;;  %3715 = vst [vmem:[#allocation4 + $0xb0] sm:$0xf8] %v3701_v45  ;;  %v3704_v37 = vsel %vm1739_vm4, %v3702_v14, %v3703_v0  ;;  %v3558_v46 = vmax.f32 %v3518_v19, 0.0  ;;  %v10086_v62 = vsel %vm1415_vm5, %v5069_v38, %v5073_v44  ;;  %v11620_v5 = vrot.slane %v10021_v54, 2  ;;  %v6318_v1 = vld [vmem:[%s11570_s5 + $0x738] sm:$0xff]  ;;  %v3410_v38 = vpop.f32.mrb[67].mxu1 }
 0x3d4   : > { %v10081_v43 = vsel %vm1739_vm4, %v4134_v24, %v11711_v21  ;;  %11712 = vst [vmem:[#allocation49_spill] sm:$0xff] %v10086_v62  ;;  %v11713_v59 = vpack.c.bf16 %v9942_v8, %v9927_v29  ;;  %v6314_v24 = vld [vmem:[%s11570_s5 + $0x718] sm:$0xff]  ;;  %3716 = vst [vmem:[#allocation4 + $0xb8] sm:$0xf8] %v3704_v37  ;;  %v3705_v14 = vrot.slane %v3557_v20, 1  ;;  %v3519_v19 = vadd.f32 %v9602_v52, %v3408_v17 }
 0x3d5   : > { %4323 = vmatmul.mubr.f32.gmra.mrb[52].mxu0 %v10081_v43  ;;  %5431 = vmatmul.mubr.f32.gmra.mrb[82].mxu1 %v10086_v62  ;;  %v10104_v29 = vsel %vm1739_vm4, %v4140_v3, %v11621_v13  ;;  %v11619_v8 = vrot.slane %v9994_v26, 1  ;;  %v3707_v45 = vrot.slane %v3558_v46, 1  ;;  %v3520_v21 = vadd.f32 %v9605_v4, %v3410_v38  ;;  %v6313_v3 = vld [vmem:[%s11570_s5 + $0x710] sm:$0xff] }
 0x3d6   : > { %7016 = vmatprep.subr.bf16.mxu0 %v11713_v59  ;;  %4328 = vmatprep.mubr.f32.mxu0 %v10104_v29  ;;  %v10112_v20 = vsel %vm1415_vm5, %v5075_v33, %v11620_v5  ;;  %v11618_v37 = vrot.slane %v9994_v26, 2  ;;  %v11715_v17 = vpack.c.bf16 %v9952_v9, %v9947_v6  ;;  %v6317_v46 = vld [vmem:[%s11570_s5 + $0x730] sm:$0xff]  ;;  %v10125_v59 = vsel %vm1739_vm4, %v3700_v36, %v3705_v14  ;;  %v6322_v9 = vld [vmem:[%s11570_s5 + $0x758] sm:$0xff] }
 0x3d7   : > { %11714 = vst [vmem:[#allocation50_spill] sm:$0xff] %v10112_v20  ;;  %3719 = vst [vmem:[#allocation4 + $0xd0] sm:$0x7] %v3705_v14  ;;  %v3559_v33 = vmax.f32 %v3519_v19, 0.0  ;;  %5436 = vmatprep.mubr.f32.mxu1 %v10112_v20  ;;  %v11716_v38 = vpack.c.bf16 %v9975_v51, %v9970_v16  ;;  %v7023_v6 = vpack.c.bf16 %v6318_v1, %v6314_v24  ;;  %v10140_v36 = vld [vmem:[%s11570_s5 + $0x750] sm:$0xff]  ;;  %v3560_v16 = vmax.f32 %v3520_v21, 0.0 }
 0x3d8   : > { %7018 = vmatpush1.bf16.msra.mxu0 %v11715_v17  ;;  %v6326_v17 = vld [vmem:[%s11570_s5 + $0x778] sm:$0xff]  ;;  %3717 = vst [vmem:[#allocation4 + $0xc0] sm:$0xff] %v10125_v59  ;;  %v10144_v14 = vsel %vm1739_vm4, %v3703_v0, %v3707_v45  ;;  %3720 = vst [vmem:[#allocation4 + $0xd8] sm:$0x7] %v3707_v45  ;;  %v3414_v51 = vpop.f32.mrb[68].mxu1  ;;  %v11717_v24 = vrot.slane %v10036_v15, 1  ;;  %v10156_v19 = vsel %vm1415_vm5, %v5073_v44, %v11618_v37 }
 0x3d9   : > { %7020 = vmatprep.subr.bf16.mxu0 %v11716_v38  ;;  %11718 = vst [vmem:[#allocation51_spill] sm:$0xff] %v10156_v19  ;;  %v10161_v0 = vld [vmem:[%s11570_s5 + $0x770] sm:$0xff]  ;;  %v10166_v45 = vld [vmem:[%s11570_s5 + $0x798] sm:$0xff]  ;;  %3718 = vst [vmem:[#allocation4 + $0xc8] sm:$0xff] %v10144_v14  ;;  %v3725_v21 = vrot.slane %v3559_v33, 3  ;;  %v3521_v44 = vadd.f32 %v9602_v52, %v3414_v51  ;;  %v3416_v38 = vpop.f32.mrb[69].mxu1  ;;  %5437 = vmatmul.mubr.f32.gmra.mrb[84].mxu1 %v10156_v19  ;;  %v7025_v5 = vpack.c.bf16 %v6317_v46, %v6313_v3 }
 0x3da   : > { %v10151_v1 = vsel %vm1739_vm4, %v11717_v24, %v11619_v8  ;;  %v10171_v15 = vld [vmem:[%s11570_s5 + $0x7b8] sm:$0xff]  ;;  %v3726_v24 = vrot.slane %v3560_v16, 3  ;;  %v3522_v37 = vadd.f32 %v9605_v4, %v3416_v38  ;;  %v11719_v8 = vpack.c.bf16 %v10017_v48, %v10012_v10  ;;  %v10181_v62 = vld [vmem:[#allocation4 + $0xb0] sm:$0xff]  ;;  %v3420_v19 = vpop.f32.mrb[70].mxu1  ;;  %v10202_v3 = vld [vmem:[%s11570_s5 + $0x790] sm:$0xff] }
 0x3db   : > { %4329 = vmatmul.mubr.f32.gmra.mrb[54].mxu0 %v10151_v1  ;;  %v7027_v13 = vpack.c.bf16 %v6326_v17, %v6322_v9  ;;  %3737 = vst [vmem:[#allocation4 + $0xd0] sm:$0xe0] %v3725_v21  ;;  %v3561_v20 = vmax.f32 %v3521_v44, 0.0  ;;  %v7029_v51 = vpack.c.bf16 %v10161_v0, %v10140_v36  ;;  %v10188_v10 = vld [vmem:[#allocation4 + $0xb8] sm:$0xff]  ;;  %v4146_v48 = vrot.slane %v10181_v62, 1  ;;  %v3422_v9 = vpop.f32.mrb[71].mxu1 }
 0x3dc   : > { %7022 = vmatpush1.bf16.msra.mxu0 %v11719_v8  ;;  %3738 = vst [vmem:[#allocation4 + $0xd8] sm:$0xe0] %v3726_v24  ;;  %v3562_v38 = vmax.f32 %v3522_v37, 0.0  ;;  %v5081_v8 = vrot.slane %v10181_v62, 2  ;;  %v4148_v17 = vrot.slane %v10188_v10, 1  ;;  %v5083_v36 = vrot.slane %v10188_v10, 2 }
 0x3dd   : > { %7024 = vmatprep.subr.bf16.mxu0 %v7023_v6  ;;  %v3727_v46 = vrot.slane %v3561_v20, 3  ;;  %v3523_v6 = vadd.f32 %v9602_v52, %v3420_v19  ;;  %v3524_v37 = vadd.f32 %v9605_v4, %v3422_v9  ;;  %v11720_v33 = vrot.slane %v10021_v54, 1 }
 0x3de   : > { %v3729_v0 = vrot.slane %v3562_v38, 3  ;;  %v11721_v9 = vrot.slane %v10021_v54, 2  ;;  %v11724_v44 = vrot.slane %v9994_v26, 2  ;;  %v11733_v55 = vrot.slane %v10144_v14, 1 }
 0x3df   : > { %v10205_v20 = vsel %vm2717_vm6, %v3725_v21, %v3727_v46  ;;  %3741 = vst [vmem:[#allocation4 + $0xf0] sm:$0x1f] %v3727_v46  ;;  %v3563_v19 = vmax.f32 %v3523_v6, 0.0  ;;  %v10210_v38 = vsel %vm1739_vm4, %v11720_v33, %v4148_v17  ;;  %v10225_v21 = vld [vmem:[%s11570_s5 + $0x7d8] sm:$0xff]  ;;  %v3426_v46 = vpop.f32.mrb[72].mxu1  ;;  %v11723_v6 = vrot.slane %v9994_v26, 1 }
 0x3e0   : > { %7026 = vmatpush1.bf16.msra.mxu0 %v7025_v5  ;;  %v10215_v16 = vsel %vm1415_vm5, %v11721_v9, %v5083_v36  ;;  %v10220_v5 = vld [vmem:[%s11570_s5 + $0x7b0] sm:$0xff]  ;;  %v10230_v33 = vld [vmem:[%s11570_s5 + $0x7f8] sm:$0xff]  ;;  %3739 = vst [vmem:[#allocation4 + $0xe0] sm:$0xff] %v10205_v20  ;;  %v10234_v54 = vsel %vm2717_vm6, %v3726_v24, %v3729_v0  ;;  %3742 = vst [vmem:[#allocation4 + $0xf8] sm:$0x1f] %v3729_v0  ;;  %4334 = vmatprep.mubr.f32.mxu0 %v10210_v38  ;;  %v11727_v26 = vrot.slane %v10144_v14, 2 }
 0x3e1   : > { %11722 = vst [vmem:[#allocation52_spill] sm:$0xff] %v10215_v16  ;;  %7028 = vmatprep.subr.bf16.mxu0 %v7027_v13  ;;  %v3564_v13 = vmax.f32 %v3524_v37, 0.0  ;;  %5442 = vmatprep.mubr.f32.mxu1 %v10215_v16  ;;  %v10241_v9 = vsel %vm1739_vm4, %v11723_v6, %v4146_v48  ;;  %v10246_v27 = vsel %vm1415_vm5, %v11724_v44, %v5081_v8  ;;  %3740 = vst [vmem:[#allocation4 + $0xe8] sm:$0xff] %v10234_v54  ;;  %v3428_v37 = vpop.f32.mrb[73].mxu1 }
 0x3e2   : > { %11725 = vst [vmem:[#allocation53_spill] sm:$0xff] %v10246_v27  ;;  %v3749_v24 = vrot.slane %v3563_v19, 5  ;;  %v3525_v0 = vadd.f32 %v9602_v52, %v3426_v46  ;;  %4335 = vmatmul.mubr.f32.gmra.mrb[56].mxu0 %v10241_v9  ;;  %5443 = vmatmul.mubr.f32.gmra.mrb[86].mxu1 %v10246_v27  ;;  %v11726_v16 = vrot.slane %v10144_v14, 1  ;;  %v10260_v44 = vsel %vm1415_vm5, %v5083_v36, %v11727_v26  ;;  %v10265_v46 = vld [vmem:[#allocation4 + $0xd0] sm:$0xff]  ;;  %v10279_v36 = vld [vmem:[%s11570_s5 + $0x7f0] sm:$0xff]  ;;  %v3432_v32 = vpop.f32.mrb[74].mxu1 }
 0x3e3   : > { %11728 = vst [vmem:[#allocation54_spill] sm:$0xff] %v10260_v44  ;;  %v3750_v7 = vrot.slane %v3564_v13, 5  ;;  %v3526_v19 = vadd.f32 %v9605_v4, %v3428_v37  ;;  %5448 = vmatprep.mubr.f32.mxu1 %v10260_v44  ;;  %v7033_v27 = vpack.c.bf16 %v10220_v5, %v10202_v3  ;;  %v11729_v37 = vrot.slane %v10125_v59, 1  ;;  %v3434_v49 = vpop.f32.mrb[75].mxu1 }
 0x3e4   : > { %v10255_v6 = vsel %vm1739_vm4, %v4148_v17, %v11726_v16  ;;  %v7035_v16 = vpack.c.bf16 %v10230_v33, %v10225_v21  ;;  %v10274_v17 = vld [vmem:[%s11570_s5 + $0x7d0] sm:$0xff]  ;;  %3765 = vst [vmem:[#allocation4 + $0xf0] sm:$0x80] %v3749_v24  ;;  %v3565_v13 = vmax.f32 %v3525_v0, 0.0  ;;  %v11730_v3 = vrot.slane %v10125_v59, 2  ;;  %v10291_v21 = vld [vmem:[#allocation4 + $0xd8] sm:$0xff]  ;;  %7030 = vmatpush1.bf16.msra.mxu0 %v7029_v51 }
 0x3e5   : > { %4340 = vmatprep.mubr.f32.mxu0 %v10255_v6  ;;  %v10284_v26 = vsel %vm1739_vm4, %v4146_v48, %v11729_v37  ;;  %v4154_v33 = vrot.slane %v10265_v46, 1  ;;  %3766 = vst [vmem:[#allocation4 + $0xf8] sm:$0x80] %v3750_v7  ;;  %v3566_v44 = vmax.f32 %v3526_v19, 0.0  ;;  %v4156_v0 = vrot.slane %v10291_v21, 1 }
 0x3e6   : > { %v10289_v5 = vsel %vm1415_vm5, %v5081_v8, %v11730_v3  ;;  %v5091_v40 = vrot.slane %v10291_v21, 2  ;;  %v5089_v48 = vrot.slane %v10265_v46, 2  ;;  %v11732_v37 = vpack.c.bf16 %v10171_v15, %v10166_v45  ;;  %4341 = vmatmul.mubr.f32.gmra.mrb[58].mxu0 %v10284_v26 }
 0x3e7   : > { %11731 = vst [vmem:[#allocation55_spill] sm:$0xff] %v10289_v5  ;;  %v3751_v8 = vrot.slane %v3565_v13, 5  ;;  %v3527_v3 = vadd.f32 %v9602_v52, %v3432_v32  ;;  %5449 = vmatmul.mubr.f32.gmra.mrb[88].mxu1 %v10289_v5  ;;  %v4160_v51 = vrot.slane %v10234_v54, 1  ;;  %v7037_v19 = vpack.c.bf16 %v10279_v36, %v10274_v17 }
 0x3e8   : > { %7032 = vmatprep.subr.bf16.mxu0 %v11732_v37  ;;  %v3753_v50 = vrot.slane %v3566_v44, 5  ;;  %v3528_v28 = vadd.f32 %v9605_v4, %v3434_v49  ;;  %v10310_v45 = vsel %vm1739_vm4, %v11733_v55, %v4156_v0  ;;  %v11734_v52 = vrot.slane %v10144_v14, 2  ;;  %v3808_v55 = vld [vmem:[%s11570_s5 + $0x8] sm:$0xff] }
 0x3e9   : > { %v10318_v15 = vsel %vm3648_vm9, %v3749_v24, %v3751_v8  ;;  %v3567_v13 = vmax.f32 %v3527_v3, 0.0  ;;  %4346 = vmatprep.mubr.f32.mxu0 %v10310_v45  ;;  %v5095_v4 = vrot.slane %v10234_v54, 2  ;;  %v4158_v49 = vrot.slane %v10205_v20, 1  ;;  %v3812_v44 = vld [vmem:[%s11570_s5 + $0x28] sm:$0xff]  ;;  %7034 = vmatpush1.bf16.msra.mxu0 %v7033_v27 }
 0x3ea   : > { %v10315_v32 = vsel %vm1415_vm5, %v11734_v52, %v5091_v40  ;;  %3767 = vst [vmem:[#allocation4 + $0x100] sm:$0xff] %v10318_v15  ;;  %v10332_v24 = vsel %vm3648_vm9, %v3750_v7, %v3753_v50  ;;  %v3568_v17 = vmax.f32 %v3528_v28, 0.0  ;;  %v11736_v36 = vrot.slane %v10125_v59, 1  ;;  %7036 = vmatprep.subr.bf16.mxu0 %v7035_v16 }
 0x3eb   : > { %11735 = vst [vmem:[#allocation56_spill] sm:$0xff] %v10315_v32  ;;  %5454 = vmatprep.mubr.f32.mxu1 %v10315_v32  ;;  %v11737_v3 = vrot.slane %v10125_v59, 2  ;;  %3768 = vst [vmem:[#allocation4 + $0x108] sm:$0xff] %v10332_v24  ;;  %v3755_v32 = vrot.slane %v3567_v13, 5  ;;  %v10348_v28 = vsel %vm1739_vm4, %v4156_v0, %v4160_v51  ;;  %v10351_v7 = vsel %vm1415_vm5, %v5091_v40, %v5095_v4  ;;  %v10356_v27 = vld [vmem:[#allocation4 + $0xf0] sm:$0xff] }
 0x3ec   : > { %v10337_v37 = vsel %vm1739_vm4, %v11736_v36, %v4154_v33  ;;  %11739 = vst [vmem:[#allocation58_spill] sm:$0xff] %v10351_v7  ;;  %v5093_v36 = vrot.slane %v10205_v20, 2  ;;  %v3757_v5 = vrot.slane %v3568_v17, 5  ;;  %v7039_v13 = vpack.c.bf16 %v3812_v44, %v3808_v55  ;;  %v10365_v40 = vld [vmem:[#allocation4 + $0xf8] sm:$0xff] }
 0x3ed   : > { %v10342_v52 = vsel %vm1415_vm5, %v11737_v3, %v5089_v48  ;;  %4347 = vmatmul.mubr.f32.gmra.mrb[60].mxu0 %v10337_v37  ;;  %v3756_v3 = vsel %vm3648_vm9, %v3751_v8, %v3755_v32  ;;  %v4162_v12 = vrot.slane %v10356_v27, 1  ;;  %v5099_v55 = vrot.slane %v10365_v40, 2 }
 0x3ee   : > { %11738 = vst [vmem:[#allocation57_spill] sm:$0xff] %v10342_v52  ;;  %5455 = vmatmul.mubr.f32.gmra.mrb[90].mxu1 %v10342_v52  ;;  %4352 = vmatprep.mubr.f32.mxu0 %v10348_v28  ;;  %v10360_v52 = vsel %vm1739_vm4, %v4154_v33, %v4158_v49  ;;  %v10363_v0 = vsel %vm1415_vm5, %v5089_v48, %v5093_v36  ;;  %3769 = vst [vmem:[#allocation4 + $0x110] sm:$0x7f] %v3756_v3  ;;  %v5097_v8 = vrot.slane %v10356_v27, 2 }
 0x3ef   : > { %5460 = vmatprep.mubr.f32.mxu1 %v10351_v7  ;;  %v3758_v17 = vsel %vm3648_vm9, %v3753_v50, %v3757_v5  ;;  %v4164_v7 = vrot.slane %v10365_v40, 1  ;;  %7038 = vmatpush1.bf16.msra.mxu0 %v7037_v19  ;;  %v10378_v16 = vsel %vm1415_vm5, %v5095_v4, %v5099_v55  ;;  %v4168_v50 = vrot.slane %v10332_v24, 1 }
 0x3f0   : > { %3770 = vst [vmem:[#allocation4 + $0x118] sm:$0x7f] %v3758_v17  ;;  %11740 = vst [vmem:[#allocation59_spill] sm:$0xff] %v10378_v16  ;;  %7040 = vmatprep.subr.bf16.mxu0 %v7039_v13  ;;  %v5103_v5 = vrot.slane %v10332_v24, 2  ;;  %v10385_v48 = vsel %vm1739_vm4, %v4158_v49, %v4162_v12  ;;  %v10388_v19 = vsel %vm1415_vm5, %v5093_v36, %v5097_v8  ;;  %v4166_v4 = vrot.slane %v10318_v15, 1 }
 0x3f1   : > { %4353 = vmatmul.mubr.f32.gmra.mrb[62].mxu0 %v10360_v52  ;;  %v10375_v33 = vsel %vm1739_vm4, %v4160_v51, %v4164_v7  ;;  %11741 = vst [vmem:[#allocation60_spill] sm:$0xff] %v10388_v19  ;;  %v10393_v51 = vsel %vm1739_vm4, %v4164_v7, %v4168_v50  ;;  %v5101_v49 = vrot.slane %v10318_v15, 2 }
 0x3f2   : > { %5461 = vmatmul.mubr.f32.gmra.mrb[92].mxu1 %v10363_v0  ;;  %4358 = vmatprep.mubr.f32.mxu0 %v10375_v33  ;;  %v10396_v32 = vsel %vm1415_vm5, %v5099_v55, %v5103_v5  ;;  %v10403_v13 = vsel %vm1739_vm4, %v4162_v12, %v4166_v4 }
 0x3f3   : > { %5466 = vmatprep.mubr.f32.mxu1 %v10378_v16  ;;  %11742 = vst [vmem:[#allocation61_spill] sm:$0xff] %v10396_v32  ;;  %v10406_v3 = vsel %vm1415_vm5, %v5097_v8, %v5101_v49 }
 0x3f5   : > { %4359 = vmatmul.mubr.f32.gmra.mrb[64].mxu0 %v10385_v48  ;;  %v3937_v44 = vld [vmem:[#allocation4 + $0x110] sm:$0x7f] }
 0x3f6   : > { %5467 = vmatmul.mubr.f32.gmra.mrb[94].mxu1 %v10388_v19  ;;  %4364 = vmatprep.mubr.f32.mxu0 %v10393_v51  ;;  %v4904_v36 = vld [vmem:[#allocation4 + $0x110] sm:$0xff]  ;;  %v10408_v55 = vrot.slane %v3937_v44, 1 }
 0x3f7   : > { %5472 = vmatprep.mubr.f32.mxu1 %v10396_v32  ;;  %v3938_v7 = vld [vmem:[#allocation4 + $0x118] sm:$0x7f]  ;;  %v10410_v19 = vrot.slane %v4904_v36, 2 }
 0x3f8   : > { %v4905_v17 = vld [vmem:[#allocation4 + $0x118] sm:$0xff]  ;;  %v10414_v32 = vrot.slane %v3938_v7, 1  ;;  %v10430_v44 = vsel %vm1739_vm4, %v4166_v4, %v10408_v55 }
 0x3f9   : > { %11743 = vst [vmem:[#allocation62_spill] sm:$0xff] %v10410_v19  ;;  %4365 = vmatmul.mubr.f32.gmra.mrb[66].mxu0 %v10403_v13  ;;  %v10416_v16 = vrot.slane %v4905_v17, 2  ;;  %v10434_v36 = vsel %vm1415_vm5, %v5101_v49, %v10410_v19  ;;  %v3816_v4 = vld [vmem:[%s11570_s5 + $0x48] sm:$0xff] }
 0x3fa   : > { %5473 = vmatmul.mubr.f32.gmra.mrb[96].mxu1 %v10406_v3  ;;  %v10420_v12 = vsel %vm1739_vm4, %v4168_v50, %v10414_v32  ;;  %11746 = vst [vmem:[#allocation65_spill] sm:$0xff] %v10434_v36  ;;  %v3807_v50 = vld [vmem:[%s11570_s5] sm:$0xff]  ;;  %v3820_v49 = vld [vmem:[%s11570_s5 + $0x68] sm:$0xff] }
 0x3fb   : > { %11744 = vst [vmem:[#allocation63_spill] sm:$0xff] %v10416_v16  ;;  %v10424_v8 = vsel %vm1415_vm5, %v5103_v5, %v10416_v16  ;;  %4370 = vmatprep.mubr.f32.mxu0 %v10420_v12  ;;  %v3811_v5 = vld [vmem:[%s11570_s5 + $0x20] sm:$0xff]  ;;  %v7043_v17 = vpack.c.bf16 %v3820_v49, %v3816_v4  ;;  %v3832_v49 = vld [vmem:[%s11570_s5 + $0xc8] sm:$0xff] }
 0x3fc   : > { %11745 = vst [vmem:[#allocation64_spill] sm:$0xff] %v10424_v8  ;;  %5478 = vmatprep.mubr.f32.mxu1 %v10424_v8  ;;  %v7041_v7 = vpack.c.bf16 %v3811_v5, %v3807_v50  ;;  %v3824_v8 = vld [vmem:[%s11570_s5 + $0x88] sm:$0xff]  ;;  %v3823_v5 = vld [vmem:[%s11570_s5 + $0x80] sm:$0xff] }
 0x3fd   : > { %4371 = vmatmul.mubr.f32.gmra.mrb[68].mxu0 %v10430_v44  ;;  %v3827_v4 = vld [vmem:[%s11570_s5 + $0xa0] sm:$0xff] }
 0x3fe   : > { %5479 = vmatmul.mubr.f32.gmra.mrb[98].mxu1 %v10434_v36  ;;  %4376 = vmatprep.mubr.f32.mxu0 %v10414_v32  ;;  %v3819_v36 = vld [vmem:[%s11570_s5 + $0x60] sm:$0xff] }
 0x3ff   : > { %5484 = vmatprep.mubr.f32.mxu1 %v10416_v16  ;;  %v3815_v16 = vld [vmem:[%s11570_s5 + $0x40] sm:$0xff] }
 0x401   : > { %4377 = vmatmul.mubr.f32.gmra.mrb[70].mxu0 %v10408_v55 }
 0x402   : > { %5485 = vmatmul.mubr.f32.gmra.mrb[100].mxu1 %v10410_v19  ;;  %4447 = vmatprep.mubr.f32.mxu0 %v9642_v30  ;;  %v3828_v19 = vld [vmem:[%s11570_s5 + $0xa8] sm:$0xff]  ;;  %v7045_v30 = vpack.c.bf16 %v3819_v36, %v3815_v16 }
 0x403   : > { %v7047_v50 = vpack.c.bf16 %v3828_v19, %v3824_v8  ;;  %v3831_v19 = vld [vmem:[%s11570_s5 + $0xc0] sm:$0xff]  ;;  %v3840_v36 = vld [vmem:[%s11570_s5 + $0x108] sm:$0xff] }
 0x404   : > { %v3835_v8 = vld [vmem:[%s11570_s5 + $0xe0] sm:$0xff] }
 0x405   : > { %4448 = vmatmul.mubr.f32.vlgmr.msra.gmra.mrb[72].mxu0 %v9655_v56  ;;  %v3836_v56 = vld [vmem:[%s11570_s5 + $0xe8] sm:$0xff] }
 0x406   : > { %4453 = vmatprep.mubr.f32.mxu0 %v9732_v53  ;;  %7042 = vmatpush1.bf16.msra.mxu0 %v7041_v7  ;;  %v7049_v53 = vpack.c.bf16 %v3827_v4, %v3823_v5  ;;  %v7051_v16 = vpack.c.bf16 %v3836_v56, %v3832_v49  ;;  %v3847_v4 = vld [vmem:[%s11570_s5 + $0x140] sm:$0xff]  ;;  %v3856_v56 = vld [vmem:[%s11570_s5 + $0x188] sm:$0xff] }
 0x407   : > { %7044 = vmatprep.subr.bf16.mxu0 %v7043_v17  ;;  %v3839_v17 = vld [vmem:[%s11570_s5 + $0x100] sm:$0xff] }
 0x408   : > { %v3851_v49 = vld [vmem:[%s11570_s5 + $0x160] sm:$0xff] }
 0x409   : > { %4454 = vmatmul.mubr.f32.gmra.mrb[74].mxu0 %v9760_v57  ;;  %v7053_v57 = vpack.c.bf16 %v3835_v8, %v3831_v19  ;;  %v3859_v19 = vld [vmem:[%s11570_s5 + $0x1a0] sm:$0xff]  ;;  %v3864_v8 = vld [vmem:[%s11570_s5 + $0x1c8] sm:$0xff] }
 0x40a   : > { %4459 = vmatprep.mubr.f32.mxu0 %v9781_v60  ;;  %7046 = vmatpush1.bf16.msra.mxu0 %v7045_v30  ;;  %v3844_v60 = vld [vmem:[%s11570_s5 + $0x128] sm:$0xff]  ;;  %v3843_v30 = vld [vmem:[%s11570_s5 + $0x120] sm:$0xff] }
 0x40b   : > { %7048 = vmatprep.subr.bf16.mxu0 %v7047_v50  ;;  %v7055_v7 = vpack.c.bf16 %v3844_v60, %v3840_v36  ;;  %v3848_v50 = vld [vmem:[%s11570_s5 + $0x148] sm:$0xff]  ;;  %v3863_v60 = vld [vmem:[%s11570_s5 + $0x1c0] sm:$0xff] }
 0x40d   : > { %4460 = vmatmul.mubr.f32.gmra.mrb[76].mxu0 %v9829_v25  ;;  %v7057_v25 = vpack.c.bf16 %v3843_v30, %v3839_v17  ;;  %v3871_v30 = vld [vmem:[%s11570_s5 + $0x200] sm:$0xff] }
 0x40e   : > { %4465 = vmatprep.mubr.f32.mxu0 %v9849_v23  ;;  %7050 = vmatpush1.bf16.msra.mxu0 %v7049_v53  ;;  %v3852_v23 = vld [vmem:[%s11570_s5 + $0x168] sm:$0xff] }
 0x40f   : > { %7052 = vmatprep.subr.bf16.mxu0 %v7051_v16  ;;  %v7059_v5 = vpack.c.bf16 %v3852_v23, %v3848_v50  ;;  %v3855_v16 = vld [vmem:[%s11570_s5 + $0x180] sm:$0xff]  ;;  %v3880_v23 = vld [vmem:[%s11570_s5 + $0x248] sm:$0xff] }
 0x410   : > { %v3875_v50 = vld [vmem:[%s11570_s5 + $0x220] sm:$0xff] }
 0x411   : > { %4466 = vmatmul.mubr.f32.gmra.mrb[78].mxu0 %v9875_v42  ;;  %v3860_v42 = vld [vmem:[%s11570_s5 + $0x1a8] sm:$0xff] }
 0x412   : > { %4471 = vmatprep.mubr.f32.mxu0 %v9882_v22  ;;  %7054 = vmatpush1.bf16.msra.mxu0 %v7053_v57  ;;  %v7061_v22 = vpack.c.bf16 %v3851_v49, %v3847_v4  ;;  %v7063_v53 = vpack.c.bf16 %v3860_v42, %v3856_v56  ;;  %v3867_v57 = vld [vmem:[%s11570_s5 + $0x1e0] sm:$0xff]  ;;  %v3888_v49 = vld [vmem:[%s11570_s5 + $0x288] sm:$0xff] }
 0x413   : > { %7056 = vmatprep.subr.bf16.mxu0 %v7055_v7  ;;  %v3872_v7 = vld [vmem:[%s11570_s5 + $0x208] sm:$0xff]  ;;  %v3883_v4 = vld [vmem:[%s11570_s5 + $0x260] sm:$0xff] }
 0x414   : > { %v3887_v42 = vld [vmem:[%s11570_s5 + $0x280] sm:$0xff] }
 0x415   : > { %4472 = vmatmul.mubr.f32.gmra.mrb[80].mxu0 %v9889_v35  ;;  %v3868_v35 = vld [vmem:[%s11570_s5 + $0x1e8] sm:$0xff] }
 0x416   : > { %4477 = vmatprep.mubr.f32.mxu0 %v9914_v61  ;;  %7058 = vmatpush1.bf16.msra.mxu0 %v7057_v25  ;;  %v7065_v61 = vpack.c.bf16 %v3859_v19, %v3855_v16  ;;  %v7067_v36 = vpack.c.bf16 %v3868_v35, %v3864_v8  ;;  %v3895_v19 = vld [vmem:[%s11570_s5 + $0x2c0] sm:$0xff]  ;;  %v3904_v35 = vld [vmem:[%s11570_s5 + $0x308] sm:$0xff] }
 0x417   : > { %7060 = vmatprep.subr.bf16.mxu0 %v7059_v5  ;;  %v3879_v5 = vld [vmem:[%s11570_s5 + $0x240] sm:$0xff] }
 0x418   : > { %v3899_v8 = vld [vmem:[%s11570_s5 + $0x2e0] sm:$0xff] }
 0x419   : > { %4478 = vmatmul.mubr.f32.gmra.mrb[82].mxu0 %v9956_v63  ;;  %v3876_v63 = vld [vmem:[%s11570_s5 + $0x228] sm:$0xff] }
 0x41a   : > { %4483 = vmatprep.mubr.f32.mxu0 %v9980_v31  ;;  %7062 = vmatpush1.bf16.msra.mxu0 %v7061_v22  ;;  %v7069_v31 = vpack.c.bf16 %v3867_v57, %v3863_v60  ;;  %v7071_v17 = vpack.c.bf16 %v3876_v63, %v3872_v7  ;;  %v3891_v22 = vld [vmem:[%s11570_s5 + $0x2a0] sm:$0xff]  ;;  %v3912_v57 = vld [vmem:[%s11570_s5 + $0x348] sm:$0xff] }
 0x41b   : > { %7064 = vmatprep.subr.bf16.mxu0 %v7063_v53  ;;  %v3896_v53 = vld [vmem:[%s11570_s5 + $0x2c8] sm:$0xff]  ;;  %v3907_v60 = vld [vmem:[%s11570_s5 + $0x320] sm:$0xff] }
 0x41c   : > { %v3911_v63 = vld [vmem:[%s11570_s5 + $0x340] sm:$0xff] }
 0x41d   : > { %4484 = vmatmul.mubr.f32.gmra.mrb[84].mxu0 %v9997_v34  ;;  %v3884_v34 = vld [vmem:[%s11570_s5 + $0x268] sm:$0xff] }
 0x41e   : > { %4489 = vmatprep.mubr.f32.mxu0 %v10044_v58  ;;  %7066 = vmatpush1.bf16.msra.mxu0 %v7065_v61  ;;  %v7073_v58 = vpack.c.bf16 %v3875_v50, %v3871_v30  ;;  %v7075_v25 = vpack.c.bf16 %v3884_v34, %v3880_v23  ;;  %v3919_v50 = vld [vmem:[%s11570_s5 + $0x380] sm:$0xff]  ;;  %v3928_v34 = vld [vmem:[%s11570_s5 + $0x3c8] sm:$0xff] }
 0x41f   : > { %7068 = vmatprep.subr.bf16.mxu0 %v7067_v36  ;;  %v3903_v36 = vld [vmem:[%s11570_s5 + $0x300] sm:$0xff] }
 0x420   : > { %v3923_v23 = vld [vmem:[%s11570_s5 + $0x3a0] sm:$0xff] }
 0x421   : > { %4490 = vmatmul.mubr.f32.gmra.mrb[86].mxu0 %v10031_v41  ;;  %v3892_v41 = vld [vmem:[%s11570_s5 + $0x2a8] sm:$0xff] }
 0x422   : > { %4495 = vmatprep.mubr.f32.mxu0 %v10067_v39  ;;  %7070 = vmatpush1.bf16.msra.mxu0 %v7069_v31  ;;  %v7077_v39 = vpack.c.bf16 %v3883_v4, %v3879_v5  ;;  %v7079_v56 = vpack.c.bf16 %v3892_v41, %v3888_v49  ;;  %v3915_v31 = vld [vmem:[%s11570_s5 + $0x360] sm:$0xff]  ;;  %v3810_v4 = vld [vmem:[%s11570_s5 + $0x18] sm:$0xff] }
 0x423   : > { %7072 = vmatprep.subr.bf16.mxu0 %v7071_v17  ;;  %v3920_v17 = vld [vmem:[%s11570_s5 + $0x388] sm:$0xff]  ;;  %v3931_v5 = vld [vmem:[%s11570_s5 + $0x3e0] sm:$0xff] }
 0x425   : > { %4496 = vmatmul.mubr.f32.gmra.mrb[88].mxu0 %v10081_v43  ;;  %v3900_v43 = vld [vmem:[%s11570_s5 + $0x2e8] sm:$0xff] }
 0x426   : > { %4501 = vmatprep.mubr.f32.mxu0 %v10104_v29  ;;  %7074 = vmatpush1.bf16.msra.mxu0 %v7073_v58  ;;  %v7081_v29 = vpack.c.bf16 %v3891_v22, %v3887_v42  ;;  %v7083_v16 = vpack.c.bf16 %v3900_v43, %v3896_v53  ;;  %v10691_v42 = vld [vmem:[#allocation4] sm:$0xff]  ;;  %v3830_v22 = vld [vmem:[%s11570_s5 + $0xb8] sm:$0xff]  ;;  %v10700_v53 = vld [vmem:[#allocation4 + $0x18] sm:$0xff] }
 0x427   : > { %7076 = vmatprep.subr.bf16.mxu0 %v7075_v25  ;;  %v3927_v25 = vld [vmem:[%s11570_s5 + $0x3c0] sm:$0xff] }
 0x429   : > { %4502 = vmatmul.mubr.f32.gmra.mrb[90].mxu0 %v10151_v1  ;;  %v3908_v1 = vld [vmem:[%s11570_s5 + $0x328] sm:$0xff] }
 0x42a   : > { %4507 = vmatprep.mubr.f32.mxu0 %v10210_v38  ;;  %7078 = vmatpush1.bf16.msra.mxu0 %v7077_v39  ;;  %v7085_v38 = vpack.c.bf16 %v3899_v8, %v3895_v19  ;;  %v7087_v61 = vpack.c.bf16 %v3908_v1, %v3904_v35  ;;  %v3817_v39 = vld [vmem:[%s11570_s5 + $0x50] sm:$0xff]  ;;  %v3834_v8 = vld [vmem:[%s11570_s5 + $0xd8] sm:$0xff]  ;;  %v10715_v1 = vld [vmem:[#allocation4 + $0x10] sm:$0xff] }
 0x42b   : > { %7080 = vmatprep.subr.bf16.mxu0 %v7079_v56  ;;  %v3821_v56 = vld [vmem:[%s11570_s5 + $0x70] sm:$0xff]  ;;  %v3838_v35 = vld [vmem:[%s11570_s5 + $0xf8] sm:$0xff] }
 0x42c   : > { %v7109_v43 = vpack.c.bf16 %v3821_v56, %v3817_v39  ;;  %v3829_v19 = vld [vmem:[%s11570_s5 + $0xb0] sm:$0xff]  ;;  %v10790_v39 = vld [vmem:[#allocation4 + $0x68] sm:$0xff] }
 0x42d   : > { %4508 = vmatmul.mubr.f32.gmra.mrb[92].mxu0 %v10241_v9  ;;  %v3916_v9 = vld [vmem:[%s11570_s5 + $0x368] sm:$0xff] }
 0x42e   : > { %4513 = vmatprep.mubr.f32.mxu0 %v10255_v6  ;;  %7082 = vmatpush1.bf16.msra.mxu0 %v7081_v29  ;;  %v7089_v6 = vpack.c.bf16 %v3907_v60, %v3903_v36  ;;  %v7091_v7 = vpack.c.bf16 %v3916_v9, %v3912_v57  ;;  %v7115_v36 = vpack.c.bf16 %v3838_v35, %v3834_v8  ;;  %v3833_v60 = vld [vmem:[%s11570_s5 + $0xd0] sm:$0xff]  ;;  %v3842_v9 = vld [vmem:[%s11570_s5 + $0x118] sm:$0xff]  ;;  %v10808_v8 = vld [vmem:[#allocation4 + $0x78] sm:$0xff] }
 0x42f   : > { %7084 = vmatprep.subr.bf16.mxu0 %v7083_v16  ;;  %v3825_v16 = vld [vmem:[%s11570_s5 + $0x90] sm:$0xff] }
 0x430   : > { %v3837_v57 = vld [vmem:[%s11570_s5 + $0xf0] sm:$0xff] }
 0x431   : > { %4514 = vmatmul.mubr.f32.gmra.mrb[94].mxu0 %v10284_v26  ;;  %v3924_v26 = vld [vmem:[%s11570_s5 + $0x3a8] sm:$0xff] }
 0x432   : > { %4519 = vmatprep.mubr.f32.mxu0 %v10310_v45  ;;  %7086 = vmatpush1.bf16.msra.mxu0 %v7085_v38  ;;  %v7093_v45 = vpack.c.bf16 %v3915_v31, %v3911_v63  ;;  %v7095_v30 = vpack.c.bf16 %v3924_v26, %v3920_v17  ;;  %v10718_v38 = vld [vmem:[#allocation4 + $0x28] sm:$0xff]  ;;  %v10736_v63 = vld [vmem:[#allocation4 + $0x38] sm:$0xff]  ;;  %v7117_v31 = vpack.c.bf16 %v3837_v57, %v3833_v60  ;;  %v3841_v26 = vld [vmem:[%s11570_s5 + $0x110] sm:$0xff] }
 0x433   : > { %7088 = vmatprep.subr.bf16.mxu0 %v7087_v61  ;;  %v7113_v61 = vpack.c.bf16 %v3829_v19, %v3825_v16  ;;  %v3878_v16 = vld [vmem:[%s11570_s5 + $0x238] sm:$0xff]  ;;  %v10805_v19 = vld [vmem:[#allocation4 + $0x60] sm:$0xff] }
 0x434   : > { %v3877_v60 = vld [vmem:[%s11570_s5 + $0x230] sm:$0xff]  ;;  %v3882_v57 = vld [vmem:[%s11570_s5 + $0x258] sm:$0xff] }
 0x435   : > { %4520 = vmatmul.mubr.f32.gmra.mrb[96].mxu0 %v10337_v37  ;;  %v3932_v37 = vld [vmem:[%s11570_s5 + $0x3e8] sm:$0xff] }
 0x436   : > { %4525 = vmatprep.mubr.f32.mxu0 %v10348_v28  ;;  %7090 = vmatpush1.bf16.msra.mxu0 %v7089_v6  ;;  %v7097_v28 = vpack.c.bf16 %v3923_v23, %v3919_v50  ;;  %v7099_v58 = vpack.c.bf16 %v3932_v37, %v3928_v34  ;;  %v3846_v6 = vld [vmem:[%s11570_s5 + $0x138] sm:$0xff]  ;;  %v10751_v23 = vld [vmem:[#allocation4 + $0x30] sm:$0xff] }
 0x437   : > { %7092 = vmatprep.subr.bf16.mxu0 %v7091_v7  ;;  %v10733_v7 = vld [vmem:[#allocation4 + $0x20] sm:$0xff]  ;;  %v7119_v17 = vpack.c.bf16 %v3846_v6, %v3842_v9  ;;  %v3854_v50 = vld [vmem:[%s11570_s5 + $0x178] sm:$0xff]  ;;  %v10823_v6 = vld [vmem:[#allocation4 + $0x70] sm:$0xff] }
 0x438   : > { %v10754_v34 = vld [vmem:[#allocation4 + $0x48] sm:$0xff] }
 0x439   : > { %4526 = vmatmul.mubr.f32.gmra.mrb[98].mxu0 %v10360_v52  ;;  %v3814_v52 = vld [vmem:[%s11570_s5 + $0x38] sm:$0xff] }
 0x43a   : > { %4531 = vmatprep.mubr.f32.mxu0 %v10375_v33  ;;  %7094 = vmatpush1.bf16.msra.mxu0 %v7093_v45  ;;  %v7101_v33 = vpack.c.bf16 %v3931_v5, %v3927_v25  ;;  %v7103_v49 = vpack.c.bf16 %v3814_v52, %v3810_v4  ;;  %v3845_v45 = vld [vmem:[%s11570_s5 + $0x130] sm:$0xff]  ;;  %v3858_v5 = vld [vmem:[%s11570_s5 + $0x198] sm:$0xff] }
 0x43b   : > { %7096 = vmatprep.subr.bf16.mxu0 %v7095_v30  ;;  %v3850_v30 = vld [vmem:[%s11570_s5 + $0x158] sm:$0xff]  ;;  %v7121_v37 = vpack.c.bf16 %v3845_v45, %v3841_v26  ;;  %v3853_v25 = vld [vmem:[%s11570_s5 + $0x170] sm:$0xff] }
 0x43c   : > { %v3862_v4 = vld [vmem:[%s11570_s5 + $0x1b8] sm:$0xff]  ;;  %v10769_v52 = vld [vmem:[#allocation4 + $0x40] sm:$0xff] }
 0x43d   : > { %4532 = vmatmul.mubr.f32.gmra.mrb[100].mxu0 %v10385_v48  ;;  %v3809_v48 = vld [vmem:[%s11570_s5 + $0x10] sm:$0xff]  ;;  %v3886_v9 = vld [vmem:[%s11570_s5 + $0x278] sm:$0xff] }
 0x43e   : > { %4537 = vmatprep.mubr.f32.mxu0 %v10393_v51  ;;  %7098 = vmatpush1.bf16.msra.mxu0 %v7097_v28  ;;  %v3813_v51 = vld [vmem:[%s11570_s5 + $0x30] sm:$0xff]  ;;  %v7123_v28 = vpack.c.bf16 %v3854_v50, %v3850_v30  ;;  %v7139_v26 = vpack.c.bf16 %v3886_v9, %v3882_v57  ;;  %v3890_v50 = vld [vmem:[%s11570_s5 + $0x298] sm:$0xff] }
 0x43f   : > { %7100 = vmatprep.subr.bf16.mxu0 %v7099_v58  ;;  %v3849_v58 = vld [vmem:[%s11570_s5 + $0x150] sm:$0xff] }
 0x440   : > { %v3881_v45 = vld [vmem:[%s11570_s5 + $0x250] sm:$0xff] }
 0x441   : > { %4538 = vmatmul.mubr.f32.gmra.mrb[102].mxu0 %v10403_v13  ;;  %v3818_v13 = vld [vmem:[%s11570_s5 + $0x58] sm:$0xff]  ;;  %v3885_v30 = vld [vmem:[%s11570_s5 + $0x270] sm:$0xff] }
 0x442   : > { %4543 = vmatprep.mubr.f32.mxu0 %v10420_v12  ;;  %7102 = vmatpush1.bf16.msra.mxu0 %v7101_v33  ;;  %v3822_v12 = vld [vmem:[%s11570_s5 + $0x78] sm:$0xff]  ;;  %v10772_v33 = vld [vmem:[#allocation4 + $0x58] sm:$0xff]  ;;  %v3913_v9 = vld [vmem:[%s11570_s5 + $0x350] sm:$0xff] }
 0x443   : > { %7104 = vmatprep.subr.bf16.mxu0 %v7103_v49  ;;  %v7107_v41 = vpack.c.bf16 %v3822_v12, %v3818_v13  ;;  %v7125_v49 = vpack.c.bf16 %v3853_v25, %v3849_v58  ;;  %v3861_v13 = vld [vmem:[%s11570_s5 + $0x1b0] sm:$0xff]  ;;  %v3866_v12 = vld [vmem:[%s11570_s5 + $0x1d8] sm:$0xff]  ;;  %v7141_v58 = vpack.c.bf16 %v3885_v30, %v3881_v45 }
 0x444   : > { %v3921_v30 = vld [vmem:[%s11570_s5 + $0x390] sm:$0xff] }
 0x445   : > { %4544 = vmatmul.mubr.f32.gmra.mrb[104].mxu0 %v10430_v44  ;;  %v10682_v44 = vld [vmem:[#allocation4 + $0x8] sm:$0xff] }
 0x446   : > { %4549 = vmatprep.mubr.f32.mxu0 %v10414_v32  ;;  %v7105_v32 = vpack.c.bf16 %v3813_v51, %v3809_v48  ;;  %v7127_v48 = vpack.c.bf16 %v3862_v4, %v3858_v5  ;;  %v3857_v51 = vld [vmem:[%s11570_s5 + $0x190] sm:$0xff] }
 0x447   : > { %v7129_v56 = vpack.c.bf16 %v3861_v13, %v3857_v51  ;;  %v3889_v5 = vld [vmem:[%s11570_s5 + $0x290] sm:$0xff]  ;;  %v10860_v51 = vld [vmem:[#allocation4 + $0xa8] sm:$0xff] }
 0x448   : > { %v3893_v4 = vld [vmem:[%s11570_s5 + $0x2b0] sm:$0xff] }
 0x449   : > { %4550 = vmatmul.mubr.f32.gmra.mrb[106].mxu0 %v10408_v55  ;;  %v3826_v55 = vld [vmem:[%s11570_s5 + $0x98] sm:$0xff]  ;;  %v7145_v13 = vpack.c.bf16 %v3893_v4, %v3889_v5  ;;  %v3933_v5 = vld [vmem:[%s11570_s5 + $0x3f0] sm:$0xff]  ;;  %v6344_v4 = vld [vmem:[%s11570_s5 + $0x808] sm:$0xff] }
 0x44a   : > { %4620 = vmatprep.mubr.f32.mxu0 %v10682_v44  ;;  %v7111_v29 = vpack.c.bf16 %v3830_v22, %v3826_v55  ;;  %v3865_v22 = vld [vmem:[%s11570_s5 + $0x1d0] sm:$0xff] }
 0x44d   : > { %4621 = vmatmul.mubr.f32.vlgmr.msra.gmra.mrb[36].mxu0 %v10691_v42 }
 0x44e   : > { %4626 = vmatprep.mubr.f32.mxu0 %v10700_v53  ;;  %7106 = vmatpush1.bf16.msra.mxu0 %v7105_v32  ;;  %v3870_v32 = vld [vmem:[%s11570_s5 + $0x1f8] sm:$0xff] }
 0x44f   : > { %7108 = vmatprep.subr.bf16.mxu0 %v7107_v41  ;;  %v10787_v41 = vld [vmem:[#allocation4 + $0x50] sm:$0xff]  ;;  %v7131_v55 = vpack.c.bf16 %v3870_v32, %v3866_v12  ;;  %v3897_v32 = vld [vmem:[%s11570_s5 + $0x2d0] sm:$0xff] }
 0x451   : > { %4627 = vmatmul.mubr.f32.gmra.mrb[38].mxu0 %v10715_v1 }
 0x452   : > { %4632 = vmatprep.mubr.f32.mxu0 %v10718_v38  ;;  %7110 = vmatpush1.bf16.msra.mxu0 %v7109_v43  ;;  %v3869_v43 = vld [vmem:[%s11570_s5 + $0x1f0] sm:$0xff] }
 0x453   : > { %7112 = vmatprep.subr.bf16.mxu0 %v7111_v29  ;;  %v3874_v29 = vld [vmem:[%s11570_s5 + $0x218] sm:$0xff]  ;;  %v7133_v35 = vpack.c.bf16 %v3869_v43, %v3865_v22  ;;  %v10875_v43 = vld [vmem:[#allocation4 + $0xa0] sm:$0xff] }
 0x454   : > { %v3910_v22 = vld [vmem:[%s11570_s5 + $0x338] sm:$0xff] }
 0x455   : > { %4633 = vmatmul.mubr.f32.gmra.mrb[40].mxu0 %v10733_v7 }
 0x456   : > { %4638 = vmatprep.mubr.f32.mxu0 %v10736_v63  ;;  %7114 = vmatpush1.bf16.msra.mxu0 %v7113_v61  ;;  %v7135_v61 = vpack.c.bf16 %v3878_v16, %v3874_v29 }
 0x457   : > { %7116 = vmatprep.subr.bf16.mxu0 %v7115_v36  ;;  %v3873_v36 = vld [vmem:[%s11570_s5 + $0x210] sm:$0xff] }
 0x459   : > { %4639 = vmatmul.mubr.f32.gmra.mrb[42].mxu0 %v10751_v23 }
 0x45a   : > { %4644 = vmatprep.mubr.f32.mxu0 %v10754_v34  ;;  %7118 = vmatpush1.bf16.msra.mxu0 %v7117_v31  ;;  %v10826_v31 = vld [vmem:[#allocation4 + $0x88] sm:$0xff] }
 0x45b   : > { %7120 = vmatprep.subr.bf16.mxu0 %v7119_v17  ;;  %v7137_v17 = vpack.c.bf16 %v3877_v60, %v3873_v36  ;;  %v3914_v36 = vld [vmem:[%s11570_s5 + $0x358] sm:$0xff] }
 0x45d   : > { %4645 = vmatmul.mubr.f32.gmra.mrb[44].mxu0 %v10769_v52 }
 0x45e   : > { %4650 = vmatprep.mubr.f32.mxu0 %v10772_v33  ;;  %7122 = vmatpush1.bf16.msra.mxu0 %v7121_v37  ;;  %v3894_v37 = vld [vmem:[%s11570_s5 + $0x2b8] sm:$0xff] }
 0x45f   : > { %7124 = vmatprep.subr.bf16.mxu0 %v7123_v28  ;;  %v10841_v28 = vld [vmem:[#allocation4 + $0x80] sm:$0xff]  ;;  %v7143_v25 = vpack.c.bf16 %v3894_v37, %v3890_v50  ;;  %v3930_v37 = vld [vmem:[%s11570_s5 + $0x3d8] sm:$0xff] }
 0x460   : > { %v3925_v50 = vld [vmem:[%s11570_s5 + $0x3b0] sm:$0xff] }
 0x461   : > { %4651 = vmatmul.mubr.f32.gmra.mrb[46].mxu0 %v10787_v41 }
 0x462   : > { %4656 = vmatprep.mubr.f32.mxu0 %v10790_v39  ;;  %7126 = vmatpush1.bf16.msra.mxu0 %v7125_v49  ;;  %v3898_v49 = vld [vmem:[%s11570_s5 + $0x2d8] sm:$0xff] }
 0x463   : > { %7128 = vmatprep.subr.bf16.mxu0 %v7127_v48  ;;  %v10857_v48 = vld [vmem:[#allocation4 + $0x90] sm:$0xff] }
 0x465   : > { %4657 = vmatmul.mubr.f32.gmra.mrb[48].mxu0 %v10805_v19 }
 0x466   : > { %4662 = vmatprep.mubr.f32.mxu0 %v10808_v8  ;;  %7130 = vmatpush1.bf16.msra.mxu0 %v7129_v56  ;;  %v3901_v56 = vld [vmem:[%s11570_s5 + $0x2f0] sm:$0xff] }
 0x467   : > { %7132 = vmatprep.subr.bf16.mxu0 %v7131_v55  ;;  %v3906_v55 = vld [vmem:[%s11570_s5 + $0x318] sm:$0xff]  ;;  %v7149_v29 = vpack.c.bf16 %v3901_v56, %v3897_v32  ;;  %v6351_v32 = vld [vmem:[%s11570_s5 + $0x840] sm:$0xff] }
 0x468   : > { %v7151_v16 = vpack.c.bf16 %v3910_v22, %v3906_v55  ;;  %v6355_v56 = vld [vmem:[%s11570_s5 + $0x860] sm:$0xff]  ;;  %v6360_v55 = vld [vmem:[%s11570_s5 + $0x888] sm:$0xff] }
 0x469   : > { %4663 = vmatmul.mubr.f32.gmra.mrb[50].mxu0 %v10823_v6  ;;  %v6364_v22 = vld [vmem:[%s11570_s5 + $0x8a8] sm:$0xff] }
 0x46a   : > { %4668 = vmatprep.mubr.f32.mxu0 %v10826_v31  ;;  %7134 = vmatpush1.bf16.msra.mxu0 %v7133_v35  ;;  %v3905_v35 = vld [vmem:[%s11570_s5 + $0x310] sm:$0xff] }
 0x46b   : > { %7136 = vmatprep.subr.bf16.mxu0 %v7135_v61  ;;  %v3909_v61 = vld [vmem:[%s11570_s5 + $0x330] sm:$0xff] }
 0x46c   : > { %v7153_v60 = vpack.c.bf16 %v3909_v61, %v3905_v35  ;;  %v6363_v35 = vld [vmem:[%s11570_s5 + $0x8a0] sm:$0xff]  ;;  %v6368_v61 = vld [vmem:[%s11570_s5 + $0x8c8] sm:$0xff] }
 0x46d   : > { %4669 = vmatmul.mubr.f32.gmra.mrb[52].mxu0 %v10841_v28 }
 0x46e   : > { %4674 = vmatprep.mubr.f32.mxu0 %v10051_v2  ;;  %7138 = vmatpush1.bf16.msra.mxu0 %v7137_v17  ;;  %v3902_v2 = vld [vmem:[%s11570_s5 + $0x2f8] sm:$0xff]  ;;  %v3917_v17 = vld [vmem:[%s11570_s5 + $0x370] sm:$0xff] }
 0x46f   : > { %7140 = vmatprep.subr.bf16.mxu0 %v7139_v26  ;;  %v7147_v12 = vpack.c.bf16 %v3902_v2, %v3898_v49  ;;  %v3922_v26 = vld [vmem:[%s11570_s5 + $0x398] sm:$0xff]  ;;  %v10938_v2 = vld [vmem:[#allocation4 + $0x118] sm:$0x3f] }
 0x471   : > { %4675 = vmatmul.mubr.f32.gmra.mrb[54].mxu0 %v10857_v48 }
 0x472   : > { %4680 = vmatprep.mubr.f32.mxu0 %v10860_v51  ;;  %7142 = vmatpush1.bf16.msra.mxu0 %v7141_v58 }
 0x473   : > { %7144 = vmatprep.subr.bf16.mxu0 %v7143_v25  ;;  %v3929_v25 = vld [vmem:[%s11570_s5 + $0x3d0] sm:$0xff] }
 0x475   : > { %4681 = vmatmul.mubr.f32.gmra.mrb[56].mxu0 %v10875_v43 }
 0x476   : > { %4686 = vmatprep.mubr.f32.mxu0 %v10188_v10  ;;  %7146 = vmatpush1.bf16.msra.mxu0 %v7145_v13  ;;  %v3918_v10 = vld [vmem:[%s11570_s5 + $0x378] sm:$0xff]  ;;  %v10947_v13 = vld [vmem:[#allocation4 + $0x110] sm:$0x3f] }
 0x477   : > { %7148 = vmatprep.subr.bf16.mxu0 %v7147_v12  ;;  %v7155_v57 = vpack.c.bf16 %v3918_v10, %v3914_v36 }
 0x479   : > { %4687 = vmatmul.mubr.f32.gmra.mrb[58].mxu0 %v10181_v62  ;;  %v3926_v62 = vld [vmem:[%s11570_s5 + $0x3b8] sm:$0xff] }
 0x47a   : > { %4692 = vmatprep.mubr.f32.mxu0 %v10144_v14  ;;  %7150 = vmatpush1.bf16.msra.mxu0 %v7149_v29  ;;  %v7157_v14 = vpack.c.bf16 %v3917_v17, %v3913_v9  ;;  %v7159_v45 = vpack.c.bf16 %v3926_v62, %v3922_v26  ;;  %v7175_v29 = vpack.c.bf16 %v6364_v22, %v6360_v55  ;;  %v6376_v9 = vld [vmem:[%s11570_s5 + $0x908] sm:$0xff]  ;;  %v6399_v22 = vld [vmem:[%s11570_s5 + $0x9c0] sm:$0xff] }
 0x47b   : > { %7152 = vmatprep.subr.bf16.mxu0 %v7151_v16  ;;  %v6359_v16 = vld [vmem:[%s11570_s5 + $0x880] sm:$0xff]  ;;  %v6380_v17 = vld [vmem:[%s11570_s5 + $0x928] sm:$0xff] }
 0x47c   : > { %v7177_v36 = vpack.c.bf16 %v6363_v35, %v6359_v16 }
 0x47d   : > { %4693 = vmatmul.mubr.f32.gmra.mrb[60].mxu0 %v10125_v59  ;;  %v3934_v59 = vld [vmem:[%s11570_s5 + $0x3f8] sm:$0xff] }
 0x47e   : > { %4698 = vmatprep.mubr.f32.mxu0 %v10291_v21  ;;  %7154 = vmatpush1.bf16.msra.mxu0 %v7153_v60  ;;  %v7161_v21 = vpack.c.bf16 %v3925_v50, %v3921_v30  ;;  %v7163_v58 = vpack.c.bf16 %v3934_v59, %v3930_v37  ;;  %v6367_v60 = vld [vmem:[%s11570_s5 + $0x8c0] sm:$0xff]  ;;  %v6384_v37 = vld [vmem:[%s11570_s5 + $0x948] sm:$0xff] }
 0x47f   : > { %7156 = vmatprep.subr.bf16.mxu0 %v7155_v57  ;;  %v6371_v57 = vld [vmem:[%s11570_s5 + $0x8e0] sm:$0xff]  ;;  %v6388_v59 = vld [vmem:[%s11570_s5 + $0x968] sm:$0xff] }
 0x480   : > { %v7181_v26 = vpack.c.bf16 %v6371_v57, %v6367_v60  ;;  %v6379_v30 = vld [vmem:[%s11570_s5 + $0x920] sm:$0xff] }
 0x481   : > { %4699 = vmatmul.mubr.f32.gmra.mrb[62].mxu0 %v10265_v46  ;;  %v7165_v46 = vpack.c.bf16 %v3933_v5, %v3929_v25  ;;  %v7187_v25 = vpack.c.bf16 %v6388_v59, %v6384_v37  ;;  %v6383_v5 = vld [vmem:[%s11570_s5 + $0x940] sm:$0xff] }
 0x482   : > { %4704 = vmatprep.mubr.f32.mxu0 %v10234_v54  ;;  %7158 = vmatpush1.bf16.msra.mxu0 %v7157_v14  ;;  %v6348_v54 = vld [vmem:[%s11570_s5 + $0x828] sm:$0xff]  ;;  %v7183_v14 = vpack.c.bf16 %v6380_v17, %v6376_v9  ;;  %v6415_v17 = vld [vmem:[%s11570_s5 + $0xa40] sm:$0xff] }
 0x483   : > { %7160 = vmatprep.subr.bf16.mxu0 %v7159_v45  ;;  %v7167_v49 = vpack.c.bf16 %v6348_v54, %v6344_v4  ;;  %v6375_v45 = vld [vmem:[%s11570_s5 + $0x900] sm:$0xff] }
 0x484   : > { %v6387_v4 = vld [vmem:[%s11570_s5 + $0x960] sm:$0xff] }
 0x485   : > { %4705 = vmatmul.mubr.f32.gmra.mrb[64].mxu0 %v10205_v20  ;;  %v6343_v20 = vld [vmem:[%s11570_s5 + $0x800] sm:$0xff] }
 0x486   : > { %4710 = vmatprep.mubr.f32.mxu0 %v10365_v40  ;;  %7162 = vmatpush1.bf16.msra.mxu0 %v7161_v21  ;;  %v6347_v40 = vld [vmem:[%s11570_s5 + $0x820] sm:$0xff]  ;;  %v7185_v21 = vpack.c.bf16 %v6379_v30, %v6375_v45 }
 0x487   : > { %7164 = vmatprep.subr.bf16.mxu0 %v7163_v58  ;;  %v6423_v37 = vld [vmem:[%s11570_s5 + $0xa80] sm:$0xff] }
 0x488   : > { %v6427_v59 = vld [vmem:[%s11570_s5 + $0xaa0] sm:$0xff] }
 0x489   : > { %4711 = vmatmul.mubr.f32.gmra.mrb[66].mxu0 %v10356_v27  ;;  %v7169_v27 = vpack.c.bf16 %v6347_v40, %v6343_v20  ;;  %v7189_v20 = vpack.c.bf16 %v6387_v4, %v6383_v5  ;;  %v7209_v4 = vpack.c.bf16 %v6427_v59, %v6423_v37  ;;  %v6464_v59 = vld [vmem:[%s11570_s5 + $0xbc8] sm:$0xff] }
 0x48a   : > { %4716 = vmatprep.mubr.f32.mxu0 %v10332_v24  ;;  %7166 = vmatpush1.bf16.msra.mxu0 %v7165_v46  ;;  %v6352_v24 = vld [vmem:[%s11570_s5 + $0x848] sm:$0xff] }
 0x48b   : > { %7168 = vmatprep.subr.bf16.mxu0 %v7167_v49  ;;  %v6392_v46 = vld [vmem:[%s11570_s5 + $0x988] sm:$0xff] }
 0x48c   : > { %v6396_v49 = vld [vmem:[%s11570_s5 + $0x9a8] sm:$0xff] }
 0x48d   : > { %4717 = vmatmul.mubr.f32.gmra.mrb[68].mxu0 %v10318_v15  ;;  %v6356_v15 = vld [vmem:[%s11570_s5 + $0x868] sm:$0xff]  ;;  %v7191_v40 = vpack.c.bf16 %v6396_v49, %v6392_v46  ;;  %v6431_v49 = vld [vmem:[%s11570_s5 + $0xac0] sm:$0xff] }
 0x48e   : > { %4722 = vmatprep.mubr.f32.mxu0 %v10938_v2  ;;  %v7171_v12 = vpack.c.bf16 %v6356_v15, %v6352_v24  ;;  %v6391_v24 = vld [vmem:[%s11570_s5 + $0x980] sm:$0xff] }
 0x48f   : > { %v6395_v15 = vld [vmem:[%s11570_s5 + $0x9a0] sm:$0xff] }
 0x491   : > { %4723 = vmatmul.mubr.f32.gmra.mrb[70].mxu0 %v10947_v13 }
 0x492   : > { %4793 = vmatprep.mubr.f32.mxu0 %v10682_v44  ;;  %v7173_v44 = vpack.c.bf16 %v6355_v56, %v6351_v32  ;;  %v7193_v56 = vpack.c.bf16 %v6395_v15, %v6391_v24  ;;  %v7800_v15 = vld [vmem:[#allocation4 + $0xb8] sm:$0xff] }
 0x495   : > { %4794 = vmatmul.mubr.f32.vlgmr.msra.gmra.mrb[72].mxu0 %v10691_v42  ;;  %v6372_v42 = vld [vmem:[%s11570_s5 + $0x8e8] sm:$0xff] }
 0x496   : > { %4799 = vmatprep.mubr.f32.mxu0 %v10700_v53  ;;  %7170 = vmatpush1.bf16.msra.mxu0 %v7169_v27  ;;  %v7179_v10 = vpack.c.bf16 %v6372_v42, %v6368_v61  ;;  %v6407_v42 = vld [vmem:[%s11570_s5 + $0xa00] sm:$0xff] }
 0x497   : > { %7172 = vmatprep.subr.bf16.mxu0 %v7171_v12  ;;  %v6400_v12 = vld [vmem:[%s11570_s5 + $0x9c8] sm:$0xff] }
 0x499   : > { %4800 = vmatmul.mubr.f32.gmra.mrb[74].mxu0 %v10715_v1 }
 0x49a   : > { %4805 = vmatprep.mubr.f32.mxu0 %v10718_v38  ;;  %7174 = vmatpush1.bf16.msra.mxu0 %v7173_v44  ;;  %v10999_v62 = vpop.f32.mrb[76].mxu1  ;;  %v6403_v44 = vld [vmem:[%s11570_s5 + $0x9e0] sm:$0xff] }
 0x49b   : > { %7176 = vmatprep.subr.bf16.mxu0 %v7175_v29  ;;  %v11007_v50 = vpop.f32.mrb[77].mxu1  ;;  %v7197_v35 = vpack.c.bf16 %v6403_v44, %v6399_v22  ;;  %v6452_v44 = vld [vmem:[%s11570_s5 + $0xb68] sm:$0xff] }
 0x49d   : > { %4806 = vmatmul.mubr.f32.gmra.mrb[76].mxu0 %v10733_v7 }
 0x49e   : > { %4811 = vmatprep.mubr.f32.mxu0 %v10736_v63  ;;  %7178 = vmatpush1.bf16.msra.mxu0 %v7177_v36  ;;  %v11017_v58 = vpop.f32.mrb[78].mxu1  ;;  %v6411_v36 = vld [vmem:[%s11570_s5 + $0xa20] sm:$0xff] }
 0x49f   : > { %7180 = vmatprep.subr.bf16.mxu0 %v7179_v10  ;;  %v11025_v54 = vpop.f32.mrb[79].mxu1  ;;  %v7201_v57 = vpack.c.bf16 %v6411_v36, %v6407_v42  ;;  %v6447_v36 = vld [vmem:[%s11570_s5 + $0xb40] sm:$0xff] }
 0x4a1   : > { %4812 = vmatmul.mubr.f32.gmra.mrb[78].mxu0 %v10751_v23 }
 0x4a2   : > { %4817 = vmatprep.mubr.f32.mxu0 %v10754_v34  ;;  %7182 = vmatpush1.bf16.msra.mxu0 %v7181_v26  ;;  %v6419_v26 = vld [vmem:[%s11570_s5 + $0xa60] sm:$0xff] }
 0x4a3   : > { %7184 = vmatprep.subr.bf16.mxu0 %v7183_v14  ;;  %v7799_v14 = vld [vmem:[#allocation4 + $0x98] sm:$0xff]  ;;  %v7205_v45 = vpack.c.bf16 %v6419_v26, %v6415_v17  ;;  %v7803_v17 = vld [vmem:[#allocation4 + $0xc0] sm:$0xff] }
 0x4a4   : > { %v11041_v27 = vpop.f32.mrb[80].mxu1 }
 0x4a5   : > { %4818 = vmatmul.mubr.f32.gmra.mrb[80].mxu0 %v10769_v52  ;;  %v11050_v32 = vpop.f32.mrb[81].mxu1 }
 0x4a6   : > { %4823 = vmatprep.mubr.f32.mxu0 %v10772_v33  ;;  %7186 = vmatpush1.bf16.msra.mxu0 %v7185_v21  ;;  %v6404_v33 = vld [vmem:[%s11570_s5 + $0x9e8] sm:$0xff] }
 0x4a7   : > { %7188 = vmatprep.subr.bf16.mxu0 %v7187_v25  ;;  %v7195_v55 = vpack.c.bf16 %v6404_v33, %v6400_v12  ;;  %v6436_v25 = vld [vmem:[%s11570_s5 + $0xae8] sm:$0xff] }
 0x4a8   : > { %v11059_v29 = vpop.f32.mrb[82].mxu1 }
 0x4a9   : > { %4824 = vmatmul.mubr.f32.gmra.mrb[82].mxu0 %v10787_v41  ;;  %v6408_v41 = vld [vmem:[%s11570_s5 + $0xa08] sm:$0xff]  ;;  %v11068_v16 = vpop.f32.mrb[83].mxu1 }
 0x4aa   : > { %4829 = vmatprep.mubr.f32.mxu0 %v10790_v39  ;;  %7190 = vmatpush1.bf16.msra.mxu0 %v7189_v20  ;;  %v6412_v39 = vld [vmem:[%s11570_s5 + $0xa28] sm:$0xff]  ;;  %v6435_v20 = vld [vmem:[%s11570_s5 + $0xae0] sm:$0xff] }
 0x4ab   : > { %7192 = vmatprep.subr.bf16.mxu0 %v7191_v40  ;;  %v7199_v61 = vpack.c.bf16 %v6412_v39, %v6408_v41  ;;  %v7213_v12 = vpack.c.bf16 %v6435_v20, %v6431_v49  ;;  %v7801_v41 = vld [vmem:[#allocation4 + $0xb0] sm:$0xff] }
 0x4ac   : > { %v11077_v10 = vpop.f32.mrb[84].mxu1 }
 0x4ad   : > { %4830 = vmatmul.mubr.f32.gmra.mrb[84].mxu0 %v10805_v19  ;;  %v6416_v19 = vld [vmem:[%s11570_s5 + $0xa48] sm:$0xff]  ;;  %v11086_v60 = vpop.f32.mrb[85].mxu1 }
 0x4ae   : > { %4835 = vmatprep.mubr.f32.mxu0 %v10808_v8  ;;  %7194 = vmatpush1.bf16.msra.mxu0 %v7193_v56  ;;  %v6420_v8 = vld [vmem:[%s11570_s5 + $0xa68] sm:$0xff]  ;;  %v6439_v56 = vld [vmem:[%s11570_s5 + $0xb00] sm:$0xff] }
 0x4af   : > { %7196 = vmatprep.subr.bf16.mxu0 %v7195_v55  ;;  %v7203_v9 = vpack.c.bf16 %v6420_v8, %v6416_v19  ;;  %v6443_v55 = vld [vmem:[%s11570_s5 + $0xb20] sm:$0xff] }
 0x4b0   : > { %v6451_v19 = vld [vmem:[%s11570_s5 + $0xb60] sm:$0xff] }
 0x4b1   : > { %4836 = vmatmul.mubr.f32.gmra.mrb[86].mxu0 %v10823_v6  ;;  %v6424_v6 = vld [vmem:[%s11570_s5 + $0xa88] sm:$0xff] }
 0x4b2   : > { %4841 = vmatprep.mubr.f32.mxu0 %v10826_v31  ;;  %7198 = vmatpush1.bf16.msra.mxu0 %v7197_v35  ;;  %v6428_v31 = vld [vmem:[%s11570_s5 + $0xaa8] sm:$0xff]  ;;  %v7802_v35 = vld [vmem:[#allocation4 + $0xc8] sm:$0xff] }
 0x4b3   : > { %7200 = vmatprep.subr.bf16.mxu0 %v7199_v61  ;;  %v7207_v30 = vpack.c.bf16 %v6428_v31, %v6424_v6  ;;  %v7217_v61 = vpack.c.bf16 %v6443_v55, %v6439_v56  ;;  %v7804_v6 = vld [vmem:[#allocation4 + $0xd8] sm:$0xff]  ;;  %v7221_v31 = vpack.c.bf16 %v6451_v19, %v6447_v36  ;;  %v7811_v36 = vld [vmem:[#allocation4 + $0x100] sm:$0xff] }
 0x4b4   : > { %v7808_v56 = vld [vmem:[#allocation4 + $0xf8] sm:$0xff] }
 0x4b5   : > { %4842 = vmatmul.mubr.f32.gmra.mrb[88].mxu0 %v10841_v28  ;;  %v11108_v21 = vpop.f32.mrb[86].mxu1  ;;  %v6432_v28 = vld [vmem:[%s11570_s5 + $0xac8] sm:$0xff] }
 0x4b6   : > { %4847 = vmatprep.mubr.f32.mxu0 %v7799_v14  ;;  %7202 = vmatpush1.bf16.msra.mxu0 %v7201_v57  ;;  %v11117_v5 = vpop.f32.mrb[87].mxu1  ;;  %v7211_v46 = vpack.c.bf16 %v6436_v25, %v6432_v28  ;;  %v6456_v57 = vld [vmem:[%s11570_s5 + $0xb88] sm:$0xff]  ;;  %v7805_v25 = vld [vmem:[#allocation4 + $0xd0] sm:$0xff] }
 0x4b7   : > { %7204 = vmatprep.subr.bf16.mxu0 %v7203_v9  ;;  %v6460_v9 = vld [vmem:[%s11570_s5 + $0xba8] sm:$0xff] }
 0x4b8   : > { %v7223_v14 = vpack.c.bf16 %v6460_v9, %v6456_v57  ;;  %v6468_v28 = vld [vmem:[%s11570_s5 + $0xbe8] sm:$0xff]  ;;  %v4902_v9 = vld [vmem:[#allocation4] sm:$0xfc] }
 0x4b9   : > { %4848 = vmatmul.mubr.f32.gmra.mrb[90].mxu0 %v10857_v48  ;;  %v6440_v48 = vld [vmem:[%s11570_s5 + $0xb08] sm:$0xff]  ;;  %v7227_v20 = vpack.c.bf16 %v6468_v28, %v6464_v59  ;;  %v11748_v59 = vld [vmem:[#allocation12_spill] sm:$0xff] }
 0x4ba   : > { %4853 = vmatprep.mubr.f32.mxu0 %v10860_v51  ;;  %7206 = vmatpush1.bf16.msra.mxu0 %v7205_v45  ;;  %v11126_v40 = vpop.f32.mrb[88].mxu1  ;;  %v6444_v51 = vld [vmem:[%s11570_s5 + $0xb28] sm:$0xff]  ;;  %v6455_v45 = vld [vmem:[%s11570_s5 + $0xb80] sm:$0xff] }
 0x4bb   : > { %7208 = vmatprep.subr.bf16.mxu0 %v7207_v30  ;;  %v11135_v24 = vpop.f32.mrb[89].mxu1  ;;  %v7215_v33 = vpack.c.bf16 %v6444_v51, %v6440_v48  ;;  %v6459_v30 = vld [vmem:[%s11570_s5 + $0xba0] sm:$0xff] }
 0x4bc   : > { %v7225_v49 = vpack.c.bf16 %v6459_v30, %v6455_v45  ;;  %v6463_v48 = vld [vmem:[%s11570_s5 + $0xbc0] sm:$0xff]  ;;  %v5045_v30 = vrot.slane %v10733_v7, 2 }
 0x4bd   : > { %4854 = vmatmul.mubr.f32.gmra.mrb[92].mxu0 %v10875_v43  ;;  %v6448_v43 = vld [vmem:[%s11570_s5 + $0xb48] sm:$0xff]  ;;  %v6467_v51 = vld [vmem:[%s11570_s5 + $0xbe0] sm:$0xff] }
 0x4be   : > { %4859 = vmatprep.mubr.f32.mxu0 %v7800_v15  ;;  %7210 = vmatpush1.bf16.msra.mxu0 %v7209_v4  ;;  %v7219_v42 = vpack.c.bf16 %v6452_v44, %v6448_v43  ;;  %v7229_v55 = vpack.c.bf16 %v6467_v51, %v6463_v48  ;;  %v7809_v44 = vld [vmem:[#allocation4 + $0xf0] sm:$0xff]  ;;  %v11754_v48 = vld [vmem:[#allocation16_spill] sm:$0xff] }
 0x4bf   : > { %7212 = vmatprep.subr.bf16.mxu0 %v7211_v46  ;;  %v7806_v46 = vld [vmem:[#allocation4 + $0xe8] sm:$0xff]  ;;  %v11755_v51 = vld [vmem:[#allocation40_spill] sm:$0xff] }
 0x4c1   : > { %v11143_v22 = vpop.f32.mrb[90].mxu1  ;;  %4860 = vmatmul.mubr.f32.gmra.mrb[94].mxu0 %v7801_v41 }
 0x4c2   : > { %v11151_v39 = vpop.f32.mrb[91].mxu1  ;;  %4865 = vmatprep.mubr.f32.mxu0 %v7802_v35  ;;  %7214 = vmatpush1.bf16.msra.mxu0 %v7213_v12  ;;  %v7807_v12 = vld [vmem:[#allocation4 + $0xe0] sm:$0xff]  ;;  %v7810_v35 = vld [vmem:[#allocation4 + $0x108] sm:$0xff] }
 0x4c3   : > { %7216 = vmatprep.subr.bf16.mxu0 %v7215_v33 }
 0x4c5   : > { %v11159_v8 = vpop.f32.mrb[92].mxu1  ;;  %4866 = vmatmul.mubr.f32.gmra.mrb[96].mxu0 %v7803_v17  ;;  %v5043_v17 = vrot.slane %v10700_v53, 2 }
 0x4c6   : > { %v11167_v26 = vpop.f32.mrb[93].mxu1  ;;  %4871 = vmatprep.mubr.f32.mxu0 %v7804_v6  ;;  %7218 = vmatpush1.bf16.msra.mxu0 %v7217_v61  ;;  %v4903_v61 = vld [vmem:[#allocation4 + $0x8] sm:$0xfc]  ;;  %v5039_v6 = vrot.slane %v4902_v9, 2  ;;  %v11763_v9 = vld [vmem:[#allocation20_spill] sm:$0xff] }
 0x4c7   : > { %7220 = vmatprep.subr.bf16.mxu0 %v7219_v42  ;;  %v5042_v57 = vrot.slane %v4903_v61, 2  ;;  %v11760_v61 = vld [vmem:[#allocation43_spill] sm:$0xff] }
 0x4c9   : > { %v11175_v37 = vpop.f32.mrb[94].mxu1  ;;  %4872 = vmatmul.mubr.f32.gmra.mrb[98].mxu0 %v7805_v25  ;;  %v11750_v25 = vld [vmem:[#allocation14_spill] sm:$0xff] }
 0x4ca   : > { %v11183_v4 = vpop.f32.mrb[95].mxu1  ;;  %4877 = vmatprep.mubr.f32.mxu0 %v7806_v46  ;;  %7222 = vmatpush1.bf16.msra.mxu0 %v7221_v31  ;;  %v11208_v31 = vsel %vm1415_vm5, %v5042_v57, %v5043_v17  ;;  %v11751_v46 = vld [vmem:[#allocation41_spill] sm:$0xff]  ;;  %v11762_v57 = vld [vmem:[#allocation19_spill] sm:$0xff] }
 0x4cb   : > { %7224 = vmatprep.subr.bf16.mxu0 %v7223_v14  ;;  %v5040_v14 = vrot.slane %v10715_v1, 2 }
 0x4cd   : > { %v11191_v15 = vpop.f32.mrb[96].mxu1  ;;  %4878 = vmatmul.mubr.f32.gmra.mrb[100].mxu0 %v7807_v12  ;;  %v11214_v45 = vsel %vm1415_vm5, %v5039_v6, %v5040_v14  ;;  %v11226_v1 = vsel %vm1415_vm5, %v5040_v14, %v5045_v30  ;;  %v11756_v12 = vrot.slane %v11755_v51, 2  ;;  %v11765_v6 = vld [vmem:[#allocation47_spill] sm:$0xff]  ;;  %v11767_v14 = vld [vmem:[#allocation22_spill] sm:$0xff] }
 0x4ce   : > { %v11193_v33 = vpop.f32.mrb[97].mxu1  ;;  %4883 = vmatprep.mubr.f32.mxu0 %v7808_v56  ;;  %7226 = vmatpush1.bf16.msra.mxu0 %v7225_v49  ;;  %v11752_v49 = vrot.slane %v11751_v46, 2  ;;  %v11777_v46 = vld [vmem:[#allocation52_spill] sm:$0xff]  ;;  %v11781_v51 = vld [vmem:[#allocation54_spill] sm:$0xff] }
 0x4cf   : > { %7228 = vmatprep.subr.bf16.mxu0 %v7227_v20  ;;  %v11753_v20 = vld [vmem:[#allocation15_spill] sm:$0xff] }
 0x4d1   : > { %v11195_v43 = vpop.f32.mrb[98].mxu1  ;;  %4884 = vmatmul.mubr.f32.gmra.mrb[102].mxu0 %v7809_v44  ;;  %v11758_v44 = vld [vmem:[#allocation17_spill] sm:$0xff] }
 0x4d2   : > { %v11197_v41 = vpop.f32.mrb[99].mxu1  ;;  %4889 = vmatprep.mubr.f32.mxu0 %v7810_v35  ;;  %7230 = vmatpush1.bf16.msra.mxu0 %v7229_v55  ;;  %v11757_v55 = vld [vmem:[#allocation42_spill] sm:$0xff] }
 0x4d3   : > { %7232 = vmatprep.subr.bf16.mxu0 %v9102_v18  ;;  %v5047_v18 = vrot.slane %v10718_v38, 2  ;;  %v5051_v38 = vrot.slane %v10736_v63, 2  ;;  %v5053_v63 = vrot.slane %v10769_v52, 2  ;;  %v11759_v35 = vld [vmem:[#allocation18_spill] sm:$0xff] }
 0x4d5   : > { %v11200_v42 = vpop.f32.mrb[100].mxu1  ;;  %4890 = vmatmul.mubr.f32.gmra.mrb[104].mxu0 %v7811_v36  ;;  %v11219_v53 = vsel %vm1415_vm5, %v5043_v17, %v5047_v18  ;;  %v11230_v7 = vsel %vm1415_vm5, %v5047_v18, %v5051_v38  ;;  %v5058_v56 = vsel %vm1415_vm5, %v5053_v63, %v11756_v12  ;;  %v11761_v36 = vld [vmem:[#allocation44_spill] sm:$0xff]  ;;  %v11764_v17 = vld [vmem:[#allocation45_spill] sm:$0xff] }
 0x4d6   : > { %v11202_v19 = vpop.f32.mrb[101].mxu1  ;;  %4895 = vmatprep.mubr.f32.mxu0 %v10938_v2  ;;  %v5055_v2 = vrot.slane %v10754_v34, 2  ;;  %v11749_v34 = vld [vmem:[#allocation13_spill] sm:$0xff] }
 0x4d7   : > { %v11766_v18 = vld [vmem:[#allocation21_spill] sm:$0xff] }
 0x4d8   : > { %v11243_v28 = vsel %vm1415_vm5, %v5051_v38, %v5055_v2  ;;  %v5060_v52 = vsel %vm1415_vm5, %v5055_v2, %v11752_v49  ;;  %v11769_v38 = vld [vmem:[#allocation48_spill] sm:$0xff]  ;;  %v11770_v2 = vld [vmem:[#allocation23_spill] sm:$0xff]  ;;  %v11782_v12 = vld [vmem:[#allocation29_spill] sm:$0xff] }
 0x4d9   : > { %4896 = vmatmul.mubr.f32.gmra.mrb[106].mxu0 %v10947_v13  ;;  %v11747_v13 = vld [vmem:[#allocation11_spill] sm:$0xff] }
 0x4da   : > { %5209 = vmatprep.mubr.f32.mxu0 %v11208_v31  ;;  %v11778_v49 = vld [vmem:[#allocation27_spill] sm:$0xff] }
 0x4dd   : > { %5210 = vmatmul.mubr.f32.vlgmr.msra.gmra.mrb[36].mxu0 %v11214_v45 }
 0x4de   : > { %5215 = vmatprep.mubr.f32.mxu0 %v11219_v53  ;;  %7234 = vmatpush1.bf16.msra.mxu0 %v9146_v47  ;;  %v5049_v47 = vrot.slane %v10751_v23, 2 }
 0x4df   : > { %7236 = vmatprep.subr.bf16.mxu0 %v9148_v11 }
 0x4e0   : > { %v11238_v11 = vsel %vm1415_vm5, %v5045_v30, %v5049_v47  ;;  %v11249_v23 = vsel %vm1415_vm5, %v5049_v47, %v5053_v63  ;;  %v11768_v30 = vld [vmem:[#allocation46_spill] sm:$0xff]  ;;  %v11772_v47 = vld [vmem:[#allocation49_spill] sm:$0xff] }
 0x4e1   : > { %5216 = vmatmul.mubr.f32.gmra.mrb[38].mxu0 %v11226_v1  ;;  %v11774_v63 = vld [vmem:[#allocation25_spill] sm:$0xff] }
 0x4e2   : > { %5221 = vmatprep.mubr.f32.mxu0 %v11230_v7  ;;  %7238 = vmatpush1.bf16.msra.mxu0 %v11747_v13  ;;  %v11771_v13 = vld [vmem:[#allocation24_spill] sm:$0xff] }
 0x4e3   : > { %7240 = vmatprep.subr.bf16.mxu0 %v11748_v59  ;;  %v11773_v59 = vld [vmem:[#allocation50_spill] sm:$0xff] }
 0x4e5   : > { %5222 = vmatmul.mubr.f32.gmra.mrb[40].mxu0 %v11238_v11 }
 0x4e6   : > { %5227 = vmatprep.mubr.f32.mxu0 %v11243_v28  ;;  %7242 = vmatpush1.bf16.msra.mxu0 %v11749_v34  ;;  %v11775_v34 = vld [vmem:[#allocation26_spill] sm:$0xff] }
 0x4e7   : > { %7244 = vmatprep.subr.bf16.mxu0 %v11750_v25  ;;  %v11776_v25 = vld [vmem:[#allocation51_spill] sm:$0xff] }
 0x4e9   : > { %5228 = vmatmul.mubr.f32.gmra.mrb[42].mxu0 %v11249_v23 }
 0x4ea   : > { %5233 = vmatprep.mubr.f32.mxu0 %v5060_v52  ;;  %7246 = vmatpush1.bf16.msra.mxu0 %v11753_v20  ;;  %v11779_v20 = vld [vmem:[#allocation28_spill] sm:$0xff] }
 0x4eb   : > { %7248 = vmatprep.subr.bf16.mxu0 %v11754_v48  ;;  %v11780_v48 = vld [vmem:[#allocation53_spill] sm:$0xff] }
 0x4ed   : > { %5234 = vmatmul.mubr.f32.gmra.mrb[44].mxu0 %v5058_v56 }
 0x4ee   : > { %5239 = vmatprep.mubr.f32.mxu0 %v11757_v55  ;;  %7250 = vmatpush1.bf16.msra.mxu0 %v11758_v44  ;;  %v11783_v55 = vld [vmem:[#allocation30_spill] sm:$0xff]  ;;  %v11784_v44 = vld [vmem:[#allocation55_spill] sm:$0xff] }
 0x4ef   : > { %7252 = vmatprep.subr.bf16.mxu0 %v11759_v35  ;;  %v11785_v35 = vld [vmem:[#allocation56_spill] sm:$0xff] }
 0x4f1   : > { %5240 = vmatmul.mubr.f32.gmra.mrb[46].mxu0 %v11760_v61  ;;  %v11786_v61 = vld [vmem:[#allocation31_spill] sm:$0xff] }
 0x4f2   : > { %5245 = vmatprep.mubr.f32.mxu0 %v11761_v36  ;;  %7254 = vmatpush1.bf16.msra.mxu0 %v11762_v57  ;;  %v11787_v36 = vld [vmem:[#allocation32_spill] sm:$0xff]  ;;  %v11788_v57 = vld [vmem:[#allocation57_spill] sm:$0xff] }
 0x4f3   : > { %7256 = vmatprep.subr.bf16.mxu0 %v11763_v9  ;;  %v11789_v9 = vld [vmem:[#allocation58_spill] sm:$0xff] }
 0x4f5   : > { %5246 = vmatmul.mubr.f32.gmra.mrb[48].mxu0 %v11764_v17  ;;  %v11790_v17 = vld [vmem:[#allocation33_spill] sm:$0xff] }
 0x4f6   : > { %5251 = vmatprep.mubr.f32.mxu0 %v11765_v6  ;;  %7258 = vmatpush1.bf16.msra.mxu0 %v11766_v18  ;;  %v11791_v6 = vld [vmem:[#allocation34_spill] sm:$0xff]  ;;  %v11792_v18 = vld [vmem:[#allocation59_spill] sm:$0xff] }
 0x4f7   : > { %7260 = vmatprep.subr.bf16.mxu0 %v11767_v14  ;;  %v11793_v14 = vld [vmem:[#allocation35_spill] sm:$0xff] }
 0x4f9   : > { %5252 = vmatmul.mubr.f32.gmra.mrb[50].mxu0 %v11768_v30  ;;  %v11794_v30 = vld [vmem:[#allocation36_spill] sm:$0xff] }
 0x4fa   : > { %5257 = vmatprep.mubr.f32.mxu0 %v11769_v38  ;;  %7262 = vmatpush1.bf16.msra.mxu0 %v11770_v2  ;;  %v11795_v38 = vld [vmem:[#allocation60_spill] sm:$0xff]  ;;  %v11796_v2 = vld [vmem:[#allocation61_spill] sm:$0xff] }
 0x4fb   : > { %7264 = vmatprep.subr.bf16.mxu0 %v11771_v13  ;;  %v11797_v13 = vld [vmem:[#allocation37_spill] sm:$0xff] }
 0x4fd   : > { %5258 = vmatmul.mubr.f32.gmra.mrb[52].mxu0 %v11772_v47  ;;  %v11798_v47 = vld [vmem:[#allocation38_spill] sm:$0xff] }
 0x4fe   : > { %5263 = vmatprep.mubr.f32.mxu0 %v11773_v59  ;;  %7266 = vmatpush1.bf16.msra.mxu0 %v11774_v63  ;;  %v11799_v59 = vld [vmem:[#allocation64_spill] sm:$0xff]  ;;  %v11800_v63 = vld [vmem:[#allocation39_spill] sm:$0xff] }
 0x4ff   : > { %7268 = vmatprep.subr.bf16.mxu0 %v11775_v34  ;;  %v11802_v34 = vld [vmem:[#allocation63_spill] sm:$0xff] }
 0x501   : > { %5264 = vmatmul.mubr.f32.gmra.mrb[54].mxu0 %v11776_v25  ;;  %v11803_v25 = vld [vmem:[#allocation62_spill] sm:$0xff] }
 0x502   : > { %5269 = vmatprep.mubr.f32.mxu0 %v11777_v46  ;;  %7270 = vmatpush1.bf16.msra.mxu0 %v11778_v49 }
 0x503   : > { %7272 = vmatprep.subr.bf16.mxu0 %v11779_v20 }
 0x505   : > { %5270 = vmatmul.mubr.f32.gmra.mrb[56].mxu0 %v11780_v48 }
 0x506   : > { %5275 = vmatprep.mubr.f32.mxu0 %v11781_v51  ;;  %7274 = vmatpush1.bf16.msra.mxu0 %v11782_v12 }
 0x507   : > { %7276 = vmatprep.subr.bf16.mxu0 %v11783_v55 }
 0x509   : > { %5276 = vmatmul.mubr.f32.gmra.mrb[58].mxu0 %v11784_v44 }
 0x50a   : > { %5281 = vmatprep.mubr.f32.mxu0 %v11785_v35  ;;  %7278 = vmatpush1.bf16.msra.mxu0 %v11786_v61 }
 0x50b   : > { %7280 = vmatprep.subr.bf16.mxu0 %v11787_v36 }
 0x50d   : > { %5282 = vmatmul.mubr.f32.gmra.mrb[60].mxu0 %v11788_v57 }
 0x50e   : > { %5287 = vmatprep.mubr.f32.mxu0 %v11789_v9  ;;  %7282 = vmatpush1.bf16.msra.mxu0 %v11790_v17 }
 0x50f   : > { %7284 = vmatprep.subr.bf16.mxu0 %v11791_v6 }
 0x511   : > { %5288 = vmatmul.mubr.f32.gmra.mrb[62].mxu0 %v10363_v0  ;;  %v11801_v0 = vld [vmem:[#allocation65_spill] sm:$0xff] }
 0x512   : > { %5293 = vmatprep.mubr.f32.mxu0 %v11792_v18  ;;  %7286 = vmatpush1.bf16.msra.mxu0 %v11793_v14 }
 0x513   : > { %7288 = vmatprep.subr.bf16.mxu0 %v11794_v30 }
 0x515   : > { %5294 = vmatmul.mubr.f32.gmra.mrb[64].mxu0 %v11795_v38 }
 0x516   : > { %5299 = vmatprep.mubr.f32.mxu0 %v11796_v2  ;;  %7290 = vmatpush1.bf16.msra.mxu0 %v11797_v13 }
 0x517   : > { %7292 = vmatprep.subr.bf16.mxu0 %v11798_v47 }
 0x519   : > { %5300 = vmatmul.mubr.f32.gmra.mrb[66].mxu0 %v10406_v3  ;;  %v11804_v3 = vld [vmem:[#allocation8_spill] sm:$0xff] }
 0x51a   : > { %5305 = vmatprep.mubr.f32.mxu0 %v11799_v59  ;;  %7294 = vmatpush1.bf16.msra.mxu0 %v11800_v63  ;;  %v5575_v46 = vsub.s32 2, %v11804_v3 }
 0x51d   : > { %5306 = vmatmul.mubr.f32.gmra.mrb[68].mxu0 %v11801_v0 }
 0x51e   : > { %5311 = vmatprep.mubr.f32.mxu0 %v11802_v34 }
 0x521   : > { %5312 = vmatmul.mubr.f32.gmra.mrb[70].mxu0 %v11803_v25 }
 0x522   : > { %5382 = vmatprep.mubr.f32.mxu0 %v11208_v31  ;;  %v11321_v31 = vld [vmem:[%s11571_s6] sm:$0xf] }
 0x525   : > { %5383 = vmatmul.mubr.f32.vlgmr.msra.gmra.mrb[72].mxu0 %v11214_v45  ;;  %v5579_v45 = vsub.s32 3, %v11804_v3 }
 0x526   : > { %5388 = vmatprep.mubr.f32.mxu0 %v11219_v53  ;;  %v11325_v53 = vrot.slane %v11321_v31, %v5575_v46 }
 0x529   : > { %5389 = vmatmul.mubr.f32.gmra.mrb[74].mxu0 %v11226_v1 }
 0x52a   : > { %5394 = vmatprep.mubr.f32.mxu0 %v11230_v7  ;;  %v11328_v7 = vrot.slane %v11321_v31, %v5579_v45 }
 0x52d   : > { %5395 = vmatmul.mubr.f32.gmra.mrb[76].mxu0 %v11238_v11 }
 0x52e   : > { %5400 = vmatprep.mubr.f32.mxu0 %v11243_v28 }
 0x531   : > { %5401 = vmatmul.mubr.f32.gmra.mrb[78].mxu0 %v11249_v23 }
 0x532   : > { %5406 = vmatprep.mubr.f32.mxu0 %v5060_v52 }
 0x535   : > { %5407 = vmatmul.mubr.f32.gmra.mrb[80].mxu0 %v5058_v56 }
 0x57c   : > { %v4825_v1 = vpop.f32.mrb[82].mxu0 }
 0x57d   : > { %v7363_v11 = vadd.f32 %v10999_v62, %v4825_v1  ;;  %v4827_v28 = vpop.f32.mrb[83].mxu0 }
 0x57e   : > { %v7364_v23 = vadd.f32 %v11007_v50, %v4827_v28 }
 0x57f   : > { %v5607_v52 = vadd.f32 %v7363_v11, %v11325_v53 }
 0x580   : > { %v5608_v56 = vadd.f32 %v7364_v23, %v11328_v7  ;;  %v4831_v49 = vpop.f32.mrb[84].mxu0 }
 0x581   : > { %v7365_v20 = vadd.f32 %v11017_v58, %v4831_v49  ;;  %v4833_v48 = vpop.f32.mrb[85].mxu0  ;;  %v5679_v12 = vmax.f32 %v5607_v52, 0.0 }
 0x582   : > { %v7366_v51 = vadd.f32 %v11025_v54, %v4833_v48  ;;  %v5680_v44 = vmax.f32 %v5608_v56, 0.0 }
 0x583   : > { %v5611_v55 = vadd.f32 %v7365_v20, %v11325_v53  ;;  %v11346_v58 = vrot.slane %v5679_v12, 4 }
 0x584   : > { %v5612_v62 = vadd.f32 %v7366_v51, %v11328_v7  ;;  %v4837_v35 = vpop.f32.mrb[86].mxu0  ;;  %v11349_v6 = vrot.slane %v5680_v44, 4 }
 0x585   : > { %v5683_v61 = vmax.f32 %v5611_v55, 0.0  ;;  %v7367_v50 = vadd.f32 %v11041_v27, %v4837_v35  ;;  %v4839_v36 = vpop.f32.mrb[87].mxu0 }
 0x586   : > { %v5684_v57 = vmax.f32 %v5612_v62, 0.0  ;;  %v7368_v9 = vadd.f32 %v11050_v32, %v4839_v36 }
 0x587   : > { %v5810_v54 = vrot.slane %v5683_v61, 4  ;;  %v5615_v17 = vadd.f32 %v7367_v50, %v11325_v53  ;;  %v5845_v63 = vrot.slane %v5683_v61, 6 }
 0x588   : > { %v5812_v18 = vrot.slane %v5684_v57, 4  ;;  %v5616_v27 = vadd.f32 %v7368_v9, %v11328_v7  ;;  %v4843_v14 = vpop.f32.mrb[88].mxu0  ;;  %v5848_v25 = vrot.slane %v5684_v57, 6 }
 0x589   : > { %v5811_v32 = vsel %vm1388_vm3, %v11346_v58, %v5810_v54  ;;  %v5687_v30 = vmax.f32 %v5615_v17, 0.0  ;;  %v7369_v38 = vadd.f32 %v11059_v29, %v4843_v14  ;;  %v4845_v2 = vpop.f32.mrb[89].mxu0 }
 0x58a   : > { %6485 = vst [vmem:[%s11344_s22 + $0xb0] sm:$0xff] %v5811_v32  ;;  %v5813_v13 = vsel %vm1388_vm3, %v11349_v6, %v5812_v18  ;;  %v5688_v47 = vmax.f32 %v5616_v27, 0.0  ;;  %v7370_v59 = vadd.f32 %v11068_v16, %v4845_v2 }
 0x58b   : > { %6486 = vst [vmem:[%s11344_s22 + $0xb8] sm:$0xff] %v5813_v13  ;;  %v5846_v0 = vrot.slane %v5687_v30, 6  ;;  %v5619_v34 = vadd.f32 %v7369_v38, %v11325_v53 }
 0x58c   : > { %v5849_v3 = vrot.slane %v5688_v47, 6  ;;  %v5620_v46 = vadd.f32 %v7370_v59, %v11328_v7  ;;  %v4849_v29 = vpop.f32.mrb[90].mxu0 }
 0x58d   : > { %v5847_v45 = vsel %vm1363_vm2, %v5845_v63, %v5846_v0  ;;  %v5691_v1 = vmax.f32 %v5619_v34, 0.0  ;;  %v7371_v11 = vadd.f32 %v11077_v10, %v4849_v29  ;;  %v4851_v28 = vpop.f32.mrb[91].mxu0 }
 0x58e   : > { %6489 = vst [vmem:[%s11344_s22 + $0xd0] sm:$0xff] %v5847_v45  ;;  %v5850_v16 = vsel %vm1363_vm2, %v5848_v25, %v5849_v3  ;;  %v5692_v23 = vmax.f32 %v5620_v46, 0.0  ;;  %v7372_v52 = vadd.f32 %v11086_v60, %v4851_v28 }
 0x58f   : > { %6490 = vst [vmem:[%s11344_s22 + $0xd8] sm:$0xff] %v5850_v16  ;;  %v5855_v56 = vrot.slane %v5691_v1, 6  ;;  %v5623_v49 = vadd.f32 %v7371_v11, %v11325_v53 }
 0x590   : > { %v5857_v20 = vrot.slane %v5692_v23, 6  ;;  %v5624_v48 = vadd.f32 %v7372_v52, %v11328_v7  ;;  %v4855_v51 = vpop.f32.mrb[92].mxu0 }
 0x591   : > { %v5856_v10 = vsel %vm1363_vm2, %v5846_v0, %v5855_v56  ;;  %v5695_v12 = vmax.f32 %v5623_v49, 0.0  ;;  %v7373_v55 = vadd.f32 %v11108_v21, %v4855_v51  ;;  %v4857_v44 = vpop.f32.mrb[93].mxu0 }
 0x592   : > { %6493 = vst [vmem:[%s11344_s22 + $0xf0] sm:$0xff] %v5856_v10  ;;  %v5858_v60 = vsel %vm1363_vm2, %v5849_v3, %v5857_v20  ;;  %v5696_v62 = vmax.f32 %v5624_v48, 0.0  ;;  %v7374_v35 = vadd.f32 %v11117_v5, %v4857_v44 }
 0x593   : > { %6494 = vst [vmem:[%s11344_s22 + $0xf8] sm:$0xff] %v5858_v60  ;;  %6497 = vst [vmem:[%s11344_s22 + $0x110] sm:$0xff] %v5695_v12  ;;  %v5627_v61 = vadd.f32 %v7373_v55, %v11325_v53 }
 0x594   : > { %6498 = vst [vmem:[%s11344_s22 + $0x118] sm:$0xff] %v5696_v62  ;;  %v5628_v50 = vadd.f32 %v7374_v35, %v11328_v7  ;;  %v4861_v36 = vpop.f32.mrb[94].mxu0 }
 0x595   : > { %v5699_v57 = vmax.f32 %v5627_v61, 0.0  ;;  %v7375_v21 = vadd.f32 %v11126_v40, %v4861_v36  ;;  %v4863_v9 = vpop.f32.mrb[95].mxu0 }
 0x596   : > { %v5700_v54 = vmax.f32 %v5628_v50, 0.0  ;;  %v7376_v17 = vadd.f32 %v11135_v24, %v4863_v9 }
 0x597   : > { %6501 = vst [vmem:[%s11344_s22 + $0x130] sm:$0xff] %v5699_v57  ;;  %v5631_v18 = vadd.f32 %v7375_v21, %v11325_v53 }
 0x598   : > { %6502 = vst [vmem:[%s11344_s22 + $0x138] sm:$0xff] %v5700_v54  ;;  %v5632_v5 = vadd.f32 %v7376_v17, %v11328_v7  ;;  %v4867_v27 = vpop.f32.mrb[96].mxu0 }
 0x599   : > { %v7377_v14 = vadd.f32 %v11143_v22, %v4867_v27  ;;  %v4869_v32 = vpop.f32.mrb[97].mxu0  ;;  %v5703_v38 = vmax.f32 %v5631_v18, 0.0 }
 0x59a   : > { %v7378_v30 = vadd.f32 %v11151_v39, %v4869_v32  ;;  %v5704_v40 = vmax.f32 %v5632_v5, 0.0 }
 0x59b   : > { %v5635_v2 = vadd.f32 %v7377_v14, %v11325_v53  ;;  %v5903_v22 = vrot.slane %v5703_v38, 2 }
 0x59c   : > { %v5636_v13 = vadd.f32 %v7378_v30, %v11328_v7  ;;  %v4873_v47 = vpop.f32.mrb[98].mxu0  ;;  %v5906_v3 = vrot.slane %v5704_v40, 2 }
 0x59d   : > { %v5707_v24 = vmax.f32 %v5635_v2, 0.0  ;;  %v7379_v59 = vadd.f32 %v11159_v8, %v4873_v47  ;;  %v4875_v63 = vpop.f32.mrb[99].mxu0 }
 0x59e   : > { %v5708_v0 = vmax.f32 %v5636_v13, 0.0  ;;  %v7380_v34 = vadd.f32 %v11167_v26, %v4875_v63  ;;  %v11805_v13 = vld [vmem:[#allocation9_spill] sm:$0xff]  ;;  %v11806_v63 = vld [vmem:[#allocation10_spill] sm:$0xff] }
 0x59f   : > { %v5904_v25 = vrot.slane %v5707_v24, 2  ;;  %v5639_v39 = vadd.f32 %v7379_v59, %v11325_v53  ;;  %v11422_v47 = vrot.slane %v11321_v31, %v11805_v13 }
 0x5a0   : > { %v5907_v46 = vrot.slane %v5708_v0, 2  ;;  %v5640_v29 = vadd.f32 %v7380_v34, %v11328_v7  ;;  %v4879_v45 = vpop.f32.mrb[100].mxu0  ;;  %v11429_v0 = vrot.slane %v11321_v31, %v11806_v63 }
 0x5a1   : > { %v5905_v1 = vsel %vm1415_vm5, %v5903_v22, %v5904_v25  ;;  %v5711_v11 = vmax.f32 %v5639_v39, 0.0  ;;  %v7381_v28 = vadd.f32 %v11175_v37, %v4879_v45  ;;  %v4881_v8 = vpop.f32.mrb[101].mxu0 }
 0x5a2   : > { %6505 = vst [vmem:[%s11344_s22 + $0x150] sm:$0xff] %v5905_v1  ;;  %v5908_v26 = vsel %vm1415_vm5, %v5906_v3, %v5907_v46  ;;  %v5712_v16 = vmax.f32 %v5640_v29, 0.0  ;;  %v7382_v23 = vadd.f32 %v11183_v4, %v4881_v8 }
 0x5a3   : > { %6506 = vst [vmem:[%s11344_s22 + $0x158] sm:$0xff] %v5908_v26  ;;  %v5913_v52 = vrot.slane %v5711_v11, 2  ;;  %v5643_v56 = vadd.f32 %v7381_v28, %v11325_v53  ;;  %v5948_v60 = vrot.slane %v5711_v11, 4 }
 0x5a4   : > { %v5915_v49 = vrot.slane %v5712_v16, 2  ;;  %v5644_v20 = vadd.f32 %v7382_v23, %v11328_v7  ;;  %v4885_v48 = vpop.f32.mrb[102].mxu0  ;;  %v5951_v61 = vrot.slane %v5712_v16, 4 }
 0x5a5   : > { %v5914_v51 = vsel %vm1415_vm5, %v5904_v25, %v5913_v52  ;;  %v5715_v37 = vmax.f32 %v5643_v56, 0.0  ;;  %v7383_v10 = vadd.f32 %v11191_v15, %v4885_v48  ;;  %v4887_v12 = vpop.f32.mrb[103].mxu0 }
 0x5a6   : > { %6509 = vst [vmem:[%s11344_s22 + $0x170] sm:$0xff] %v5914_v51  ;;  %v5916_v55 = vsel %vm1415_vm5, %v5907_v46, %v5915_v49  ;;  %v5716_v4 = vmax.f32 %v5644_v20, 0.0  ;;  %v7384_v44 = vadd.f32 %v11193_v33, %v4887_v12 }
 0x5a7   : > { %6510 = vst [vmem:[%s11344_s22 + $0x178] sm:$0xff] %v5916_v55  ;;  %v5949_v62 = vrot.slane %v5715_v37, 4  ;;  %v5647_v35 = vadd.f32 %v7383_v10, %v11325_v53 }
 0x5a8   : > { %v5952_v50 = vrot.slane %v5716_v4, 4  ;;  %v5648_v36 = vadd.f32 %v7384_v44, %v11328_v7  ;;  %v4891_v57 = vpop.f32.mrb[104].mxu0 }
 0x5a9   : > { %v5950_v15 = vsel %vm1388_vm3, %v5948_v60, %v5949_v62  ;;  %v5719_v21 = vmax.f32 %v5647_v35, 0.0  ;;  %v7385_v9 = vadd.f32 %v11195_v43, %v4891_v57  ;;  %v4893_v54 = vpop.f32.mrb[105].mxu0 }
 0x5aa   : > { %6513 = vst [vmem:[%s11344_s22 + $0x190] sm:$0xff] %v5950_v15  ;;  %v5953_v33 = vsel %vm1388_vm3, %v5951_v61, %v5952_v50  ;;  %v5720_v17 = vmax.f32 %v5648_v36, 0.0  ;;  %v7386_v18 = vadd.f32 %v11197_v41, %v4893_v54 }
 0x5ab   : > { %6514 = vst [vmem:[%s11344_s22 + $0x198] sm:$0xff] %v5953_v33  ;;  %v5958_v5 = vrot.slane %v5719_v21, 4  ;;  %v5651_v27 = vadd.f32 %v7385_v9, %v11325_v53  ;;  %v5993_v34 = vrot.slane %v5719_v21, 6 }
 0x5ac   : > { %v5960_v14 = vrot.slane %v5720_v17, 4  ;;  %v5652_v32 = vadd.f32 %v7386_v18, %v11328_v7  ;;  %v4897_v30 = vpop.f32.mrb[106].mxu0  ;;  %v5996_v25 = vrot.slane %v5720_v17, 6 }
 0x5ad   : > { %v5959_v38 = vsel %vm1388_vm3, %v5949_v62, %v5958_v5  ;;  %v5723_v43 = vmax.f32 %v5651_v27, 0.0  ;;  %v7387_v2 = vadd.f32 %v11200_v42, %v4897_v30  ;;  %v4899_v40 = vpop.f32.mrb[107].mxu0 }
 0x5ae   : > { %6517 = vst [vmem:[%s11344_s22 + $0x1b0] sm:$0xff] %v5959_v38  ;;  %v5961_v41 = vsel %vm1388_vm3, %v5952_v50, %v5960_v14  ;;  %v5724_v24 = vmax.f32 %v5652_v32, 0.0  ;;  %v7388_v59 = vadd.f32 %v11202_v19, %v4899_v40 }
 0x5af   : > { %6518 = vst [vmem:[%s11344_s22 + $0x1b8] sm:$0xff] %v5961_v41  ;;  %v5994_v42 = vrot.slane %v5723_v43, 6  ;;  %v5655_v22 = vadd.f32 %v7387_v2, %v11325_v53 }
 0x5b0   : > { %v5997_v39 = vrot.slane %v5724_v24, 6  ;;  %v5656_v3 = vadd.f32 %v7388_v59, %v11328_v7  ;;  %v5211_v46 = vpop.f32.mrb[36].mxu0 }
 0x5b1   : > { %v5995_v29 = vsel %vm1363_vm2, %v5993_v34, %v5994_v42  ;;  %v5727_v45 = vmax.f32 %v5655_v22, 0.0  ;;  %v5585_v19 = vadd.f32 %v11422_v47, %v5211_v46  ;;  %v5213_v31 = vpop.f32.mrb[37].mxu0 }
 0x5b2   : > { %6521 = vst [vmem:[%s11344_s22 + $0x1d0] sm:$0xff] %v5995_v29  ;;  %v5998_v1 = vsel %vm1363_vm2, %v5996_v25, %v5997_v39  ;;  %v5728_v11 = vmax.f32 %v5656_v3, 0.0  ;;  %v5586_v28 = vadd.f32 %v11429_v0, %v5213_v31 }
 0x5b3   : > { %6522 = vst [vmem:[%s11344_s22 + $0x1d8] sm:$0xff] %v5998_v1  ;;  %v6003_v8 = vrot.slane %v5727_v45, 6  ;;  %v5657_v26 = vmax.f32 %v5585_v19, 0.0 }
 0x5b4   : > { %v6005_v16 = vrot.slane %v5728_v11, 6  ;;  %v5658_v23 = vmax.f32 %v5586_v28, 0.0  ;;  %v5217_v52 = vpop.f32.mrb[38].mxu0 }
 0x5b5   : > { %v6004_v56 = vsel %vm1363_vm2, %v5994_v42, %v6003_v8  ;;  %5729 = vst [vmem:[%s11344_s22] sm:$0xff] %v5657_v26  ;;  %v5589_v49 = vadd.f32 %v11422_v47, %v5217_v52  ;;  %v5219_v20 = vpop.f32.mrb[39].mxu0 }
 0x5b6   : > { %6525 = vst [vmem:[%s11344_s22 + $0x1f0] sm:$0xff] %v6004_v56  ;;  %v6006_v48 = vsel %vm1363_vm2, %v5997_v39, %v6005_v16  ;;  %5730 = vst [vmem:[%s11344_s22 + $0x8] sm:$0xff] %v5658_v23  ;;  %v5590_v51 = vadd.f32 %v11429_v0, %v5219_v20 }
 0x5b7   : > { %6526 = vst [vmem:[%s11344_s22 + $0x1f8] sm:$0xff] %v6006_v48  ;;  %v5661_v37 = vmax.f32 %v5589_v49, 0.0 }
 0x5b8   : > { %v5662_v10 = vmax.f32 %v5590_v51, 0.0  ;;  %v5223_v12 = vpop.f32.mrb[40].mxu0 }
 0x5b9   : > { %5733 = vst [vmem:[%s11344_s22 + $0x20] sm:$0xff] %v5661_v37  ;;  %v5593_v55 = vadd.f32 %v11422_v47, %v5223_v12  ;;  %v5225_v4 = vpop.f32.mrb[41].mxu0 }
 0x5ba   : > { %5734 = vst [vmem:[%s11344_s22 + $0x28] sm:$0xff] %v5662_v10  ;;  %v5594_v44 = vadd.f32 %v11429_v0, %v5225_v4 }
 0x5bb   : > { %v5665_v62 = vmax.f32 %v5593_v55, 0.0 }
 0x5bc   : > { %v5229_v60 = vpop.f32.mrb[42].mxu0  ;;  %v5666_v50 = vmax.f32 %v5594_v44, 0.0 }
 0x5bd   : > { %v5597_v35 = vadd.f32 %v11422_v47, %v5229_v60  ;;  %v5231_v61 = vpop.f32.mrb[43].mxu0  ;;  %v5749_v9 = vrot.slane %v5665_v62, 2 }
 0x5be   : > { %v5598_v36 = vadd.f32 %v11429_v0, %v5231_v61  ;;  %v5752_v18 = vrot.slane %v5666_v50, 2 }
 0x5bf   : > { %v5669_v57 = vmax.f32 %v5597_v35, 0.0 }
 0x5c0   : > { %v5670_v15 = vmax.f32 %v5598_v36, 0.0  ;;  %v5235_v21 = vpop.f32.mrb[44].mxu0 }
 0x5c1   : > { %v5750_v54 = vrot.slane %v5669_v57, 2  ;;  %v5601_v33 = vadd.f32 %v11422_v47, %v5235_v21  ;;  %v5237_v17 = vpop.f32.mrb[45].mxu0 }
 0x5c2   : > { %v5753_v5 = vrot.slane %v5670_v15, 2  ;;  %v5602_v27 = vadd.f32 %v11429_v0, %v5237_v17 }
 0x5c3   : > { %v5751_v14 = vsel %vm1415_vm5, %v5749_v9, %v5750_v54  ;;  %v5673_v32 = vmax.f32 %v5601_v33, 0.0 }
 0x5c4   : > { %6471 = vst [vmem:[%s11344_s22 + $0x40] sm:$0xff] %v5751_v14  ;;  %v5754_v30 = vsel %vm1415_vm5, %v5752_v18, %v5753_v5  ;;  %v5674_v38 = vmax.f32 %v5602_v27, 0.0  ;;  %v5241_v43 = vpop.f32.mrb[46].mxu0 }
 0x5c5   : > { %6472 = vst [vmem:[%s11344_s22 + $0x48] sm:$0xff] %v5754_v30  ;;  %v5761_v2 = vrot.slane %v5673_v32, 2  ;;  %v5605_v40 = vadd.f32 %v11422_v47, %v5241_v43  ;;  %v5243_v13 = vpop.f32.mrb[47].mxu0  ;;  %v5794_v25 = vrot.slane %v5673_v32, 4 }
 0x5c6   : > { %v5763_v41 = vrot.slane %v5674_v38, 2  ;;  %v5606_v24 = vadd.f32 %v11429_v0, %v5243_v13  ;;  %v5797_v29 = vrot.slane %v5674_v38, 4 }
 0x5c7   : > { %v5762_v59 = vsel %vm1415_vm5, %v5750_v54, %v5761_v2  ;;  %v5677_v63 = vmax.f32 %v5605_v40, 0.0 }
 0x5c8   : > { %6475 = vst [vmem:[%s11344_s22 + $0x60] sm:$0xff] %v5762_v59  ;;  %v5764_v34 = vsel %vm1415_vm5, %v5753_v5, %v5763_v41  ;;  %v5678_v42 = vmax.f32 %v5606_v24, 0.0  ;;  %v5247_v22 = vpop.f32.mrb[48].mxu0 }
 0x5c9   : > { %6476 = vst [vmem:[%s11344_s22 + $0x68] sm:$0xff] %v5764_v34  ;;  %v5795_v39 = vrot.slane %v5677_v63, 4  ;;  %v5609_v3 = vadd.f32 %v11422_v47, %v5247_v22  ;;  %v5249_v46 = vpop.f32.mrb[49].mxu0 }
 0x5ca   : > { %v5798_v45 = vrot.slane %v5678_v42, 4  ;;  %v5610_v19 = vadd.f32 %v11429_v0, %v5249_v46 }
 0x5cb   : > { %v5796_v31 = vsel %vm1388_vm3, %v5794_v25, %v5795_v39  ;;  %v5681_v1 = vmax.f32 %v5609_v3, 0.0 }
 0x5cc   : > { %6479 = vst [vmem:[%s11344_s22 + $0x80] sm:$0xff] %v5796_v31  ;;  %v5799_v11 = vsel %vm1388_vm3, %v5797_v29, %v5798_v45  ;;  %v5682_v28 = vmax.f32 %v5610_v19, 0.0  ;;  %v5253_v8 = vpop.f32.mrb[50].mxu0 }
 0x5cd   : > { %6480 = vst [vmem:[%s11344_s22 + $0x88] sm:$0xff] %v5799_v11  ;;  %v5806_v26 = vrot.slane %v5681_v1, 4  ;;  %v5613_v16 = vadd.f32 %v11422_v47, %v5253_v8  ;;  %v5255_v23 = vpop.f32.mrb[51].mxu0  ;;  %v5839_v10 = vrot.slane %v5681_v1, 6 }
 0x5ce   : > { %v5808_v52 = vrot.slane %v5682_v28, 4  ;;  %v5614_v56 = vadd.f32 %v11429_v0, %v5255_v23  ;;  %v5842_v44 = vrot.slane %v5682_v28, 6 }
 0x5cf   : > { %v5807_v49 = vsel %vm1388_vm3, %v5795_v39, %v5806_v26  ;;  %v5685_v20 = vmax.f32 %v5613_v16, 0.0 }
 0x5d0   : > { %6483 = vst [vmem:[%s11344_s22 + $0xa0] sm:$0xff] %v5807_v49  ;;  %v5809_v48 = vsel %vm1388_vm3, %v5798_v45, %v5808_v52  ;;  %v5686_v51 = vmax.f32 %v5614_v56, 0.0  ;;  %v5259_v37 = vpop.f32.mrb[52].mxu0 }
 0x5d1   : > { %6484 = vst [vmem:[%s11344_s22 + $0xa8] sm:$0xff] %v5809_v48  ;;  %v5840_v12 = vrot.slane %v5685_v20, 6  ;;  %v5617_v55 = vadd.f32 %v11422_v47, %v5259_v37  ;;  %v5261_v4 = vpop.f32.mrb[53].mxu0 }
 0x5d2   : > { %v5843_v60 = vrot.slane %v5686_v51, 6  ;;  %v5618_v62 = vadd.f32 %v11429_v0, %v5261_v4 }
 0x5d3   : > { %v5841_v35 = vsel %vm1363_vm2, %v5839_v10, %v5840_v12  ;;  %v5689_v61 = vmax.f32 %v5617_v55, 0.0 }
 0x5d4   : > { %6487 = vst [vmem:[%s11344_s22 + $0xc0] sm:$0xff] %v5841_v35  ;;  %v5844_v50 = vsel %vm1363_vm2, %v5842_v44, %v5843_v60  ;;  %v5690_v36 = vmax.f32 %v5618_v62, 0.0  ;;  %v5265_v57 = vpop.f32.mrb[54].mxu0 }
 0x5d5   : > { %6488 = vst [vmem:[%s11344_s22 + $0xc8] sm:$0xff] %v5844_v50  ;;  %v5851_v15 = vrot.slane %v5689_v61, 6  ;;  %v5621_v21 = vadd.f32 %v11422_v47, %v5265_v57  ;;  %v5267_v9 = vpop.f32.mrb[55].mxu0 }
 0x5d6   : > { %v5853_v54 = vrot.slane %v5690_v36, 6  ;;  %v5622_v33 = vadd.f32 %v11429_v0, %v5267_v9 }
 0x5d7   : > { %v5852_v17 = vsel %vm1363_vm2, %v5840_v12, %v5851_v15  ;;  %v5693_v18 = vmax.f32 %v5621_v21, 0.0 }
 0x5d8   : > { %6491 = vst [vmem:[%s11344_s22 + $0xe0] sm:$0xff] %v5852_v17  ;;  %v5854_v5 = vsel %vm1363_vm2, %v5843_v60, %v5853_v54  ;;  %v5694_v27 = vmax.f32 %v5622_v33, 0.0  ;;  %v5271_v14 = vpop.f32.mrb[56].mxu0 }
 0x5d9   : > { %6492 = vst [vmem:[%s11344_s22 + $0xe8] sm:$0xff] %v5854_v5  ;;  %6495 = vst [vmem:[%s11344_s22 + $0x100] sm:$0xff] %v5693_v18  ;;  %v5625_v32 = vadd.f32 %v11422_v47, %v5271_v14  ;;  %v5273_v30 = vpop.f32.mrb[57].mxu0 }
 0x5da   : > { %6496 = vst [vmem:[%s11344_s22 + $0x108] sm:$0xff] %v5694_v27  ;;  %v5626_v38 = vadd.f32 %v11429_v0, %v5273_v30 }
 0x5db   : > { %v5697_v43 = vmax.f32 %v5625_v32, 0.0 }
 0x5dc   : > { %v5698_v2 = vmax.f32 %v5626_v38, 0.0  ;;  %v5277_v40 = vpop.f32.mrb[58].mxu0 }
 0x5dd   : > { %6499 = vst [vmem:[%s11344_s22 + $0x120] sm:$0xff] %v5697_v43  ;;  %v5629_v13 = vadd.f32 %v11422_v47, %v5277_v40  ;;  %v5279_v41 = vpop.f32.mrb[59].mxu0 }
 0x5de   : > { %6500 = vst [vmem:[%s11344_s22 + $0x128] sm:$0xff] %v5698_v2  ;;  %v5630_v24 = vadd.f32 %v11429_v0, %v5279_v41 }
 0x5df   : > { %v5701_v63 = vmax.f32 %v5629_v13, 0.0 }
 0x5e0   : > { %v5283_v59 = vpop.f32.mrb[60].mxu0  ;;  %v5702_v22 = vmax.f32 %v5630_v24, 0.0 }
 0x5e1   : > { %v5633_v34 = vadd.f32 %v11422_v47, %v5283_v59  ;;  %v5285_v42 = vpop.f32.mrb[61].mxu0  ;;  %v5897_v29 = vrot.slane %v5701_v63, 2 }
 0x5e2   : > { %v5634_v25 = vadd.f32 %v11429_v0, %v5285_v42  ;;  %v5900_v1 = vrot.slane %v5702_v22, 2 }
 0x5e3   : > { %v5705_v39 = vmax.f32 %v5633_v34, 0.0 }
 0x5e4   : > { %v5706_v3 = vmax.f32 %v5634_v25, 0.0  ;;  %v5289_v46 = vpop.f32.mrb[62].mxu0 }
 0x5e5   : > { %v5898_v45 = vrot.slane %v5705_v39, 2  ;;  %v5637_v19 = vadd.f32 %v11422_v47, %v5289_v46  ;;  %v5291_v31 = vpop.f32.mrb[63].mxu0 }
 0x5e6   : > { %v5901_v11 = vrot.slane %v5706_v3, 2  ;;  %v5638_v28 = vadd.f32 %v11429_v0, %v5291_v31 }
 0x5e7   : > { %v5899_v8 = vsel %vm1415_vm5, %v5897_v29, %v5898_v45  ;;  %v5709_v26 = vmax.f32 %v5637_v19, 0.0 }
 0x5e8   : > { %6503 = vst [vmem:[%s11344_s22 + $0x140] sm:$0xff] %v5899_v8  ;;  %v5902_v16 = vsel %vm1415_vm5, %v5900_v1, %v5901_v11  ;;  %v5710_v23 = vmax.f32 %v5638_v28, 0.0  ;;  %v5295_v52 = vpop.f32.mrb[64].mxu0 }
 0x5e9   : > { %6504 = vst [vmem:[%s11344_s22 + $0x148] sm:$0xff] %v5902_v16  ;;  %v5909_v56 = vrot.slane %v5709_v26, 2  ;;  %v5641_v49 = vadd.f32 %v11422_v47, %v5295_v52  ;;  %v5297_v20 = vpop.f32.mrb[65].mxu0  ;;  %v5942_v44 = vrot.slane %v5709_v26, 4 }
 0x5ea   : > { %v5911_v48 = vrot.slane %v5710_v23, 2  ;;  %v5642_v51 = vadd.f32 %v11429_v0, %v5297_v20  ;;  %v5945_v61 = vrot.slane %v5710_v23, 4 }
 0x5eb   : > { %v5910_v37 = vsel %vm1415_vm5, %v5898_v45, %v5909_v56  ;;  %v5713_v10 = vmax.f32 %v5641_v49, 0.0 }
 0x5ec   : > { %6507 = vst [vmem:[%s11344_s22 + $0x160] sm:$0xff] %v5910_v37  ;;  %v5912_v12 = vsel %vm1415_vm5, %v5901_v11, %v5911_v48  ;;  %v5714_v55 = vmax.f32 %v5642_v51, 0.0  ;;  %v5301_v4 = vpop.f32.mrb[66].mxu0 }
 0x5ed   : > { %6508 = vst [vmem:[%s11344_s22 + $0x168] sm:$0xff] %v5912_v12  ;;  %v5943_v60 = vrot.slane %v5713_v10, 4  ;;  %v5645_v62 = vadd.f32 %v11422_v47, %v5301_v4  ;;  %v5303_v35 = vpop.f32.mrb[67].mxu0 }
 0x5ee   : > { %v5946_v50 = vrot.slane %v5714_v55, 4  ;;  %v5646_v36 = vadd.f32 %v11429_v0, %v5303_v35 }
 0x5ef   : > { %v5944_v57 = vsel %vm1388_vm3, %v5942_v44, %v5943_v60  ;;  %v5717_v15 = vmax.f32 %v5645_v62, 0.0 }
 0x5f0   : > { %6511 = vst [vmem:[%s11344_s22 + $0x180] sm:$0xff] %v5944_v57  ;;  %v5947_v21 = vsel %vm1388_vm3, %v5945_v61, %v5946_v50  ;;  %v5718_v9 = vmax.f32 %v5646_v36, 0.0  ;;  %v5307_v54 = vpop.f32.mrb[68].mxu0 }
 0x5f1   : > { %6512 = vst [vmem:[%s11344_s22 + $0x188] sm:$0xff] %v5947_v21  ;;  %v5954_v33 = vrot.slane %v5717_v15, 4  ;;  %v5649_v17 = vadd.f32 %v11422_v47, %v5307_v54  ;;  %v5309_v18 = vpop.f32.mrb[69].mxu0  ;;  %v5987_v2 = vrot.slane %v5717_v15, 6 }
 0x5f2   : > { %v5956_v5 = vrot.slane %v5718_v9, 4  ;;  %v5650_v27 = vadd.f32 %v11429_v0, %v5309_v18  ;;  %v5990_v24 = vrot.slane %v5718_v9, 6 }
 0x5f3   : > { %v5955_v14 = vsel %vm1388_vm3, %v5943_v60, %v5954_v33  ;;  %v5721_v32 = vmax.f32 %v5649_v17, 0.0 }
 0x5f4   : > { %6515 = vst [vmem:[%s11344_s22 + $0x1a0] sm:$0xff] %v5955_v14  ;;  %v5957_v30 = vsel %vm1388_vm3, %v5946_v50, %v5956_v5  ;;  %v5722_v38 = vmax.f32 %v5650_v27, 0.0  ;;  %v5313_v43 = vpop.f32.mrb[70].mxu0 }
 0x5f5   : > { %6516 = vst [vmem:[%s11344_s22 + $0x1a8] sm:$0xff] %v5957_v30  ;;  %v5988_v40 = vrot.slane %v5721_v32, 6  ;;  %v5653_v13 = vadd.f32 %v11422_v47, %v5313_v43  ;;  %v5315_v41 = vpop.f32.mrb[71].mxu0 }
 0x5f6   : > { %v5991_v59 = vrot.slane %v5722_v38, 6  ;;  %v5654_v63 = vadd.f32 %v11429_v0, %v5315_v41 }
 0x5f7   : > { %v5989_v34 = vsel %vm1363_vm2, %v5987_v2, %v5988_v40  ;;  %v5725_v42 = vmax.f32 %v5653_v13, 0.0 }
 0x5f8   : > { %6519 = vst [vmem:[%s11344_s22 + $0x1c0] sm:$0xff] %v5989_v34  ;;  %v5992_v22 = vsel %vm1363_vm2, %v5990_v24, %v5991_v59  ;;  %v5726_v25 = vmax.f32 %v5654_v63, 0.0  ;;  %v5384_v39 = vpop.f32.mrb[72].mxu0 }
 0x5f9   : > { %6520 = vst [vmem:[%s11344_s22 + $0x1c8] sm:$0xff] %v5992_v22  ;;  %v5999_v3 = vrot.slane %v5725_v42, 6  ;;  %v5587_v47 = vadd.f32 %v11325_v53, %v5384_v39  ;;  %v5386_v46 = vpop.f32.mrb[73].mxu0 }
 0x5fa   : > { %v6001_v29 = vrot.slane %v5726_v25, 6  ;;  %v5588_v45 = vadd.f32 %v11328_v7, %v5386_v46 }
 0x5fb   : > { %v6000_v0 = vsel %vm1363_vm2, %v5988_v40, %v5999_v3  ;;  %v5659_v19 = vmax.f32 %v5587_v47, 0.0 }
 0x5fc   : > { %6523 = vst [vmem:[%s11344_s22 + $0x1e0] sm:$0xff] %v6000_v0  ;;  %v6002_v31 = vsel %vm1363_vm2, %v5991_v59, %v6001_v29  ;;  %v5660_v1 = vmax.f32 %v5588_v45, 0.0  ;;  %v5390_v11 = vpop.f32.mrb[74].mxu0 }
 0x5fd   : > { %6524 = vst [vmem:[%s11344_s22 + $0x1e8] sm:$0xff] %v6002_v31  ;;  %5731 = vst [vmem:[%s11344_s22 + $0x10] sm:$0xff] %v5659_v19  ;;  %v5591_v28 = vadd.f32 %v11325_v53, %v5390_v11  ;;  %v5392_v8 = vpop.f32.mrb[75].mxu0 }
 0x5fe   : > { %5732 = vst [vmem:[%s11344_s22 + $0x18] sm:$0xff] %v5660_v1  ;;  %v5592_v26 = vadd.f32 %v11328_v7, %v5392_v8 }
 0x5ff   : > { %v5663_v16 = vmax.f32 %v5591_v28, 0.0 }
 0x600   : > { %v5664_v23 = vmax.f32 %v5592_v26, 0.0  ;;  %v5396_v52 = vpop.f32.mrb[76].mxu0 }
 0x601   : > { %5735 = vst [vmem:[%s11344_s22 + $0x30] sm:$0xff] %v5663_v16  ;;  %v5595_v56 = vadd.f32 %v11325_v53, %v5396_v52  ;;  %v5398_v49 = vpop.f32.mrb[77].mxu0 }
 0x602   : > { %5736 = vst [vmem:[%s11344_s22 + $0x38] sm:$0xff] %v5664_v23  ;;  %v5596_v20 = vadd.f32 %v11328_v7, %v5398_v49 }
 0x603   : > { %v5667_v51 = vmax.f32 %v5595_v56, 0.0 }
 0x604   : > { %v5402_v48 = vpop.f32.mrb[78].mxu0  ;;  %v5668_v12 = vmax.f32 %v5596_v20, 0.0 }
 0x605   : > { %v5599_v37 = vadd.f32 %v11325_v53, %v5402_v48  ;;  %v5404_v10 = vpop.f32.mrb[79].mxu0  ;;  %v5755_v62 = vrot.slane %v5667_v51, 2 }
 0x606   : > { %v5600_v55 = vadd.f32 %v11328_v7, %v5404_v10  ;;  %v5758_v36 = vrot.slane %v5668_v12, 2 }
 0x607   : > { %v5671_v4 = vmax.f32 %v5599_v37, 0.0 }
 0x608   : > { %v5672_v44 = vmax.f32 %v5600_v55, 0.0  ;;  %v5408_v60 = vpop.f32.mrb[80].mxu0 }
 0x609   : > { %v5756_v35 = vrot.slane %v5671_v4, 2  ;;  %v5603_v61 = vadd.f32 %v11325_v53, %v5408_v60  ;;  %v5410_v50 = vpop.f32.mrb[81].mxu0 }
 0x60a   : > { %v5759_v57 = vrot.slane %v5672_v44, 2  ;;  %v5604_v15 = vadd.f32 %v11328_v7, %v5410_v50 }
 0x60b   : > { %v5757_v21 = vsel %vm1415_vm5, %v5755_v62, %v5756_v35  ;;  %v5675_v9 = vmax.f32 %v5603_v61, 0.0 }
 0x60c   : > { %6473 = vst [vmem:[%s11344_s22 + $0x50] sm:$0xff] %v5757_v21  ;;  %v5760_v54 = vsel %vm1415_vm5, %v5758_v36, %v5759_v57  ;;  %v5676_v33 = vmax.f32 %v5604_v15, 0.0 }
 0x60d   : > { %6474 = vst [vmem:[%s11344_s22 + $0x58] sm:$0xff] %v5760_v54  ;;  %v5765_v17 = vrot.slane %v5675_v9, 2  ;;  %v5800_v18 = vrot.slane %v5675_v9, 4 }
 0x60e   : > { %v5767_v53 = vrot.slane %v5676_v33, 2  ;;  %v5803_v5 = vrot.slane %v5676_v33, 4 }
 0x60f   : > { %v5766_v27 = vsel %vm1415_vm5, %v5756_v35, %v5765_v17  ;;  %v5802_v14 = vsel %vm1388_vm3, %v5800_v18, %v11346_v58 }
 0x610   : > { %6477 = vst [vmem:[%s11344_s22 + $0x70] sm:$0xff] %v5766_v27  ;;  %6481 = vst [vmem:[%s11344_s22 + $0x90] sm:$0xff] %v5802_v14  ;;  %v5768_v7 = vsel %vm1415_vm5, %v5759_v57, %v5767_v53  ;;  %v5805_v32 = vsel %vm1388_vm3, %v5803_v5, %v11349_v6 }
 0x611   : > { %6478 = vst [vmem:[%s11344_s22 + $0x78] sm:$0xff] %v5768_v7  ;;  %6482 = vst [vmem:[%s11344_s22 + $0x98] sm:$0xff] %v5805_v32 }
 0x612 PF: > { %s18_s24 = sadd.s32 1, %s7850_s24  }
 0x613   : > { %p15_p3 = scmp.ge.s32.totalorder %s18_s24, 4  }
 0x615   :  { %17 = sbr.rel (!%p15_p3) target bundleno = 1 (0x1), region = 120 }
 0x61c   :  { %6048 = vsyncpa [#allocation6], 1 }
 0x61d   :  { %6050 = vsyncpa [#allocation6 + $0x1], 1 }

</bundles_post_ra>
